<compile_context>
chip_gen: v5e
topology: v5e:2x2
jax: 0.10.0
libtpu: 0.0.40
codegen_flags: <defaults>
</compile_context>

<pallas_src>
import jax
import jax.numpy as jnp
from jax import lax
from jax.experimental import pallas as pl
from jax.experimental.pallas import tpu as pltpu

EPS_GEM = 1e-6
EPS_BN = 1e-5
PID_NUM = 128
CHANS = (3, 256, 512, 1024, 2048)


# ------------------------------ Pallas kernel -------------------------------

def _fused_eval_kernel(p_ref, x_ref,
                       w1_ref, b1_ref, w2_ref, b2_ref,
                       w3_ref, b3_ref, w4_ref, b4_ref,
                       pool_ref, scale_ref, shift_ref, o_ref):
    """4x (1x1 conv + bias + ReLU)  ->  GeM pooling  ->  folded BatchNorm."""

    def mm_bias_relu(a, w_ref, b_ref):
        y = jnp.dot(a, w_ref[...], preferred_element_type=jnp.float32)
        return jnp.maximum(y + b_ref[...], 0.0)

    a = mm_bias_relu(x_ref[...], w1_ref, b1_ref)     # (M, 256)
    a = mm_bias_relu(a, w2_ref, b2_ref)              # (M, 512)
    a = mm_bias_relu(a, w3_ref, b3_ref)              # (M, 1024)
    a = mm_bias_relu(a, w4_ref, b4_ref)              # (M, 2048)

    # GeneralizedMeanPoolingP:  y = (mean_spatial clamp(x, eps)^p)^(1/p).
    p = p_ref[0]
    xp = jnp.exp(p * jnp.log(jnp.maximum(a, EPS_GEM)))               # x^p
    pooled = jnp.dot(pool_ref[...], xp,
                     preferred_element_type=jnp.float32)             # (N, 2048) mean
    gem = jnp.exp(jnp.log(pooled) / p)                               # mean^(1/p)

    # BNNeck BatchNorm1d (eval), pre-folded into scale/shift.
    o_ref[...] = gem * scale_ref[...] + shift_ref[...]


# -------------------------------- Model glue --------------------------------

def init_params(key):
    params = {}
    keys = jax.random.split(key, 12)
    for i in range(4):
        cin, cout = CHANS[i], CHANS[i + 1]
        scale = (2.0 / cin) ** 0.5
        params[f"w{i + 1}"] = scale * jax.random.normal(
            keys[i], (cin, cout), dtype=jnp.float32)
        params[f"b{i + 1}"] = 0.1 * jax.random.normal(
            keys[4 + i], (1, cout), dtype=jnp.float32)
    params["gem_p"] = jnp.full((1,), 3.0, dtype=jnp.float32)

    # BatchNorm1d (eval mode) parameters of the BNNeck (beta/bias frozen at 0).
    f = CHANS[-1]
    params["bn_gamma"] = 1.0 + 0.1 * jax.random.normal(keys[8], (1, f), jnp.float32)
    params["bn_beta"] = jnp.zeros((1, f), dtype=jnp.float32)
    params["bn_mean"] = 0.1 * jax.random.normal(keys[9], (1, f), jnp.float32)
    params["bn_var"] = 0.5 + jax.random.uniform(keys[10], (1, f), jnp.float32)

    # Fold the BN affine once at parameter time: y = x * scale + shift.
    bn_scale = params["bn_gamma"] * lax.rsqrt(params["bn_var"] + EPS_BN)
    params["bn_scale"] = bn_scale
    params["bn_shift"] = params["bn_beta"] - params["bn_mean"] * bn_scale
    # Classifier Linear(2048, PID_NUM) only produces the (discarded) cls score
    # on the eval path, so it is intentionally not materialized here.
    return params


def model_forward_eval(x, params):
    """Model.forward with self.training == False -> backbone_bn_features."""
    n = x.shape[0]
    c_out = CHANS[-1]

    # Fold the four stride-2 subsamples: 1x1 conv + ReLU are pointwise, so only
    # the ::16 spatial positions ever reach features_map.
    xs = x[:, :, ::16, ::16]                                        # (N, 3, Hs, Ws)
    hs, ws = xs.shape[2], xs.shape[3]
    hw = hs * ws
    m = n * hw
    x2d = jnp.transpose(xs, (0, 2, 3, 1)).reshape(m, CHANS[0])      # rows = (n, h, w)

    # Constant mean-pooling matrix: pooled[b] = mean over batch b's rows.
    pool = jnp.repeat(jnp.eye(n, dtype=jnp.float32), hw, axis=1) / float(hw)

    tensor_args = (x2d,
                   params["w1"], params["b1"], params["w2"], params["b2"],
                   params["w3"], params["b3"], params["w4"], params["b4"],
                   pool, params["bn_scale"], params["bn_shift"])

    def _full(shape):
        return pl.BlockSpec(shape, lambda i: (0, 0))    # all operands are 2-D

    return pl.pallas_call(
        _fused_eval_kernel,
        out_shape=jax.ShapeDtypeStruct((n, c_out), jnp.float32),
        grid=(1,),
        in_specs=[pl.BlockSpec(memory_space=pltpu.MemorySpace.SMEM)]  # gem_p scalar
                 + [_full(a.shape) for a in tensor_args],
        out_specs=_full((n, c_out)),
        compiler_params=pltpu.CompilerParams(
            dimension_semantics=("arbitrary",),
            vmem_limit_bytes=48 * 1024 * 1024),
    )(params["gem_p"], *tensor_args)


# --------------------------- pure-JAX reference ------------------------------

def _reference(x, params):
    """Un-fused full-resolution reference (validates the stride folding too)."""
    h = x
    for i in range(4):
        h = h[:, :, ::2, ::2]
        n, cin, H, W = h.shape
        h2 = jnp.transpose(h, (0, 2, 3, 1)).reshape(-1, cin)
        h2 = jnp.maximum(h2 @ params[f"w{i + 1}"] + params[f"b{i + 1}"], 0.0)
        h = jnp.transpose(h2.reshape(n, H, W, -1), (0, 3, 1, 2))
    p = params["gem_p"][0]
    xc = jnp.maximum(h, EPS_GEM)
    pooled = jnp.mean(xc ** p, axis=(2, 3)) ** (1.0 / p)
    bn = ((pooled - params["bn_mean"]) * lax.rsqrt(params["bn_var"] + EPS_BN)
          * params["bn_gamma"] + params["bn_beta"])
    return bn


if __name__ == "__main__":
    key = jax.random.PRNGKey(0)
    kx, kp = jax.random.split(key)
    x = jax.random.normal(kx, (2, 3, 32, 32), dtype=jnp.float32)
    params = init_params(kp)

    out = jax.jit(model_forward_eval)(x, params)
    out = jax.block_until_ready(out)
    assert out.shape == (2, 2048), out.shape

    ref = _reference(x, params)
    assert jnp.allclose(out, ref, rtol=2e-3, atol=2e-3), float(
        jnp.max(jnp.abs(out - ref)))

    print("KERNEL_OK")
</pallas_src>

<mosaic_0001>
module attributes {stable_mosaic.version = 11 : i64} {
  func.func @_fused_eval_kernel(%arg0: i32, %arg1: memref<1xf32, #tpu.memory_space<smem>>, %arg2: memref<8x3xf32, #tpu.memory_space<vmem>>, %arg3: memref<3x256xf32, #tpu.memory_space<vmem>>, %arg4: memref<1x256xf32, #tpu.memory_space<vmem>>, %arg5: memref<256x512xf32, #tpu.memory_space<vmem>>, %arg6: memref<1x512xf32, #tpu.memory_space<vmem>>, %arg7: memref<512x1024xf32, #tpu.memory_space<vmem>>, %arg8: memref<1x1024xf32, #tpu.memory_space<vmem>>, %arg9: memref<1024x2048xf32, #tpu.memory_space<vmem>>, %arg10: memref<1x2048xf32, #tpu.memory_space<vmem>>, %arg11: memref<2x8xf32, #tpu.memory_space<vmem>>, %arg12: memref<1x2048xf32, #tpu.memory_space<vmem>>, %arg13: memref<1x2048xf32, #tpu.memory_space<vmem>>, %arg14: memref<2x2048xf32, #tpu.memory_space<vmem>>) attributes {dimension_semantics = [#tpu.dimension_semantics<arbitrary>], iteration_bounds = array<i64: 1>, scalar_prefetch = 0 : i64, scratch_operands = 0 : i64, tpu.core_type = #tpu.core_type<tc>, window_params = [{transform_indices = @transform_0, window_bounds = array<i64: 1>}, {pipeline_mode = #tpu.pipeline_mode<synchronous>, transform_indices = @transform_1, window_bounds = array<i64: 8, 3>}, {pipeline_mode = #tpu.pipeline_mode<synchronous>, transform_indices = @transform_2, window_bounds = array<i64: 3, 256>}, {pipeline_mode = #tpu.pipeline_mode<synchronous>, transform_indices = @transform_3, window_bounds = array<i64: 1, 256>}, {pipeline_mode = #tpu.pipeline_mode<synchronous>, transform_indices = @transform_4, window_bounds = array<i64: 256, 512>}, {pipeline_mode = #tpu.pipeline_mode<synchronous>, transform_indices = @transform_5, window_bounds = array<i64: 1, 512>}, {pipeline_mode = #tpu.pipeline_mode<synchronous>, transform_indices = @transform_6, window_bounds = array<i64: 512, 1024>}, {pipeline_mode = #tpu.pipeline_mode<synchronous>, transform_indices = @transform_7, window_bounds = array<i64: 1, 1024>}, {pipeline_mode = #tpu.pipeline_mode<synchronous>, transform_indices = @transform_8, window_bounds = array<i64: 1024, 2048>}, {pipeline_mode = #tpu.pipeline_mode<synchronous>, transform_indices = @transform_9, window_bounds = array<i64: 1, 2048>}, {pipeline_mode = #tpu.pipeline_mode<synchronous>, transform_indices = @transform_10, window_bounds = array<i64: 2, 8>}, {pipeline_mode = #tpu.pipeline_mode<synchronous>, transform_indices = @transform_11, window_bounds = array<i64: 1, 2048>}, {pipeline_mode = #tpu.pipeline_mode<synchronous>, transform_indices = @transform_12, window_bounds = array<i64: 1, 2048>}, {pipeline_mode = #tpu.pipeline_mode<synchronous>, transform_indices = @transform_13, window_bounds = array<i64: 2, 2048>}]} {
    %c0 = arith.constant 0 : index
    %c0_0 = arith.constant 0 : index
    %0 = vector.load %arg2[%c0, %c0_0] : memref<8x3xf32, #tpu.memory_space<vmem>>, vector<8x3xf32>
    %c0_1 = arith.constant 0 : index
    %c0_2 = arith.constant 0 : index
    %1 = vector.load %arg3[%c0_1, %c0_2] : memref<3x256xf32, #tpu.memory_space<vmem>>, vector<3x256xf32>
    %cst = arith.constant dense<0.000000e+00> : vector<8x256xf32>
    %2 = tpu.matmul %0, %1, %cst {dimension_numbers = #tpu.dot_dimension_numbers<[1], [0], [0], [1], [0, 0, 1, 1], [], []>} : vector<8x3xf32>, vector<3x256xf32>, vector<8x256xf32> -> vector<8x256xf32>
    %c0_3 = arith.constant 0 : index
    %c0_4 = arith.constant 0 : index
    %3 = vector.load %arg4[%c0_3, %c0_4] : memref<1x256xf32, #tpu.memory_space<vmem>>, vector<1x256xf32>
    %4 = vector.broadcast %3 : vector<1x256xf32> to vector<8x256xf32>
    %5 = arith.addf %2, %4 : vector<8x256xf32>
    %cst_5 = arith.constant 0.000000e+00 : f32
    %6 = vector.broadcast %cst_5 : f32 to vector<8x256xf32>
    %7 = arith.maximumf %5, %6 : vector<8x256xf32>
    %c0_6 = arith.constant 0 : index
    %c0_7 = arith.constant 0 : index
    %8 = vector.load %arg5[%c0_6, %c0_7] : memref<256x512xf32, #tpu.memory_space<vmem>>, vector<256x512xf32>
    %cst_8 = arith.constant dense<0.000000e+00> : vector<8x512xf32>
    %9 = tpu.matmul %7, %8, %cst_8 {dimension_numbers = #tpu.dot_dimension_numbers<[1], [0], [0], [1], [0, 0, 1, 1], [], []>} : vector<8x256xf32>, vector<256x512xf32>, vector<8x512xf32> -> vector<8x512xf32>
    %c0_9 = arith.constant 0 : index
    %c0_10 = arith.constant 0 : index
    %10 = vector.load %arg6[%c0_9, %c0_10] : memref<1x512xf32, #tpu.memory_space<vmem>>, vector<1x512xf32>
    %11 = vector.broadcast %10 : vector<1x512xf32> to vector<8x512xf32>
    %12 = arith.addf %9, %11 : vector<8x512xf32>
    %cst_11 = arith.constant 0.000000e+00 : f32
    %13 = vector.broadcast %cst_11 : f32 to vector<8x512xf32>
    %14 = arith.maximumf %12, %13 : vector<8x512xf32>
    %c0_12 = arith.constant 0 : index
    %c0_13 = arith.constant 0 : index
    %15 = vector.load %arg7[%c0_12, %c0_13] : memref<512x1024xf32, #tpu.memory_space<vmem>>, vector<512x1024xf32>
    %cst_14 = arith.constant dense<0.000000e+00> : vector<8x1024xf32>
    %16 = tpu.matmul %14, %15, %cst_14 {dimension_numbers = #tpu.dot_dimension_numbers<[1], [0], [0], [1], [0, 0, 1, 1], [], []>} : vector<8x512xf32>, vector<512x1024xf32>, vector<8x1024xf32> -> vector<8x1024xf32>
    %c0_15 = arith.constant 0 : index
    %c0_16 = arith.constant 0 : index
    %17 = vector.load %arg8[%c0_15, %c0_16] : memref<1x1024xf32, #tpu.memory_space<vmem>>, vector<1x1024xf32>
    %18 = vector.broadcast %17 : vector<1x1024xf32> to vector<8x1024xf32>
    %19 = arith.addf %16, %18 : vector<8x1024xf32>
    %cst_17 = arith.constant 0.000000e+00 : f32
    %20 = vector.broadcast %cst_17 : f32 to vector<8x1024xf32>
    %21 = arith.maximumf %19, %20 : vector<8x1024xf32>
    %c0_18 = arith.constant 0 : index
    %c0_19 = arith.constant 0 : index
    %22 = vector.load %arg9[%c0_18, %c0_19] : memref<1024x2048xf32, #tpu.memory_space<vmem>>, vector<1024x2048xf32>
    %cst_20 = arith.constant dense<0.000000e+00> : vector<8x2048xf32>
    %23 = tpu.matmul %21, %22, %cst_20 {dimension_numbers = #tpu.dot_dimension_numbers<[1], [0], [0], [1], [0, 0, 1, 1], [], []>} : vector<8x1024xf32>, vector<1024x2048xf32>, vector<8x2048xf32> -> vector<8x2048xf32>
    %c0_21 = arith.constant 0 : index
    %c0_22 = arith.constant 0 : index
    %24 = vector.load %arg10[%c0_21, %c0_22] : memref<1x2048xf32, #tpu.memory_space<vmem>>, vector<1x2048xf32>
    %25 = vector.broadcast %24 : vector<1x2048xf32> to vector<8x2048xf32>
    %26 = arith.addf %23, %25 : vector<8x2048xf32>
    %cst_23 = arith.constant 0.000000e+00 : f32
    %27 = vector.broadcast %cst_23 : f32 to vector<8x2048xf32>
    %28 = arith.maximumf %26, %27 : vector<8x2048xf32>
    %c0_24 = arith.constant 0 : index
    %29 = memref.load %arg1[%c0_24] : memref<1xf32, #tpu.memory_space<smem>>
    %cst_25 = arith.constant 9.99999997E-7 : f32
    %30 = vector.broadcast %cst_25 : f32 to vector<8x2048xf32>
    %31 = arith.maximumf %28, %30 : vector<8x2048xf32>
    %32 = math.log %31 : vector<8x2048xf32>
    %33 = vector.broadcast %29 : f32 to vector<8x2048xf32>
    %34 = arith.mulf %33, %32 : vector<8x2048xf32>
    %35 = math.exp %34 : vector<8x2048xf32>
    %c0_26 = arith.constant 0 : index
    %c0_27 = arith.constant 0 : index
    %36 = vector.load %arg11[%c0_26, %c0_27] : memref<2x8xf32, #tpu.memory_space<vmem>>, vector<2x8xf32>
    %cst_28 = arith.constant dense<0.000000e+00> : vector<2x2048xf32>
    %37 = tpu.matmul %36, %35, %cst_28 {dimension_numbers = #tpu.dot_dimension_numbers<[1], [0], [0], [1], [0, 0, 1, 1], [], []>} : vector<2x8xf32>, vector<8x2048xf32>, vector<2x2048xf32> -> vector<2x2048xf32>
    %38 = math.log %37 : vector<2x2048xf32>
    %39 = vector.broadcast %29 : f32 to vector<2x2048xf32>
    %40 = arith.divf %38, %39 : vector<2x2048xf32>
    %41 = math.exp %40 : vector<2x2048xf32>
    %c0_29 = arith.constant 0 : index
    %c0_30 = arith.constant 0 : index
    %42 = vector.load %arg12[%c0_29, %c0_30] : memref<1x2048xf32, #tpu.memory_space<vmem>>, vector<1x2048xf32>
    %43 = vector.broadcast %42 : vector<1x2048xf32> to vector<2x2048xf32>
    %44 = arith.mulf %41, %43 : vector<2x2048xf32>
    %c0_31 = arith.constant 0 : index
    %c0_32 = arith.constant 0 : index
    %45 = vector.load %arg13[%c0_31, %c0_32] : memref<1x2048xf32, #tpu.memory_space<vmem>>, vector<1x2048xf32>
    %46 = vector.broadcast %45 : vector<1x2048xf32> to vector<2x2048xf32>
    %47 = arith.addf %44, %46 : vector<2x2048xf32>
    %c0_33 = arith.constant 0 : index
    %c0_34 = arith.constant 0 : index
    %48 = vector.load %arg14[%c0_33, %c0_34] : memref<2x2048xf32, #tpu.memory_space<vmem>>, vector<2x2048xf32>
    tpu.vector_store %arg14[%c0_33, %c0_34], %47 {strides = array<i32>} : memref<2x2048xf32, #tpu.memory_space<vmem>>, vector<2x2048xf32>,
    return
  }
  func.func @transform_0(%arg0: i32) -> i32 {
    %c0_i32 = arith.constant 0 : i32
    %c0_i32_0 = arith.constant 0 : i32
    return %c0_i32 : i32
  }
  func.func @transform_1(%arg0: i32) -> (i32, i32) {
    %c0_i32 = arith.constant 0 : i32
    %c0_i32_0 = arith.constant 0 : i32
    %c0_i32_1 = arith.constant 0 : i32
    return %c0_i32, %c0_i32_0 : i32, i32
  }
  func.func @transform_2(%arg0: i32) -> (i32, i32) {
    %c0_i32 = arith.constant 0 : i32
    %c0_i32_0 = arith.constant 0 : i32
    %c0_i32_1 = arith.constant 0 : i32
    return %c0_i32, %c0_i32_0 : i32, i32
  }
  func.func @transform_3(%arg0: i32) -> (i32, i32) {
    %c0_i32 = arith.constant 0 : i32
    %c0_i32_0 = arith.constant 0 : i32
    %c0_i32_1 = arith.constant 0 : i32
    return %c0_i32, %c0_i32_0 : i32, i32
  }
  func.func @transform_4(%arg0: i32) -> (i32, i32) {
    %c0_i32 = arith.constant 0 : i32
    %c0_i32_0 = arith.constant 0 : i32
    %c0_i32_1 = arith.constant 0 : i32
    return %c0_i32, %c0_i32_0 : i32, i32
  }
  func.func @transform_5(%arg0: i32) -> (i32, i32) {
    %c0_i32 = arith.constant 0 : i32
    %c0_i32_0 = arith.constant 0 : i32
    %c0_i32_1 = arith.constant 0 : i32
    return %c0_i32, %c0_i32_0 : i32, i32
  }
  func.func @transform_6(%arg0: i32) -> (i32, i32) {
    %c0_i32 = arith.constant 0 : i32
    %c0_i32_0 = arith.constant 0 : i32
    %c0_i32_1 = arith.constant 0 : i32
    return %c0_i32, %c0_i32_0 : i32, i32
  }
  func.func @transform_7(%arg0: i32) -> (i32, i32) {
    %c0_i32 = arith.constant 0 : i32
    %c0_i32_0 = arith.constant 0 : i32
    %c0_i32_1 = arith.constant 0 : i32
    return %c0_i32, %c0_i32_0 : i32, i32
  }
  func.func @transform_8(%arg0: i32) -> (i32, i32) {
    %c0_i32 = arith.constant 0 : i32
    %c0_i32_0 = arith.constant 0 : i32
    %c0_i32_1 = arith.constant 0 : i32
    return %c0_i32, %c0_i32_0 : i32, i32
  }
  func.func @transform_9(%arg0: i32) -> (i32, i32) {
    %c0_i32 = arith.constant 0 : i32
    %c0_i32_0 = arith.constant 0 : i32
    %c0_i32_1 = arith.constant 0 : i32
    return %c0_i32, %c0_i32_0 : i32, i32
  }
  func.func @transform_10(%arg0: i32) -> (i32, i32) {
    %c0_i32 = arith.constant 0 : i32
    %c0_i32_0 = arith.constant 0 : i32
    %c0_i32_1 = arith.constant 0 : i32
    return %c0_i32, %c0_i32_0 : i32, i32
  }
  func.func @transform_11(%arg0: i32) -> (i32, i32) {
    %c0_i32 = arith.constant 0 : i32
    %c0_i32_0 = arith.constant 0 : i32
    %c0_i32_1 = arith.constant 0 : i32
    return %c0_i32, %c0_i32_0 : i32, i32
  }
  func.func @transform_12(%arg0: i32) -> (i32, i32) {
    %c0_i32 = arith.constant 0 : i32
    %c0_i32_0 = arith.constant 0 : i32
    %c0_i32_1 = arith.constant 0 : i32
    return %c0_i32, %c0_i32_0 : i32, i32
  }
  func.func @transform_13(%arg0: i32) -> (i32, i32) {
    %c0_i32 = arith.constant 0 : i32
    %c0_i32_0 = arith.constant 0 : i32
    %c0_i32_1 = arith.constant 0 : i32
    return %c0_i32, %c0_i32_0 : i32, i32
  }
}

</mosaic_0001>

<bundles_post_ra>
// kernel: model_forward_eval.1
= control target key start
LH: loop header
LB: loop body
LE: loop exit
PB: predicated region body
PF: predicated region fallthrough
CT: control target
= control target key end

     0   :  { %19 = vsyncpa [#allocation4], 0  ;;  %s8284_s0 = inlined_call_operand.<no memory space> [shape: f32[1], index: 0, kind: input, shape index: {}]   ;;  %s8285_s1 = inlined_call_operand.vmem [shape: f32[8,3], index: 1, kind: input, shape index: {}]   ;;  %s8286_s2 = inlined_call_operand.hbm [shape: f32[3,256], index: 2, kind: input, shape index: {}]   ;;  %s8287_s3 = inlined_call_operand.hbm [shape: f32[1,256], index: 3, kind: input, shape index: {}]   ;;  %s8288_s4 = inlined_call_operand.hbm [shape: f32[256,512], index: 4, kind: input, shape index: {}]   ;;  %s8289_s5 = inlined_call_operand.hbm [shape: f32[1,512], index: 5, kind: input, shape index: {}]   ;;  %s8290_s6 = inlined_call_operand.hbm [shape: f32[512,1024], index: 6, kind: input, shape index: {}]   ;;  %s8291_s7 = inlined_call_operand.hbm [shape: f32[1,1024], index: 7, kind: input, shape index: {}]   ;;  %s8292_s8 = inlined_call_operand.hbm [shape: f32[1024,2048], index: 8, kind: input, shape index: {}]   ;;  %s8293_s9 = inlined_call_operand.hbm [shape: f32[1,2048], index: 9, kind: input, shape index: {}]   ;;  %s8294_s10 = inlined_call_operand.vmem [shape: f32[2,8], index: 10, kind: input, shape index: {}]   ;;  %s8295_s11 = inlined_call_operand.hbm [shape: f32[1,2048], index: 11, kind: input, shape index: {}]   ;;  %s8296_s12 = inlined_call_operand.hbm [shape: f32[1,2048], index: 12, kind: input, shape index: {}]   ;;  %s8297_s13 = inlined_call_operand.hbm [shape: f32[2,2048], index: 13, kind: output, shape index: {}]  }
   0x1   :  { %20 = vsyncpa [#allocation7], 0 }
   0x2   :  { %21 = vsyncpa [#allocation10], 0 }
   0x3   :  { %22 = vsyncpa [#allocation13], 0 }
   0x4   :  { %23 = vsyncpa [#allocation16], 0 }
   0x5   :  { %24 = vsyncpa [#allocation19], 0  ;;  %s46_s27 = sshll.u32 %s8287_s3, 4  ;;  %s47_s27 = int_to_ptr.hbm [resolvable:$true] %s46_s27 }
   0x6   :  { %25 = vsyncpa [#allocation5], 0  ;;  %s7533_s28 = smov [#allocation6]   ;;  %s70_s15 = sshll.u32 %s8289_s5, 4  ;;  %s71_s15 = int_to_ptr.hbm [resolvable:$true] %s70_s15 }
   0x7   :  { %s48_s29 = sshll.u32 %s7533_s28, 4  ;;  %s7534_s16 = smov [#allocation9]   ;;  %s49_s29 = int_to_ptr.vmem [resolvable:$true] %s48_s29 }
   0x8   :  { %51 = dma.hbm_to_vmem [thread:$0]  %s47_s27, 32, %s49_s29, [#allocation7]  }
   0x9   :  { %s72_s17 = sshll.u32 %s7534_s16, 4  ;;  %s94_s20 = sshll.u32 %s8291_s7, 4  ;;  %s73_s17 = int_to_ptr.vmem [resolvable:$true] %s72_s17  ;;  %s95_s20 = int_to_ptr.hbm [resolvable:$true] %s94_s20 }
   0xa   :  { %75 = dma.hbm_to_vmem [thread:$0]  %s71_s15, 64, %s73_s17, [#allocation10]  }
   0xb   :  { %s118_s22 = sshll.u32 %s8293_s9, 4  ;;  %s7535_s23 = smov [#allocation12]   ;;  %s119_s22 = int_to_ptr.hbm [resolvable:$true] %s118_s22 }
   0xc   :  { %s96_s24 = sshll.u32 %s7535_s23, 4  ;;  %s7536_s5 = smov [#allocation15]   ;;  %s97_s24 = int_to_ptr.vmem [resolvable:$true] %s96_s24 }
   0xd   :  { %99 = dma.hbm_to_vmem [thread:$0]  %s95_s20, 128, %s97_s24, [#allocation13]  }
   0xe   :  { %s120_s25 = sshll.u32 %s7536_s5, 4  ;;  %s35_s28 = sshll.u32 %s8286_s2, 4  ;;  %s121_s25 = int_to_ptr.vmem [resolvable:$true] %s120_s25  ;;  %s36_s28 = int_to_ptr.hbm [resolvable:$true] %s35_s28 }
   0xf   :  { %123 = dma.hbm_to_vmem [thread:$0]  %s119_s22, 256, %s121_s25, [#allocation16]  }
  0x10   :  { %s56_s30 = sshll.u32 %s8288_s4, 4  ;;  %s7537_s14 = smov [#allocation3]   ;;  %s57_s30 = int_to_ptr.hbm [resolvable:$true] %s56_s30 }
  0x11   :  { %s37_s9 = sshll.u32 %s7537_s14, 4  ;;  %s7538_s15 = smov [#allocation8]   ;;  %s38_s9 = int_to_ptr.vmem [resolvable:$true] %s37_s9 }
  0x12   :  { %40 = dma.hbm_to_vmem [thread:$0]  %s36_s28, 128, %s38_s9, [#allocation4]  }
  0x13   :  { %s58_s16 = sshll.u32 %s7538_s15, 4  ;;  %s7539_s17 = smov 512   ;;  %s59_s16 = int_to_ptr.vmem [resolvable:$true] %s58_s16 }
  0x14   :  { %s7540_s18 = smov 32   ;;  %s80_s20 = sshll.u32 %s8290_s6, 4  ;;  %s81_s20 = int_to_ptr.hbm [resolvable:$true] %s80_s20 }
  0x15   :  { %64 = dma.hbm_to_vmem [thread:$0]  %s57_s30, 16384, %s59_s16, [#allocation7], %s7539_s17, %s7539_s17, %s7540_s18  }
  0x16   :  { %s7541_s3 = smov [#allocation11]   ;;  %s104_s23 = sshll.u32 %s8292_s8, 4  ;;  %s105_s23 = int_to_ptr.hbm [resolvable:$true] %s104_s23 }
  0x17   :  { %s82_s21 = sshll.u32 %s7541_s3, 4  ;;  %s7542_s24 = smov 1024   ;;  %s83_s21 = int_to_ptr.vmem [resolvable:$true] %s82_s21 }
  0x18   :  { %s7543_s5 = smov 64   ;;  %s7544_s25 = smov [#allocation14]  }
  0x19   :  { %88 = dma.hbm_to_vmem [thread:$0]  %s81_s20, 65536, %s83_s21, [#allocation10], %s7542_s24, %s7542_s24, %s7543_s5  }
  0x1a   :  { %s106_s26 = sshll.u32 %s7544_s25, 4  ;;  %s7545_s27 = smov 2048   ;;  %s107_s26 = int_to_ptr.vmem [resolvable:$true] %s106_s26 }
  0x1b   :  { %s7546_s28 = smov 128   ;;  %s131_s29 = sshll.u32 %s8295_s11, 4  ;;  %s132_s29 = int_to_ptr.hbm [resolvable:$true] %s131_s29 }
  0x1c   :  { %112 = dma.hbm_to_vmem [thread:$0]  %s105_s23, 262144, %s107_s26, [#allocation13], %s7545_s27, %s7545_s27, %s7546_s28  }
  0x1d   :  { %s7547_s30 = smov [#allocation17]   ;;  %s142_s15 = sshll.u32 %s8296_s12, 4  ;;  %s143_s15 = int_to_ptr.hbm [resolvable:$true] %s142_s15 }
  0x1e   :  { %s133_s14 = sshll.u32 %s7547_s30, 4  ;;  %s7548_s16 = smov [#allocation18]   ;;  %s134_s14 = int_to_ptr.vmem [resolvable:$true] %s133_s14 }
  0x1f   :  { %136 = dma.hbm_to_vmem [thread:$0]  %s132_s29, 256, %s134_s14, [#allocation16]  }
  0x20   :  { %s144_s17 = sshll.u32 %s7548_s16, 4  ;;  %s145_s17 = int_to_ptr.vmem [resolvable:$true] %s144_s17 }
  0x21   :  { %147 = dma.hbm_to_vmem [thread:$0]  %s143_s15, 256, %s145_s17, [#allocation19]  }
  0x22   :  { %7519 = dma.done.wait [#allocation4], 128  }
  0x23   :  { %7520 = vsyncadd [#allocation4], 4294967168 }
  0x24   :  { %7521 = dma.done.wait [#allocation7], 16416  }
  0x25   :  { %7522 = vsyncadd [#allocation7], 4294950880 }
  0x26   :  { %7523 = dma.done.wait [#allocation10], 65600  }
  0x27   :  { %7524 = vsyncadd [#allocation10], 4294901696 }
  0x28   :  { %7525 = dma.done.wait [#allocation13], 262272  }
  0x29   :  { %7526 = vsyncadd [#allocation13], 4294705024 }
  0x2a   :  { %7527 = dma.done.wait [#allocation16], 512  }
  0x2b   :  { %7528 = vsyncadd [#allocation16], 4294966784 }
  0x2c   :  { %7529 = dma.done.wait [#allocation19], 256  }
  0x2d   :  { %7530 = vsyncadd [#allocation19], 4294967040  ;;  %v189_v0 = vld [vmem:[#allocation3] sm:$0x77]  ;;  %v311_v1 = vld [vmem:[#allocation8 + $0x1e0] sm:$0xff]  ;;  %vm204_vm0 = vcmask 1042432  }
  0x2e   :  { %197 = vst [vmem:[#allocation1] ss:$2 sm:$0xff] %v189_v0  ;;  %389 = vmatpush.msra.mxu2 %v311_v1  ;;  %v375_v2 = vld [vmem:[#allocation8 + $0x3e0] sm:$0xff]  ;;  %v188_v9 = vld [vmem:[%s8285_s1] sm:$0xff]  ;;  %vm200_vm1 = vcmask 23552   ;;  %vm6490_vm2 = vcmask 64512  }
  0x2f   :  { %409 = vmatpush.msra.mxu3 %v375_v2  ;;  %v307_v3 = vld [vmem:[#allocation8 + $0x1c0] sm:$0xff]  ;;  %v312_v10 = vld [vmem:[#allocation8 + $0x1e8] sm:$0xff]  ;;  %v313_v62 = vld [vmem:[#allocation8 + $0x1f0] sm:$0xff]  ;;  %vm7040_vm7 = vcmask 1041408   ;;  %vm7042_vm8 = vcmask 1045508   ;;  %vm7044_vm9 = vcmask 1043456  }
  0x30   :  { %v371_v4 = vld [vmem:[#allocation8 + $0x3c0] sm:$0xff]  ;;  %390 = vmatpush.msra.mxu2 %v307_v3  ;;  %v376_v11 = vld [vmem:[#allocation8 + $0x3e8] sm:$0xff]  ;;  %v377_v63 = vld [vmem:[#allocation8 + $0x3f0] sm:$0xff]  ;;  %s7070_s21 = sshll.u32 %s8297_s13, 4  ;;  %s7071_s21 = int_to_ptr.hbm [resolvable:$true] %s7070_s21 }
  0x31   :  { %v303_v5 = vld [vmem:[#allocation8 + $0x1a0] sm:$0xff]  ;;  %410 = vmatpush.msra.mxu3 %v371_v4  ;;  %v308_v16 = vld [vmem:[#allocation8 + $0x1c8] sm:$0xff]  ;;  %v309_v2 = vld [vmem:[#allocation8 + $0x1d0] sm:$0xff] }
  0x32   :  { %v367_v6 = vld [vmem:[#allocation8 + $0x3a0] sm:$0xff]  ;;  %391 = vmatpush.msra.mxu2 %v303_v5  ;;  %v372_v17 = vld [vmem:[#allocation8 + $0x3c8] sm:$0xff]  ;;  %v373_v3 = vld [vmem:[#allocation8 + $0x3d0] sm:$0xff] }
  0x33   :  { %v299_v7 = vld [vmem:[#allocation8 + $0x180] sm:$0xff]  ;;  %411 = vmatpush.msra.mxu3 %v367_v6  ;;  %v304_v20 = vld [vmem:[#allocation8 + $0x1a8] sm:$0xff]  ;;  %v305_v6 = vld [vmem:[#allocation8 + $0x1b0] sm:$0xff] }
  0x34   :  { %v363_v8 = vld [vmem:[#allocation8 + $0x380] sm:$0xff]  ;;  %392 = vmatpush.msra.mxu2 %v299_v7  ;;  %v368_v21 = vld [vmem:[#allocation8 + $0x3a8] sm:$0xff]  ;;  %v369_v7 = vld [vmem:[#allocation8 + $0x3b0] sm:$0xff] }
  0x35   :  { %v198_v12 = vld.sshfl [vmem:[#allocation1] sm:$0xff pattern:$0x75316420]  ;;  %v199_v13 = vld.sshfl [vmem:[#allocation1 + $0x8] sm:$0xff pattern:$0x75316420]  ;;  %412 = vmatpush.msra.mxu3 %v363_v8 }
  0x36   :  { %7085 = vmatpush.msk.msra.mxu0 %vm204_vm0, %v198_v12  ;;  %7087 = vmatpush.msk.msra.mxu1 %vm204_vm0, %v199_v13  ;;  %v295_v14 = vld [vmem:[#allocation8 + $0x160] sm:$0xff]  ;;  %v300_v24 = vld [vmem:[#allocation8 + $0x188] sm:$0xff]  ;;  %v301_v12 = vld [vmem:[#allocation8 + $0x190] sm:$0xff] }
  0x37   :  { %v359_v15 = vld [vmem:[#allocation8 + $0x360] sm:$0xff]  ;;  %7086 = vmatmul.msk.f32.vlgmr.msra.gmra.mxu0 %vm200_vm1, %v188_v9  ;;  %7088 = vmatmul.msk.f32.vlgmr.msra.gmra.mxu1 %vm200_vm1, %v188_v9  ;;  %v364_v25 = vld [vmem:[#allocation8 + $0x388] sm:$0xff]  ;;  %v365_v13 = vld [vmem:[#allocation8 + $0x390] sm:$0xff] }
  0x38   :  { %429 = vmatpush.msrb.mxu0 %v312_v10  ;;  %449 = vmatpush.msrb.mxu1 %v376_v11  ;;  %v291_v18 = vld [vmem:[#allocation8 + $0x140] sm:$0xff]  ;;  %v296_v28 = vld [vmem:[#allocation8 + $0x168] sm:$0xff]  ;;  %v314_v10 = vld [vmem:[#allocation8 + $0x1f8] sm:$0xff] }
  0x39   :  { %v355_v19 = vld [vmem:[#allocation8 + $0x340] sm:$0xff]  ;;  %393 = vmatpush.msra.mxu2 %v295_v14  ;;  %413 = vmatpush.msra.mxu3 %v359_v15  ;;  %v360_v29 = vld [vmem:[#allocation8 + $0x368] sm:$0xff]  ;;  %v378_v11 = vld [vmem:[#allocation8 + $0x3f8] sm:$0xff] }
  0x3a   :  { %430 = vmatpush.msrb.mxu0 %v308_v16  ;;  %450 = vmatpush.msrb.mxu1 %v372_v17  ;;  %v287_v22 = vld [vmem:[#allocation8 + $0x120] sm:$0xff]  ;;  %v292_v32 = vld [vmem:[#allocation8 + $0x148] sm:$0xff]  ;;  %v310_v14 = vld [vmem:[#allocation8 + $0x1d8] sm:$0xff] }
  0x3b   :  { %v351_v23 = vld [vmem:[#allocation8 + $0x320] sm:$0xff]  ;;  %394 = vmatpush.msra.mxu2 %v291_v18  ;;  %414 = vmatpush.msra.mxu3 %v355_v19  ;;  %v356_v33 = vld [vmem:[#allocation8 + $0x348] sm:$0xff]  ;;  %v374_v15 = vld [vmem:[#allocation8 + $0x3d8] sm:$0xff] }
  0x3c   :  { %431 = vmatpush.msrb.mxu0 %v304_v20  ;;  %451 = vmatpush.msrb.mxu1 %v368_v21  ;;  %v283_v26 = vld [vmem:[#allocation8 + $0x100] sm:$0xff]  ;;  %v288_v36 = vld [vmem:[#allocation8 + $0x128] sm:$0xff]  ;;  %v297_v16 = vld [vmem:[#allocation8 + $0x170] sm:$0xff] }
  0x3d   :  { %v347_v27 = vld [vmem:[#allocation8 + $0x300] sm:$0xff]  ;;  %395 = vmatpush.msra.mxu2 %v287_v22  ;;  %415 = vmatpush.msra.mxu3 %v351_v23  ;;  %v352_v37 = vld [vmem:[#allocation8 + $0x328] sm:$0xff]  ;;  %v361_v17 = vld [vmem:[#allocation8 + $0x370] sm:$0xff] }
  0x3e   :  { %432 = vmatpush.msrb.mxu0 %v300_v24  ;;  %452 = vmatpush.msrb.mxu1 %v364_v25  ;;  %v279_v30 = vld [vmem:[#allocation8 + $0xe0] sm:$0xff]  ;;  %v284_v40 = vld [vmem:[#allocation8 + $0x108] sm:$0xff]  ;;  %v306_v18 = vld [vmem:[#allocation8 + $0x1b8] sm:$0xff] }
  0x3f   :  { %v343_v31 = vld [vmem:[#allocation8 + $0x2e0] sm:$0xff]  ;;  %396 = vmatpush.msra.mxu2 %v283_v26  ;;  %416 = vmatpush.msra.mxu3 %v347_v27  ;;  %v348_v41 = vld [vmem:[#allocation8 + $0x308] sm:$0xff]  ;;  %v370_v19 = vld [vmem:[#allocation8 + $0x3b8] sm:$0xff] }
  0x40   :  { %433 = vmatpush.msrb.mxu0 %v296_v28  ;;  %453 = vmatpush.msrb.mxu1 %v360_v29  ;;  %v275_v34 = vld [vmem:[#allocation8 + $0xc0] sm:$0xff]  ;;  %v280_v44 = vld [vmem:[#allocation8 + $0xe8] sm:$0xff]  ;;  %v293_v20 = vld [vmem:[#allocation8 + $0x150] sm:$0xff] }
  0x41   :  { %v339_v35 = vld [vmem:[#allocation8 + $0x2c0] sm:$0xff]  ;;  %397 = vmatpush.msra.mxu2 %v279_v30  ;;  %417 = vmatpush.msra.mxu3 %v343_v31  ;;  %v344_v45 = vld [vmem:[#allocation8 + $0x2e8] sm:$0xff]  ;;  %v357_v21 = vld [vmem:[#allocation8 + $0x350] sm:$0xff] }
  0x42   :  { %434 = vmatpush.msrb.mxu0 %v292_v32  ;;  %454 = vmatpush.msrb.mxu1 %v356_v33  ;;  %v271_v38 = vld [vmem:[#allocation8 + $0xa0] sm:$0xff]  ;;  %v276_v48 = vld [vmem:[#allocation8 + $0xc8] sm:$0xff]  ;;  %v302_v22 = vld [vmem:[#allocation8 + $0x198] sm:$0xff] }
  0x43   :  { %v335_v39 = vld [vmem:[#allocation8 + $0x2a0] sm:$0xff]  ;;  %398 = vmatpush.msra.mxu2 %v275_v34  ;;  %418 = vmatpush.msra.mxu3 %v339_v35  ;;  %v340_v49 = vld [vmem:[#allocation8 + $0x2c8] sm:$0xff]  ;;  %v366_v23 = vld [vmem:[#allocation8 + $0x398] sm:$0xff] }
  0x44   :  { %435 = vmatpush.msrb.mxu0 %v288_v36  ;;  %455 = vmatpush.msrb.mxu1 %v352_v37  ;;  %v267_v42 = vld [vmem:[#allocation8 + $0x80] sm:$0xff]  ;;  %v272_v52 = vld [vmem:[#allocation8 + $0xa8] sm:$0xff]  ;;  %v289_v24 = vld [vmem:[#allocation8 + $0x130] sm:$0xff] }
  0x45   :  { %v331_v43 = vld [vmem:[#allocation8 + $0x280] sm:$0xff]  ;;  %399 = vmatpush.msra.mxu2 %v271_v38  ;;  %419 = vmatpush.msra.mxu3 %v335_v39  ;;  %v336_v53 = vld [vmem:[#allocation8 + $0x2a8] sm:$0xff]  ;;  %v353_v25 = vld [vmem:[#allocation8 + $0x330] sm:$0xff] }
  0x46   :  { %436 = vmatpush.msrb.mxu0 %v284_v40  ;;  %456 = vmatpush.msrb.mxu1 %v348_v41  ;;  %v263_v46 = vld [vmem:[#allocation8 + $0x60] sm:$0xff]  ;;  %v268_v56 = vld [vmem:[#allocation8 + $0x88] sm:$0xff]  ;;  %v298_v26 = vld [vmem:[#allocation8 + $0x178] sm:$0xff] }
  0x47   :  { %v327_v47 = vld [vmem:[#allocation8 + $0x260] sm:$0xff]  ;;  %400 = vmatpush.msra.mxu2 %v267_v42  ;;  %420 = vmatpush.msra.mxu3 %v331_v43  ;;  %v332_v57 = vld [vmem:[#allocation8 + $0x288] sm:$0xff]  ;;  %v362_v27 = vld [vmem:[#allocation8 + $0x378] sm:$0xff] }
  0x48   :  { %437 = vmatpush.msrb.mxu0 %v280_v44  ;;  %457 = vmatpush.msrb.mxu1 %v344_v45  ;;  %v259_v50 = vld [vmem:[#allocation8 + $0x40] sm:$0xff]  ;;  %v264_v60 = vld [vmem:[#allocation8 + $0x68] sm:$0xff]  ;;  %v285_v28 = vld [vmem:[#allocation8 + $0x110] sm:$0xff] }
  0x49   :  { %v323_v51 = vld [vmem:[#allocation8 + $0x240] sm:$0xff]  ;;  %401 = vmatpush.msra.mxu2 %v263_v46  ;;  %421 = vmatpush.msra.mxu3 %v327_v47  ;;  %v328_v61 = vld [vmem:[#allocation8 + $0x268] sm:$0xff]  ;;  %v349_v29 = vld [vmem:[#allocation8 + $0x310] sm:$0xff] }
  0x4a   :  { %438 = vmatpush.msrb.mxu0 %v276_v48  ;;  %458 = vmatpush.msrb.mxu1 %v340_v49  ;;  %v255_v54 = vld [vmem:[#allocation8 + $0x20] sm:$0xff]  ;;  %v260_v0 = vld [vmem:[#allocation8 + $0x48] sm:$0xff]  ;;  %v294_v30 = vld [vmem:[#allocation8 + $0x158] sm:$0xff] }
  0x4b   :  { %v319_v55 = vld [vmem:[#allocation8 + $0x220] sm:$0xff]  ;;  %402 = vmatpush.msra.mxu2 %v259_v50  ;;  %422 = vmatpush.msra.mxu3 %v323_v51  ;;  %v324_v1 = vld [vmem:[#allocation8 + $0x248] sm:$0xff]  ;;  %v358_v31 = vld [vmem:[#allocation8 + $0x358] sm:$0xff] }
  0x4c   :  { %439 = vmatpush.msrb.mxu0 %v272_v52  ;;  %459 = vmatpush.msrb.mxu1 %v336_v53  ;;  %v251_v58 = vld [vmem:[#allocation8] sm:$0xff]  ;;  %v256_v4 = vld [vmem:[#allocation8 + $0x28] sm:$0xff]  ;;  %v281_v32 = vld [vmem:[#allocation8 + $0xf0] sm:$0xff] }
  0x4d   :  { %v315_v59 = vld [vmem:[#allocation8 + $0x200] sm:$0xff]  ;;  %403 = vmatpush.msra.mxu2 %v255_v54  ;;  %423 = vmatpush.msra.mxu3 %v319_v55  ;;  %v320_v5 = vld [vmem:[#allocation8 + $0x228] sm:$0xff]  ;;  %v345_v33 = vld [vmem:[#allocation8 + $0x2f0] sm:$0xff] }
  0x4e   :  { %440 = vmatpush.msrb.mxu0 %v268_v56  ;;  %460 = vmatpush.msrb.mxu1 %v332_v57  ;;  %v252_v8 = vld [vmem:[#allocation8 + $0x8] sm:$0xff]  ;;  %v290_v34 = vld [vmem:[#allocation8 + $0x138] sm:$0xff]  ;;  %v277_v40 = vld [vmem:[#allocation8 + $0xd0] sm:$0xff] }
  0x4f   :  { %404 = vmatpush.msra.mxu2 %v251_v58  ;;  %424 = vmatpush.msra.mxu3 %v315_v59  ;;  %v316_v9 = vld [vmem:[#allocation8 + $0x208] sm:$0xff]  ;;  %v354_v35 = vld [vmem:[#allocation8 + $0x338] sm:$0xff]  ;;  %v341_v41 = vld [vmem:[#allocation8 + $0x2d0] sm:$0xff] }
  0x50   :  { %441 = vmatpush.msrb.mxu0 %v264_v60  ;;  %461 = vmatpush.msrb.mxu1 %v328_v61  ;;  %v286_v36 = vld [vmem:[#allocation8 + $0x118] sm:$0xff]  ;;  %v273_v44 = vld [vmem:[#allocation8 + $0xb0] sm:$0xff] }
  0x51   :  { %469 = vmatpush.msrb.mxu2 %v313_v62  ;;  %489 = vmatpush.msrb.mxu3 %v377_v63  ;;  %v350_v37 = vld [vmem:[#allocation8 + $0x318] sm:$0xff]  ;;  %v337_v45 = vld [vmem:[#allocation8 + $0x2b0] sm:$0xff] }
  0x52   :  { %442 = vmatpush.msrb.mxu0 %v260_v0  ;;  %462 = vmatpush.msrb.mxu1 %v324_v1  ;;  %v282_v38 = vld [vmem:[#allocation8 + $0xf8] sm:$0xff]  ;;  %v269_v48 = vld [vmem:[#allocation8 + $0x90] sm:$0xff] }
  0x53   :  { %470 = vmatpush.msrb.mxu2 %v309_v2  ;;  %490 = vmatpush.msrb.mxu3 %v373_v3  ;;  %v346_v39 = vld [vmem:[#allocation8 + $0x2f8] sm:$0xff]  ;;  %v333_v49 = vld [vmem:[#allocation8 + $0x290] sm:$0xff] }
  0x54   :  { %443 = vmatpush.msrb.mxu0 %v256_v4  ;;  %463 = vmatpush.msrb.mxu1 %v320_v5  ;;  %v278_v42 = vld [vmem:[#allocation8 + $0xd8] sm:$0xff]  ;;  %v265_v52 = vld [vmem:[#allocation8 + $0x70] sm:$0xff] }
  0x55   :  { %471 = vmatpush.msrb.mxu2 %v305_v6  ;;  %491 = vmatpush.msrb.mxu3 %v369_v7  ;;  %v342_v43 = vld [vmem:[#allocation8 + $0x2d8] sm:$0xff]  ;;  %v329_v53 = vld [vmem:[#allocation8 + $0x270] sm:$0xff] }
  0x56   :  { %444 = vmatpush.msrb.mxu0 %v252_v8  ;;  %464 = vmatpush.msrb.mxu1 %v316_v9  ;;  %v274_v46 = vld [vmem:[#allocation8 + $0xb8] sm:$0xff]  ;;  %v261_v56 = vld [vmem:[#allocation8 + $0x50] sm:$0xff] }
  0x57   :  { %472 = vmatpush.msrb.mxu2 %v301_v12  ;;  %492 = vmatpush.msrb.mxu3 %v365_v13  ;;  %v338_v47 = vld [vmem:[#allocation8 + $0x2b8] sm:$0xff]  ;;  %v325_v57 = vld [vmem:[#allocation8 + $0x250] sm:$0xff]  ;;  %v801_v13 = vld [vmem:[#allocation11 + $0x7c0] sm:$0xff] }
  0x58   :  { %509 = vmatpush.msra.mxu0 %v314_v10  ;;  %529 = vmatpush.msra.mxu1 %v378_v11  ;;  %v270_v50 = vld [vmem:[#allocation8 + $0x98] sm:$0xff]  ;;  %v257_v60 = vld [vmem:[#allocation8 + $0x30] sm:$0xff] }
  0x59   :  { %473 = vmatpush.msrb.mxu2 %v297_v16  ;;  %493 = vmatpush.msrb.mxu3 %v361_v17  ;;  %v334_v51 = vld [vmem:[#allocation8 + $0x298] sm:$0xff]  ;;  %v321_v61 = vld [vmem:[#allocation8 + $0x230] sm:$0xff]  ;;  %v929_v16 = vld [vmem:[#allocation11 + $0xbc0] sm:$0xff] }
  0x5a   :  { %510 = vmatpush.msra.mxu0 %v310_v14  ;;  %530 = vmatpush.msra.mxu1 %v374_v15  ;;  %v266_v54 = vld [vmem:[#allocation8 + $0x78] sm:$0xff]  ;;  %v253_v0 = vld [vmem:[#allocation8 + $0x10] sm:$0xff]  ;;  %v673_v14 = vld [vmem:[#allocation11 + $0x3c0] sm:$0xff] }
  0x5b   :  { %474 = vmatpush.msrb.mxu2 %v293_v20  ;;  %494 = vmatpush.msrb.mxu3 %v357_v21  ;;  %v330_v55 = vld [vmem:[#allocation8 + $0x278] sm:$0xff]  ;;  %v317_v1 = vld [vmem:[#allocation8 + $0x210] sm:$0xff]  ;;  %v1057_v15 = vld [vmem:[#allocation11 + $0xfc0] sm:$0xff] }
  0x5c   :  { %511 = vmatpush.msra.mxu0 %v306_v18  ;;  %531 = vmatpush.msra.mxu1 %v370_v19  ;;  %v262_v58 = vld [vmem:[#allocation8 + $0x58] sm:$0xff]  ;;  %v793_v17 = vld [vmem:[#allocation11 + $0x780] sm:$0xff] }
  0x5d   :  { %475 = vmatpush.msrb.mxu2 %v289_v24  ;;  %495 = vmatpush.msrb.mxu3 %v353_v25  ;;  %v326_v59 = vld [vmem:[#allocation8 + $0x258] sm:$0xff]  ;;  %v665_v18 = vld [vmem:[#allocation11 + $0x380] sm:$0xff] }
  0x5e   :  { %512 = vmatpush.msra.mxu0 %v302_v22  ;;  %532 = vmatpush.msra.mxu1 %v366_v23  ;;  %v258_v62 = vld [vmem:[#allocation8 + $0x38] sm:$0xff]  ;;  %v1049_v19 = vld [vmem:[#allocation11 + $0xf80] sm:$0xff] }
  0x5f   :  { %476 = vmatpush.msrb.mxu2 %v285_v28  ;;  %496 = vmatpush.msrb.mxu3 %v349_v29  ;;  %v322_v63 = vld [vmem:[#allocation8 + $0x238] sm:$0xff]  ;;  %v921_v20 = vld [vmem:[#allocation11 + $0xb80] sm:$0xff] }
  0x60   :  { %513 = vmatpush.msra.mxu0 %v298_v26  ;;  %533 = vmatpush.msra.mxu1 %v362_v27  ;;  %v254_v2 = vld [vmem:[#allocation8 + $0x18] sm:$0xff]  ;;  %v785_v21 = vld [vmem:[#allocation11 + $0x740] sm:$0xff] }
  0x61   :  { %477 = vmatpush.msrb.mxu2 %v281_v32  ;;  %497 = vmatpush.msrb.mxu3 %v345_v33  ;;  %v318_v3 = vld [vmem:[#allocation8 + $0x218] sm:$0xff]  ;;  %v657_v22 = vld [vmem:[#allocation11 + $0x340] sm:$0xff] }
  0x62   :  { %514 = vmatpush.msra.mxu0 %v294_v30  ;;  %534 = vmatpush.msra.mxu1 %v358_v31  ;;  %v190_v4 = vld [vmem:[#allocation6] sm:$0x3]  ;;  %v1041_v23 = vld [vmem:[#allocation11 + $0xf40] sm:$0xff] }
  0x63   :  { %478 = vmatpush.msrb.mxu2 %v277_v40  ;;  %498 = vmatpush.msrb.mxu3 %v341_v41  ;;  %v192_v5 = vperm.slane %v190_v4, 0  ;;  %v193_v6 = vperm.slane %v190_v4, 1  ;;  %v913_v24 = vld [vmem:[#allocation11 + $0xb40] sm:$0xff] }
  0x64   :  { %515 = vmatpush.msra.mxu0 %v290_v34  ;;  %535 = vmatpush.msra.mxu1 %v354_v35  ;;  %v777_v25 = vld [vmem:[#allocation11 + $0x700] sm:$0xff] }
  0x65   :  { %479 = vmatpush.msrb.mxu2 %v273_v44  ;;  %499 = vmatpush.msrb.mxu3 %v337_v45  ;;  %v649_v26 = vld [vmem:[#allocation11 + $0x300] sm:$0xff] }
  0x66   :  { %516 = vmatpush.msra.mxu0 %v286_v36  ;;  %536 = vmatpush.msra.mxu1 %v350_v37  ;;  %v1033_v27 = vld [vmem:[#allocation11 + $0xf00] sm:$0xff] }
  0x67   :  { %480 = vmatpush.msrb.mxu2 %v269_v48  ;;  %500 = vmatpush.msrb.mxu3 %v333_v49  ;;  %v905_v28 = vld [vmem:[#allocation11 + $0xb00] sm:$0xff] }
  0x68   :  { %517 = vmatpush.msra.mxu0 %v282_v38  ;;  %537 = vmatpush.msra.mxu1 %v346_v39  ;;  %v769_v29 = vld [vmem:[#allocation11 + $0x6c0] sm:$0xff] }
  0x69   :  { %481 = vmatpush.msrb.mxu2 %v265_v52  ;;  %501 = vmatpush.msrb.mxu3 %v329_v53  ;;  %v641_v30 = vld [vmem:[#allocation11 + $0x2c0] sm:$0xff] }
  0x6a   :  { %518 = vmatpush.msra.mxu0 %v278_v42  ;;  %538 = vmatpush.msra.mxu1 %v342_v43  ;;  %v1025_v31 = vld [vmem:[#allocation11 + $0xec0] sm:$0xff] }
  0x6b   :  { %482 = vmatpush.msrb.mxu2 %v261_v56  ;;  %502 = vmatpush.msrb.mxu3 %v325_v57  ;;  %v897_v32 = vld [vmem:[#allocation11 + $0xac0] sm:$0xff] }
  0x6c   :  { %519 = vmatpush.msra.mxu0 %v274_v46  ;;  %539 = vmatpush.msra.mxu1 %v338_v47  ;;  %v761_v33 = vld [vmem:[#allocation11 + $0x680] sm:$0xff] }
  0x6d   :  { %483 = vmatpush.msrb.mxu2 %v257_v60  ;;  %503 = vmatpush.msrb.mxu3 %v321_v61  ;;  %v633_v34 = vld [vmem:[#allocation11 + $0x280] sm:$0xff] }
  0x6e   :  { %520 = vmatpush.msra.mxu0 %v270_v50  ;;  %540 = vmatpush.msra.mxu1 %v334_v51  ;;  %v1017_v35 = vld [vmem:[#allocation11 + $0xe80] sm:$0xff] }
  0x6f   :  { %484 = vmatpush.msrb.mxu2 %v253_v0  ;;  %504 = vmatpush.msrb.mxu3 %v317_v1  ;;  %v889_v36 = vld [vmem:[#allocation11 + $0xa80] sm:$0xff] }
  0x70   :  { %521 = vmatpush.msra.mxu0 %v266_v54  ;;  %541 = vmatpush.msra.mxu1 %v330_v55  ;;  %v753_v37 = vld [vmem:[#allocation11 + $0x640] sm:$0xff] }
  0x71   :  { %v625_v38 = vld [vmem:[#allocation11 + $0x240] sm:$0xff] }
  0x72   :  { %522 = vmatpush.msra.mxu0 %v262_v58  ;;  %542 = vmatpush.msra.mxu1 %v326_v59  ;;  %v1009_v39 = vld [vmem:[#allocation11 + $0xe40] sm:$0xff] }
  0x73   :  { %v881_v40 = vld [vmem:[#allocation11 + $0xa40] sm:$0xff] }
  0x74   :  { %523 = vmatpush.msra.mxu0 %v258_v62  ;;  %543 = vmatpush.msra.mxu1 %v322_v63  ;;  %v745_v41 = vld [vmem:[#allocation11 + $0x600] sm:$0xff] }
  0x75   :  { %v617_v42 = vld [vmem:[#allocation11 + $0x200] sm:$0xff] }
  0x76   :  { %524 = vmatpush.msra.mxu0 %v254_v2  ;;  %544 = vmatpush.msra.mxu1 %v318_v3  ;;  %v1001_v43 = vld [vmem:[#allocation11 + $0xe00] sm:$0xff] }
  0x77   :  { %v873_v44 = vld [vmem:[#allocation11 + $0xa00] sm:$0xff] }
  0x78   :  { %v737_v45 = vld [vmem:[#allocation11 + $0x5c0] sm:$0xff] }
  0x79   :  { %v609_v46 = vld [vmem:[#allocation11 + $0x1c0] sm:$0xff] }
  0x7a   :  { %v993_v47 = vld [vmem:[#allocation11 + $0xdc0] sm:$0xff] }
  0x7b   :  { %v865_v48 = vld [vmem:[#allocation11 + $0x9c0] sm:$0xff] }
  0x7c   :  { %v729_v49 = vld [vmem:[#allocation11 + $0x580] sm:$0xff] }
  0x7d   :  { %v601_v50 = vld [vmem:[#allocation11 + $0x180] sm:$0xff] }
  0x7e   :  { %v985_v51 = vld [vmem:[#allocation11 + $0xd80] sm:$0xff] }
  0x7f   :  { %v857_v52 = vld [vmem:[#allocation11 + $0x980] sm:$0xff] }
  0x80   :  { %v721_v53 = vld [vmem:[#allocation11 + $0x540] sm:$0xff] }
  0x81   :  { %v593_v54 = vld [vmem:[#allocation11 + $0x140] sm:$0xff] }
  0x82   :  { %v977_v55 = vld [vmem:[#allocation11 + $0xd40] sm:$0xff] }
  0x83   :  { %v849_v56 = vld [vmem:[#allocation11 + $0x940] sm:$0xff] }
  0x84   :  { %v713_v57 = vld [vmem:[#allocation11 + $0x500] sm:$0xff] }
  0x85   :  { %v585_v58 = vld [vmem:[#allocation11 + $0x100] sm:$0xff] }
  0x86   :  { %v969_v59 = vld [vmem:[#allocation11 + $0xd00] sm:$0xff] }
  0x87   :  { %v841_v60 = vld [vmem:[#allocation11 + $0x900] sm:$0xff] }
  0x88   :  { %v705_v61 = vld [vmem:[#allocation11 + $0x4c0] sm:$0xff] }
  0x89   :  { %v577_v62 = vld [vmem:[#allocation11 + $0xc0] sm:$0xff] }
  0x8a   :  { %v961_v63 = vld [vmem:[#allocation11 + $0xcc0] sm:$0xff] }
  0x8b   :  { %v833_v0 = vld [vmem:[#allocation11 + $0x8c0] sm:$0xff] }
  0x8c   :  { %v697_v1 = vld [vmem:[#allocation11 + $0x480] sm:$0xff] }
  0x8d   :  { %v569_v2 = vld [vmem:[#allocation11 + $0x80] sm:$0xff] }
  0x8e   :  { %v953_v3 = vld [vmem:[#allocation11 + $0xc80] sm:$0xff] }
  0x8f   :  { %v825_v4 = vld [vmem:[#allocation11 + $0x880] sm:$0xff] }
  0xb4   :  { %v226_v7 = vpop.f32.mrf.mxu0  ;;  %v246_v8 = vpop.f32.mrf.mxu1 }
  0xb5   :  { %v227_v9 = vadd.f32 %v226_v7, %v192_v5  ;;  %v247_v10 = vadd.f32 %v246_v8, %v193_v6  ;;  %v689_v5 = vld [vmem:[#allocation11 + $0x440] sm:$0xff] }
  0xb6   :  { %v561_v6 = vld [vmem:[#allocation11 + $0x40] sm:$0xff] }
  0xb7   :  { %v249_v11 = vmax.f32 %v227_v9, 0.0  ;;  %v250_v12 = vmax.f32 %v247_v10, 0.0  ;;  %v945_v7 = vld [vmem:[#allocation11 + $0xc40] sm:$0xff] }
  0xb8   :  { %v817_v8 = vld [vmem:[#allocation11 + $0x840] sm:$0xff] }
  0xb9   :  { %405 = vmatmul.f32.vlgmr.msra.gmra.mxu2 %v249_v11  ;;  %425 = vmatmul.f32.vlgmr.msra.gmra.mxu3 %v250_v12  ;;  %v681_v9 = vld [vmem:[#allocation11 + $0x400] sm:$0xff] }
  0xba   :  { %445 = vmatmul.f32.vlgmr.msrb.gmra.mxu0 %v249_v11  ;;  %465 = vmatmul.f32.vlgmr.msrb.gmra.mxu1 %v250_v12  ;;  %v553_v10 = vld [vmem:[#allocation11] sm:$0xff] }
  0xbb   :  { %1103 = vmatpush.msra.mxu3 %v801_v13  ;;  %1083 = vmatpush.msra.mxu2 %v673_v14  ;;  %v937_v13 = vld [vmem:[#allocation11 + $0xc00] sm:$0xff] }
  0xbc   :  { %1143 = vmatpush.msrb.mxu1 %v1057_v15  ;;  %1123 = vmatpush.msrb.mxu0 %v929_v16  ;;  %v809_v14 = vld [vmem:[#allocation11 + $0x800] sm:$0xff]  ;;  %v794_v15 = vld [vmem:[#allocation11 + $0x788] sm:$0xff] }
  0xbd   :  { %1104 = vmatpush.msra.mxu3 %v793_v17  ;;  %1084 = vmatpush.msra.mxu2 %v665_v18  ;;  %v666_v16 = vld [vmem:[#allocation11 + $0x388] sm:$0xff] }
  0xbe   :  { %1144 = vmatpush.msrb.mxu1 %v1049_v19  ;;  %1124 = vmatpush.msrb.mxu0 %v921_v20  ;;  %v1058_v17 = vld [vmem:[#allocation11 + $0xfc8] sm:$0xff] }
  0xbf   :  { %1105 = vmatpush.msra.mxu3 %v785_v21  ;;  %1085 = vmatpush.msra.mxu2 %v657_v22  ;;  %v930_v18 = vld [vmem:[#allocation11 + $0xbc8] sm:$0xff] }
  0xc0   :  { %1145 = vmatpush.msrb.mxu1 %v1041_v23  ;;  %1125 = vmatpush.msrb.mxu0 %v913_v24  ;;  %v786_v19 = vld [vmem:[#allocation11 + $0x748] sm:$0xff] }
  0xc1   :  { %485 = vmatmul.f32.vlgmr.msrb.gmra.mxu2 %v249_v11  ;;  %505 = vmatmul.f32.vlgmr.msrb.gmra.mxu3 %v250_v12  ;;  %v658_v20 = vld [vmem:[#allocation11 + $0x348] sm:$0xff] }
  0xc2   :  { %525 = vmatmul.f32.vlgmr.msra.gmra.mxu0 %v249_v11  ;;  %545 = vmatmul.f32.vlgmr.msra.gmra.mxu1 %v250_v12  ;;  %v802_v11 = vld [vmem:[#allocation11 + $0x7c8] sm:$0xff] }
  0xc3   :  { %1106 = vmatpush.msra.mxu3 %v777_v25  ;;  %1086 = vmatpush.msra.mxu2 %v649_v26  ;;  %v674_v12 = vld [vmem:[#allocation11 + $0x3c8] sm:$0xff] }
  0xc4   :  { %1146 = vmatpush.msrb.mxu1 %v1033_v27  ;;  %1126 = vmatpush.msrb.mxu0 %v905_v28  ;;  %v1050_v21 = vld [vmem:[#allocation11 + $0xf88] sm:$0xff] }
  0xc5   :  { %1107 = vmatpush.msra.mxu3 %v769_v29  ;;  %1087 = vmatpush.msra.mxu2 %v641_v30  ;;  %v922_v22 = vld [vmem:[#allocation11 + $0xb88] sm:$0xff] }
  0xc6   :  { %1147 = vmatpush.msrb.mxu1 %v1025_v31  ;;  %1127 = vmatpush.msrb.mxu0 %v897_v32  ;;  %v778_v23 = vld [vmem:[#allocation11 + $0x708] sm:$0xff] }
  0xc7   :  { %1108 = vmatpush.msra.mxu3 %v761_v33  ;;  %1088 = vmatpush.msra.mxu2 %v633_v34  ;;  %v650_v24 = vld [vmem:[#allocation11 + $0x308] sm:$0xff] }
  0xc8   :  { %1148 = vmatpush.msrb.mxu1 %v1017_v35  ;;  %1128 = vmatpush.msrb.mxu0 %v889_v36  ;;  %v1042_v25 = vld [vmem:[#allocation11 + $0xf48] sm:$0xff] }
  0xc9   :  { %1109 = vmatpush.msra.mxu3 %v753_v37  ;;  %1089 = vmatpush.msra.mxu2 %v625_v38  ;;  %v914_v26 = vld [vmem:[#allocation11 + $0xb48] sm:$0xff] }
  0xca   :  { %1149 = vmatpush.msrb.mxu1 %v1009_v39  ;;  %1129 = vmatpush.msrb.mxu0 %v881_v40  ;;  %v770_v27 = vld [vmem:[#allocation11 + $0x6c8] sm:$0xff] }
  0xcb   :  { %1110 = vmatpush.msra.mxu3 %v745_v41  ;;  %1090 = vmatpush.msra.mxu2 %v617_v42  ;;  %v642_v28 = vld [vmem:[#allocation11 + $0x2c8] sm:$0xff] }
  0xcc   :  { %1150 = vmatpush.msrb.mxu1 %v1001_v43  ;;  %1130 = vmatpush.msrb.mxu0 %v873_v44  ;;  %v1034_v29 = vld [vmem:[#allocation11 + $0xf08] sm:$0xff] }
  0xcd   :  { %1111 = vmatpush.msra.mxu3 %v737_v45  ;;  %1091 = vmatpush.msra.mxu2 %v609_v46  ;;  %v906_v30 = vld [vmem:[#allocation11 + $0xb08] sm:$0xff] }
  0xce   :  { %1151 = vmatpush.msrb.mxu1 %v993_v47  ;;  %1131 = vmatpush.msrb.mxu0 %v865_v48  ;;  %v762_v31 = vld [vmem:[#allocation11 + $0x688] sm:$0xff] }
  0xcf   :  { %1112 = vmatpush.msra.mxu3 %v729_v49  ;;  %1092 = vmatpush.msra.mxu2 %v601_v50  ;;  %v634_v32 = vld [vmem:[#allocation11 + $0x288] sm:$0xff] }
  0xd0   :  { %1152 = vmatpush.msrb.mxu1 %v985_v51  ;;  %1132 = vmatpush.msrb.mxu0 %v857_v52  ;;  %v1026_v33 = vld [vmem:[#allocation11 + $0xec8] sm:$0xff] }
  0xd1   :  { %1113 = vmatpush.msra.mxu3 %v721_v53  ;;  %1093 = vmatpush.msra.mxu2 %v593_v54  ;;  %v898_v34 = vld [vmem:[#allocation11 + $0xac8] sm:$0xff] }
  0xd2   :  { %1153 = vmatpush.msrb.mxu1 %v977_v55  ;;  %1133 = vmatpush.msrb.mxu0 %v849_v56  ;;  %v754_v35 = vld [vmem:[#allocation11 + $0x648] sm:$0xff] }
  0xd3   :  { %1114 = vmatpush.msra.mxu3 %v713_v57  ;;  %1094 = vmatpush.msra.mxu2 %v585_v58  ;;  %v626_v36 = vld [vmem:[#allocation11 + $0x248] sm:$0xff] }
  0xd4   :  { %1154 = vmatpush.msrb.mxu1 %v969_v59  ;;  %1134 = vmatpush.msrb.mxu0 %v841_v60  ;;  %v1018_v37 = vld [vmem:[#allocation11 + $0xe88] sm:$0xff] }
  0xd5   :  { %1115 = vmatpush.msra.mxu3 %v705_v61  ;;  %1095 = vmatpush.msra.mxu2 %v577_v62  ;;  %v746_v38 = vld [vmem:[#allocation11 + $0x608] sm:$0xff] }
  0xd6   :  { %1155 = vmatpush.msrb.mxu1 %v961_v63  ;;  %1135 = vmatpush.msrb.mxu0 %v833_v0  ;;  %v618_v39 = vld [vmem:[#allocation11 + $0x208] sm:$0xff] }
  0xd7   :  { %1116 = vmatpush.msra.mxu3 %v697_v1  ;;  %1096 = vmatpush.msra.mxu2 %v569_v2  ;;  %v1010_v40 = vld [vmem:[#allocation11 + $0xe48] sm:$0xff] }
  0xd8   :  { %1156 = vmatpush.msrb.mxu1 %v953_v3  ;;  %1136 = vmatpush.msrb.mxu0 %v825_v4  ;;  %v738_v41 = vld [vmem:[#allocation11 + $0x5c8] sm:$0xff] }
  0xd9   :  { %1117 = vmatpush.msra.mxu3 %v689_v5  ;;  %1097 = vmatpush.msra.mxu2 %v561_v6  ;;  %v610_v42 = vld [vmem:[#allocation11 + $0x1c8] sm:$0xff] }
  0xda   :  { %1157 = vmatpush.msrb.mxu1 %v945_v7  ;;  %1137 = vmatpush.msrb.mxu0 %v817_v8  ;;  %v1002_v43 = vld [vmem:[#allocation11 + $0xe08] sm:$0xff] }
  0xdb   :  { %1118 = vmatpush.msra.mxu3 %v681_v9  ;;  %1098 = vmatpush.msra.mxu2 %v553_v10  ;;  %v730_v44 = vld [vmem:[#allocation11 + $0x588] sm:$0xff] }
  0xdc   :  { %1158 = vmatpush.msrb.mxu1 %v937_v13  ;;  %1138 = vmatpush.msrb.mxu0 %v809_v14  ;;  %v722_v45 = vld [vmem:[#allocation11 + $0x548] sm:$0xff]  ;;  %v379_v13 = vld [vmem:[#allocation9] sm:$0xf] }
  0xdd   :  { %1183 = vmatpush.msrb.mxu3 %v802_v11  ;;  %1163 = vmatpush.msrb.mxu2 %v674_v12  ;;  %v714_v46 = vld [vmem:[#allocation11 + $0x508] sm:$0xff]  ;;  %v382_v14 = vperm.slane %v379_v13, 1 }
  0xde   :  { %1223 = vmatpush.msra.mxu1 %v1058_v17  ;;  %1203 = vmatpush.msra.mxu0 %v930_v18  ;;  %v602_v47 = vld [vmem:[#allocation11 + $0x188] sm:$0xff]  ;;  %v381_v18 = vperm.slane %v379_v13, 0 }
  0xdf   :  { %1184 = vmatpush.msrb.mxu3 %v794_v15  ;;  %1164 = vmatpush.msrb.mxu2 %v666_v16  ;;  %v706_v48 = vld [vmem:[#allocation11 + $0x4c8] sm:$0xff] }
  0xe0   :  { %1224 = vmatpush.msra.mxu1 %v1050_v21  ;;  %1204 = vmatpush.msra.mxu0 %v922_v22  ;;  %v890_v49 = vld [vmem:[#allocation11 + $0xa88] sm:$0xff] }
  0xe1   :  { %1185 = vmatpush.msrb.mxu3 %v786_v19  ;;  %1165 = vmatpush.msrb.mxu2 %v658_v20  ;;  %v994_v50 = vld [vmem:[#allocation11 + $0xdc8] sm:$0xff] }
  0xe2   :  { %1225 = vmatpush.msra.mxu1 %v1042_v25  ;;  %1205 = vmatpush.msra.mxu0 %v914_v26  ;;  %v594_v51 = vld [vmem:[#allocation11 + $0x148] sm:$0xff]  ;;  %v795_v26 = vld [vmem:[#allocation11 + $0x790] sm:$0xff] }
  0xe3   :  { %1186 = vmatpush.msrb.mxu3 %v778_v23  ;;  %1166 = vmatpush.msrb.mxu2 %v650_v24  ;;  %v698_v52 = vld [vmem:[#allocation11 + $0x488] sm:$0xff]  ;;  %v803_v23 = vld [vmem:[#allocation11 + $0x7d0] sm:$0xff]  ;;  %v384_v24 = vperm.slane %v379_v13, 3 }
  0xe4   :  { %1226 = vmatpush.msra.mxu1 %v1034_v29  ;;  %1206 = vmatpush.msra.mxu0 %v906_v30  ;;  %v882_v53 = vld [vmem:[#allocation11 + $0xa48] sm:$0xff]  ;;  %v787_v30 = vld [vmem:[#allocation11 + $0x750] sm:$0xff] }
  0xe5   :  { %1187 = vmatpush.msrb.mxu3 %v770_v27  ;;  %1167 = vmatpush.msrb.mxu2 %v642_v28  ;;  %v986_v54 = vld [vmem:[#allocation11 + $0xd88] sm:$0xff] }
  0xe6   :  { %1227 = vmatpush.msra.mxu1 %v1026_v33  ;;  %1207 = vmatpush.msra.mxu0 %v898_v34  ;;  %v586_v55 = vld [vmem:[#allocation11 + $0x108] sm:$0xff]  ;;  %v675_v33 = vld [vmem:[#allocation11 + $0x3d0] sm:$0xff]  ;;  %v383_v34 = vperm.slane %v379_v13, 2 }
  0xe7   :  { %1188 = vmatpush.msrb.mxu3 %v762_v31  ;;  %1168 = vmatpush.msrb.mxu2 %v634_v32  ;;  %v690_v56 = vld [vmem:[#allocation11 + $0x448] sm:$0xff]  ;;  %v699_v13 = vld [vmem:[#allocation11 + $0x490] sm:$0xff] }
  0xe8   :  { %1228 = vmatpush.msra.mxu1 %v1018_v37  ;;  %1208 = vmatpush.msra.mxu0 %v890_v49  ;;  %v874_v57 = vld [vmem:[#allocation11 + $0xa08] sm:$0xff]  ;;  %v755_v49 = vld [vmem:[#allocation11 + $0x650] sm:$0xff] }
  0xe9   :  { %1189 = vmatpush.msrb.mxu3 %v754_v35  ;;  %1169 = vmatpush.msrb.mxu2 %v626_v36  ;;  %v978_v58 = vld [vmem:[#allocation11 + $0xd48] sm:$0xff]  ;;  %v779_v36 = vld [vmem:[#allocation11 + $0x710] sm:$0xff] }
  0xea   :  { %1229 = vmatpush.msra.mxu1 %v1010_v40  ;;  %1209 = vmatpush.msra.mxu0 %v882_v53  ;;  %v578_v59 = vld [vmem:[#allocation11 + $0xc8] sm:$0xff]  ;;  %v771_v40 = vld [vmem:[#allocation11 + $0x6d0] sm:$0xff] }
  0xeb   :  { %1190 = vmatpush.msrb.mxu3 %v746_v38  ;;  %1170 = vmatpush.msrb.mxu2 %v618_v39  ;;  %v682_v60 = vld [vmem:[#allocation11 + $0x408] sm:$0xff]  ;;  %v667_v39 = vld [vmem:[#allocation11 + $0x390] sm:$0xff] }
  0xec   :  { %1230 = vmatpush.msra.mxu1 %v1002_v43  ;;  %1210 = vmatpush.msra.mxu0 %v874_v57  ;;  %v866_v61 = vld [vmem:[#allocation11 + $0x9c8] sm:$0xff]  ;;  %v643_v53 = vld [vmem:[#allocation11 + $0x2d0] sm:$0xff] }
  0xed   :  { %1191 = vmatpush.msrb.mxu3 %v738_v41  ;;  %1171 = vmatpush.msrb.mxu2 %v610_v42  ;;  %v970_v62 = vld [vmem:[#allocation11 + $0xd08] sm:$0xff]  ;;  %v1059_v42 = vld [vmem:[#allocation11 + $0xfd0] sm:$0xff] }
  0xee   :  { %1231 = vmatpush.msra.mxu1 %v994_v50  ;;  %1211 = vmatpush.msra.mxu0 %v866_v61  ;;  %v570_v63 = vld [vmem:[#allocation11 + $0x88] sm:$0xff]  ;;  %v635_v57 = vld [vmem:[#allocation11 + $0x290] sm:$0xff] }
  0xef   :  { %1192 = vmatpush.msrb.mxu3 %v730_v44  ;;  %1172 = vmatpush.msrb.mxu2 %v602_v47  ;;  %v858_v0 = vld [vmem:[#allocation11 + $0x988] sm:$0xff]  ;;  %v659_v44 = vld [vmem:[#allocation11 + $0x350] sm:$0xff] }
  0xf0   :  { %1232 = vmatpush.msra.mxu1 %v986_v54  ;;  %v962_v1 = vld [vmem:[#allocation11 + $0xcc8] sm:$0xff]  ;;  %1212 = vmatpush.msra.mxu0 %v858_v0  ;;  %v1051_v47 = vld [vmem:[#allocation11 + $0xf90] sm:$0xff] }
  0xf1   :  { %1193 = vmatpush.msrb.mxu3 %v722_v45  ;;  %1173 = vmatpush.msrb.mxu2 %v594_v51  ;;  %v562_v2 = vld [vmem:[#allocation11 + $0x48] sm:$0xff]  ;;  %v763_v45 = vld [vmem:[#allocation11 + $0x690] sm:$0xff] }
  0xf2   :  { %1233 = vmatpush.msra.mxu1 %v978_v58  ;;  %v850_v3 = vld [vmem:[#allocation11 + $0x948] sm:$0xff]  ;;  %v1043_v51 = vld [vmem:[#allocation11 + $0xf50] sm:$0xff] }
  0xf3   :  { %1194 = vmatpush.msrb.mxu3 %v714_v46  ;;  %1174 = vmatpush.msrb.mxu2 %v586_v55  ;;  %v954_v4 = vld [vmem:[#allocation11 + $0xc88] sm:$0xff]  ;;  %v931_v54 = vld [vmem:[#allocation11 + $0xbd0] sm:$0xff] }
  0xf4   :  { %1234 = vmatpush.msra.mxu1 %v970_v62  ;;  %1213 = vmatpush.msra.mxu0 %v850_v3  ;;  %v554_v5 = vld [vmem:[#allocation11 + $0x8] sm:$0xff]  ;;  %v1035_v55 = vld [vmem:[#allocation11 + $0xf10] sm:$0xff] }
  0xf5   :  { %1195 = vmatpush.msrb.mxu3 %v706_v48  ;;  %1175 = vmatpush.msrb.mxu2 %v578_v59  ;;  %v842_v6 = vld [vmem:[#allocation11 + $0x908] sm:$0xff]  ;;  %v651_v48 = vld [vmem:[#allocation11 + $0x310] sm:$0xff] }
  0xf6   :  { %1235 = vmatpush.msra.mxu1 %v962_v1  ;;  %v946_v7 = vld [vmem:[#allocation11 + $0xc48] sm:$0xff]  ;;  %1214 = vmatpush.msra.mxu0 %v842_v6  ;;  %v923_v58 = vld [vmem:[#allocation11 + $0xb90] sm:$0xff] }
  0xf7   :  { %1196 = vmatpush.msrb.mxu3 %v698_v52  ;;  %1176 = vmatpush.msrb.mxu2 %v570_v63  ;;  %v834_v8 = vld [vmem:[#allocation11 + $0x8c8] sm:$0xff]  ;;  %v747_v52 = vld [vmem:[#allocation11 + $0x610] sm:$0xff] }
  0xf8   :  { %1236 = vmatpush.msra.mxu1 %v954_v4  ;;  %v938_v9 = vld [vmem:[#allocation11 + $0xc08] sm:$0xff]  ;;  %1215 = vmatpush.msra.mxu0 %v834_v8  ;;  %v1027_v59 = vld [vmem:[#allocation11 + $0xed0] sm:$0xff] }
  0xf9   :  { %1197 = vmatpush.msrb.mxu3 %v690_v56  ;;  %1177 = vmatpush.msrb.mxu2 %v562_v2  ;;  %v826_v10 = vld [vmem:[#allocation11 + $0x888] sm:$0xff]  ;;  %v739_v56 = vld [vmem:[#allocation11 + $0x5d0] sm:$0xff] }
  0xfa   :  { %1237 = vmatpush.msra.mxu1 %v946_v7  ;;  %1216 = vmatpush.msra.mxu0 %v826_v10  ;;  %v818_v11 = vld [vmem:[#allocation11 + $0x848] sm:$0xff]  ;;  %v731_v61 = vld [vmem:[#allocation11 + $0x590] sm:$0xff] }
  0xfb   :  { %1198 = vmatpush.msrb.mxu3 %v682_v60  ;;  %1178 = vmatpush.msrb.mxu2 %v554_v5  ;;  %v810_v12 = vld [vmem:[#allocation11 + $0x808] sm:$0xff]  ;;  %v627_v60 = vld [vmem:[#allocation11 + $0x250] sm:$0xff] }
  0xfc   :  { %1238 = vmatpush.msra.mxu1 %v938_v9  ;;  %1217 = vmatpush.msra.mxu0 %v818_v11  ;;  %v915_v62 = vld [vmem:[#allocation11 + $0xb50] sm:$0xff] }
  0xfd   :  { %v1019_v63 = vld [vmem:[#allocation11 + $0xe90] sm:$0xff] }
  0xfe   :  { %1218 = vmatpush.msra.mxu0 %v810_v12  ;;  %v619_v0 = vld [vmem:[#allocation11 + $0x210] sm:$0xff] }
  0xff   :  { %v723_v1 = vld [vmem:[#allocation11 + $0x550] sm:$0xff] }
 0x100   :  { %v907_v2 = vld [vmem:[#allocation11 + $0xb10] sm:$0xff] }
 0x101   :  { %v1011_v3 = vld [vmem:[#allocation11 + $0xe50] sm:$0xff] }
 0x102   :  { %v611_v4 = vld [vmem:[#allocation11 + $0x1d0] sm:$0xff] }
 0x103   :  { %v715_v5 = vld [vmem:[#allocation11 + $0x510] sm:$0xff] }
 0x104   :  { %v899_v6 = vld [vmem:[#allocation11 + $0xad0] sm:$0xff] }
 0x105   :  { %v1003_v7 = vld [vmem:[#allocation11 + $0xe10] sm:$0xff] }
 0x106   :  { %v603_v8 = vld [vmem:[#allocation11 + $0x190] sm:$0xff] }
 0x107   :  { %v707_v9 = vld [vmem:[#allocation11 + $0x4d0] sm:$0xff] }
 0x108   :  { %v891_v10 = vld [vmem:[#allocation11 + $0xa90] sm:$0xff] }
 0x109   :  { %v995_v11 = vld [vmem:[#allocation11 + $0xdd0] sm:$0xff] }
 0x10a   :  { %v595_v12 = vld [vmem:[#allocation11 + $0x150] sm:$0xff] }
 0x137   :  { %v446_v15 = vpop.f32.mrf.mxu0  ;;  %v466_v16 = vpop.f32.mrf.mxu1 }
 0x138   :  { %v447_v17 = vadd.f32 %v446_v15, %v382_v14  ;;  %v883_v14 = vld [vmem:[#allocation11 + $0xa50] sm:$0xff] }
 0x139   :  { %v987_v15 = vld [vmem:[#allocation11 + $0xd90] sm:$0xff] }
 0x13a   :  { %v467_v19 = vadd.f32 %v466_v16, %v447_v17  ;;  %v587_v16 = vld [vmem:[#allocation11 + $0x110] sm:$0xff] }
 0x13b   :  { %v691_v17 = vld [vmem:[#allocation11 + $0x450] sm:$0xff] }
 0x13c   :  { %v7653_v20 = vmax.f32 %v467_v19, 0.0  ;;  %v406_v21 = vpop.f32.mrf.mxu2  ;;  %v426_v22 = vpop.f32.mrf.mxu3  ;;  %v979_v19 = vld [vmem:[#allocation11 + $0xd50] sm:$0xff] }
 0x13d   :  { %v407_v25 = vadd.f32 %v406_v21, %v381_v18  ;;  %v875_v18 = vld [vmem:[#allocation11 + $0xa10] sm:$0xff] }
 0x13e   :  { %1119 = vmatmul.f32.vlgmr.msra.gmra.mxu3 %v7653_v20  ;;  %v579_v21 = vld [vmem:[#allocation11 + $0xd0] sm:$0xff] }
 0x13f   :  { %v427_v27 = vadd.f32 %v426_v22, %v407_v25  ;;  %1263 = vmatpush.msra.mxu3 %v803_v23  ;;  %v526_v28 = vpop.f32.mrf.mxu0  ;;  %v546_v32 = vpop.f32.mrf.mxu1  ;;  %v683_v22 = vld [vmem:[#allocation11 + $0x410] sm:$0xff]  ;;  %v804_v25 = vld [vmem:[#allocation11 + $0x7d8] sm:$0xff] }
 0x140   :  { %v527_v29 = vadd.f32 %v526_v28, %v384_v24  ;;  %v867_v23 = vld [vmem:[#allocation11 + $0x9d0] sm:$0xff] }
 0x141   :  { %v7656_v31 = vmax.f32 %v427_v27, 0.0  ;;  %1264 = vmatpush.msra.mxu3 %v795_v26  ;;  %v971_v24 = vld [vmem:[#allocation11 + $0xd10] sm:$0xff] }
 0x142   :  { %v547_v35 = vadd.f32 %v546_v32, %v527_v29  ;;  %v571_v26 = vld [vmem:[#allocation11 + $0x90] sm:$0xff]  ;;  %v796_v29 = vld [vmem:[#allocation11 + $0x798] sm:$0xff] }
 0x143   :  { %1265 = vmatpush.msra.mxu3 %v787_v30  ;;  %1099 = vmatmul.f32.vlgmr.msra.gmra.mxu2 %v7656_v31  ;;  %v859_v27 = vld [vmem:[#allocation11 + $0x990] sm:$0xff] }
 0x144   :  { %v7659_v37 = vmax.f32 %v547_v35, 0.0  ;;  %1243 = vmatpush.msra.mxu2 %v675_v33  ;;  %v486_v38 = vpop.f32.mrf.mxu2  ;;  %v506_v43 = vpop.f32.mrf.mxu3  ;;  %v963_v28 = vld [vmem:[#allocation11 + $0xcd0] sm:$0xff] }
 0x145   :  { %1266 = vmatpush.msra.mxu3 %v779_v36  ;;  %v487_v41 = vadd.f32 %v486_v38, %v383_v34  ;;  %v563_v30 = vld [vmem:[#allocation11 + $0x50] sm:$0xff]  ;;  %v788_v34 = vld [vmem:[#allocation11 + $0x758] sm:$0xff] }
 0x146   :  { %1159 = vmatmul.f32.vlgmr.msrb.gmra.mxu1 %v7659_v37  ;;  %1199 = vmatmul.f32.vlgmr.msrb.gmra.mxu3 %v7653_v20  ;;  %v851_v32 = vld [vmem:[#allocation11 + $0x950] sm:$0xff] }
 0x147   :  { %v507_v46 = vadd.f32 %v506_v43, %v487_v41  ;;  %1244 = vmatpush.msra.mxu2 %v667_v39  ;;  %1267 = vmatpush.msra.mxu3 %v771_v40  ;;  %v955_v33 = vld [vmem:[#allocation11 + $0xc90] sm:$0xff]  ;;  %v780_v39 = vld [vmem:[#allocation11 + $0x718] sm:$0xff] }
 0x148   :  { %1303 = vmatpush.msrb.mxu1 %v1059_v42  ;;  %v555_v35 = vld [vmem:[#allocation11 + $0x10] sm:$0xff]  ;;  %v676_v40 = vld [vmem:[#allocation11 + $0x3d8] sm:$0xff] }
 0x149   :  { %v7663_v50 = vmax.f32 %v507_v46, 0.0  ;;  %1245 = vmatpush.msra.mxu2 %v659_v44  ;;  %1268 = vmatpush.msra.mxu3 %v763_v45  ;;  %v843_v36 = vld [vmem:[#allocation11 + $0x910] sm:$0xff]  ;;  %v772_v43 = vld [vmem:[#allocation11 + $0x6d8] sm:$0xff] }
 0x14a   :  { %1304 = vmatpush.msrb.mxu1 %v1051_v47  ;;  %v947_v38 = vld [vmem:[#allocation11 + $0xc50] sm:$0xff]  ;;  %v668_v44 = vld [vmem:[#allocation11 + $0x398] sm:$0xff] }
 0x14b   :  { %1246 = vmatpush.msra.mxu2 %v651_v48  ;;  %1269 = vmatpush.msra.mxu3 %v755_v49  ;;  %v835_v41 = vld [vmem:[#allocation11 + $0x8d0] sm:$0xff]  ;;  %v1060_v45 = vld [vmem:[#allocation11 + $0xfd8] sm:$0xff] }
 0x14c   :  { %1305 = vmatpush.msrb.mxu1 %v1043_v51  ;;  %1139 = vmatmul.f32.vlgmr.msrb.gmra.mxu0 %v7663_v50  ;;  %v939_v42 = vld [vmem:[#allocation11 + $0xc10] sm:$0xff]  ;;  %v660_v47 = vld [vmem:[#allocation11 + $0x358] sm:$0xff] }
 0x14d   :  { %1179 = vmatmul.f32.vlgmr.msrb.gmra.mxu2 %v7656_v31  ;;  %1270 = vmatpush.msra.mxu3 %v747_v52  ;;  %v827_v46 = vld [vmem:[#allocation11 + $0x890] sm:$0xff]  ;;  %v764_v48 = vld [vmem:[#allocation11 + $0x698] sm:$0xff] }
 0x14e   :  { %1247 = vmatpush.msra.mxu2 %v643_v53  ;;  %1283 = vmatpush.msrb.mxu0 %v931_v54  ;;  %v1052_v49 = vld [vmem:[#allocation11 + $0xf98] sm:$0xff]  ;;  %v819_v51 = vld [vmem:[#allocation11 + $0x850] sm:$0xff] }
 0x14f   :  { %1306 = vmatpush.msrb.mxu1 %v1035_v55  ;;  %1271 = vmatpush.msra.mxu3 %v739_v56  ;;  %v652_v52 = vld [vmem:[#allocation11 + $0x318] sm:$0xff]  ;;  %v811_v55 = vld [vmem:[#allocation11 + $0x810] sm:$0xff] }
 0x150   :  { %1239 = vmatmul.f32.vlgmr.msra.gmra.mxu1 %v7659_v37  ;;  %1248 = vmatpush.msra.mxu2 %v635_v57  ;;  %v756_v53 = vld [vmem:[#allocation11 + $0x658] sm:$0xff] }
 0x151   :  { %1284 = vmatpush.msrb.mxu0 %v923_v58  ;;  %1307 = vmatpush.msrb.mxu1 %v1027_v59  ;;  %v1044_v54 = vld [vmem:[#allocation11 + $0xf58] sm:$0xff] }
 0x152   :  { %1249 = vmatpush.msra.mxu2 %v627_v60  ;;  %1272 = vmatpush.msra.mxu3 %v731_v61  ;;  %v644_v56 = vld [vmem:[#allocation11 + $0x2d8] sm:$0xff] }
 0x153   :  { %1285 = vmatpush.msrb.mxu0 %v915_v62  ;;  %1308 = vmatpush.msrb.mxu1 %v1019_v63  ;;  %v748_v57 = vld [vmem:[#allocation11 + $0x618] sm:$0xff] }
 0x154   :  { %1250 = vmatpush.msra.mxu2 %v619_v0  ;;  %1273 = vmatpush.msra.mxu3 %v723_v1  ;;  %v932_v58 = vld [vmem:[#allocation11 + $0xbd8] sm:$0xff] }
 0x155   :  { %1286 = vmatpush.msrb.mxu0 %v907_v2  ;;  %1309 = vmatpush.msrb.mxu1 %v1011_v3  ;;  %v1036_v59 = vld [vmem:[#allocation11 + $0xf18] sm:$0xff] }
 0x156   :  { %1219 = vmatmul.f32.vlgmr.msra.gmra.mxu0 %v7663_v50  ;;  %1251 = vmatpush.msra.mxu2 %v611_v4  ;;  %v636_v60 = vld [vmem:[#allocation11 + $0x298] sm:$0xff] }
 0x157   :  { %1274 = vmatpush.msra.mxu3 %v715_v5  ;;  %1287 = vmatpush.msrb.mxu0 %v899_v6  ;;  %v740_v61 = vld [vmem:[#allocation11 + $0x5d8] sm:$0xff] }
 0x158   :  { %1310 = vmatpush.msrb.mxu1 %v1003_v7  ;;  %1252 = vmatpush.msra.mxu2 %v603_v8  ;;  %v924_v62 = vld [vmem:[#allocation11 + $0xb98] sm:$0xff] }
 0x159   :  { %1275 = vmatpush.msra.mxu3 %v707_v9  ;;  %1288 = vmatpush.msrb.mxu0 %v891_v10  ;;  %v1028_v63 = vld [vmem:[#allocation11 + $0xed8] sm:$0xff] }
 0x15a   :  { %1311 = vmatpush.msrb.mxu1 %v995_v11  ;;  %1253 = vmatpush.msra.mxu2 %v595_v12  ;;  %v628_v0 = vld [vmem:[#allocation11 + $0x258] sm:$0xff] }
 0x15b   :  { %1276 = vmatpush.msra.mxu3 %v699_v13  ;;  %1289 = vmatpush.msrb.mxu0 %v883_v14  ;;  %v732_v1 = vld [vmem:[#allocation11 + $0x598] sm:$0xff] }
 0x15c   :  { %1312 = vmatpush.msrb.mxu1 %v987_v15  ;;  %1254 = vmatpush.msra.mxu2 %v587_v16  ;;  %v916_v2 = vld [vmem:[#allocation11 + $0xb58] sm:$0xff] }
 0x15d   :  { %1277 = vmatpush.msra.mxu3 %v691_v17  ;;  %1290 = vmatpush.msrb.mxu0 %v875_v18  ;;  %v1020_v3 = vld [vmem:[#allocation11 + $0xe98] sm:$0xff] }
 0x15e   :  { %1313 = vmatpush.msrb.mxu1 %v979_v19  ;;  %1255 = vmatpush.msra.mxu2 %v579_v21  ;;  %v620_v4 = vld [vmem:[#allocation11 + $0x218] sm:$0xff] }
 0x15f   :  { %1278 = vmatpush.msra.mxu3 %v683_v22  ;;  %1291 = vmatpush.msrb.mxu0 %v867_v23  ;;  %v724_v5 = vld [vmem:[#allocation11 + $0x558] sm:$0xff] }
 0x160   :  { %1314 = vmatpush.msrb.mxu1 %v971_v24  ;;  %1279 = vmatmul.f32.vlgmr.msra.gmra.mxu3 %v7653_v20  ;;  %v908_v6 = vld [vmem:[#allocation11 + $0xb18] sm:$0xff] }
 0x161   :  { %1343 = vmatpush.msrb.mxu3 %v804_v25  ;;  %1256 = vmatpush.msra.mxu2 %v571_v26  ;;  %v1012_v7 = vld [vmem:[#allocation11 + $0xe58] sm:$0xff] }
 0x162   :  { %1292 = vmatpush.msrb.mxu0 %v859_v27  ;;  %1315 = vmatpush.msrb.mxu1 %v963_v28  ;;  %v612_v8 = vld [vmem:[#allocation11 + $0x1d8] sm:$0xff] }
 0x163   :  { %1344 = vmatpush.msrb.mxu3 %v796_v29  ;;  %1257 = vmatpush.msra.mxu2 %v563_v30  ;;  %v716_v9 = vld [vmem:[#allocation11 + $0x518] sm:$0xff]  ;;  %v805_v29 = vld [vmem:[#allocation11 + $0x7e0] sm:$0xff] }
 0x164   :  { %1293 = vmatpush.msrb.mxu0 %v851_v32  ;;  %1316 = vmatpush.msrb.mxu1 %v955_v33  ;;  %v900_v10 = vld [vmem:[#allocation11 + $0xad8] sm:$0xff] }
 0x165   :  { %1345 = vmatpush.msrb.mxu3 %v788_v34  ;;  %1258 = vmatpush.msra.mxu2 %v555_v35  ;;  %v1004_v11 = vld [vmem:[#allocation11 + $0xe18] sm:$0xff]  ;;  %v797_v34 = vld [vmem:[#allocation11 + $0x7a0] sm:$0xff] }
 0x166   :  { %1294 = vmatpush.msrb.mxu0 %v843_v36  ;;  %1317 = vmatpush.msrb.mxu1 %v947_v38  ;;  %v604_v12 = vld [vmem:[#allocation11 + $0x198] sm:$0xff] }
 0x167   :  { %1259 = vmatmul.f32.vlgmr.msra.gmra.mxu2 %v7656_v31  ;;  %1346 = vmatpush.msrb.mxu3 %v780_v39  ;;  %v708_v13 = vld [vmem:[#allocation11 + $0x4d8] sm:$0xff]  ;;  %v789_v39 = vld [vmem:[#allocation11 + $0x760] sm:$0xff] }
 0x168   :  { %1323 = vmatpush.msrb.mxu2 %v676_v40  ;;  %1295 = vmatpush.msrb.mxu0 %v835_v41  ;;  %v892_v14 = vld [vmem:[#allocation11 + $0xa98] sm:$0xff] }
 0x169   :  { %1318 = vmatpush.msrb.mxu1 %v939_v42  ;;  %1347 = vmatpush.msrb.mxu3 %v772_v43  ;;  %v996_v15 = vld [vmem:[#allocation11 + $0xdd8] sm:$0xff]  ;;  %v781_v43 = vld [vmem:[#allocation11 + $0x720] sm:$0xff] }
 0x16a   :  { %1319 = vmatmul.f32.vlgmr.msrb.gmra.mxu1 %v7659_v37  ;;  %1324 = vmatpush.msrb.mxu2 %v668_v44  ;;  %v596_v16 = vld [vmem:[#allocation11 + $0x158] sm:$0xff]  ;;  %v677_v44 = vld [vmem:[#allocation11 + $0x3e0] sm:$0xff] }
 0x16b   :  { %1383 = vmatpush.msra.mxu1 %v1060_v45  ;;  %1296 = vmatpush.msrb.mxu0 %v827_v46  ;;  %v700_v17 = vld [vmem:[#allocation11 + $0x498] sm:$0xff] }
 0x16c   :  { %1325 = vmatpush.msrb.mxu2 %v660_v47  ;;  %1348 = vmatpush.msrb.mxu3 %v764_v48  ;;  %v884_v18 = vld [vmem:[#allocation11 + $0xa58] sm:$0xff]  ;;  %v773_v47 = vld [vmem:[#allocation11 + $0x6e0] sm:$0xff] }
 0x16d   :  { %1384 = vmatpush.msra.mxu1 %v1052_v49  ;;  %1297 = vmatpush.msrb.mxu0 %v819_v51  ;;  %v988_v19 = vld [vmem:[#allocation11 + $0xd98] sm:$0xff]  ;;  %v669_v48 = vld [vmem:[#allocation11 + $0x3a0] sm:$0xff] }
 0x16e   :  { %1326 = vmatpush.msrb.mxu2 %v652_v52  ;;  %1349 = vmatpush.msrb.mxu3 %v756_v53  ;;  %v588_v21 = vld [vmem:[#allocation11 + $0x118] sm:$0xff]  ;;  %v1061_v49 = vld [vmem:[#allocation11 + $0xfe0] sm:$0xff] }
 0x16f   :  { %1385 = vmatpush.msra.mxu1 %v1044_v54  ;;  %1298 = vmatpush.msrb.mxu0 %v811_v55  ;;  %v692_v22 = vld [vmem:[#allocation11 + $0x458] sm:$0xff]  ;;  %v661_v52 = vld [vmem:[#allocation11 + $0x360] sm:$0xff] }
 0x170   :  { %1299 = vmatmul.f32.vlgmr.msrb.gmra.mxu0 %v7663_v50  ;;  %1327 = vmatpush.msrb.mxu2 %v644_v56  ;;  %v876_v23 = vld [vmem:[#allocation11 + $0xa18] sm:$0xff]  ;;  %v765_v53 = vld [vmem:[#allocation11 + $0x6a0] sm:$0xff] }
 0x171   :  { %1350 = vmatpush.msrb.mxu3 %v748_v57  ;;  %1363 = vmatpush.msra.mxu0 %v932_v58  ;;  %v980_v24 = vld [vmem:[#allocation11 + $0xd58] sm:$0xff]  ;;  %v1053_v54 = vld [vmem:[#allocation11 + $0xfa0] sm:$0xff] }
 0x172   :  { %1386 = vmatpush.msra.mxu1 %v1036_v59  ;;  %1328 = vmatpush.msrb.mxu2 %v636_v60  ;;  %v580_v25 = vld [vmem:[#allocation11 + $0xd8] sm:$0xff]  ;;  %v653_v56 = vld [vmem:[#allocation11 + $0x320] sm:$0xff] }
 0x173   :  { %1351 = vmatpush.msrb.mxu3 %v740_v61  ;;  %1364 = vmatpush.msra.mxu0 %v924_v62  ;;  %v684_v26 = vld [vmem:[#allocation11 + $0x418] sm:$0xff]  ;;  %v757_v57 = vld [vmem:[#allocation11 + $0x660] sm:$0xff] }
 0x174   :  { %1387 = vmatpush.msra.mxu1 %v1028_v63  ;;  %1329 = vmatpush.msrb.mxu2 %v628_v0  ;;  %v868_v27 = vld [vmem:[#allocation11 + $0x9d8] sm:$0xff]  ;;  %v1045_v58 = vld [vmem:[#allocation11 + $0xf60] sm:$0xff] }
 0x175   :  { %1352 = vmatpush.msrb.mxu3 %v732_v1  ;;  %1365 = vmatpush.msra.mxu0 %v916_v2  ;;  %v972_v28 = vld [vmem:[#allocation11 + $0xd18] sm:$0xff]  ;;  %v645_v60 = vld [vmem:[#allocation11 + $0x2e0] sm:$0xff] }
 0x176   :  { %1388 = vmatpush.msra.mxu1 %v1020_v3  ;;  %1330 = vmatpush.msrb.mxu2 %v620_v4  ;;  %v572_v30 = vld [vmem:[#allocation11 + $0x98] sm:$0xff]  ;;  %v749_v61 = vld [vmem:[#allocation11 + $0x620] sm:$0xff] }
 0x177   :  { %1353 = vmatpush.msrb.mxu3 %v724_v5  ;;  %1366 = vmatpush.msra.mxu0 %v908_v6  ;;  %v860_v32 = vld [vmem:[#allocation11 + $0x998] sm:$0xff]  ;;  %v933_v62 = vld [vmem:[#allocation11 + $0xbe0] sm:$0xff] }
 0x178   :  { %1389 = vmatpush.msra.mxu1 %v1012_v7  ;;  %1331 = vmatpush.msrb.mxu2 %v612_v8  ;;  %v964_v33 = vld [vmem:[#allocation11 + $0xcd8] sm:$0xff]  ;;  %v1037_v63 = vld [vmem:[#allocation11 + $0xf20] sm:$0xff] }
 0x179   :  { %1354 = vmatpush.msrb.mxu3 %v716_v9  ;;  %1367 = vmatpush.msra.mxu0 %v900_v10  ;;  %v564_v35 = vld [vmem:[#allocation11 + $0x58] sm:$0xff]  ;;  %v637_v0 = vld [vmem:[#allocation11 + $0x2a0] sm:$0xff] }
 0x17a   :  { %1390 = vmatpush.msra.mxu1 %v1004_v11  ;;  %1332 = vmatpush.msrb.mxu2 %v604_v12  ;;  %v852_v36 = vld [vmem:[#allocation11 + $0x958] sm:$0xff]  ;;  %v741_v1 = vld [vmem:[#allocation11 + $0x5e0] sm:$0xff] }
 0x17b   :  { %1355 = vmatpush.msrb.mxu3 %v708_v13  ;;  %1368 = vmatpush.msra.mxu0 %v892_v14  ;;  %v956_v38 = vld [vmem:[#allocation11 + $0xc98] sm:$0xff]  ;;  %v925_v2 = vld [vmem:[#allocation11 + $0xba0] sm:$0xff] }
 0x17c   :  { %1391 = vmatpush.msra.mxu1 %v996_v15  ;;  %1333 = vmatpush.msrb.mxu2 %v596_v16  ;;  %v556_v40 = vld [vmem:[#allocation11 + $0x18] sm:$0xff]  ;;  %v1029_v3 = vld [vmem:[#allocation11 + $0xee0] sm:$0xff] }
 0x17d   :  { %1356 = vmatpush.msrb.mxu3 %v700_v17  ;;  %1369 = vmatpush.msra.mxu0 %v884_v18  ;;  %v844_v41 = vld [vmem:[#allocation11 + $0x918] sm:$0xff]  ;;  %v629_v4 = vld [vmem:[#allocation11 + $0x260] sm:$0xff] }
 0x17e   :  { %1392 = vmatpush.msra.mxu1 %v988_v19  ;;  %1334 = vmatpush.msrb.mxu2 %v588_v21  ;;  %v948_v42 = vld [vmem:[#allocation11 + $0xc58] sm:$0xff]  ;;  %v733_v5 = vld [vmem:[#allocation11 + $0x5a0] sm:$0xff] }
 0x17f   :  { %1357 = vmatpush.msrb.mxu3 %v692_v22  ;;  %1370 = vmatpush.msra.mxu0 %v876_v23  ;;  %v836_v45 = vld [vmem:[#allocation11 + $0x8d8] sm:$0xff]  ;;  %v917_v6 = vld [vmem:[#allocation11 + $0xb60] sm:$0xff] }
 0x180   :  { %1393 = vmatpush.msra.mxu1 %v980_v24  ;;  %1335 = vmatpush.msrb.mxu2 %v580_v25  ;;  %v940_v46 = vld [vmem:[#allocation11 + $0xc18] sm:$0xff]  ;;  %v1021_v7 = vld [vmem:[#allocation11 + $0xea0] sm:$0xff] }
 0x181   :  { %1358 = vmatpush.msrb.mxu3 %v684_v26  ;;  %1371 = vmatpush.msra.mxu0 %v868_v27  ;;  %v828_v51 = vld [vmem:[#allocation11 + $0x898] sm:$0xff]  ;;  %v621_v8 = vld [vmem:[#allocation11 + $0x220] sm:$0xff] }
 0x182   :  { %1394 = vmatpush.msra.mxu1 %v972_v28  ;;  %1359 = vmatmul.f32.vlgmr.msrb.gmra.mxu3 %v7653_v20  ;;  %v820_v55 = vld [vmem:[#allocation11 + $0x858] sm:$0xff]  ;;  %v725_v9 = vld [vmem:[#allocation11 + $0x560] sm:$0xff] }
 0x183   :  { %1423 = vmatpush.msra.mxu3 %v805_v29  ;;  %1336 = vmatpush.msrb.mxu2 %v572_v30  ;;  %v812_v59 = vld [vmem:[#allocation11 + $0x818] sm:$0xff]  ;;  %v909_v10 = vld [vmem:[#allocation11 + $0xb20] sm:$0xff] }
 0x184   :  { %1372 = vmatpush.msra.mxu0 %v860_v32  ;;  %1395 = vmatpush.msra.mxu1 %v964_v33  ;;  %v1013_v11 = vld [vmem:[#allocation11 + $0xe60] sm:$0xff] }
 0x185   :  { %1424 = vmatpush.msra.mxu3 %v797_v34  ;;  %1337 = vmatpush.msrb.mxu2 %v564_v35  ;;  %v613_v12 = vld [vmem:[#allocation11 + $0x1e0] sm:$0xff]  ;;  %v806_v34 = vld [vmem:[#allocation11 + $0x7e8] sm:$0xff] }
 0x186   :  { %1373 = vmatpush.msra.mxu0 %v852_v36  ;;  %1396 = vmatpush.msra.mxu1 %v956_v38  ;;  %v717_v13 = vld [vmem:[#allocation11 + $0x520] sm:$0xff] }
 0x187   :  { %1425 = vmatpush.msra.mxu3 %v789_v39  ;;  %1338 = vmatpush.msrb.mxu2 %v556_v40  ;;  %v901_v14 = vld [vmem:[#allocation11 + $0xae0] sm:$0xff]  ;;  %v798_v39 = vld [vmem:[#allocation11 + $0x7a8] sm:$0xff] }
 0x188   :  { %1374 = vmatpush.msra.mxu0 %v844_v41  ;;  %1397 = vmatpush.msra.mxu1 %v948_v42  ;;  %v1005_v15 = vld [vmem:[#allocation11 + $0xe20] sm:$0xff] }
 0x189   :  { %1339 = vmatmul.f32.vlgmr.msrb.gmra.mxu2 %v7656_v31  ;;  %1426 = vmatpush.msra.mxu3 %v781_v43  ;;  %v605_v16 = vld [vmem:[#allocation11 + $0x1a0] sm:$0xff]  ;;  %v790_v43 = vld [vmem:[#allocation11 + $0x768] sm:$0xff] }
 0x18a   :  { %1403 = vmatpush.msra.mxu2 %v677_v44  ;;  %1375 = vmatpush.msra.mxu0 %v836_v45  ;;  %v709_v17 = vld [vmem:[#allocation11 + $0x4e0] sm:$0xff] }
 0x18b   :  { %1398 = vmatpush.msra.mxu1 %v940_v46  ;;  %1427 = vmatpush.msra.mxu3 %v773_v47  ;;  %v893_v18 = vld [vmem:[#allocation11 + $0xaa0] sm:$0xff]  ;;  %v782_v47 = vld [vmem:[#allocation11 + $0x728] sm:$0xff] }
 0x18c   :  { %1399 = vmatmul.f32.vlgmr.msra.gmra.mxu1 %v7659_v37  ;;  %1404 = vmatpush.msra.mxu2 %v669_v48  ;;  %v997_v19 = vld [vmem:[#allocation11 + $0xde0] sm:$0xff]  ;;  %v678_v48 = vld [vmem:[#allocation11 + $0x3e8] sm:$0xff] }
 0x18d   :  { %1463 = vmatpush.msrb.mxu1 %v1061_v49  ;;  %1376 = vmatpush.msra.mxu0 %v828_v51  ;;  %v597_v21 = vld [vmem:[#allocation11 + $0x160] sm:$0xff] }
 0x18e   :  { %1405 = vmatpush.msra.mxu2 %v661_v52  ;;  %1428 = vmatpush.msra.mxu3 %v765_v53  ;;  %v701_v22 = vld [vmem:[#allocation11 + $0x4a0] sm:$0xff]  ;;  %v774_v52 = vld [vmem:[#allocation11 + $0x6e8] sm:$0xff] }
 0x18f   :  { %1464 = vmatpush.msrb.mxu1 %v1053_v54  ;;  %1377 = vmatpush.msra.mxu0 %v820_v55  ;;  %v885_v23 = vld [vmem:[#allocation11 + $0xa60] sm:$0xff]  ;;  %v670_v53 = vld [vmem:[#allocation11 + $0x3a8] sm:$0xff] }
 0x190   :  { %1406 = vmatpush.msra.mxu2 %v653_v56  ;;  %1429 = vmatpush.msra.mxu3 %v757_v57  ;;  %v989_v24 = vld [vmem:[#allocation11 + $0xda0] sm:$0xff]  ;;  %v1062_v54 = vld [vmem:[#allocation11 + $0xfe8] sm:$0xff] }
 0x191   :  { %1465 = vmatpush.msrb.mxu1 %v1045_v58  ;;  %1378 = vmatpush.msra.mxu0 %v812_v59  ;;  %v589_v25 = vld [vmem:[#allocation11 + $0x120] sm:$0xff]  ;;  %v662_v56 = vld [vmem:[#allocation11 + $0x368] sm:$0xff] }
 0x192   :  { %1379 = vmatmul.f32.vlgmr.msra.gmra.mxu0 %v7663_v50  ;;  %1407 = vmatpush.msra.mxu2 %v645_v60  ;;  %v693_v26 = vld [vmem:[#allocation11 + $0x460] sm:$0xff]  ;;  %v766_v57 = vld [vmem:[#allocation11 + $0x6a8] sm:$0xff] }
 0x193   :  { %1430 = vmatpush.msra.mxu3 %v749_v61  ;;  %1443 = vmatpush.msrb.mxu0 %v933_v62  ;;  %v877_v27 = vld [vmem:[#allocation11 + $0xa20] sm:$0xff]  ;;  %v1054_v58 = vld [vmem:[#allocation11 + $0xfa8] sm:$0xff] }
 0x194   :  { %1466 = vmatpush.msrb.mxu1 %v1037_v63  ;;  %1408 = vmatpush.msra.mxu2 %v637_v0  ;;  %v981_v28 = vld [vmem:[#allocation11 + $0xd60] sm:$0xff]  ;;  %v654_v60 = vld [vmem:[#allocation11 + $0x328] sm:$0xff] }
 0x195   :  { %1431 = vmatpush.msra.mxu3 %v741_v1  ;;  %1444 = vmatpush.msrb.mxu0 %v925_v2  ;;  %v581_v29 = vld [vmem:[#allocation11 + $0xe0] sm:$0xff]  ;;  %v758_v61 = vld [vmem:[#allocation11 + $0x668] sm:$0xff] }
 0x196   :  { %1467 = vmatpush.msrb.mxu1 %v1029_v3  ;;  %1409 = vmatpush.msra.mxu2 %v629_v4  ;;  %v685_v30 = vld [vmem:[#allocation11 + $0x420] sm:$0xff]  ;;  %v1046_v62 = vld [vmem:[#allocation11 + $0xf68] sm:$0xff] }
 0x197   :  { %1432 = vmatpush.msra.mxu3 %v733_v5  ;;  %1445 = vmatpush.msrb.mxu0 %v917_v6  ;;  %v869_v32 = vld [vmem:[#allocation11 + $0x9e0] sm:$0xff]  ;;  %v646_v0 = vld [vmem:[#allocation11 + $0x2e8] sm:$0xff] }
 0x198   :  { %1468 = vmatpush.msrb.mxu1 %v1021_v7  ;;  %1410 = vmatpush.msra.mxu2 %v621_v8  ;;  %v973_v33 = vld [vmem:[#allocation11 + $0xd20] sm:$0xff]  ;;  %v750_v1 = vld [vmem:[#allocation11 + $0x628] sm:$0xff] }
 0x199   :  { %1433 = vmatpush.msra.mxu3 %v725_v9  ;;  %1446 = vmatpush.msrb.mxu0 %v909_v10  ;;  %v573_v35 = vld [vmem:[#allocation11 + $0xa0] sm:$0xff]  ;;  %v934_v2 = vld [vmem:[#allocation11 + $0xbe8] sm:$0xff] }
 0x19a   :  { %1469 = vmatpush.msrb.mxu1 %v1013_v11  ;;  %1411 = vmatpush.msra.mxu2 %v613_v12  ;;  %v861_v36 = vld [vmem:[#allocation11 + $0x9a0] sm:$0xff]  ;;  %v1038_v3 = vld [vmem:[#allocation11 + $0xf28] sm:$0xff] }
 0x19b   :  { %1434 = vmatpush.msra.mxu3 %v717_v13  ;;  %1447 = vmatpush.msrb.mxu0 %v901_v14  ;;  %v965_v38 = vld [vmem:[#allocation11 + $0xce0] sm:$0xff]  ;;  %v638_v4 = vld [vmem:[#allocation11 + $0x2a8] sm:$0xff] }
 0x19c   :  { %1470 = vmatpush.msrb.mxu1 %v1005_v15  ;;  %1412 = vmatpush.msra.mxu2 %v605_v16  ;;  %v565_v40 = vld [vmem:[#allocation11 + $0x60] sm:$0xff]  ;;  %v742_v5 = vld [vmem:[#allocation11 + $0x5e8] sm:$0xff] }
 0x19d   :  { %1435 = vmatpush.msra.mxu3 %v709_v17  ;;  %1448 = vmatpush.msrb.mxu0 %v893_v18  ;;  %v853_v41 = vld [vmem:[#allocation11 + $0x960] sm:$0xff]  ;;  %v926_v6 = vld [vmem:[#allocation11 + $0xba8] sm:$0xff] }
 0x19e   :  { %1471 = vmatpush.msrb.mxu1 %v997_v19  ;;  %1413 = vmatpush.msra.mxu2 %v597_v21  ;;  %v957_v42 = vld [vmem:[#allocation11 + $0xca0] sm:$0xff]  ;;  %v1030_v7 = vld [vmem:[#allocation11 + $0xee8] sm:$0xff] }
 0x19f   :  { %1436 = vmatpush.msra.mxu3 %v701_v22  ;;  %1449 = vmatpush.msrb.mxu0 %v885_v23  ;;  %v557_v44 = vld [vmem:[#allocation11 + $0x20] sm:$0xff]  ;;  %v630_v8 = vld [vmem:[#allocation11 + $0x268] sm:$0xff] }
 0x1a0   :  { %1472 = vmatpush.msrb.mxu1 %v989_v24  ;;  %1414 = vmatpush.msra.mxu2 %v589_v25  ;;  %v845_v45 = vld [vmem:[#allocation11 + $0x920] sm:$0xff]  ;;  %v734_v9 = vld [vmem:[#allocation11 + $0x5a8] sm:$0xff] }
 0x1a1   :  { %1437 = vmatpush.msra.mxu3 %v693_v26  ;;  %1450 = vmatpush.msrb.mxu0 %v877_v27  ;;  %v949_v46 = vld [vmem:[#allocation11 + $0xc60] sm:$0xff]  ;;  %v918_v10 = vld [vmem:[#allocation11 + $0xb68] sm:$0xff] }
 0x1a2   :  { %1473 = vmatpush.msrb.mxu1 %v981_v28  ;;  %1415 = vmatpush.msra.mxu2 %v581_v29  ;;  %v837_v49 = vld [vmem:[#allocation11 + $0x8e0] sm:$0xff]  ;;  %v1022_v11 = vld [vmem:[#allocation11 + $0xea8] sm:$0xff] }
 0x1a3   :  { %1438 = vmatpush.msra.mxu3 %v685_v30  ;;  %1451 = vmatpush.msrb.mxu0 %v869_v32  ;;  %v941_v51 = vld [vmem:[#allocation11 + $0xc20] sm:$0xff]  ;;  %v622_v12 = vld [vmem:[#allocation11 + $0x228] sm:$0xff] }
 0x1a4   :  { %1474 = vmatpush.msrb.mxu1 %v973_v33  ;;  %1439 = vmatmul.f32.vlgmr.msra.gmra.mxu3 %v7653_v20  ;;  %v829_v55 = vld [vmem:[#allocation11 + $0x8a0] sm:$0xff]  ;;  %v726_v13 = vld [vmem:[#allocation11 + $0x568] sm:$0xff] }
 0x1a5   :  { %1503 = vmatpush.msrb.mxu3 %v806_v34  ;;  %1416 = vmatpush.msra.mxu2 %v573_v35  ;;  %v821_v59 = vld [vmem:[#allocation11 + $0x860] sm:$0xff]  ;;  %v910_v14 = vld [vmem:[#allocation11 + $0xb28] sm:$0xff] }
 0x1a6   :  { %1452 = vmatpush.msrb.mxu0 %v861_v36  ;;  %1475 = vmatpush.msrb.mxu1 %v965_v38  ;;  %v813_v63 = vld [vmem:[#allocation11 + $0x820] sm:$0xff]  ;;  %v1014_v15 = vld [vmem:[#allocation11 + $0xe68] sm:$0xff] }
 0x1a7   :  { %1504 = vmatpush.msrb.mxu3 %v798_v39  ;;  %1417 = vmatpush.msra.mxu2 %v565_v40  ;;  %v614_v16 = vld [vmem:[#allocation11 + $0x1e8] sm:$0xff]  ;;  %v807_v39 = vld [vmem:[#allocation11 + $0x7f0] sm:$0xff] }
 0x1a8   :  { %1453 = vmatpush.msrb.mxu0 %v853_v41  ;;  %1476 = vmatpush.msrb.mxu1 %v957_v42  ;;  %v718_v17 = vld [vmem:[#allocation11 + $0x528] sm:$0xff] }
 0x1a9   :  { %1505 = vmatpush.msrb.mxu3 %v790_v43  ;;  %1418 = vmatpush.msra.mxu2 %v557_v44  ;;  %v902_v18 = vld [vmem:[#allocation11 + $0xae8] sm:$0xff]  ;;  %v799_v43 = vld [vmem:[#allocation11 + $0x7b0] sm:$0xff] }
 0x1aa   :  { %1454 = vmatpush.msrb.mxu0 %v845_v45  ;;  %1477 = vmatpush.msrb.mxu1 %v949_v46  ;;  %v1006_v19 = vld [vmem:[#allocation11 + $0xe28] sm:$0xff] }
 0x1ab   :  { %1419 = vmatmul.f32.vlgmr.msra.gmra.mxu2 %v7656_v31  ;;  %1506 = vmatpush.msrb.mxu3 %v782_v47  ;;  %v606_v21 = vld [vmem:[#allocation11 + $0x1a8] sm:$0xff]  ;;  %v791_v47 = vld [vmem:[#allocation11 + $0x770] sm:$0xff] }
 0x1ac   :  { %1483 = vmatpush.msrb.mxu2 %v678_v48  ;;  %1455 = vmatpush.msrb.mxu0 %v837_v49  ;;  %v710_v22 = vld [vmem:[#allocation11 + $0x4e8] sm:$0xff] }
 0x1ad   :  { %1478 = vmatpush.msrb.mxu1 %v941_v51  ;;  %1507 = vmatpush.msrb.mxu3 %v774_v52  ;;  %v894_v23 = vld [vmem:[#allocation11 + $0xaa8] sm:$0xff]  ;;  %v783_v52 = vld [vmem:[#allocation11 + $0x730] sm:$0xff] }
 0x1ae   :  { %1479 = vmatmul.f32.vlgmr.msrb.gmra.mxu1 %v7659_v37  ;;  %1484 = vmatpush.msrb.mxu2 %v670_v53  ;;  %v998_v24 = vld [vmem:[#allocation11 + $0xde8] sm:$0xff]  ;;  %v679_v53 = vld [vmem:[#allocation11 + $0x3f0] sm:$0xff] }
 0x1af   :  { %1543 = vmatpush.msra.mxu1 %v1062_v54  ;;  %1456 = vmatpush.msrb.mxu0 %v829_v55  ;;  %v598_v25 = vld [vmem:[#allocation11 + $0x168] sm:$0xff] }
 0x1b0   :  { %1485 = vmatpush.msrb.mxu2 %v662_v56  ;;  %1508 = vmatpush.msrb.mxu3 %v766_v57  ;;  %v702_v26 = vld [vmem:[#allocation11 + $0x4a8] sm:$0xff]  ;;  %v775_v56 = vld [vmem:[#allocation11 + $0x6f0] sm:$0xff] }
 0x1b1   :  { %1544 = vmatpush.msra.mxu1 %v1054_v58  ;;  %1457 = vmatpush.msrb.mxu0 %v821_v59  ;;  %v886_v27 = vld [vmem:[#allocation11 + $0xa68] sm:$0xff]  ;;  %v671_v57 = vld [vmem:[#allocation11 + $0x3b0] sm:$0xff] }
 0x1b2   :  { %1486 = vmatpush.msrb.mxu2 %v654_v60  ;;  %1509 = vmatpush.msrb.mxu3 %v758_v61  ;;  %v990_v28 = vld [vmem:[#allocation11 + $0xda8] sm:$0xff]  ;;  %v1063_v58 = vld [vmem:[#allocation11 + $0xff0] sm:$0xff] }
 0x1b3   :  { %1545 = vmatpush.msra.mxu1 %v1046_v62  ;;  %1458 = vmatpush.msrb.mxu0 %v813_v63  ;;  %v590_v29 = vld [vmem:[#allocation11 + $0x128] sm:$0xff]  ;;  %v663_v60 = vld [vmem:[#allocation11 + $0x370] sm:$0xff] }
 0x1b4   :  { %1459 = vmatmul.f32.vlgmr.msrb.gmra.mxu0 %v7663_v50  ;;  %1487 = vmatpush.msrb.mxu2 %v646_v0  ;;  %v694_v30 = vld [vmem:[#allocation11 + $0x468] sm:$0xff]  ;;  %v767_v61 = vld [vmem:[#allocation11 + $0x6b0] sm:$0xff] }
 0x1b5   :  { %1510 = vmatpush.msrb.mxu3 %v750_v1  ;;  %1523 = vmatpush.msra.mxu0 %v934_v2  ;;  %v878_v32 = vld [vmem:[#allocation11 + $0xa28] sm:$0xff]  ;;  %v1055_v62 = vld [vmem:[#allocation11 + $0xfb0] sm:$0xff] }
 0x1b6   :  { %1546 = vmatpush.msra.mxu1 %v1038_v3  ;;  %1488 = vmatpush.msrb.mxu2 %v638_v4  ;;  %v982_v33 = vld [vmem:[#allocation11 + $0xd68] sm:$0xff]  ;;  %v655_v0 = vld [vmem:[#allocation11 + $0x330] sm:$0xff] }
 0x1b7   :  { %1511 = vmatpush.msrb.mxu3 %v742_v5  ;;  %1524 = vmatpush.msra.mxu0 %v926_v6  ;;  %v582_v34 = vld [vmem:[#allocation11 + $0xe8] sm:$0xff]  ;;  %v759_v1 = vld [vmem:[#allocation11 + $0x670] sm:$0xff] }
 0x1b8   :  { %1547 = vmatpush.msra.mxu1 %v1030_v7  ;;  %1489 = vmatpush.msrb.mxu2 %v630_v8  ;;  %v686_v35 = vld [vmem:[#allocation11 + $0x428] sm:$0xff]  ;;  %v1047_v2 = vld [vmem:[#allocation11 + $0xf70] sm:$0xff] }
 0x1b9   :  { %1512 = vmatpush.msrb.mxu3 %v734_v9  ;;  %1525 = vmatpush.msra.mxu0 %v918_v10  ;;  %v870_v36 = vld [vmem:[#allocation11 + $0x9e8] sm:$0xff]  ;;  %v647_v4 = vld [vmem:[#allocation11 + $0x2f0] sm:$0xff] }
 0x1ba   :  { %1548 = vmatpush.msra.mxu1 %v1022_v11  ;;  %1490 = vmatpush.msrb.mxu2 %v622_v12  ;;  %v974_v38 = vld [vmem:[#allocation11 + $0xd28] sm:$0xff]  ;;  %v751_v5 = vld [vmem:[#allocation11 + $0x630] sm:$0xff] }
 0x1bb   :  { %1513 = vmatpush.msrb.mxu3 %v726_v13  ;;  %1526 = vmatpush.msra.mxu0 %v910_v14  ;;  %v574_v40 = vld [vmem:[#allocation11 + $0xa8] sm:$0xff]  ;;  %v935_v6 = vld [vmem:[#allocation11 + $0xbf0] sm:$0xff] }
 0x1bc   :  { %1549 = vmatpush.msra.mxu1 %v1014_v15  ;;  %1491 = vmatpush.msrb.mxu2 %v614_v16  ;;  %v862_v41 = vld [vmem:[#allocation11 + $0x9a8] sm:$0xff]  ;;  %v1039_v7 = vld [vmem:[#allocation11 + $0xf30] sm:$0xff] }
 0x1bd   :  { %1514 = vmatpush.msrb.mxu3 %v718_v17  ;;  %1527 = vmatpush.msra.mxu0 %v902_v18  ;;  %v966_v42 = vld [vmem:[#allocation11 + $0xce8] sm:$0xff]  ;;  %v639_v8 = vld [vmem:[#allocation11 + $0x2b0] sm:$0xff] }
 0x1be   :  { %1550 = vmatpush.msra.mxu1 %v1006_v19  ;;  %1492 = vmatpush.msrb.mxu2 %v606_v21  ;;  %v566_v44 = vld [vmem:[#allocation11 + $0x68] sm:$0xff]  ;;  %v743_v9 = vld [vmem:[#allocation11 + $0x5f0] sm:$0xff] }
 0x1bf   :  { %1515 = vmatpush.msrb.mxu3 %v710_v22  ;;  %1528 = vmatpush.msra.mxu0 %v894_v23  ;;  %v854_v45 = vld [vmem:[#allocation11 + $0x968] sm:$0xff]  ;;  %v927_v10 = vld [vmem:[#allocation11 + $0xbb0] sm:$0xff] }
 0x1c0   :  { %1551 = vmatpush.msra.mxu1 %v998_v24  ;;  %1493 = vmatpush.msrb.mxu2 %v598_v25  ;;  %v958_v46 = vld [vmem:[#allocation11 + $0xca8] sm:$0xff]  ;;  %v1031_v11 = vld [vmem:[#allocation11 + $0xef0] sm:$0xff] }
 0x1c1   :  { %1516 = vmatpush.msrb.mxu3 %v702_v26  ;;  %1529 = vmatpush.msra.mxu0 %v886_v27  ;;  %v558_v48 = vld [vmem:[#allocation11 + $0x28] sm:$0xff]  ;;  %v631_v12 = vld [vmem:[#allocation11 + $0x270] sm:$0xff] }
 0x1c2   :  { %1552 = vmatpush.msra.mxu1 %v990_v28  ;;  %1494 = vmatpush.msrb.mxu2 %v590_v29  ;;  %v846_v49 = vld [vmem:[#allocation11 + $0x928] sm:$0xff]  ;;  %v735_v13 = vld [vmem:[#allocation11 + $0x5b0] sm:$0xff] }
 0x1c3   :  { %1517 = vmatpush.msrb.mxu3 %v694_v30  ;;  %1530 = vmatpush.msra.mxu0 %v878_v32  ;;  %v950_v51 = vld [vmem:[#allocation11 + $0xc68] sm:$0xff]  ;;  %v919_v14 = vld [vmem:[#allocation11 + $0xb70] sm:$0xff] }
 0x1c4   :  { %1553 = vmatpush.msra.mxu1 %v982_v33  ;;  %1495 = vmatpush.msrb.mxu2 %v582_v34  ;;  %v838_v54 = vld [vmem:[#allocation11 + $0x8e8] sm:$0xff]  ;;  %v1023_v15 = vld [vmem:[#allocation11 + $0xeb0] sm:$0xff] }
 0x1c5   :  { %1518 = vmatpush.msrb.mxu3 %v686_v35  ;;  %1531 = vmatpush.msra.mxu0 %v870_v36  ;;  %v942_v55 = vld [vmem:[#allocation11 + $0xc28] sm:$0xff]  ;;  %v623_v16 = vld [vmem:[#allocation11 + $0x230] sm:$0xff] }
 0x1c6   :  { %1554 = vmatpush.msra.mxu1 %v974_v38  ;;  %1519 = vmatmul.f32.vlgmr.msrb.gmra.mxu3 %v7653_v20  ;;  %v830_v59 = vld [vmem:[#allocation11 + $0x8a8] sm:$0xff]  ;;  %v727_v17 = vld [vmem:[#allocation11 + $0x570] sm:$0xff] }
 0x1c7   :  { %1583 = vmatpush.msra.mxu3 %v807_v39  ;;  %1496 = vmatpush.msrb.mxu2 %v574_v40  ;;  %v822_v63 = vld [vmem:[#allocation11 + $0x868] sm:$0xff]  ;;  %v911_v18 = vld [vmem:[#allocation11 + $0xb30] sm:$0xff] }
 0x1c8   :  { %1532 = vmatpush.msra.mxu0 %v862_v41  ;;  %1555 = vmatpush.msra.mxu1 %v966_v42  ;;  %v814_v3 = vld [vmem:[#allocation11 + $0x828] sm:$0xff]  ;;  %v1015_v19 = vld [vmem:[#allocation11 + $0xe70] sm:$0xff] }
 0x1c9   :  { %1584 = vmatpush.msra.mxu3 %v799_v43  ;;  %1497 = vmatpush.msrb.mxu2 %v566_v44  ;;  %v615_v21 = vld [vmem:[#allocation11 + $0x1f0] sm:$0xff]  ;;  %v808_v43 = vld [vmem:[#allocation11 + $0x7f8] sm:$0xff] }
 0x1ca   :  { %1533 = vmatpush.msra.mxu0 %v854_v45  ;;  %1556 = vmatpush.msra.mxu1 %v958_v46  ;;  %v719_v22 = vld [vmem:[#allocation11 + $0x530] sm:$0xff] }
 0x1cb   :  { %1585 = vmatpush.msra.mxu3 %v791_v47  ;;  %1498 = vmatpush.msrb.mxu2 %v558_v48  ;;  %v903_v23 = vld [vmem:[#allocation11 + $0xaf0] sm:$0xff]  ;;  %v800_v47 = vld [vmem:[#allocation11 + $0x7b8] sm:$0xff] }
 0x1cc   :  { %1534 = vmatpush.msra.mxu0 %v846_v49  ;;  %1557 = vmatpush.msra.mxu1 %v950_v51  ;;  %v1007_v24 = vld [vmem:[#allocation11 + $0xe30] sm:$0xff] }
 0x1cd   :  { %1499 = vmatmul.f32.vlgmr.msrb.gmra.mxu2 %v7656_v31  ;;  %1586 = vmatpush.msra.mxu3 %v783_v52  ;;  %v607_v25 = vld [vmem:[#allocation11 + $0x1b0] sm:$0xff]  ;;  %v792_v52 = vld [vmem:[#allocation11 + $0x778] sm:$0xff] }
 0x1ce   :  { %1563 = vmatpush.msra.mxu2 %v679_v53  ;;  %1535 = vmatpush.msra.mxu0 %v838_v54  ;;  %v711_v26 = vld [vmem:[#allocation11 + $0x4f0] sm:$0xff] }
 0x1cf   :  { %1558 = vmatpush.msra.mxu1 %v942_v55  ;;  %1587 = vmatpush.msra.mxu3 %v775_v56  ;;  %v895_v27 = vld [vmem:[#allocation11 + $0xab0] sm:$0xff]  ;;  %v784_v56 = vld [vmem:[#allocation11 + $0x738] sm:$0xff] }
 0x1d0   :  { %1559 = vmatmul.f32.vlgmr.msra.gmra.mxu1 %v7659_v37  ;;  %1564 = vmatpush.msra.mxu2 %v671_v57  ;;  %v999_v28 = vld [vmem:[#allocation11 + $0xdf0] sm:$0xff]  ;;  %v680_v57 = vld [vmem:[#allocation11 + $0x3f8] sm:$0xff] }
 0x1d1   :  { %1623 = vmatpush.msrb.mxu1 %v1063_v58  ;;  %1536 = vmatpush.msra.mxu0 %v830_v59  ;;  %v599_v29 = vld [vmem:[#allocation11 + $0x170] sm:$0xff] }
 0x1d2   :  { %1565 = vmatpush.msra.mxu2 %v663_v60  ;;  %1588 = vmatpush.msra.mxu3 %v767_v61  ;;  %v703_v30 = vld [vmem:[#allocation11 + $0x4b0] sm:$0xff]  ;;  %v776_v60 = vld [vmem:[#allocation11 + $0x6f8] sm:$0xff] }
 0x1d3   :  { %1624 = vmatpush.msrb.mxu1 %v1055_v62  ;;  %1537 = vmatpush.msra.mxu0 %v822_v63  ;;  %v887_v32 = vld [vmem:[#allocation11 + $0xa70] sm:$0xff]  ;;  %v672_v61 = vld [vmem:[#allocation11 + $0x3b8] sm:$0xff] }
 0x1d4   :  { %1566 = vmatpush.msra.mxu2 %v655_v0  ;;  %1589 = vmatpush.msra.mxu3 %v759_v1  ;;  %v991_v33 = vld [vmem:[#allocation11 + $0xdb0] sm:$0xff]  ;;  %v1064_v62 = vld [vmem:[#allocation11 + $0xff8] sm:$0xff] }
 0x1d5   :  { %1625 = vmatpush.msrb.mxu1 %v1047_v2  ;;  %1538 = vmatpush.msra.mxu0 %v814_v3  ;;  %v591_v34 = vld [vmem:[#allocation11 + $0x130] sm:$0xff]  ;;  %v664_v0 = vld [vmem:[#allocation11 + $0x378] sm:$0xff] }
 0x1d6   :  { %1539 = vmatmul.f32.vlgmr.msra.gmra.mxu0 %v7663_v50  ;;  %1567 = vmatpush.msra.mxu2 %v647_v4  ;;  %v695_v35 = vld [vmem:[#allocation11 + $0x470] sm:$0xff]  ;;  %v768_v1 = vld [vmem:[#allocation11 + $0x6b8] sm:$0xff] }
 0x1d7   :  { %1590 = vmatpush.msra.mxu3 %v751_v5  ;;  %1603 = vmatpush.msrb.mxu0 %v935_v6  ;;  %v879_v36 = vld [vmem:[#allocation11 + $0xa30] sm:$0xff]  ;;  %v1056_v2 = vld [vmem:[#allocation11 + $0xfb8] sm:$0xff] }
 0x1d8   :  { %1626 = vmatpush.msrb.mxu1 %v1039_v7  ;;  %1568 = vmatpush.msra.mxu2 %v639_v8  ;;  %v983_v38 = vld [vmem:[#allocation11 + $0xd70] sm:$0xff]  ;;  %v656_v4 = vld [vmem:[#allocation11 + $0x338] sm:$0xff] }
 0x1d9   :  { %1591 = vmatpush.msra.mxu3 %v743_v9  ;;  %1604 = vmatpush.msrb.mxu0 %v927_v10  ;;  %v583_v39 = vld [vmem:[#allocation11 + $0xf0] sm:$0xff]  ;;  %v760_v5 = vld [vmem:[#allocation11 + $0x678] sm:$0xff] }
 0x1da   :  { %1627 = vmatpush.msrb.mxu1 %v1031_v11  ;;  %1569 = vmatpush.msra.mxu2 %v631_v12  ;;  %v687_v40 = vld [vmem:[#allocation11 + $0x430] sm:$0xff]  ;;  %v1048_v6 = vld [vmem:[#allocation11 + $0xf78] sm:$0xff] }
 0x1db   :  { %1592 = vmatpush.msra.mxu3 %v735_v13  ;;  %1605 = vmatpush.msrb.mxu0 %v919_v14  ;;  %v871_v41 = vld [vmem:[#allocation11 + $0x9f0] sm:$0xff]  ;;  %v648_v8 = vld [vmem:[#allocation11 + $0x2f8] sm:$0xff] }
 0x1dc   :  { %1628 = vmatpush.msrb.mxu1 %v1023_v15  ;;  %1570 = vmatpush.msra.mxu2 %v623_v16  ;;  %v975_v42 = vld [vmem:[#allocation11 + $0xd30] sm:$0xff]  ;;  %v752_v9 = vld [vmem:[#allocation11 + $0x638] sm:$0xff] }
 0x1dd   :  { %1593 = vmatpush.msra.mxu3 %v727_v17  ;;  %1606 = vmatpush.msrb.mxu0 %v911_v18  ;;  %v575_v44 = vld [vmem:[#allocation11 + $0xb0] sm:$0xff]  ;;  %v936_v10 = vld [vmem:[#allocation11 + $0xbf8] sm:$0xff] }
 0x1de   :  { %1629 = vmatpush.msrb.mxu1 %v1015_v19  ;;  %1571 = vmatpush.msra.mxu2 %v615_v21  ;;  %v863_v45 = vld [vmem:[#allocation11 + $0x9b0] sm:$0xff]  ;;  %v1040_v11 = vld [vmem:[#allocation11 + $0xf38] sm:$0xff] }
 0x1df   :  { %1594 = vmatpush.msra.mxu3 %v719_v22  ;;  %1607 = vmatpush.msrb.mxu0 %v903_v23  ;;  %v967_v46 = vld [vmem:[#allocation11 + $0xcf0] sm:$0xff]  ;;  %v640_v12 = vld [vmem:[#allocation11 + $0x2b8] sm:$0xff] }
 0x1e0   :  { %1630 = vmatpush.msrb.mxu1 %v1007_v24  ;;  %1572 = vmatpush.msra.mxu2 %v607_v25  ;;  %v567_v48 = vld [vmem:[#allocation11 + $0x70] sm:$0xff]  ;;  %v744_v13 = vld [vmem:[#allocation11 + $0x5f8] sm:$0xff] }
 0x1e1   :  { %1595 = vmatpush.msra.mxu3 %v711_v26  ;;  %1608 = vmatpush.msrb.mxu0 %v895_v27  ;;  %v855_v49 = vld [vmem:[#allocation11 + $0x970] sm:$0xff]  ;;  %v928_v14 = vld [vmem:[#allocation11 + $0xbb8] sm:$0xff] }
 0x1e2   :  { %1631 = vmatpush.msrb.mxu1 %v999_v28  ;;  %1573 = vmatpush.msra.mxu2 %v599_v29  ;;  %v959_v51 = vld [vmem:[#allocation11 + $0xcb0] sm:$0xff]  ;;  %v1032_v15 = vld [vmem:[#allocation11 + $0xef8] sm:$0xff] }
 0x1e3   :  { %1596 = vmatpush.msra.mxu3 %v703_v30  ;;  %1609 = vmatpush.msrb.mxu0 %v887_v32  ;;  %v559_v53 = vld [vmem:[#allocation11 + $0x30] sm:$0xff]  ;;  %v632_v16 = vld [vmem:[#allocation11 + $0x278] sm:$0xff] }
 0x1e4   :  { %1632 = vmatpush.msrb.mxu1 %v991_v33  ;;  %1574 = vmatpush.msra.mxu2 %v591_v34  ;;  %v847_v54 = vld [vmem:[#allocation11 + $0x930] sm:$0xff]  ;;  %v736_v17 = vld [vmem:[#allocation11 + $0x5b8] sm:$0xff] }
 0x1e5   :  { %1597 = vmatpush.msra.mxu3 %v695_v35  ;;  %1610 = vmatpush.msrb.mxu0 %v879_v36  ;;  %v951_v55 = vld [vmem:[#allocation11 + $0xc70] sm:$0xff]  ;;  %v920_v18 = vld [vmem:[#allocation11 + $0xb78] sm:$0xff] }
 0x1e6   :  { %1633 = vmatpush.msrb.mxu1 %v983_v38  ;;  %1575 = vmatpush.msra.mxu2 %v583_v39  ;;  %v839_v58 = vld [vmem:[#allocation11 + $0x8f0] sm:$0xff]  ;;  %v1024_v19 = vld [vmem:[#allocation11 + $0xeb8] sm:$0xff] }
 0x1e7   :  { %1598 = vmatpush.msra.mxu3 %v687_v40  ;;  %1611 = vmatpush.msrb.mxu0 %v871_v41  ;;  %v943_v59 = vld [vmem:[#allocation11 + $0xc30] sm:$0xff]  ;;  %v624_v21 = vld [vmem:[#allocation11 + $0x238] sm:$0xff] }
 0x1e8   :  { %1634 = vmatpush.msrb.mxu1 %v975_v42  ;;  %1599 = vmatmul.f32.vlgmr.msra.gmra.mxu3 %v7653_v20  ;;  %v831_v63 = vld [vmem:[#allocation11 + $0x8b0] sm:$0xff]  ;;  %v728_v22 = vld [vmem:[#allocation11 + $0x578] sm:$0xff] }
 0x1e9   :  { %1663 = vmatpush.msrb.mxu3 %v808_v43  ;;  %1576 = vmatpush.msra.mxu2 %v575_v44  ;;  %v823_v3 = vld [vmem:[#allocation11 + $0x870] sm:$0xff]  ;;  %v912_v23 = vld [vmem:[#allocation11 + $0xb38] sm:$0xff] }
 0x1ea   :  { %1612 = vmatpush.msrb.mxu0 %v863_v45  ;;  %1635 = vmatpush.msrb.mxu1 %v967_v46  ;;  %v815_v7 = vld [vmem:[#allocation11 + $0x830] sm:$0xff]  ;;  %v1016_v24 = vld [vmem:[#allocation11 + $0xe78] sm:$0xff]  ;;  %v7689_v46 = vpop.f32.mrf.mxu2 }
 0x1eb   :  { %1664 = vmatpush.msrb.mxu3 %v800_v47  ;;  %1577 = vmatpush.msra.mxu2 %v567_v48  ;;  %v616_v25 = vld [vmem:[#allocation11 + $0x1f8] sm:$0xff]  ;;  %v2227_v48 = vld [vmem:[#allocation14 + $0xf80] sm:$0xff] }
 0x1ec   :  { %1613 = vmatpush.msrb.mxu0 %v855_v49  ;;  %1636 = vmatpush.msrb.mxu1 %v959_v51  ;;  %v720_v26 = vld [vmem:[#allocation11 + $0x538] sm:$0xff] }
 0x1ed   :  { %1665 = vmatpush.msrb.mxu3 %v792_v52  ;;  %1578 = vmatpush.msra.mxu2 %v559_v53  ;;  %v904_v27 = vld [vmem:[#allocation11 + $0xaf8] sm:$0xff]  ;;  %v2211_v53 = vld [vmem:[#allocation14 + $0xf00] sm:$0xff] }
 0x1ee   :  { %1614 = vmatpush.msrb.mxu0 %v847_v54  ;;  %1637 = vmatpush.msrb.mxu1 %v951_v55  ;;  %v1008_v28 = vld [vmem:[#allocation11 + $0xe38] sm:$0xff] }
 0x1ef   :  { %1579 = vmatmul.f32.vlgmr.msra.gmra.mxu2 %v7656_v31  ;;  %1666 = vmatpush.msrb.mxu3 %v784_v56  ;;  %v608_v29 = vld [vmem:[#allocation11 + $0x1b8] sm:$0xff] }
 0x1f0   :  { %1643 = vmatpush.msrb.mxu2 %v680_v57  ;;  %1615 = vmatpush.msrb.mxu0 %v839_v58  ;;  %v712_v30 = vld [vmem:[#allocation11 + $0x4f8] sm:$0xff]  ;;  %v2195_v57 = vld [vmem:[#allocation14 + $0xe80] sm:$0xff] }
 0x1f1   :  { %1638 = vmatpush.msrb.mxu1 %v943_v59  ;;  %1667 = vmatpush.msrb.mxu3 %v776_v60  ;;  %v896_v32 = vld [vmem:[#allocation11 + $0xab8] sm:$0xff]  ;;  %v7692_v59 = vpop.f32.mrf.mxu3 }
 0x1f2   :  { %1639 = vmatmul.f32.vlgmr.msrb.gmra.mxu1 %v7659_v37  ;;  %1644 = vmatpush.msrb.mxu2 %v672_v61  ;;  %v1000_v33 = vld [vmem:[#allocation11 + $0xdf8] sm:$0xff] }
 0x1f3   :  { %1703 = vmatpush.msra.mxu1 %v1064_v62  ;;  %1616 = vmatpush.msrb.mxu0 %v831_v63  ;;  %v600_v34 = vld [vmem:[#allocation11 + $0x178] sm:$0xff]  ;;  %v2179_v62 = vld [vmem:[#allocation14 + $0xe00] sm:$0xff] }
 0x1f4   :  { %1645 = vmatpush.msrb.mxu2 %v664_v0  ;;  %1668 = vmatpush.msrb.mxu3 %v768_v1  ;;  %v704_v35 = vld [vmem:[#allocation11 + $0x4b8] sm:$0xff]  ;;  %v2163_v1 = vld [vmem:[#allocation14 + $0xd80] sm:$0xff] }
 0x1f5   :  { %1704 = vmatpush.msra.mxu1 %v1056_v2  ;;  %1617 = vmatpush.msrb.mxu0 %v823_v3  ;;  %v888_v36 = vld [vmem:[#allocation11 + $0xa78] sm:$0xff]  ;;  %v7694_v2 = vpop.f32.mrf.mxu0  ;;  %v1180_v3 = vpop.f32.mrf.mxu2 }
 0x1f6   :  { %1646 = vmatpush.msrb.mxu2 %v656_v4  ;;  %1669 = vmatpush.msrb.mxu3 %v760_v5  ;;  %v992_v38 = vld [vmem:[#allocation11 + $0xdb8] sm:$0xff]  ;;  %v1955_v4 = vld [vmem:[#allocation14 + $0x700] sm:$0xff] }
 0x1f7   :  { %1705 = vmatpush.msra.mxu1 %v1048_v6  ;;  %1618 = vmatpush.msrb.mxu0 %v815_v7  ;;  %v592_v39 = vld [vmem:[#allocation11 + $0x138] sm:$0xff]  ;;  %v2739_v5 = vld [vmem:[#allocation14 + $0x1f80] sm:$0xff] }
 0x1f8   :  { %1619 = vmatmul.f32.vlgmr.msrb.gmra.mxu0 %v7663_v50  ;;  %1647 = vmatpush.msrb.mxu2 %v648_v8  ;;  %v696_v40 = vld [vmem:[#allocation11 + $0x478] sm:$0xff]  ;;  %v1939_v7 = vld [vmem:[#allocation14 + $0x680] sm:$0xff] }
 0x1f9   :  { %1670 = vmatpush.msrb.mxu3 %v752_v9  ;;  %1683 = vmatpush.msra.mxu0 %v936_v10  ;;  %v880_v41 = vld [vmem:[#allocation11 + $0xa38] sm:$0xff]  ;;  %v2147_v8 = vld [vmem:[#allocation14 + $0xd00] sm:$0xff] }
 0x1fa   :  { %1706 = vmatpush.msra.mxu1 %v1040_v11  ;;  %1648 = vmatpush.msrb.mxu2 %v640_v12  ;;  %v984_v42 = vld [vmem:[#allocation11 + $0xd78] sm:$0xff]  ;;  %v2723_v9 = vld [vmem:[#allocation14 + $0x1f00] sm:$0xff]  ;;  %v7698_v11 = vpop.f32.mrf.mxu1  ;;  %v7700_v12 = vld [vmem:[#allocation12] sm:$0xff] }
 0x1fb   :  { %1671 = vmatpush.msrb.mxu3 %v744_v13  ;;  %1684 = vmatpush.msra.mxu0 %v928_v14  ;;  %v584_v43 = vld [vmem:[#allocation11 + $0xf8] sm:$0xff]  ;;  %v2131_v13 = vld [vmem:[#allocation14 + $0xc80] sm:$0xff]  ;;  %v1068_v14 = vperm.slane %v7700_v12, 1 }
 0x1fc   :  { %1707 = vmatpush.msra.mxu1 %v1032_v15  ;;  %1649 = vmatpush.msrb.mxu2 %v632_v16  ;;  %v688_v44 = vld [vmem:[#allocation11 + $0x438] sm:$0xff]  ;;  %v2707_v15 = vld [vmem:[#allocation14 + $0x1e80] sm:$0xff] }
 0x1fd   :  { %1672 = vmatpush.msrb.mxu3 %v736_v17  ;;  %1685 = vmatpush.msra.mxu0 %v920_v18  ;;  %v872_v45 = vld [vmem:[#allocation11 + $0x9f8] sm:$0xff]  ;;  %v1200_v17 = vpop.f32.mrf.mxu3  ;;  %v2115_v18 = vld [vmem:[#allocation14 + $0xc00] sm:$0xff] }
 0x1fe   :  { %1708 = vmatpush.msra.mxu1 %v1024_v19  ;;  %1650 = vmatpush.msrb.mxu2 %v624_v21  ;;  %v976_v47 = vld [vmem:[#allocation11 + $0xd38] sm:$0xff]  ;;  %v2483_v19 = vld [vmem:[#allocation14 + $0x1780] sm:$0xff]  ;;  %v7703_v21 = vpop.f32.mrf.mxu2 }
 0x1ff   :  { %1673 = vmatpush.msrb.mxu3 %v728_v22  ;;  %1686 = vmatpush.msra.mxu0 %v912_v23  ;;  %v576_v49 = vld [vmem:[#allocation11 + $0xb8] sm:$0xff]  ;;  %v2691_v22 = vld [vmem:[#allocation14 + $0x1e00] sm:$0xff] }
 0x200   :  { %1709 = vmatpush.msra.mxu1 %v1016_v24  ;;  %1651 = vmatpush.msrb.mxu2 %v616_v25  ;;  %v864_v51 = vld [vmem:[#allocation11 + $0x9b8] sm:$0xff]  ;;  %v1891_v23 = vld [vmem:[#allocation14 + $0x500] sm:$0xff]  ;;  %v1181_v24 = vadd.f32 %v1180_v3, %v1068_v14 }
 0x201   :  { %1674 = vmatpush.msrb.mxu3 %v720_v26  ;;  %1687 = vmatpush.msra.mxu0 %v904_v27  ;;  %v968_v52 = vld [vmem:[#allocation11 + $0xcf8] sm:$0xff]  ;;  %v2099_v25 = vld [vmem:[#allocation14 + $0xb80] sm:$0xff]  ;;  %v1220_v27 = vpop.f32.mrf.mxu0 }
 0x202   :  { %1710 = vmatpush.msra.mxu1 %v1008_v28  ;;  %1652 = vmatpush.msrb.mxu2 %v608_v29  ;;  %v568_v54 = vld [vmem:[#allocation11 + $0x78] sm:$0xff]  ;;  %v2467_v26 = vld [vmem:[#allocation14 + $0x1700] sm:$0xff] }
 0x203   :  { %1675 = vmatpush.msrb.mxu3 %v712_v30  ;;  %1688 = vmatpush.msra.mxu0 %v896_v32  ;;  %v856_v55 = vld [vmem:[#allocation11 + $0x978] sm:$0xff]  ;;  %v2675_v28 = vld [vmem:[#allocation14 + $0x1d80] sm:$0xff] }
 0x204   :  { %1711 = vmatpush.msra.mxu1 %v1000_v33  ;;  %1653 = vmatpush.msrb.mxu2 %v600_v34  ;;  %v960_v56 = vld [vmem:[#allocation11 + $0xcb8] sm:$0xff]  ;;  %v1875_v29 = vld [vmem:[#allocation14 + $0x480] sm:$0xff]  ;;  %v1067_v33 = vperm.slane %v7700_v12, 0 }
 0x205   :  { %1676 = vmatpush.msrb.mxu3 %v704_v35  ;;  %1689 = vmatpush.msra.mxu0 %v888_v36  ;;  %v560_v58 = vld [vmem:[#allocation11 + $0x38] sm:$0xff]  ;;  %v2083_v30 = vld [vmem:[#allocation14 + $0xb00] sm:$0xff]  ;;  %v1201_v36 = vadd.f32 %v1200_v17, %v1181_v24 }
 0x206   :  { %1712 = vmatpush.msra.mxu1 %v992_v38  ;;  %1654 = vmatpush.msrb.mxu2 %v592_v39  ;;  %v848_v60 = vld [vmem:[#allocation11 + $0x938] sm:$0xff]  ;;  %v2451_v32 = vld [vmem:[#allocation14 + $0x1680] sm:$0xff]  ;;  %v1240_v39 = vpop.f32.mrf.mxu1 }
 0x207   :  { %1677 = vmatpush.msrb.mxu3 %v696_v40  ;;  %1690 = vmatpush.msra.mxu0 %v880_v41  ;;  %v952_v61 = vld [vmem:[#allocation11 + $0xc78] sm:$0xff]  ;;  %v2659_v34 = vld [vmem:[#allocation14 + $0x1d00] sm:$0xff]  ;;  %v7707_v40 = vpop.f32.mrf.mxu3 }
 0x208   :  { %1713 = vmatpush.msra.mxu1 %v984_v42  ;;  %1655 = vmatpush.msrb.mxu2 %v584_v43  ;;  %v840_v63 = vld [vmem:[#allocation11 + $0x8f8] sm:$0xff]  ;;  %v1859_v35 = vld [vmem:[#allocation14 + $0x400] sm:$0xff]  ;;  %v1070_v43 = vperm.slane %v7700_v12, 3 }
 0x209   :  { %1678 = vmatpush.msrb.mxu3 %v688_v44  ;;  %1691 = vmatpush.msra.mxu0 %v872_v45  ;;  %v944_v0 = vld [vmem:[#allocation11 + $0xc38] sm:$0xff]  ;;  %v2435_v38 = vld [vmem:[#allocation14 + $0x1600] sm:$0xff] }
 0x20a   :  { %1714 = vmatpush.msra.mxu1 %v976_v47  ;;  %1679 = vmatmul.f32.vlgmr.msrb.gmra.mxu3 %v7653_v20  ;;  %v1971_v20 = vld [vmem:[#allocation14 + $0x780] sm:$0xff]  ;;  %v832_v6 = vld [vmem:[#allocation11 + $0x8b8] sm:$0xff]  ;;  %v1101_v47 = vadd.f32 %v7689_v46, %v1067_v33 }
 0x20b   :  { %3835 = vmatpush.msra.mxu3 %v2227_v48  ;;  %1656 = vmatpush.msrb.mxu2 %v576_v49  ;;  %v824_v10 = vld [vmem:[#allocation11 + $0x878] sm:$0xff]  ;;  %v2643_v41 = vld [vmem:[#allocation14 + $0x1c80] sm:$0xff] }
 0x20c   :  { %1692 = vmatpush.msra.mxu0 %v864_v51  ;;  %1715 = vmatpush.msra.mxu1 %v968_v52  ;;  %v816_v16 = vld [vmem:[#allocation11 + $0x838] sm:$0xff]  ;;  %v1843_v42 = vld [vmem:[#allocation14 + $0x380] sm:$0xff]  ;;  %v1340_v48 = vpop.f32.mrf.mxu2  ;;  %v1221_v52 = vadd.f32 %v1220_v27, %v1201_v36 }
 0x20d   :  { %3836 = vmatpush.msra.mxu3 %v2211_v53  ;;  %1657 = vmatpush.msrb.mxu2 %v568_v54  ;;  %v2051_v44 = vld [vmem:[#allocation14 + $0xa00] sm:$0xff] }
 0x20e   :  { %1693 = vmatpush.msra.mxu0 %v856_v55  ;;  %1716 = vmatpush.msra.mxu1 %v960_v56  ;;  %v2419_v45 = vld [vmem:[#allocation14 + $0x1580] sm:$0xff]  ;;  %v7711_v55 = vpop.f32.mrf.mxu0 }
 0x20f   :  { %3837 = vmatpush.msra.mxu3 %v2195_v57  ;;  %1658 = vmatpush.msrb.mxu2 %v560_v58  ;;  %v2627_v49 = vld [vmem:[#allocation14 + $0x1c00] sm:$0xff]  ;;  %v1341_v58 = vadd.f32 %v1340_v48, %v1070_v43 }
 0x210   :  { %1694 = vmatpush.msra.mxu0 %v848_v60  ;;  %1717 = vmatpush.msra.mxu1 %v952_v61  ;;  %v1827_v51 = vld [vmem:[#allocation14 + $0x300] sm:$0xff]  ;;  %v1121_v61 = vadd.f32 %v7692_v59, %v1101_v47 }
 0x211   :  { %1659 = vmatmul.f32.vlgmr.msrb.gmra.mxu2 %v7656_v31  ;;  %3838 = vmatpush.msra.mxu3 %v2179_v62  ;;  %v1923_v31 = vld [vmem:[#allocation14 + $0x600] sm:$0xff] }
 0x212   :  { %3815 = vmatpush.msra.mxu2 %v1971_v20  ;;  %1695 = vmatpush.msra.mxu0 %v840_v63  ;;  %v2035_v53 = vld [vmem:[#allocation14 + $0x980] sm:$0xff]  ;;  %v1241_v63 = vadd.f32 %v1240_v39, %v1221_v52 }
 0x213   :  { %1718 = vmatpush.msra.mxu1 %v944_v0  ;;  %3839 = vmatpush.msra.mxu3 %v2163_v1  ;;  %v2403_v54 = vld [vmem:[#allocation14 + $0x1500] sm:$0xff]  ;;  %v1069_v0 = vperm.slane %v7700_v12, 2 }
 0x214   :  { %1719 = vmatmul.f32.vlgmr.msra.gmra.mxu1 %v7659_v37  ;;  %3816 = vmatpush.msra.mxu2 %v1955_v4  ;;  %v1907_v37 = vld [vmem:[#allocation14 + $0x580] sm:$0xff]  ;;  %v7715_v4 = vpop.f32.mrf.mxu1 }
 0x215   :  { %3875 = vmatpush.msrb.mxu1 %v2739_v5  ;;  %1696 = vmatpush.msra.mxu0 %v832_v6  ;;  %v2611_v56 = vld [vmem:[#allocation14 + $0x1b80] sm:$0xff]  ;;  %v1360_v5 = vpop.f32.mrf.mxu3  ;;  %v1261_v14 = vadd.f32 %v7703_v21, %v1069_v0 }
 0x216   :  { %3817 = vmatpush.msra.mxu2 %v1939_v7  ;;  %3840 = vmatpush.msra.mxu3 %v2147_v8  ;;  %v1811_v57 = vld [vmem:[#allocation14 + $0x280] sm:$0xff]  ;;  %v1361_v8 = vadd.f32 %v1360_v5, %v1341_v58  ;;  %v1380_v17 = vpop.f32.mrf.mxu0 }
 0x217   :  { %3876 = vmatpush.msrb.mxu1 %v2723_v9  ;;  %1697 = vmatpush.msra.mxu0 %v824_v10  ;;  %v2019_v46 = vld [vmem:[#allocation14 + $0x900] sm:$0xff]  ;;  %v1141_v10 = vadd.f32 %v7694_v2, %v1121_v61 }
 0x218   :  { %3818 = vmatpush.msra.mxu2 %v1923_v31  ;;  %3841 = vmatpush.msra.mxu3 %v2131_v13  ;;  %v2387_v60 = vld [vmem:[#allocation14 + $0x1480] sm:$0xff]  ;;  %v7718_v13 = vmax.f32 %v1241_v63, 0.0 }
 0x219   :  { %3877 = vmatpush.msrb.mxu1 %v2707_v15  ;;  %1698 = vmatpush.msra.mxu0 %v816_v16  ;;  %v2595_v62 = vld [vmem:[#allocation14 + $0x1b00] sm:$0xff] }
 0x21a   :  { %1699 = vmatmul.f32.vlgmr.msra.gmra.mxu0 %v7663_v50  ;;  %3819 = vmatpush.msra.mxu2 %v1907_v37  ;;  %v2067_v50 = vld [vmem:[#allocation14 + $0xa80] sm:$0xff] }
 0x21b   :  { %3842 = vmatpush.msra.mxu3 %v2115_v18  ;;  %3855 = vmatpush.msrb.mxu0 %v2483_v19  ;;  %v1795_v20 = vld [vmem:[#allocation14 + $0x200] sm:$0xff]  ;;  %v1381_v19 = vadd.f32 %v1380_v17, %v1361_v8 }
 0x21c   :  { %3878 = vmatpush.msrb.mxu1 %v2691_v22  ;;  %3820 = vmatpush.msra.mxu2 %v1891_v23  ;;  %v2003_v1 = vld [vmem:[#allocation14 + $0x880] sm:$0xff]  ;;  %v1161_v23 = vadd.f32 %v7698_v11, %v1141_v10 }
 0x21d   :  { %3843 = vmatpush.msra.mxu3 %v2099_v25  ;;  %3856 = vmatpush.msrb.mxu0 %v2467_v26  ;;  %v2371_v3 = vld [vmem:[#allocation14 + $0x1400] sm:$0xff]  ;;  %v1281_v25 = vadd.f32 %v7707_v40, %v1261_v14 }
 0x21e   :  { %3879 = vmatpush.msrb.mxu1 %v2675_v28  ;;  %3821 = vmatpush.msra.mxu2 %v1875_v29  ;;  %v2579_v6 = vld [vmem:[#allocation14 + $0x1a80] sm:$0xff]  ;;  %v1400_v28 = vpop.f32.mrf.mxu1  ;;  %v7724_v11 = vmax.f32 %v1161_v23, 0.0 }
 0x21f   :  { %3844 = vmatpush.msra.mxu3 %v2083_v30  ;;  %3857 = vmatpush.msrb.mxu0 %v2451_v32  ;;  %v1779_v7 = vld [vmem:[#allocation14 + $0x180] sm:$0xff]  ;;  %v1401_v32 = vadd.f32 %v1400_v28, %v1381_v19  ;;  %v1301_v36 = vadd.f32 %v7711_v55, %v1281_v25  ;;  %v2212_v28 = vld [vmem:[#allocation14 + $0xf08] sm:$0xff] }
 0x220   :  { %3880 = vmatpush.msrb.mxu1 %v2659_v34  ;;  %3822 = vmatpush.msra.mxu2 %v1859_v35  ;;  %v1987_v59 = vld [vmem:[#allocation14 + $0x800] sm:$0xff]  ;;  %8304 = vst [vmem:[#allocation28_spill] sm:$0xff] %v7724_v11 }
 0x221   :  { %3845 = vmatpush.msra.mxu3 %v2067_v50  ;;  %3858 = vmatpush.msrb.mxu0 %v2435_v38  ;;  %v2355_v9 = vld [vmem:[#allocation14 + $0x1380] sm:$0xff]  ;;  %v7728_v40 = vmax.f32 %v1401_v32, 0.0 }
 0x222   :  { %3881 = vmatpush.msrb.mxu1 %v2643_v41  ;;  %3823 = vmatpush.msra.mxu2 %v1843_v42  ;;  %v2563_v31 = vld [vmem:[#allocation14 + $0x1a00] sm:$0xff] }
 0x223   :  { %3846 = vmatpush.msra.mxu3 %v2051_v44  ;;  %3859 = vmatpush.msrb.mxu0 %v2419_v45  ;;  %v3251_v15 = vld [vmem:[#allocation14 + $0x2f80] sm:$0xff]  ;;  %v1321_v44 = vadd.f32 %v7715_v4, %v1301_v36  ;;  %v1072_v36 = vperm.slane %v7700_v12, 5 }
 0x224   :  { %3882 = vmatpush.msrb.mxu1 %v2627_v49  ;;  %3824 = vmatpush.msra.mxu2 %v1827_v51  ;;  %v1763_v16 = vld [vmem:[#allocation14 + $0x100] sm:$0xff] }
 0x225   :  { %3847 = vmatpush.msra.mxu3 %v2035_v53  ;;  %3860 = vmatpush.msrb.mxu0 %v2403_v54  ;;  %v2339_v37 = vld [vmem:[#allocation14 + $0x1300] sm:$0xff]  ;;  %v7732_v53 = vmax.f32 %v1321_v44, 0.0 }
 0x226   :  { %3883 = vmatpush.msrb.mxu1 %v2611_v56  ;;  %3825 = vmatpush.msra.mxu2 %v1811_v57  ;;  %v2547_v18 = vld [vmem:[#allocation14 + $0x1980] sm:$0xff] }
 0x227   :  { %3848 = vmatpush.msra.mxu3 %v2019_v46  ;;  %3861 = vmatpush.msrb.mxu0 %v2387_v60  ;;  %v3235_v2 = vld [vmem:[#allocation14 + $0x2f00] sm:$0xff]  ;;  %8305 = vst [vmem:[#allocation29_spill] sm:$0xff] %v7732_v53  ;;  %v1071_v46 = vperm.slane %v7700_v12, 4  ;;  %v1440_v8 = vpop.f32.mrf.mxu3 }
 0x228   :  { %3884 = vmatpush.msrb.mxu1 %v2595_v62  ;;  %3826 = vmatpush.msra.mxu2 %v1795_v20  ;;  %v1747_v22 = vld [vmem:[#allocation14 + $0x80] sm:$0xff] }
 0x229   :  { %3849 = vmatpush.msra.mxu3 %v2003_v1  ;;  %3862 = vmatpush.msrb.mxu0 %v2371_v3  ;;  %v2323_v21 = vld [vmem:[#allocation14 + $0x1280] sm:$0xff] }
 0x22a   :  { %3885 = vmatpush.msrb.mxu1 %v2579_v6  ;;  %3827 = vmatpush.msra.mxu2 %v1779_v7  ;;  %v2531_v24 = vld [vmem:[#allocation14 + $0x1900] sm:$0xff] }
 0x22b   :  { %3850 = vmatpush.msra.mxu3 %v1987_v59  ;;  %3863 = vmatpush.msrb.mxu0 %v2355_v9  ;;  %v3219_v26 = vld [vmem:[#allocation14 + $0x2e80] sm:$0xff] }
 0x22c   :  { %3886 = vmatpush.msrb.mxu1 %v2563_v31  ;;  %3851 = vmatmul.f32.vlgmr.msra.gmra.mxu3 %v7718_v13  ;;  %v1731_v27 = vld [vmem:[#allocation14] sm:$0xff] }
 0x22d   :  { %3915 = vmatpush.msrb.mxu3 %v3251_v15  ;;  %3828 = vmatpush.msra.mxu2 %v1763_v16  ;;  %v2307_v29 = vld [vmem:[#allocation14 + $0x1200] sm:$0xff] }
 0x22e   :  { %3864 = vmatpush.msrb.mxu0 %v2339_v37  ;;  %3887 = vmatpush.msrb.mxu1 %v2547_v18  ;;  %v2515_v30 = vld [vmem:[#allocation14 + $0x1880] sm:$0xff]  ;;  %v1420_v61 = vpop.f32.mrf.mxu2 }
 0x22f   :  { %3916 = vmatpush.msrb.mxu3 %v3235_v2  ;;  %3829 = vmatpush.msra.mxu2 %v1747_v22  ;;  %v3203_v33 = vld [vmem:[#allocation14 + $0x2e00] sm:$0xff]  ;;  %v1421_v3 = vadd.f32 %v1420_v61, %v1071_v46  ;;  %v2132_v61 = vld [vmem:[#allocation14 + $0xc88] sm:$0xff] }
 0x230   :  { %3865 = vmatpush.msrb.mxu0 %v2323_v21  ;;  %3888 = vmatpush.msrb.mxu1 %v2531_v24  ;;  %v2995_v34 = vld [vmem:[#allocation14 + $0x2780] sm:$0xff]  ;;  %v2228_v24 = vld [vmem:[#allocation14 + $0xf88] sm:$0xff] }
 0x231   :  { %3917 = vmatpush.msrb.mxu3 %v3219_v26  ;;  %3830 = vmatpush.msra.mxu2 %v1731_v27  ;;  %v2291_v35 = vld [vmem:[#allocation14 + $0x1180] sm:$0xff]  ;;  %v1441_v31 = vadd.f32 %v1440_v8, %v1421_v3  ;;  %v1460_v18 = vpop.f32.mrf.mxu0  ;;  %v2116_v3 = vld [vmem:[#allocation14 + $0xc08] sm:$0xff] }
 0x232   :  { %3866 = vmatpush.msrb.mxu0 %v2307_v29  ;;  %3889 = vmatpush.msrb.mxu1 %v2515_v30  ;;  %v2499_v50 = vld [vmem:[#allocation14 + $0x1800] sm:$0xff]  ;;  %v1480_v29 = vpop.f32.mrf.mxu1  ;;  %v2100_v8 = vld [vmem:[#allocation14 + $0xb88] sm:$0xff] }
 0x233   :  { %v3187_v38 = vld [vmem:[#allocation14 + $0x2d80] sm:$0xff]  ;;  %3831 = vmatmul.f32.vlgmr.msra.gmra.mxu2 %v7724_v11  ;;  %3918 = vmatpush.msrb.mxu3 %v3203_v33  ;;  %v1461_v23 = vadd.f32 %v1460_v18, %v1441_v31  ;;  %v2084_v31 = vld [vmem:[#allocation14 + $0xb08] sm:$0xff] }
 0x234   :  { %v2979_v39 = vld [vmem:[#allocation14 + $0x2700] sm:$0xff]  ;;  %3895 = vmatpush.msrb.mxu2 %v2995_v34  ;;  %3867 = vmatpush.msrb.mxu0 %v2291_v35  ;;  %v2196_v35 = vld [vmem:[#allocation14 + $0xe88] sm:$0xff] }
 0x235   :  { %v2275_v41 = vld [vmem:[#allocation14 + $0x1100] sm:$0xff]  ;;  %3890 = vmatpush.msrb.mxu1 %v2499_v50  ;;  %3919 = vmatpush.msrb.mxu3 %v3187_v38  ;;  %v1481_v33 = vadd.f32 %v1480_v29, %v1461_v23  ;;  %v2404_v29 = vld [vmem:[#allocation14 + $0x1508] sm:$0xff] }
 0x236   :  { %v3171_v42 = vld [vmem:[#allocation14 + $0x2d00] sm:$0xff]  ;;  %3891 = vmatmul.f32.vlgmr.msrb.gmra.mxu1 %v7728_v40  ;;  %3896 = vmatpush.msrb.mxu2 %v2979_v39 }
 0x237   :  { %v2963_v43 = vld [vmem:[#allocation14 + $0x2680] sm:$0xff]  ;;  %3868 = vmatpush.msrb.mxu0 %v2275_v41  ;;  %3920 = vmatpush.msrb.mxu3 %v3171_v42  ;;  %v2180_v41 = vld [vmem:[#allocation14 + $0xe08] sm:$0xff]  ;;  %v7737_v44 = vmax.f32 %v1481_v33, 0.0 }
 0x238   :  { %v2259_v45 = vld [vmem:[#allocation14 + $0x1080] sm:$0xff]  ;;  %3897 = vmatpush.msrb.mxu2 %v2963_v43  ;;  %v2004_v33 = vld [vmem:[#allocation14 + $0x888] sm:$0xff] }
 0x239   :  { %v3155_v47 = vld [vmem:[#allocation14 + $0x2c80] sm:$0xff]  ;;  %3869 = vmatpush.msrb.mxu0 %v2259_v45  ;;  %8306 = vst [vmem:[#allocation30_spill] sm:$0xff] %v7737_v44  ;;  %v1972_v45 = vld [vmem:[#allocation14 + $0x788] sm:$0xff] }
 0x23a   :  { %v2947_v48 = vld [vmem:[#allocation14 + $0x2600] sm:$0xff]  ;;  %3921 = vmatpush.msrb.mxu3 %v3155_v47  ;;  %v2164_v47 = vld [vmem:[#allocation14 + $0xd88] sm:$0xff] }
 0x23b   :  { %v2243_v49 = vld [vmem:[#allocation14 + $0x1000] sm:$0xff]  ;;  %3898 = vmatpush.msrb.mxu2 %v2947_v48 }
 0x23c   :  { %v3139_v51 = vld [vmem:[#allocation14 + $0x2c00] sm:$0xff]  ;;  %3870 = vmatpush.msrb.mxu0 %v2243_v49 }
 0x23d   :  { %v2931_v52 = vld [vmem:[#allocation14 + $0x2580] sm:$0xff]  ;;  %3922 = vmatpush.msrb.mxu3 %v3139_v51  ;;  %3871 = vmatmul.f32.vlgmr.msrb.gmra.mxu0 %v7732_v53 }
 0x23e   :  { %v3123_v54 = vld [vmem:[#allocation14 + $0x2b80] sm:$0xff]  ;;  %3899 = vmatpush.msrb.mxu2 %v2931_v52 }
 0x23f   :  { %v3507_v55 = vld [vmem:[#allocation14 + $0x3780] sm:$0xff]  ;;  %3923 = vmatpush.msrb.mxu3 %v3123_v54  ;;  %v1956_v54 = vld [vmem:[#allocation14 + $0x708] sm:$0xff] }
 0x240   :  { %v2915_v56 = vld [vmem:[#allocation14 + $0x2500] sm:$0xff]  ;;  %3935 = vmatpush.msra.mxu0 %v3507_v55  ;;  %v2148_v55 = vld [vmem:[#allocation14 + $0xd08] sm:$0xff] }
 0x241   :  { %v3107_v57 = vld [vmem:[#allocation14 + $0x2b00] sm:$0xff]  ;;  %3900 = vmatpush.msrb.mxu2 %v2915_v56 }
 0x242   :  { %v3491_v58 = vld [vmem:[#allocation14 + $0x3700] sm:$0xff]  ;;  %3924 = vmatpush.msrb.mxu3 %v3107_v57 }
 0x243   :  { %v2899_v60 = vld [vmem:[#allocation14 + $0x2480] sm:$0xff]  ;;  %3936 = vmatpush.msra.mxu0 %v3491_v58 }
 0x244   :  { %v3091_v62 = vld [vmem:[#allocation14 + $0x2a80] sm:$0xff]  ;;  %3901 = vmatpush.msrb.mxu2 %v2899_v60  ;;  %v1940_v60 = vld [vmem:[#allocation14 + $0x688] sm:$0xff] }
 0x245   :  { %v3475_v20 = vld [vmem:[#allocation14 + $0x3680] sm:$0xff]  ;;  %3925 = vmatpush.msrb.mxu3 %v3091_v62 }
 0x246   :  { %v2883_v63 = vld [vmem:[#allocation14 + $0x2400] sm:$0xff]  ;;  %3937 = vmatpush.msra.mxu0 %v3475_v20 }
 0x247   :  { %v3075_v0 = vld [vmem:[#allocation14 + $0x2a00] sm:$0xff]  ;;  %3902 = vmatpush.msrb.mxu2 %v2883_v63 }
 0x248   :  { %v3459_v1 = vld [vmem:[#allocation14 + $0x3600] sm:$0xff]  ;;  %3926 = vmatpush.msrb.mxu3 %v3075_v0 }
 0x249   :  { %v2867_v4 = vld [vmem:[#allocation14 + $0x2380] sm:$0xff]  ;;  %3938 = vmatpush.msra.mxu0 %v3459_v1  ;;  %v1520_v49 = vpop.f32.mrf.mxu3  ;;  %v1924_v1 = vld [vmem:[#allocation14 + $0x608] sm:$0xff] }
 0x24a   :  { %v3059_v5 = vld [vmem:[#allocation14 + $0x2980] sm:$0xff]  ;;  %3903 = vmatpush.msrb.mxu2 %v2867_v4 }
 0x24b   :  { %v3443_v6 = vld [vmem:[#allocation14 + $0x3580] sm:$0xff]  ;;  %3927 = vmatpush.msrb.mxu3 %v3059_v5 }
 0x24c   :  { %v2851_v7 = vld [vmem:[#allocation14 + $0x2300] sm:$0xff]  ;;  %3939 = vmatpush.msra.mxu0 %v3443_v6  ;;  %v1908_v6 = vld [vmem:[#allocation14 + $0x588] sm:$0xff] }
 0x24d   :  { %v3043_v59 = vld [vmem:[#allocation14 + $0x2900] sm:$0xff]  ;;  %3904 = vmatpush.msrb.mxu2 %v2851_v7  ;;  %v1560_v20 = vpop.f32.mrf.mxu1 }
 0x24e   :  { %v3427_v9 = vld [vmem:[#allocation14 + $0x3500] sm:$0xff]  ;;  %3928 = vmatpush.msrb.mxu3 %v3043_v59  ;;  %v2484_v59 = vld [vmem:[#allocation14 + $0x1788] sm:$0xff] }
 0x24f   :  { %v3763_v10 = vld [vmem:[#allocation14 + $0x3f80] sm:$0xff]  ;;  %3940 = vmatpush.msra.mxu0 %v3427_v9 }
 0x250   :  { %v2835_v14 = vld [vmem:[#allocation14 + $0x2280] sm:$0xff]  ;;  %3955 = vmatpush.msra.mxu1 %v3763_v10  ;;  %v1500_v42 = vpop.f32.mrf.mxu2  ;;  %v1892_v10 = vld [vmem:[#allocation14 + $0x508] sm:$0xff] }
 0x251   :  { %v3027_v15 = vld [vmem:[#allocation14 + $0x2880] sm:$0xff]  ;;  %3905 = vmatpush.msrb.mxu2 %v2835_v14  ;;  %v1501_v48 = vadd.f32 %v1500_v42, %v1072_v36  ;;  %v2468_v14 = vld [vmem:[#allocation14 + $0x1708] sm:$0xff] }
 0x252   :  { %v3411_v16 = vld [vmem:[#allocation14 + $0x3480] sm:$0xff]  ;;  %3929 = vmatpush.msrb.mxu3 %v3027_v15  ;;  %v1796_v36 = vld [vmem:[#allocation14 + $0x208] sm:$0xff] }
 0x253   :  { %v3747_v17 = vld [vmem:[#allocation14 + $0x3f00] sm:$0xff]  ;;  %3941 = vmatpush.msra.mxu0 %v3411_v16  ;;  %v1521_v56 = vadd.f32 %v1520_v49, %v1501_v48  ;;  %v1540_v57 = vpop.f32.mrf.mxu0  ;;  %v1876_v16 = vld [vmem:[#allocation14 + $0x488] sm:$0xff] }
 0x254   :  { %v2819_v37 = vld [vmem:[#allocation14 + $0x2200] sm:$0xff]  ;;  %3956 = vmatpush.msra.mxu1 %v3747_v17  ;;  %v2068_v17 = vld [vmem:[#allocation14 + $0xa88] sm:$0xff] }
 0x255   :  { %v3011_v19 = vld [vmem:[#allocation14 + $0x2800] sm:$0xff]  ;;  %3906 = vmatpush.msrb.mxu2 %v2819_v37  ;;  %v1541_v62 = vadd.f32 %v1540_v57, %v1521_v56  ;;  %v2452_v37 = vld [vmem:[#allocation14 + $0x1688] sm:$0xff]  ;;  %v1073_v57 = vperm.slane %v7700_v12, 6 }
 0x256   :  { %v3395_v2 = vld [vmem:[#allocation14 + $0x3400] sm:$0xff]  ;;  %3930 = vmatpush.msrb.mxu3 %v3011_v19  ;;  %v1860_v19 = vld [vmem:[#allocation14 + $0x408] sm:$0xff] }
 0x257   :  { %v3731_v22 = vld [vmem:[#allocation14 + $0x3e80] sm:$0xff]  ;;  %3942 = vmatpush.msra.mxu0 %v3395_v2  ;;  %v1561_v4 = vadd.f32 %v1560_v20, %v1541_v62  ;;  %v2052_v2 = vld [vmem:[#allocation14 + $0xa08] sm:$0xff] }
 0x258   :  { %v2803_v21 = vld [vmem:[#allocation14 + $0x2180] sm:$0xff]  ;;  %3957 = vmatpush.msra.mxu1 %v3731_v22  ;;  %3995 = vmatpush.msra.mxu3 %v2228_v24  ;;  %v2436_v22 = vld [vmem:[#allocation14 + $0x1608] sm:$0xff] }
 0x259   :  { %v3379_v25 = vld [vmem:[#allocation14 + $0x3380] sm:$0xff]  ;;  %3907 = vmatpush.msrb.mxu2 %v2803_v21  ;;  %v7740_v7 = vmax.f32 %v1561_v4, 0.0  ;;  %v1844_v21 = vld [vmem:[#allocation14 + $0x388] sm:$0xff] }
 0x25a   :  { %v3715_v26 = vld [vmem:[#allocation14 + $0x3e00] sm:$0xff]  ;;  %3943 = vmatpush.msra.mxu0 %v3379_v25  ;;  %3996 = vmatpush.msra.mxu3 %v2212_v28  ;;  %v2036_v24 = vld [vmem:[#allocation14 + $0x988] sm:$0xff] }
 0x25b   :  { %v2787_v27 = vld [vmem:[#allocation14 + $0x2100] sm:$0xff]  ;;  %3958 = vmatpush.msra.mxu1 %v3715_v26  ;;  %8307 = vst [vmem:[#allocation31_spill] sm:$0xff] %v7740_v7  ;;  %3931 = vmatmul.f32.vlgmr.msrb.gmra.mxu3 %v7740_v7  ;;  %v2420_v25 = vld [vmem:[#allocation14 + $0x1588] sm:$0xff] }
 0x25c   :  { %v3363_v30 = vld [vmem:[#allocation14 + $0x3300] sm:$0xff]  ;;  %3908 = vmatpush.msrb.mxu2 %v2787_v27  ;;  %3997 = vmatpush.msra.mxu3 %v2196_v35  ;;  %v1828_v27 = vld [vmem:[#allocation14 + $0x308] sm:$0xff] }
 0x25d   :  { %v3699_v32 = vld [vmem:[#allocation14 + $0x3d80] sm:$0xff]  ;;  %3944 = vmatpush.msra.mxu0 %v3363_v30  ;;  %v2020_v28 = vld [vmem:[#allocation14 + $0x908] sm:$0xff] }
 0x25e   :  { %v2771_v34 = vld [vmem:[#allocation14 + $0x2080] sm:$0xff]  ;;  %3959 = vmatpush.msra.mxu1 %v3699_v32  ;;  %3998 = vmatpush.msra.mxu3 %v2180_v41  ;;  %v1812_v32 = vld [vmem:[#allocation14 + $0x288] sm:$0xff] }
 0x25f   :  { %v3347_v50 = vld [vmem:[#allocation14 + $0x3280] sm:$0xff]  ;;  %3909 = vmatpush.msrb.mxu2 %v2771_v34  ;;  %v2388_v34 = vld [vmem:[#allocation14 + $0x1488] sm:$0xff] }
 0x260   :  { %v3683_v38 = vld [vmem:[#allocation14 + $0x3d00] sm:$0xff]  ;;  %3945 = vmatpush.msra.mxu0 %v3347_v50  ;;  %3999 = vmatpush.msra.mxu3 %v2164_v47  ;;  %v1988_v50 = vld [vmem:[#allocation14 + $0x808] sm:$0xff] }
 0x261   :  { %v2755_v39 = vld [vmem:[#allocation14 + $0x2000] sm:$0xff]  ;;  %3960 = vmatpush.msra.mxu1 %v3683_v38  ;;  %v3252_v38 = vld [vmem:[#allocation14 + $0x2f88] sm:$0xff] }
 0x262   :  { %v3331_v43 = vld [vmem:[#allocation14 + $0x3200] sm:$0xff]  ;;  %3910 = vmatpush.msrb.mxu2 %v2755_v39  ;;  %4000 = vmatpush.msra.mxu3 %v2148_v55  ;;  %v2372_v39 = vld [vmem:[#allocation14 + $0x1408] sm:$0xff] }
 0x263   :  { %v3315_v51 = vld [vmem:[#allocation14 + $0x3180] sm:$0xff]  ;;  %3911 = vmatmul.f32.vlgmr.msrb.gmra.mxu2 %v7737_v44  ;;  %3946 = vmatpush.msra.mxu0 %v3331_v43  ;;  %v1780_v41 = vld [vmem:[#allocation14 + $0x188] sm:$0xff] }
 0x264   :  { %v3667_v52 = vld [vmem:[#allocation14 + $0x3c80] sm:$0xff]  ;;  %3975 = vmatpush.msra.mxu2 %v1972_v45  ;;  %4001 = vmatpush.msra.mxu3 %v2132_v61  ;;  %v3236_v42 = vld [vmem:[#allocation14 + $0x2f08] sm:$0xff] }
 0x265   :  { %v3299_v58 = vld [vmem:[#allocation14 + $0x3100] sm:$0xff]  ;;  %3947 = vmatpush.msra.mxu0 %v3315_v51  ;;  %3961 = vmatpush.msra.mxu1 %v3667_v52  ;;  %v2356_v43 = vld [vmem:[#allocation14 + $0x1388] sm:$0xff] }
 0x266   :  { %v3651_v46 = vld [vmem:[#allocation14 + $0x3c00] sm:$0xff]  ;;  %3976 = vmatpush.msra.mxu2 %v1956_v54  ;;  %4002 = vmatpush.msra.mxu3 %v2116_v3  ;;  %v1764_v45 = vld [vmem:[#allocation14 + $0x108] sm:$0xff] }
 0x267   :  { %v3283_v63 = vld [vmem:[#allocation14 + $0x3080] sm:$0xff]  ;;  %3948 = vmatpush.msra.mxu0 %v3299_v58  ;;  %3962 = vmatpush.msra.mxu1 %v3651_v46  ;;  %v2740_v47 = vld [vmem:[#allocation14 + $0x1f88] sm:$0xff] }
 0x268   :  { %v3635_v0 = vld [vmem:[#allocation14 + $0x3b80] sm:$0xff]  ;;  %3977 = vmatpush.msra.mxu2 %v1940_v60  ;;  %4003 = vmatpush.msra.mxu3 %v2100_v8  ;;  %v3220_v48 = vld [vmem:[#allocation14 + $0x2e88] sm:$0xff] }
 0x269   :  { %v3267_v5 = vld [vmem:[#allocation14 + $0x3000] sm:$0xff]  ;;  %3949 = vmatpush.msra.mxu0 %v3283_v63  ;;  %3963 = vmatpush.msra.mxu1 %v3635_v0  ;;  %v2340_v49 = vld [vmem:[#allocation14 + $0x1308] sm:$0xff] }
 0x26a   :  { %3978 = vmatpush.msra.mxu2 %v1924_v1  ;;  %v3619_v9 = vld [vmem:[#allocation14 + $0x3b00] sm:$0xff]  ;;  %4004 = vmatpush.msra.mxu3 %v2084_v31  ;;  %v1748_v51 = vld [vmem:[#allocation14 + $0x88] sm:$0xff] }
 0x26b   :  { %3950 = vmatpush.msra.mxu0 %v3267_v5  ;;  %v3603_v15 = vld [vmem:[#allocation14 + $0x3a80] sm:$0xff]  ;;  %3964 = vmatpush.msra.mxu1 %v3619_v9  ;;  %v2724_v52 = vld [vmem:[#allocation14 + $0x1f08] sm:$0xff]  ;;  %v1600_v12 = vpop.f32.mrf.mxu3 }
 0x26c   :  { %3979 = vmatpush.msra.mxu2 %v1908_v6  ;;  %v3587_v18 = vld [vmem:[#allocation14 + $0x3a00] sm:$0xff]  ;;  %4005 = vmatpush.msra.mxu3 %v2068_v17  ;;  %v3204_v54 = vld [vmem:[#allocation14 + $0x2e08] sm:$0xff] }
 0x26d   :  { %4015 = vmatpush.msrb.mxu0 %v2484_v59  ;;  %3965 = vmatpush.msra.mxu1 %v3603_v15  ;;  %v3571_v23 = vld [vmem:[#allocation14 + $0x3980] sm:$0xff]  ;;  %v2324_v55 = vld [vmem:[#allocation14 + $0x1288] sm:$0xff] }
 0x26e   :  { %3980 = vmatpush.msra.mxu2 %v1892_v10  ;;  %4006 = vmatpush.msra.mxu3 %v2052_v2  ;;  %v3555_v26 = vld [vmem:[#allocation14 + $0x3900] sm:$0xff]  ;;  %v1732_v56 = vld [vmem:[#allocation14 + $0x8] sm:$0xff] }
 0x26f   :  { %4016 = vmatpush.msrb.mxu0 %v2468_v14  ;;  %3966 = vmatpush.msra.mxu1 %v3587_v18  ;;  %v3539_v30 = vld [vmem:[#allocation14 + $0x3880] sm:$0xff]  ;;  %v2708_v58 = vld [vmem:[#allocation14 + $0x1e88] sm:$0xff]  ;;  %v1640_v17 = vpop.f32.mrf.mxu1 }
 0x270   :  { %3981 = vmatpush.msra.mxu2 %v1876_v16  ;;  %4007 = vmatpush.msra.mxu3 %v2036_v24  ;;  %v3523_v35 = vld [vmem:[#allocation14 + $0x3800] sm:$0xff]  ;;  %v3188_v46 = vld [vmem:[#allocation14 + $0x2d88] sm:$0xff] }
 0x271   :  { %4017 = vmatpush.msrb.mxu0 %v2452_v37  ;;  %3967 = vmatpush.msra.mxu1 %v3571_v23  ;;  %v2996_v60 = vld [vmem:[#allocation14 + $0x2788] sm:$0xff] }
 0x272   :  { %3982 = vmatpush.msra.mxu2 %v1860_v19  ;;  %4008 = vmatpush.msra.mxu3 %v2020_v28  ;;  %v2308_v61 = vld [vmem:[#allocation14 + $0x1208] sm:$0xff]  ;;  %v1580_v20 = vpop.f32.mrf.mxu2 }
 0x273   :  { %4018 = vmatpush.msrb.mxu0 %v2436_v22  ;;  %3968 = vmatpush.msra.mxu1 %v3555_v26  ;;  %v3172_v62 = vld [vmem:[#allocation14 + $0x2d08] sm:$0xff]  ;;  %v1581_v1 = vadd.f32 %v1580_v20, %v1073_v57 }
 0x274   :  { %3983 = vmatpush.msra.mxu2 %v1844_v21  ;;  %4009 = vmatpush.msra.mxu3 %v2004_v33  ;;  %v2692_v63 = vld [vmem:[#allocation14 + $0x1e08] sm:$0xff] }
 0x275   :  { %4019 = vmatpush.msrb.mxu0 %v2420_v25  ;;  %3969 = vmatpush.msra.mxu1 %v3539_v30  ;;  %v2980_v0 = vld [vmem:[#allocation14 + $0x2708] sm:$0xff]  ;;  %v1601_v8 = vadd.f32 %v1600_v12, %v1581_v1  ;;  %v1620_v10 = vpop.f32.mrf.mxu0  ;;  %v2181_v1 = vld [vmem:[#allocation14 + $0xe10] sm:$0xff] }
 0x276   :  { %3984 = vmatpush.msra.mxu2 %v1828_v27  ;;  %4010 = vmatpush.msra.mxu3 %v1988_v50  ;;  %v2292_v3 = vld [vmem:[#allocation14 + $0x1188] sm:$0xff] }
 0x277   :  { %4020 = vmatpush.msrb.mxu0 %v2404_v29  ;;  %3970 = vmatpush.msra.mxu1 %v3523_v35  ;;  %v3156_v4 = vld [vmem:[#allocation14 + $0x2c88] sm:$0xff]  ;;  %v1621_v15 = vadd.f32 %v1620_v10, %v1601_v8  ;;  %v7252_v8 = vld [vmem:[#allocation12] sm:$0xff]  ;;  %v2149_v10 = vld [vmem:[#allocation14 + $0xd10] sm:$0xff] }
 0x278   :  { %3985 = vmatpush.msra.mxu2 %v1812_v32  ;;  %4075 = vmatpush.msrb.mxu3 %v3252_v38  ;;  %v2676_v5 = vld [vmem:[#allocation14 + $0x1d88] sm:$0xff] }
 0x279   :  { %4021 = vmatpush.msrb.mxu0 %v2388_v34  ;;  %4011 = vmatmul.f32.vlgmr.msra.gmra.mxu3 %v7718_v13  ;;  %v2964_v6 = vld [vmem:[#allocation14 + $0x2688] sm:$0xff]  ;;  %v1641_v2 = vadd.f32 %v1640_v17, %v1621_v15  ;;  %v2133_v15 = vld [vmem:[#allocation14 + $0xc90] sm:$0xff] }
 0x27a   :  { %3986 = vmatpush.msra.mxu2 %v1796_v36  ;;  %4076 = vmatpush.msrb.mxu3 %v3236_v42  ;;  %v2276_v59 = vld [vmem:[#allocation14 + $0x1108] sm:$0xff]  ;;  %v1941_v17 = vld [vmem:[#allocation14 + $0x690] sm:$0xff] }
 0x27b   :  { %4022 = vmatpush.msrb.mxu0 %v2372_v39  ;;  %4035 = vmatpush.msrb.mxu1 %v2740_v47  ;;  %v3140_v9 = vld [vmem:[#allocation14 + $0x2c08] sm:$0xff]  ;;  %v7746_v21 = vmax.f32 %v1641_v2, 0.0  ;;  %v2117_v2 = vld [vmem:[#allocation14 + $0xc10] sm:$0xff] }
 0x27c   :  { %3987 = vmatpush.msra.mxu2 %v1780_v41  ;;  %4077 = vmatpush.msrb.mxu3 %v3220_v48  ;;  %v2660_v31 = vld [vmem:[#allocation14 + $0x1d08] sm:$0xff] }
 0x27d   :  { %4023 = vmatpush.msrb.mxu0 %v2356_v43  ;;  %4036 = vmatpush.msrb.mxu1 %v2724_v52  ;;  %v2948_v14 = vld [vmem:[#allocation14 + $0x2608] sm:$0xff] }
 0x27e   :  { %3988 = vmatpush.msra.mxu2 %v1764_v45  ;;  %4078 = vmatpush.msrb.mxu3 %v3204_v54  ;;  %v2260_v16 = vld [vmem:[#allocation14 + $0x1088] sm:$0xff]  ;;  %v2229_v54 = vld [vmem:[#allocation14 + $0xf90] sm:$0xff] }
 0x27f   :  { %4024 = vmatpush.msrb.mxu0 %v2340_v49  ;;  %4037 = vmatpush.msrb.mxu1 %v2708_v58  ;;  %v3124_v37 = vld [vmem:[#allocation14 + $0x2b88] sm:$0xff]  ;;  %v2213_v58 = vld [vmem:[#allocation14 + $0xf10] sm:$0xff] }
 0x280   :  { %3989 = vmatpush.msra.mxu2 %v1748_v51  ;;  %4079 = vmatpush.msrb.mxu3 %v3188_v46  ;;  %v2644_v18 = vld [vmem:[#allocation14 + $0x1c88] sm:$0xff] }
 0x281   :  { %4025 = vmatpush.msrb.mxu0 %v2324_v55  ;;  %4038 = vmatpush.msrb.mxu1 %v2692_v63  ;;  %v2932_v19 = vld [vmem:[#allocation14 + $0x2588] sm:$0xff] }
 0x282   :  { %3990 = vmatpush.msra.mxu2 %v1732_v56  ;;  %4080 = vmatpush.msrb.mxu3 %v3172_v62  ;;  %v2244_v22 = vld [vmem:[#allocation14 + $0x1008] sm:$0xff]  ;;  %v2197_v62 = vld [vmem:[#allocation14 + $0xe90] sm:$0xff] }
 0x283   :  { %3991 = vmatmul.f32.vlgmr.msra.gmra.mxu2 %v7724_v11  ;;  %4026 = vmatpush.msrb.mxu0 %v2308_v61  ;;  %v3108_v23 = vld [vmem:[#allocation14 + $0x2b08] sm:$0xff] }
 0x284   :  { %4055 = vmatpush.msrb.mxu2 %v2996_v60  ;;  %4081 = vmatpush.msrb.mxu3 %v3156_v4  ;;  %v2916_v24 = vld [vmem:[#allocation14 + $0x2508] sm:$0xff] }
 0x285   :  { %4027 = vmatpush.msrb.mxu0 %v2292_v3  ;;  %4039 = vmatpush.msrb.mxu1 %v2676_v5  ;;  %v3508_v25 = vld [vmem:[#allocation14 + $0x3788] sm:$0xff]  ;;  %v2165_v5 = vld [vmem:[#allocation14 + $0xd90] sm:$0xff] }
 0x286   :  { %4056 = vmatpush.msrb.mxu2 %v2980_v0  ;;  %4082 = vmatpush.msrb.mxu3 %v3140_v9  ;;  %v3092_v26 = vld [vmem:[#allocation14 + $0x2a88] sm:$0xff] }
 0x287   :  { %4028 = vmatpush.msrb.mxu0 %v2276_v59  ;;  %4040 = vmatpush.msrb.mxu1 %v2660_v31  ;;  %v2628_v27 = vld [vmem:[#allocation14 + $0x1c08] sm:$0xff]  ;;  %v1074_v59 = vperm.slane %v7252_v8, 7  ;;  %v1957_v31 = vld [vmem:[#allocation14 + $0x710] sm:$0xff] }
 0x288   :  { %4057 = vmatpush.msrb.mxu2 %v2964_v6  ;;  %4083 = vmatpush.msrb.mxu3 %v3124_v37  ;;  %v2900_v28 = vld [vmem:[#allocation14 + $0x2488] sm:$0xff]  ;;  %v1973_v6 = vld [vmem:[#allocation14 + $0x790] sm:$0xff] }
 0x289   :  { %4029 = vmatpush.msrb.mxu0 %v2260_v16  ;;  %4041 = vmatpush.msrb.mxu1 %v2644_v18  ;;  %v3492_v29 = vld [vmem:[#allocation14 + $0x3708] sm:$0xff]  ;;  %v1749_v8 = vld [vmem:[#allocation14 + $0x90] sm:$0xff] }
 0x28a   :  { %4058 = vmatpush.msrb.mxu2 %v2948_v14  ;;  %4084 = vmatpush.msrb.mxu3 %v3108_v23  ;;  %v3076_v30 = vld [vmem:[#allocation14 + $0x2a08] sm:$0xff] }
 0x28b   :  { %4030 = vmatpush.msrb.mxu0 %v2244_v22  ;;  %v2612_v32 = vld [vmem:[#allocation14 + $0x1b88] sm:$0xff]  ;;  %4042 = vmatpush.msrb.mxu1 %v2628_v27  ;;  %v1925_v22 = vld [vmem:[#allocation14 + $0x610] sm:$0xff] }
 0x28c   :  { %4059 = vmatpush.msrb.mxu2 %v2932_v19  ;;  %3951 = vmatmul.f32.vlgmr.msra.gmra.mxu0 %v7746_v21  ;;  %v2884_v33 = vld [vmem:[#allocation14 + $0x2408] sm:$0xff]  ;;  %v1909_v27 = vld [vmem:[#allocation14 + $0x590] sm:$0xff] }
 0x28d   :  { %4095 = vmatpush.msra.mxu0 %v3508_v25  ;;  %4085 = vmatpush.msrb.mxu3 %v3092_v26  ;;  %v3476_v34 = vld [vmem:[#allocation14 + $0x3688] sm:$0xff]  ;;  %v1680_v19 = vpop.f32.mrf.mxu3  ;;  %v2101_v26 = vld [vmem:[#allocation14 + $0xb90] sm:$0xff] }
 0x28e   :  { %4060 = vmatpush.msrb.mxu2 %v2916_v24  ;;  %v3060_v35 = vld [vmem:[#allocation14 + $0x2988] sm:$0xff]  ;;  %4043 = vmatpush.msrb.mxu1 %v2612_v32  ;;  %v2085_v32 = vld [vmem:[#allocation14 + $0xb10] sm:$0xff] }
 0x28f   :  { %4096 = vmatpush.msra.mxu0 %v3492_v29  ;;  %v2596_v36 = vld [vmem:[#allocation14 + $0x1b08] sm:$0xff]  ;;  %4086 = vmatpush.msrb.mxu3 %v3076_v30 }
 0x290   :  { %4061 = vmatpush.msrb.mxu2 %v2900_v28  ;;  %v2868_v50 = vld [vmem:[#allocation14 + $0x2388] sm:$0xff]  ;;  %4044 = vmatpush.msrb.mxu1 %v2596_v36  ;;  %v2069_v36 = vld [vmem:[#allocation14 + $0xa90] sm:$0xff] }
 0x291   :  { %v3460_v38 = vld [vmem:[#allocation14 + $0x3608] sm:$0xff]  ;;  %4097 = vmatpush.msra.mxu0 %v3476_v34  ;;  %4087 = vmatpush.msrb.mxu3 %v3060_v35  ;;  %v1720_v30 = vpop.f32.mrf.mxu1  ;;  %v1893_v34 = vld [vmem:[#allocation14 + $0x510] sm:$0xff] }
 0x292   :  { %4062 = vmatpush.msrb.mxu2 %v2884_v33  ;;  %v3044_v39 = vld [vmem:[#allocation14 + $0x2908] sm:$0xff] }
 0x293   :  { %v2852_v41 = vld [vmem:[#allocation14 + $0x2308] sm:$0xff]  ;;  %4098 = vmatpush.msra.mxu0 %v3460_v38  ;;  %4088 = vmatpush.msrb.mxu3 %v3044_v39  ;;  %v1877_v38 = vld [vmem:[#allocation14 + $0x490] sm:$0xff] }
 0x294   :  { %v3444_v42 = vld [vmem:[#allocation14 + $0x3588] sm:$0xff]  ;;  %4063 = vmatpush.msrb.mxu2 %v2868_v50  ;;  %4031 = vmatmul.f32.vlgmr.msrb.gmra.mxu0 %v7732_v53  ;;  %v1660_v16 = vpop.f32.mrf.mxu2  ;;  %v2053_v39 = vld [vmem:[#allocation14 + $0xa10] sm:$0xff] }
 0x295   :  { %v3028_v43 = vld [vmem:[#allocation14 + $0x2888] sm:$0xff]  ;;  %4099 = vmatpush.msra.mxu0 %v3444_v42  ;;  %v1661_v37 = vadd.f32 %v1660_v16, %v1074_v59  ;;  %v1861_v42 = vld [vmem:[#allocation14 + $0x410] sm:$0xff] }
 0x296   :  { %v2580_v45 = vld [vmem:[#allocation14 + $0x1a88] sm:$0xff]  ;;  %4064 = vmatpush.msrb.mxu2 %v2852_v41  ;;  %4089 = vmatpush.msrb.mxu3 %v3028_v43  ;;  %v2485_v43 = vld [vmem:[#allocation14 + $0x1790] sm:$0xff] }
 0x297   :  { %v2836_v47 = vld [vmem:[#allocation14 + $0x2288] sm:$0xff]  ;;  %4045 = vmatpush.msrb.mxu1 %v2580_v45  ;;  %v1681_v23 = vadd.f32 %v1680_v19, %v1661_v37  ;;  %v1700_v25 = vpop.f32.mrf.mxu0  ;;  %v2037_v45 = vld [vmem:[#allocation14 + $0x990] sm:$0xff] }
 0x298   :  { %v3428_v48 = vld [vmem:[#allocation14 + $0x3508] sm:$0xff]  ;;  %4065 = vmatpush.msrb.mxu2 %v2836_v47  ;;  %v2389_v59 = vld [vmem:[#allocation14 + $0x1490] sm:$0xff] }
 0x299   :  { %v3012_v49 = vld [vmem:[#allocation14 + $0x2808] sm:$0xff]  ;;  %4100 = vmatpush.msra.mxu0 %v3428_v48  ;;  %v1701_v28 = vadd.f32 %v1700_v25, %v1681_v23  ;;  %v1845_v48 = vld [vmem:[#allocation14 + $0x390] sm:$0xff] }
 0x29a   :  { %v2564_v51 = vld [vmem:[#allocation14 + $0x1a08] sm:$0xff]  ;;  %4090 = vmatpush.msrb.mxu3 %v3012_v49  ;;  %v2469_v49 = vld [vmem:[#allocation14 + $0x1710] sm:$0xff] }
 0x29b   :  { %v2820_v52 = vld [vmem:[#allocation14 + $0x2208] sm:$0xff]  ;;  %4046 = vmatpush.msrb.mxu1 %v2564_v51  ;;  %4091 = vmatmul.f32.vlgmr.msrb.gmra.mxu3 %v7740_v7  ;;  %v1721_v33 = vadd.f32 %v1720_v30, %v1701_v28  ;;  %v2021_v51 = vld [vmem:[#allocation14 + $0x910] sm:$0xff] }
 0x29c   :  { %v3412_v55 = vld [vmem:[#allocation14 + $0x3488] sm:$0xff]  ;;  %4066 = vmatpush.msrb.mxu2 %v2820_v52  ;;  %4155 = vmatpush.msra.mxu3 %v2229_v54  ;;  %v1829_v54 = vld [vmem:[#allocation14 + $0x310] sm:$0xff] }
 0x29d   :  { %v2804_v56 = vld [vmem:[#allocation14 + $0x2188] sm:$0xff]  ;;  %4101 = vmatpush.msra.mxu0 %v3412_v55  ;;  %v7752_v50 = vmax.f32 %v1721_v33, 0.0  ;;  %v2453_v55 = vld [vmem:[#allocation14 + $0x1690] sm:$0xff] }
 0x29e   :  { %v2548_v57 = vld [vmem:[#allocation14 + $0x1988] sm:$0xff]  ;;  %4067 = vmatpush.msrb.mxu2 %v2804_v56  ;;  %4156 = vmatpush.msra.mxu3 %v2213_v58  ;;  %v2005_v56 = vld [vmem:[#allocation14 + $0x890] sm:$0xff] }
 0x29f   :  { %v3396_v46 = vld [vmem:[#allocation14 + $0x3408] sm:$0xff]  ;;  %4047 = vmatpush.msrb.mxu1 %v2548_v57  ;;  %8308 = vst [vmem:[#allocation32_spill] sm:$0xff] %v7752_v50  ;;  %v1813_v58 = vld [vmem:[#allocation14 + $0x290] sm:$0xff] }
 0x2a0   :  { %v2788_v60 = vld [vmem:[#allocation14 + $0x2108] sm:$0xff]  ;;  %4102 = vmatpush.msra.mxu0 %v3396_v46  ;;  %4157 = vmatpush.msra.mxu3 %v2197_v62  ;;  %v2437_v46 = vld [vmem:[#allocation14 + $0x1610] sm:$0xff] }
 0x2a1   :  { %v2532_v61 = vld [vmem:[#allocation14 + $0x1908] sm:$0xff]  ;;  %4068 = vmatpush.msrb.mxu2 %v2788_v60  ;;  %3971 = vmatmul.f32.vlgmr.msra.gmra.mxu1 %v7752_v50  ;;  %v1989_v60 = vld [vmem:[#allocation14 + $0x810] sm:$0xff] }
 0x2a2   :  { %v3380_v20 = vld [vmem:[#allocation14 + $0x3388] sm:$0xff]  ;;  %4048 = vmatpush.msrb.mxu1 %v2532_v61  ;;  %4158 = vmatpush.msra.mxu3 %v2181_v1  ;;  %v1797_v61 = vld [vmem:[#allocation14 + $0x210] sm:$0xff] }
 0x2a3   :  { %v2772_v63 = vld [vmem:[#allocation14 + $0x2088] sm:$0xff]  ;;  %4103 = vmatpush.msra.mxu0 %v3380_v20  ;;  %v3253_v62 = vld [vmem:[#allocation14 + $0x2f90] sm:$0xff] }
 0x2a4   :  { %v2516_v0 = vld [vmem:[#allocation14 + $0x1888] sm:$0xff]  ;;  %4069 = vmatpush.msrb.mxu2 %v2772_v63  ;;  %4159 = vmatpush.msra.mxu3 %v2165_v5  ;;  %v1781_v63 = vld [vmem:[#allocation14 + $0x190] sm:$0xff] }
 0x2a5   :  { %v3364_v3 = vld [vmem:[#allocation14 + $0x3308] sm:$0xff]  ;;  %4049 = vmatpush.msrb.mxu1 %v2516_v0  ;;  %v2421_v0 = vld [vmem:[#allocation14 + $0x1590] sm:$0xff] }
 0x2a6   :  { %v2756_v12 = vld [vmem:[#allocation14 + $0x2008] sm:$0xff]  ;;  %4104 = vmatpush.msra.mxu0 %v3364_v3  ;;  %4160 = vmatpush.msra.mxu3 %v2149_v10  ;;  %v3237_v1 = vld [vmem:[#allocation14 + $0x2f10] sm:$0xff] }
 0x2a7   :  { %v2500_v4 = vld [vmem:[#allocation14 + $0x1808] sm:$0xff]  ;;  %4070 = vmatpush.msrb.mxu2 %v2756_v12  ;;  %v1765_v12 = vld [vmem:[#allocation14 + $0x110] sm:$0xff] }
 0x2a8   :  { %v3348_v9 = vld [vmem:[#allocation14 + $0x3288] sm:$0xff]  ;;  %4050 = vmatpush.msrb.mxu1 %v2500_v4  ;;  %4071 = vmatmul.f32.vlgmr.msrb.gmra.mxu2 %v7737_v44  ;;  %v2405_v4 = vld [vmem:[#allocation14 + $0x1510] sm:$0xff] }
 0x2a9   :  { %v3332_v14 = vld [vmem:[#allocation14 + $0x3208] sm:$0xff]  ;;  %4135 = vmatpush.msra.mxu2 %v1973_v6  ;;  %4105 = vmatpush.msra.mxu0 %v3348_v9  ;;  %v3221_v5 = vld [vmem:[#allocation14 + $0x2e90] sm:$0xff] }
 0x2aa   :  { %v3316_v18 = vld [vmem:[#allocation14 + $0x3188] sm:$0xff]  ;;  %4161 = vmatpush.msra.mxu3 %v2133_v15  ;;  %4051 = vmatmul.f32.vlgmr.msrb.gmra.mxu1 %v7728_v40  ;;  %v3205_v9 = vld [vmem:[#allocation14 + $0x2e10] sm:$0xff] }
 0x2ab   :  { %4136 = vmatpush.msra.mxu2 %v1957_v31  ;;  %4106 = vmatpush.msra.mxu0 %v3332_v14  ;;  %v3300_v24 = vld [vmem:[#allocation14 + $0x3108] sm:$0xff]  ;;  %v1733_v31 = vld [vmem:[#allocation14 + $0x10] sm:$0xff] }
 0x2ac   :  { %4162 = vmatpush.msra.mxu3 %v2117_v2  ;;  %v3284_v29 = vld [vmem:[#allocation14 + $0x3088] sm:$0xff]  ;;  %v2373_v14 = vld [vmem:[#allocation14 + $0x1410] sm:$0xff] }
 0x2ad   :  { %4137 = vmatpush.msra.mxu2 %v1941_v17  ;;  %4107 = vmatpush.msra.mxu0 %v3316_v18  ;;  %v3268_v35 = vld [vmem:[#allocation14 + $0x3008] sm:$0xff]  ;;  %v3189_v15 = vld [vmem:[#allocation14 + $0x2d90] sm:$0xff] }
 0x2ae   :  { %4163 = vmatpush.msra.mxu3 %v2101_v26  ;;  %v3764_v41 = vld [vmem:[#allocation14 + $0x3f88] sm:$0xff]  ;;  %v2997_v16 = vld [vmem:[#allocation14 + $0x2790] sm:$0xff] }
 0x2af   :  { %4138 = vmatpush.msra.mxu2 %v1925_v22  ;;  %4108 = vmatpush.msra.mxu0 %v3300_v24  ;;  %v3748_v47 = vld [vmem:[#allocation14 + $0x3f08] sm:$0xff]  ;;  %v2357_v37 = vld [vmem:[#allocation14 + $0x1390] sm:$0xff] }
 0x2b0   :  { %4164 = vmatpush.msra.mxu3 %v2085_v32  ;;  %4115 = vmatpush.msra.mxu1 %v3764_v41  ;;  %v3732_v52 = vld [vmem:[#allocation14 + $0x3e88] sm:$0xff]  ;;  %v3173_v18 = vld [vmem:[#allocation14 + $0x2d10] sm:$0xff] }
 0x2b1   :  { %4139 = vmatpush.msra.mxu2 %v1909_v27  ;;  %4109 = vmatpush.msra.mxu0 %v3284_v29  ;;  %v3716_v57 = vld [vmem:[#allocation14 + $0x3e08] sm:$0xff]  ;;  %v2981_v19 = vld [vmem:[#allocation14 + $0x2710] sm:$0xff] }
 0x2b2   :  { %4165 = vmatpush.msra.mxu3 %v2069_v36  ;;  %4116 = vmatpush.msra.mxu1 %v3748_v47  ;;  %v3700_v20 = vld [vmem:[#allocation14 + $0x3d88] sm:$0xff]  ;;  %v2341_v22 = vld [vmem:[#allocation14 + $0x1310] sm:$0xff] }
 0x2b3   :  { %4140 = vmatpush.msra.mxu2 %v1893_v34  ;;  %4110 = vmatpush.msra.mxu0 %v3268_v35  ;;  %v3684_v3 = vld [vmem:[#allocation14 + $0x3d08] sm:$0xff]  ;;  %v3157_v23 = vld [vmem:[#allocation14 + $0x2c90] sm:$0xff] }
 0x2b4   :  { %4111 = vmatmul.f32.vlgmr.msra.gmra.mxu0 %v7746_v21  ;;  %4166 = vmatpush.msra.mxu3 %v2053_v39  ;;  %v3668_v6 = vld [vmem:[#allocation14 + $0x3c88] sm:$0xff]  ;;  %v2965_v24 = vld [vmem:[#allocation14 + $0x2690] sm:$0xff] }
 0x2b5   :  { %4141 = vmatpush.msra.mxu2 %v1877_v38  ;;  %4175 = vmatpush.msrb.mxu0 %v2485_v43  ;;  %v3652_v10 = vld [vmem:[#allocation14 + $0x3c08] sm:$0xff]  ;;  %v2325_v26 = vld [vmem:[#allocation14 + $0x1290] sm:$0xff] }
 0x2b6   :  { %4167 = vmatpush.msra.mxu3 %v2037_v45  ;;  %4117 = vmatpush.msra.mxu1 %v3732_v52  ;;  %v3636_v17 = vld [vmem:[#allocation14 + $0x3b88] sm:$0xff]  ;;  %v3141_v27 = vld [vmem:[#allocation14 + $0x2c10] sm:$0xff] }
 0x2b7   :  { %4142 = vmatpush.msra.mxu2 %v1861_v42  ;;  %4176 = vmatpush.msrb.mxu0 %v2469_v49  ;;  %v3620_v2 = vld [vmem:[#allocation14 + $0x3b08] sm:$0xff]  ;;  %v2949_v28 = vld [vmem:[#allocation14 + $0x2610] sm:$0xff] }
 0x2b8   :  { %4168 = vmatpush.msra.mxu3 %v2021_v51  ;;  %4118 = vmatpush.msra.mxu1 %v3716_v57  ;;  %v3604_v25 = vld [vmem:[#allocation14 + $0x3a88] sm:$0xff]  ;;  %v2309_v30 = vld [vmem:[#allocation14 + $0x1210] sm:$0xff] }
 0x2b9   :  { %4143 = vmatpush.msra.mxu2 %v1845_v48  ;;  %4177 = vmatpush.msrb.mxu0 %v2453_v55  ;;  %v3588_v29 = vld [vmem:[#allocation14 + $0x3a08] sm:$0xff]  ;;  %v3125_v32 = vld [vmem:[#allocation14 + $0x2b90] sm:$0xff] }
 0x2ba   :  { %4169 = vmatpush.msra.mxu3 %v2005_v56  ;;  %4119 = vmatpush.msra.mxu1 %v3700_v20  ;;  %v2933_v33 = vld [vmem:[#allocation14 + $0x2590] sm:$0xff]  ;;  %v3572_v34 = vld [vmem:[#allocation14 + $0x3988] sm:$0xff] }
 0x2bb   :  { %4144 = vmatpush.msra.mxu2 %v1829_v54  ;;  %4178 = vmatpush.msrb.mxu0 %v2437_v46  ;;  %v2293_v35 = vld [vmem:[#allocation14 + $0x1190] sm:$0xff]  ;;  %v3556_v39 = vld [vmem:[#allocation14 + $0x3908] sm:$0xff] }
 0x2bc   :  { %4170 = vmatpush.msra.mxu3 %v1989_v60  ;;  %4120 = vmatpush.msra.mxu1 %v3684_v3  ;;  %v3109_v36 = vld [vmem:[#allocation14 + $0x2b10] sm:$0xff]  ;;  %v3540_v45 = vld [vmem:[#allocation14 + $0x3888] sm:$0xff] }
 0x2bd   :  { %4145 = vmatpush.msra.mxu2 %v1813_v58  ;;  %4171 = vmatmul.f32.vlgmr.msra.gmra.mxu3 %v7718_v13  ;;  %v2917_v38 = vld [vmem:[#allocation14 + $0x2510] sm:$0xff]  ;;  %v3524_v51 = vld [vmem:[#allocation14 + $0x3808] sm:$0xff] }
 0x2be   :  { %4235 = vmatpush.msrb.mxu3 %v3253_v62  ;;  %4179 = vmatpush.msrb.mxu0 %v2421_v0  ;;  %v2277_v41 = vld [vmem:[#allocation14 + $0x1110] sm:$0xff] }
 0x2bf   :  { %4146 = vmatpush.msra.mxu2 %v1797_v61  ;;  %4121 = vmatpush.msra.mxu1 %v3668_v6  ;;  %v3093_v42 = vld [vmem:[#allocation14 + $0x2a90] sm:$0xff] }
 0x2c0   :  { %4236 = vmatpush.msrb.mxu3 %v3237_v1  ;;  %4180 = vmatpush.msrb.mxu0 %v2405_v4  ;;  %v2901_v43 = vld [vmem:[#allocation14 + $0x2490] sm:$0xff] }
 0x2c1   :  { %4147 = vmatpush.msra.mxu2 %v1781_v63  ;;  %4122 = vmatpush.msra.mxu1 %v3652_v10  ;;  %v2261_v47 = vld [vmem:[#allocation14 + $0x1090] sm:$0xff] }
 0x2c2   :  { %4237 = vmatpush.msrb.mxu3 %v3221_v5  ;;  %4181 = vmatpush.msrb.mxu0 %v2389_v59  ;;  %v3077_v48 = vld [vmem:[#allocation14 + $0x2a10] sm:$0xff] }
 0x2c3   :  { %4148 = vmatpush.msra.mxu2 %v1765_v12  ;;  %4123 = vmatpush.msra.mxu1 %v3636_v17  ;;  %v2885_v49 = vld [vmem:[#allocation14 + $0x2410] sm:$0xff]  ;;  %v2198_v17 = vld [vmem:[#allocation14 + $0xe98] sm:$0xff] }
 0x2c4   :  { %4238 = vmatpush.msrb.mxu3 %v3205_v9  ;;  %4182 = vmatpush.msrb.mxu0 %v2373_v14  ;;  %v2245_v52 = vld [vmem:[#allocation14 + $0x1010] sm:$0xff] }
 0x2c5   :  { %4149 = vmatpush.msra.mxu2 %v1749_v8  ;;  %4124 = vmatpush.msra.mxu1 %v3620_v2  ;;  %v2869_v54 = vld [vmem:[#allocation14 + $0x2390] sm:$0xff]  ;;  %v2230_v8 = vld [vmem:[#allocation14 + $0xf98] sm:$0xff] }
 0x2c6   :  { %4239 = vmatpush.msrb.mxu3 %v3189_v15  ;;  %4183 = vmatpush.msrb.mxu0 %v2357_v37  ;;  %v2741_v55 = vld [vmem:[#allocation14 + $0x1f90] sm:$0xff]  ;;  %v2182_v2 = vld [vmem:[#allocation14 + $0xe18] sm:$0xff] }
 0x2c7   :  { %4150 = vmatpush.msra.mxu2 %v1733_v31  ;;  %4125 = vmatpush.msra.mxu1 %v3604_v25  ;;  %v3061_v56 = vld [vmem:[#allocation14 + $0x2990] sm:$0xff]  ;;  %v2214_v31 = vld [vmem:[#allocation14 + $0xf18] sm:$0xff] }
 0x2c8   :  { %4151 = vmatmul.f32.vlgmr.msra.gmra.mxu2 %v7724_v11  ;;  %4240 = vmatpush.msrb.mxu3 %v3173_v18  ;;  %v2853_v57 = vld [vmem:[#allocation14 + $0x2310] sm:$0xff]  ;;  %v2166_v25 = vld [vmem:[#allocation14 + $0xd98] sm:$0xff] }
 0x2c9   :  { %4215 = vmatpush.msrb.mxu2 %v2997_v16  ;;  %4184 = vmatpush.msrb.mxu0 %v2341_v22  ;;  %v3509_v58 = vld [vmem:[#allocation14 + $0x3790] sm:$0xff] }
 0x2ca   :  { %4241 = vmatpush.msrb.mxu3 %v3157_v23  ;;  %4126 = vmatpush.msra.mxu1 %v3588_v29  ;;  %v2725_v46 = vld [vmem:[#allocation14 + $0x1f10] sm:$0xff]  ;;  %v2150_v29 = vld [vmem:[#allocation14 + $0xd18] sm:$0xff] }
 0x2cb   :  { %4216 = vmatpush.msrb.mxu2 %v2981_v19  ;;  %4185 = vmatpush.msrb.mxu0 %v2325_v26  ;;  %v3045_v60 = vld [vmem:[#allocation14 + $0x2910] sm:$0xff]  ;;  %v1974_v19 = vld [vmem:[#allocation14 + $0x798] sm:$0xff] }
 0x2cc   :  { %4242 = vmatpush.msrb.mxu3 %v3141_v27  ;;  %4127 = vmatpush.msra.mxu1 %v3572_v34  ;;  %v2837_v61 = vld [vmem:[#allocation14 + $0x2290] sm:$0xff]  ;;  %v2134_v34 = vld [vmem:[#allocation14 + $0xc98] sm:$0xff] }
 0x2cd   :  { %4217 = vmatpush.msrb.mxu2 %v2965_v24  ;;  %4186 = vmatpush.msrb.mxu0 %v2309_v30  ;;  %v3493_v62 = vld [vmem:[#allocation14 + $0x3710] sm:$0xff]  ;;  %v1958_v24 = vld [vmem:[#allocation14 + $0x718] sm:$0xff] }
 0x2ce   :  { %4243 = vmatpush.msrb.mxu3 %v3125_v32  ;;  %4128 = vmatpush.msra.mxu1 %v3556_v39  ;;  %v2709_v20 = vld [vmem:[#allocation14 + $0x1e90] sm:$0xff]  ;;  %v2118_v39 = vld [vmem:[#allocation14 + $0xc18] sm:$0xff] }
 0x2cf   :  { %4218 = vmatpush.msrb.mxu2 %v2949_v28  ;;  %4187 = vmatpush.msrb.mxu0 %v2293_v35  ;;  %v3029_v63 = vld [vmem:[#allocation14 + $0x2890] sm:$0xff]  ;;  %v1942_v28 = vld [vmem:[#allocation14 + $0x698] sm:$0xff] }
 0x2d0   :  { %4244 = vmatpush.msrb.mxu3 %v3109_v36  ;;  %4129 = vmatpush.msra.mxu1 %v3540_v45  ;;  %v2821_v0 = vld [vmem:[#allocation14 + $0x2210] sm:$0xff]  ;;  %v2102_v45 = vld [vmem:[#allocation14 + $0xb98] sm:$0xff] }
 0x2d1   :  { %4219 = vmatpush.msrb.mxu2 %v2933_v33  ;;  %4188 = vmatpush.msrb.mxu0 %v2277_v41  ;;  %v3477_v1 = vld [vmem:[#allocation14 + $0x3690] sm:$0xff]  ;;  %v1926_v33 = vld [vmem:[#allocation14 + $0x618] sm:$0xff] }
 0x2d2   :  { %4245 = vmatpush.msrb.mxu3 %v3093_v42  ;;  %4130 = vmatpush.msra.mxu1 %v3524_v51  ;;  %v2693_v3 = vld [vmem:[#allocation14 + $0x1e10] sm:$0xff]  ;;  %v2086_v51 = vld [vmem:[#allocation14 + $0xb18] sm:$0xff] }
 0x2d3   :  { %4220 = vmatpush.msrb.mxu2 %v2917_v38  ;;  %4189 = vmatpush.msrb.mxu0 %v2261_v47  ;;  %v3013_v12 = vld [vmem:[#allocation14 + $0x2810] sm:$0xff]  ;;  %v1910_v38 = vld [vmem:[#allocation14 + $0x598] sm:$0xff] }
 0x2d4   :  { %4246 = vmatpush.msrb.mxu3 %v3077_v48  ;;  %4131 = vmatmul.f32.vlgmr.msra.gmra.mxu1 %v7752_v50  ;;  %v2805_v4 = vld [vmem:[#allocation14 + $0x2190] sm:$0xff] }
 0x2d5   :  { %4221 = vmatpush.msrb.mxu2 %v2901_v43  ;;  %4190 = vmatpush.msrb.mxu0 %v2245_v52  ;;  %v3461_v5 = vld [vmem:[#allocation14 + $0x3610] sm:$0xff]  ;;  %v1894_v43 = vld [vmem:[#allocation14 + $0x518] sm:$0xff] }
 0x2d6   :  { %4191 = vmatmul.f32.vlgmr.msrb.gmra.mxu0 %v7732_v53  ;;  %4195 = vmatpush.msrb.mxu1 %v2741_v55  ;;  %v2677_v6 = vld [vmem:[#allocation14 + $0x1d90] sm:$0xff]  ;;  %v1862_v55 = vld [vmem:[#allocation14 + $0x418] sm:$0xff] }
 0x2d7   :  { %4222 = vmatpush.msrb.mxu2 %v2885_v49  ;;  %4247 = vmatpush.msrb.mxu3 %v3061_v56  ;;  %v2789_v59 = vld [vmem:[#allocation14 + $0x2110] sm:$0xff]  ;;  %v1878_v49 = vld [vmem:[#allocation14 + $0x498] sm:$0xff] }
 0x2d8   :  { %4255 = vmatpush.msra.mxu0 %v3509_v58  ;;  %4196 = vmatpush.msrb.mxu1 %v2725_v46  ;;  %v3445_v9 = vld [vmem:[#allocation14 + $0x3590] sm:$0xff]  ;;  %v2070_v56 = vld [vmem:[#allocation14 + $0xa98] sm:$0xff] }
 0x2d9   :  { %4223 = vmatpush.msrb.mxu2 %v2869_v54  ;;  %4248 = vmatpush.msrb.mxu3 %v3045_v60  ;;  %v2661_v10 = vld [vmem:[#allocation14 + $0x1d10] sm:$0xff]  ;;  %v1846_v46 = vld [vmem:[#allocation14 + $0x398] sm:$0xff] }
 0x2da   :  { %4256 = vmatpush.msra.mxu0 %v3493_v62  ;;  %4197 = vmatpush.msrb.mxu1 %v2709_v20  ;;  %v2773_v14 = vld [vmem:[#allocation14 + $0x2090] sm:$0xff]  ;;  %v2054_v60 = vld [vmem:[#allocation14 + $0xa18] sm:$0xff] }
 0x2db   :  { %4224 = vmatpush.msrb.mxu2 %v2853_v57  ;;  %4249 = vmatpush.msrb.mxu3 %v3029_v63  ;;  %v3429_v15 = vld [vmem:[#allocation14 + $0x3510] sm:$0xff]  ;;  %v1830_v63 = vld [vmem:[#allocation14 + $0x318] sm:$0xff] }
 0x2dc   :  { %4257 = vmatpush.msra.mxu0 %v3477_v1  ;;  %4198 = vmatpush.msrb.mxu1 %v2693_v3  ;;  %v2645_v16 = vld [vmem:[#allocation14 + $0x1c90] sm:$0xff]  ;;  %v2486_v1 = vld [vmem:[#allocation14 + $0x1798] sm:$0xff] }
 0x2dd   :  { %4225 = vmatpush.msrb.mxu2 %v2837_v61  ;;  %4250 = vmatpush.msrb.mxu3 %v3013_v12  ;;  %v2757_v37 = vld [vmem:[#allocation14 + $0x2010] sm:$0xff]  ;;  %v1814_v12 = vld [vmem:[#allocation14 + $0x298] sm:$0xff] }
 0x2de   :  { %4258 = vmatpush.msra.mxu0 %v3461_v5  ;;  %4251 = vmatmul.f32.vlgmr.msrb.gmra.mxu3 %v7740_v7  ;;  %v3413_v18 = vld [vmem:[#allocation14 + $0x3490] sm:$0xff]  ;;  %v2470_v5 = vld [vmem:[#allocation14 + $0x1718] sm:$0xff] }
 0x2df   :  { %4226 = vmatpush.msrb.mxu2 %v2821_v0  ;;  %4199 = vmatpush.msrb.mxu1 %v2677_v6  ;;  %v2629_v22 = vld [vmem:[#allocation14 + $0x1c10] sm:$0xff]  ;;  %v2038_v0 = vld [vmem:[#allocation14 + $0x998] sm:$0xff] }
 0x2e0   :  { %4315 = vmatpush.msra.mxu3 %v2230_v8  ;;  %4259 = vmatpush.msra.mxu0 %v3445_v9  ;;  %v3397_v23 = vld [vmem:[#allocation14 + $0x3410] sm:$0xff]  ;;  %v1798_v8 = vld [vmem:[#allocation14 + $0x218] sm:$0xff] }
 0x2e1   :  { %4227 = vmatpush.msrb.mxu2 %v2805_v4  ;;  %4200 = vmatpush.msrb.mxu1 %v2661_v10  ;;  %v2613_v26 = vld [vmem:[#allocation14 + $0x1b90] sm:$0xff]  ;;  %v2022_v4 = vld [vmem:[#allocation14 + $0x918] sm:$0xff] }
 0x2e2   :  { %4316 = vmatpush.msra.mxu3 %v2214_v31  ;;  %4260 = vmatpush.msra.mxu0 %v3429_v15  ;;  %v3381_v27 = vld [vmem:[#allocation14 + $0x3390] sm:$0xff]  ;;  %v2454_v9 = vld [vmem:[#allocation14 + $0x1698] sm:$0xff] }
 0x2e3   :  { %4228 = vmatpush.msrb.mxu2 %v2789_v59  ;;  %4201 = vmatpush.msrb.mxu1 %v2645_v16  ;;  %v2597_v30 = vld [vmem:[#allocation14 + $0x1b10] sm:$0xff]  ;;  %v2006_v59 = vld [vmem:[#allocation14 + $0x898] sm:$0xff] }
 0x2e4   :  { %4317 = vmatpush.msra.mxu3 %v2198_v17  ;;  %4261 = vmatpush.msra.mxu0 %v3413_v18  ;;  %v3365_v32 = vld [vmem:[#allocation14 + $0x3310] sm:$0xff]  ;;  %v1782_v31 = vld [vmem:[#allocation14 + $0x198] sm:$0xff] }
 0x2e5   :  { %4229 = vmatpush.msrb.mxu2 %v2773_v14  ;;  %4202 = vmatpush.msrb.mxu1 %v2629_v22  ;;  %v2581_v35 = vld [vmem:[#allocation14 + $0x1a90] sm:$0xff]  ;;  %v1990_v14 = vld [vmem:[#allocation14 + $0x818] sm:$0xff] }
 0x2e6   :  { %4318 = vmatpush.msra.mxu3 %v2182_v2  ;;  %4262 = vmatpush.msra.mxu0 %v3397_v23  ;;  %v3349_v36 = vld [vmem:[#allocation14 + $0x3290] sm:$0xff]  ;;  %v2438_v15 = vld [vmem:[#allocation14 + $0x1618] sm:$0xff] }
 0x2e7   :  { %4230 = vmatpush.msrb.mxu2 %v2757_v37  ;;  %4203 = vmatpush.msrb.mxu1 %v2613_v26  ;;  %v2565_v41 = vld [vmem:[#allocation14 + $0x1a10] sm:$0xff]  ;;  %v3254_v17 = vld [vmem:[#allocation14 + $0x2f98] sm:$0xff] }
 0x2e8   :  { %4231 = vmatmul.f32.vlgmr.msrb.gmra.mxu2 %v7737_v44  ;;  %4319 = vmatpush.msra.mxu3 %v2166_v25  ;;  %v3333_v42 = vld [vmem:[#allocation14 + $0x3210] sm:$0xff]  ;;  %v1766_v37 = vld [vmem:[#allocation14 + $0x118] sm:$0xff] }
 0x2e9   :  { %4295 = vmatpush.msra.mxu2 %v1974_v19  ;;  %4263 = vmatpush.msra.mxu0 %v3381_v27  ;;  %v2549_v47 = vld [vmem:[#allocation14 + $0x1990] sm:$0xff]  ;;  %v2422_v18 = vld [vmem:[#allocation14 + $0x1598] sm:$0xff] }
 0x2ea   :  { %4320 = vmatpush.msra.mxu3 %v2150_v29  ;;  %4204 = vmatpush.msrb.mxu1 %v2597_v30  ;;  %v3317_v48 = vld [vmem:[#allocation14 + $0x3190] sm:$0xff]  ;;  %v3238_v2 = vld [vmem:[#allocation14 + $0x2f18] sm:$0xff] }
 0x2eb   :  { %4296 = vmatpush.msra.mxu2 %v1958_v24  ;;  %4264 = vmatpush.msra.mxu0 %v3365_v32  ;;  %v2533_v52 = vld [vmem:[#allocation14 + $0x1910] sm:$0xff]  ;;  %v1750_v22 = vld [vmem:[#allocation14 + $0x98] sm:$0xff] }
 0x2ec   :  { %4321 = vmatpush.msra.mxu3 %v2134_v34  ;;  %4205 = vmatpush.msrb.mxu1 %v2581_v35  ;;  %v3301_v54 = vld [vmem:[#allocation14 + $0x3110] sm:$0xff]  ;;  %v2406_v23 = vld [vmem:[#allocation14 + $0x1518] sm:$0xff] }
 0x2ed   :  { %4297 = vmatpush.msra.mxu2 %v1942_v28  ;;  %4265 = vmatpush.msra.mxu0 %v3349_v36  ;;  %v2517_v57 = vld [vmem:[#allocation14 + $0x1890] sm:$0xff]  ;;  %v3222_v25 = vld [vmem:[#allocation14 + $0x2e98] sm:$0xff] }
 0x2ee   :  { %4322 = vmatpush.msra.mxu3 %v2118_v39  ;;  %4206 = vmatpush.msrb.mxu1 %v2565_v41  ;;  %v3285_v58 = vld [vmem:[#allocation14 + $0x3090] sm:$0xff]  ;;  %v1734_v26 = vld [vmem:[#allocation14 + $0x18] sm:$0xff] }
 0x2ef   :  { %4298 = vmatpush.msra.mxu2 %v1926_v33  ;;  %4266 = vmatpush.msra.mxu0 %v3333_v42  ;;  %v2501_v61 = vld [vmem:[#allocation14 + $0x1810] sm:$0xff]  ;;  %v2390_v27 = vld [vmem:[#allocation14 + $0x1498] sm:$0xff] }
 0x2f0   :  { %4323 = vmatpush.msra.mxu3 %v2102_v45  ;;  %4207 = vmatpush.msrb.mxu1 %v2549_v47  ;;  %v3269_v62 = vld [vmem:[#allocation14 + $0x3010] sm:$0xff]  ;;  %v2998_v28 = vld [vmem:[#allocation14 + $0x2798] sm:$0xff] }
 0x2f1   :  { %4299 = vmatpush.msra.mxu2 %v1910_v38  ;;  %4267 = vmatpush.msra.mxu0 %v3317_v48  ;;  %v3765_v20 = vld [vmem:[#allocation14 + $0x3f90] sm:$0xff]  ;;  %v3206_v29 = vld [vmem:[#allocation14 + $0x2e18] sm:$0xff] }
 0x2f2   :  { %4324 = vmatpush.msra.mxu3 %v2086_v51  ;;  %4208 = vmatpush.msrb.mxu1 %v2533_v52  ;;  %v3749_v3 = vld [vmem:[#allocation14 + $0x3f10] sm:$0xff]  ;;  %v2374_v32 = vld [vmem:[#allocation14 + $0x1418] sm:$0xff] }
 0x2f3   :  { %4300 = vmatpush.msra.mxu2 %v1894_v43  ;;  %4268 = vmatpush.msra.mxu0 %v3301_v54  ;;  %v3733_v6 = vld [vmem:[#allocation14 + $0x3e90] sm:$0xff]  ;;  %v2982_v33 = vld [vmem:[#allocation14 + $0x2718] sm:$0xff] }
 0x2f4   :  { %4325 = vmatpush.msra.mxu3 %v2070_v56  ;;  %4209 = vmatpush.msrb.mxu1 %v2517_v57  ;;  %v3717_v10 = vld [vmem:[#allocation14 + $0x3e10] sm:$0xff]  ;;  %v3190_v34 = vld [vmem:[#allocation14 + $0x2d98] sm:$0xff] }
 0x2f5   :  { %4301 = vmatpush.msra.mxu2 %v1878_v49  ;;  %4269 = vmatpush.msra.mxu0 %v3285_v58  ;;  %v3701_v16 = vld [vmem:[#allocation14 + $0x3d90] sm:$0xff]  ;;  %v2358_v36 = vld [vmem:[#allocation14 + $0x1398] sm:$0xff] }
 0x2f6   :  { %4326 = vmatpush.msra.mxu3 %v2054_v60  ;;  %4210 = vmatpush.msrb.mxu1 %v2501_v61  ;;  %v3685_v19 = vld [vmem:[#allocation14 + $0x3d10] sm:$0xff]  ;;  %v2966_v38 = vld [vmem:[#allocation14 + $0x2698] sm:$0xff] }
 0x2f7   :  { %4302 = vmatpush.msra.mxu2 %v1862_v55  ;;  %4270 = vmatpush.msra.mxu0 %v3269_v62  ;;  %v3669_v24 = vld [vmem:[#allocation14 + $0x3c90] sm:$0xff]  ;;  %v3174_v39 = vld [vmem:[#allocation14 + $0x2d18] sm:$0xff] }
 0x2f8   :  { %4211 = vmatmul.f32.vlgmr.msrb.gmra.mxu1 %v7728_v40  ;;  %4271 = vmatmul.f32.vlgmr.msra.gmra.mxu0 %v7746_v21  ;;  %v3653_v30 = vld [vmem:[#allocation14 + $0x3c10] sm:$0xff]  ;;  %v2342_v42 = vld [vmem:[#allocation14 + $0x1318] sm:$0xff] }
 0x2f9   :  { %4303 = vmatpush.msra.mxu2 %v1846_v46  ;;  %4275 = vmatpush.msra.mxu1 %v3765_v20  ;;  %v3637_v35 = vld [vmem:[#allocation14 + $0x3b90] sm:$0xff]  ;;  %v2950_v43 = vld [vmem:[#allocation14 + $0x2618] sm:$0xff] }
 0x2fa   :  { %4327 = vmatpush.msra.mxu3 %v2038_v0  ;;  %4335 = vmatpush.msrb.mxu0 %v2486_v1  ;;  %v3621_v41 = vld [vmem:[#allocation14 + $0x3b10] sm:$0xff]  ;;  %v3158_v45 = vld [vmem:[#allocation14 + $0x2c98] sm:$0xff] }
 0x2fb   :  { %4304 = vmatpush.msra.mxu2 %v1830_v63  ;;  %4276 = vmatpush.msra.mxu1 %v3749_v3  ;;  %v3605_v47 = vld [vmem:[#allocation14 + $0x3a90] sm:$0xff]  ;;  %v2326_v48 = vld [vmem:[#allocation14 + $0x1298] sm:$0xff] }
 0x2fc   :  { %4328 = vmatpush.msra.mxu3 %v2022_v4  ;;  %4336 = vmatpush.msrb.mxu0 %v2470_v5  ;;  %v2934_v49 = vld [vmem:[#allocation14 + $0x2598] sm:$0xff]  ;;  %v3589_v52 = vld [vmem:[#allocation14 + $0x3a10] sm:$0xff] }
 0x2fd   :  { %4305 = vmatpush.msra.mxu2 %v1814_v12  ;;  %4277 = vmatpush.msra.mxu1 %v3733_v6  ;;  %v3142_v51 = vld [vmem:[#allocation14 + $0x2c18] sm:$0xff]  ;;  %v3573_v57 = vld [vmem:[#allocation14 + $0x3990] sm:$0xff] }
 0x2fe   :  { %4329 = vmatpush.msra.mxu3 %v2006_v59  ;;  %4337 = vmatpush.msrb.mxu0 %v2454_v9  ;;  %v2310_v54 = vld [vmem:[#allocation14 + $0x1218] sm:$0xff]  ;;  %v3557_v61 = vld [vmem:[#allocation14 + $0x3910] sm:$0xff] }
 0x2ff   :  { %4306 = vmatpush.msra.mxu2 %v1798_v8  ;;  %4278 = vmatpush.msra.mxu1 %v3717_v10  ;;  %v2918_v55 = vld [vmem:[#allocation14 + $0x2518] sm:$0xff]  ;;  %v3541_v0 = vld [vmem:[#allocation14 + $0x3890] sm:$0xff] }
 0x300   :  { %4330 = vmatpush.msra.mxu3 %v1990_v14  ;;  %4338 = vmatpush.msrb.mxu0 %v2438_v15  ;;  %v3126_v56 = vld [vmem:[#allocation14 + $0x2b98] sm:$0xff]  ;;  %v3525_v4 = vld [vmem:[#allocation14 + $0x3810] sm:$0xff] }
 0x301   :  { %4307 = vmatpush.msra.mxu2 %v1782_v31  ;;  %4331 = vmatmul.f32.vlgmr.msra.gmra.mxu3 %v7718_v13  ;;  %v2294_v58 = vld [vmem:[#allocation14 + $0x1198] sm:$0xff] }
 0x302   :  { %4279 = vmatpush.msra.mxu1 %v3701_v16  ;;  %4395 = vmatpush.msrb.mxu3 %v3254_v17  ;;  %v2902_v46 = vld [vmem:[#allocation14 + $0x2498] sm:$0xff] }
 0x303   :  { %4308 = vmatpush.msra.mxu2 %v1766_v37  ;;  %4339 = vmatpush.msrb.mxu0 %v2422_v18  ;;  %v3110_v60 = vld [vmem:[#allocation14 + $0x2b18] sm:$0xff] }
 0x304   :  { %4280 = vmatpush.msra.mxu1 %v3685_v19  ;;  %4396 = vmatpush.msrb.mxu3 %v3238_v2  ;;  %v2278_v62 = vld [vmem:[#allocation14 + $0x1118] sm:$0xff] }
 0x305   :  { %4309 = vmatpush.msra.mxu2 %v1750_v22  ;;  %4340 = vmatpush.msrb.mxu0 %v2406_v23  ;;  %v2886_v20 = vld [vmem:[#allocation14 + $0x2418] sm:$0xff] }
 0x306   :  { %4281 = vmatpush.msra.mxu1 %v3669_v24  ;;  %4397 = vmatpush.msrb.mxu3 %v3222_v25  ;;  %v3094_v63 = vld [vmem:[#allocation14 + $0x2a98] sm:$0xff]  ;;  %v2231_v25 = vld [vmem:[#allocation14 + $0xfa0] sm:$0xff] }
 0x307   :  { %4310 = vmatpush.msra.mxu2 %v1734_v26  ;;  %4341 = vmatpush.msrb.mxu0 %v2390_v27  ;;  %v2262_v1 = vld [vmem:[#allocation14 + $0x1098] sm:$0xff] }
 0x308   :  { %4311 = vmatmul.f32.vlgmr.msra.gmra.mxu2 %v7724_v11  ;;  %4398 = vmatpush.msrb.mxu3 %v3206_v29  ;;  %v2870_v3 = vld [vmem:[#allocation14 + $0x2398] sm:$0xff]  ;;  %v2215_v29 = vld [vmem:[#allocation14 + $0xf20] sm:$0xff] }
 0x309   :  { %4375 = vmatpush.msrb.mxu2 %v2998_v28  ;;  %4282 = vmatpush.msra.mxu1 %v3653_v30  ;;  %v3078_v12 = vld [vmem:[#allocation14 + $0x2a18] sm:$0xff] }
 0x30a   :  { %4342 = vmatpush.msrb.mxu0 %v2374_v32  ;;  %4399 = vmatpush.msrb.mxu3 %v3190_v34  ;;  %v2246_v5 = vld [vmem:[#allocation14 + $0x1018] sm:$0xff]  ;;  %v2199_v34 = vld [vmem:[#allocation14 + $0xea0] sm:$0xff] }
 0x30b   :  { %4376 = vmatpush.msrb.mxu2 %v2982_v33  ;;  %4283 = vmatpush.msra.mxu1 %v3637_v35  ;;  %v2742_v6 = vld [vmem:[#allocation14 + $0x1f98] sm:$0xff] }
 0x30c   :  { %4343 = vmatpush.msrb.mxu0 %v2358_v36  ;;  %4400 = vmatpush.msrb.mxu3 %v3174_v39  ;;  %v2854_v8 = vld [vmem:[#allocation14 + $0x2318] sm:$0xff]  ;;  %v2183_v39 = vld [vmem:[#allocation14 + $0xe20] sm:$0xff] }
 0x30d   :  { %4377 = vmatpush.msrb.mxu2 %v2966_v38  ;;  %4284 = vmatpush.msra.mxu1 %v3621_v41  ;;  %v3062_v59 = vld [vmem:[#allocation14 + $0x2998] sm:$0xff]  ;;  %v1975_v38 = vld [vmem:[#allocation14 + $0x7a0] sm:$0xff] }
 0x30e   :  { %4344 = vmatpush.msrb.mxu0 %v2342_v42  ;;  %4401 = vmatpush.msrb.mxu3 %v3158_v45  ;;  %v3510_v9 = vld [vmem:[#allocation14 + $0x3798] sm:$0xff]  ;;  %v2167_v45 = vld [vmem:[#allocation14 + $0xda0] sm:$0xff] }
 0x30f   :  { %4378 = vmatpush.msrb.mxu2 %v2950_v43  ;;  %4285 = vmatpush.msra.mxu1 %v3605_v47  ;;  %v2726_v10 = vld [vmem:[#allocation14 + $0x1f18] sm:$0xff]  ;;  %v1959_v43 = vld [vmem:[#allocation14 + $0x720] sm:$0xff] }
 0x310   :  { %4345 = vmatpush.msrb.mxu0 %v2326_v48  ;;  %4402 = vmatpush.msrb.mxu3 %v3142_v51  ;;  %v2838_v31 = vld [vmem:[#allocation14 + $0x2298] sm:$0xff]  ;;  %v2151_v51 = vld [vmem:[#allocation14 + $0xd20] sm:$0xff] }
 0x311   :  { %4379 = vmatpush.msrb.mxu2 %v2934_v49  ;;  %4286 = vmatpush.msra.mxu1 %v3589_v52  ;;  %v3046_v14 = vld [vmem:[#allocation14 + $0x2918] sm:$0xff]  ;;  %v1943_v49 = vld [vmem:[#allocation14 + $0x6a0] sm:$0xff] }
 0x312   :  { %4346 = vmatpush.msrb.mxu0 %v2310_v54  ;;  %4403 = vmatpush.msrb.mxu3 %v3126_v56  ;;  %v3494_v15 = vld [vmem:[#allocation14 + $0x3718] sm:$0xff]  ;;  %v2135_v56 = vld [vmem:[#allocation14 + $0xca0] sm:$0xff] }
 0x313   :  { %4380 = vmatpush.msrb.mxu2 %v2918_v55  ;;  %4287 = vmatpush.msra.mxu1 %v3573_v57  ;;  %v2710_v16 = vld [vmem:[#allocation14 + $0x1e98] sm:$0xff]  ;;  %v1927_v55 = vld [vmem:[#allocation14 + $0x620] sm:$0xff] }
 0x314   :  { %4347 = vmatpush.msrb.mxu0 %v2294_v58  ;;  %4404 = vmatpush.msrb.mxu3 %v3110_v60  ;;  %v2822_v17 = vld [vmem:[#allocation14 + $0x2218] sm:$0xff]  ;;  %v2119_v60 = vld [vmem:[#allocation14 + $0xc20] sm:$0xff] }
 0x315   :  { %4381 = vmatpush.msrb.mxu2 %v2902_v46  ;;  %4288 = vmatpush.msra.mxu1 %v3557_v61  ;;  %v3030_v37 = vld [vmem:[#allocation14 + $0x2898] sm:$0xff]  ;;  %v1911_v46 = vld [vmem:[#allocation14 + $0x5a0] sm:$0xff] }
 0x316   :  { %4348 = vmatpush.msrb.mxu0 %v2278_v62  ;;  %4405 = vmatpush.msrb.mxu3 %v3094_v63  ;;  %v3478_v18 = vld [vmem:[#allocation14 + $0x3698] sm:$0xff]  ;;  %v2103_v63 = vld [vmem:[#allocation14 + $0xba0] sm:$0xff] }
 0x317   :  { %4382 = vmatpush.msrb.mxu2 %v2886_v20  ;;  %4289 = vmatpush.msra.mxu1 %v3541_v0  ;;  %v2694_v19 = vld [vmem:[#allocation14 + $0x1e18] sm:$0xff]  ;;  %v1895_v20 = vld [vmem:[#allocation14 + $0x520] sm:$0xff] }
 0x318   :  { %4349 = vmatpush.msrb.mxu0 %v2262_v1  ;;  %4406 = vmatpush.msrb.mxu3 %v3078_v12  ;;  %v2806_v2 = vld [vmem:[#allocation14 + $0x2198] sm:$0xff]  ;;  %v2087_v12 = vld [vmem:[#allocation14 + $0xb20] sm:$0xff] }
 0x319   :  { %4383 = vmatpush.msrb.mxu2 %v2870_v3  ;;  %4290 = vmatpush.msra.mxu1 %v3525_v4  ;;  %v3014_v22 = vld [vmem:[#allocation14 + $0x2818] sm:$0xff]  ;;  %v1879_v3 = vld [vmem:[#allocation14 + $0x4a0] sm:$0xff] }
 0x31a   :  { %4350 = vmatpush.msrb.mxu0 %v2246_v5  ;;  %4291 = vmatmul.f32.vlgmr.msra.gmra.mxu1 %v7752_v50  ;;  %v3462_v23 = vld [vmem:[#allocation14 + $0x3618] sm:$0xff] }
 0x31b   :  { %4351 = vmatmul.f32.vlgmr.msrb.gmra.mxu0 %v7732_v53  ;;  %4355 = vmatpush.msrb.mxu1 %v2742_v6  ;;  %v2678_v24 = vld [vmem:[#allocation14 + $0x1d98] sm:$0xff]  ;;  %v1863_v6 = vld [vmem:[#allocation14 + $0x420] sm:$0xff] }
 0x31c   :  { %4384 = vmatpush.msrb.mxu2 %v2854_v8  ;;  %4407 = vmatpush.msrb.mxu3 %v3062_v59  ;;  %v2790_v26 = vld [vmem:[#allocation14 + $0x2118] sm:$0xff]  ;;  %v2071_v8 = vld [vmem:[#allocation14 + $0xaa0] sm:$0xff] }
 0x31d   :  { %4415 = vmatpush.msra.mxu0 %v3510_v9  ;;  %4356 = vmatpush.msrb.mxu1 %v2726_v10  ;;  %v3446_v27 = vld [vmem:[#allocation14 + $0x3598] sm:$0xff]  ;;  %v1847_v10 = vld [vmem:[#allocation14 + $0x3a0] sm:$0xff] }
 0x31e   :  { %4385 = vmatpush.msrb.mxu2 %v2838_v31  ;;  %4408 = vmatpush.msrb.mxu3 %v3046_v14  ;;  %v2662_v28 = vld [vmem:[#allocation14 + $0x1d18] sm:$0xff]  ;;  %v2055_v31 = vld [vmem:[#allocation14 + $0xa20] sm:$0xff] }
 0x31f   :  { %4416 = vmatpush.msra.mxu0 %v3494_v15  ;;  %4357 = vmatpush.msrb.mxu1 %v2710_v16  ;;  %v2774_v30 = vld [vmem:[#allocation14 + $0x2098] sm:$0xff] }
 0x320   :  { %4386 = vmatpush.msrb.mxu2 %v2822_v17  ;;  %4409 = vmatpush.msrb.mxu3 %v3030_v37  ;;  %v3430_v32 = vld [vmem:[#allocation14 + $0x3518] sm:$0xff]  ;;  %v1831_v17 = vld [vmem:[#allocation14 + $0x320] sm:$0xff] }
 0x321   :  { %4417 = vmatpush.msra.mxu0 %v3478_v18  ;;  %4358 = vmatpush.msrb.mxu1 %v2694_v19  ;;  %v2646_v33 = vld [vmem:[#allocation14 + $0x1c98] sm:$0xff]  ;;  %v2039_v37 = vld [vmem:[#allocation14 + $0x9a0] sm:$0xff] }
 0x322   :  { %4387 = vmatpush.msrb.mxu2 %v2806_v2  ;;  %4410 = vmatpush.msrb.mxu3 %v3014_v22  ;;  %v2758_v35 = vld [vmem:[#allocation14 + $0x2018] sm:$0xff]  ;;  %v2487_v18 = vld [vmem:[#allocation14 + $0x17a0] sm:$0xff] }
 0x323   :  { %4418 = vmatpush.msra.mxu0 %v3462_v23  ;;  %4411 = vmatmul.f32.vlgmr.msrb.gmra.mxu3 %v7740_v7  ;;  %v3414_v36 = vld [vmem:[#allocation14 + $0x3498] sm:$0xff]  ;;  %v1815_v2 = vld [vmem:[#allocation14 + $0x2a0] sm:$0xff] }
 0x324   :  { %4359 = vmatpush.msrb.mxu1 %v2678_v24  ;;  %4475 = vmatpush.msra.mxu3 %v2231_v25  ;;  %v2630_v41 = vld [vmem:[#allocation14 + $0x1c18] sm:$0xff]  ;;  %v2023_v22 = vld [vmem:[#allocation14 + $0x920] sm:$0xff] }
 0x325   :  { %4388 = vmatpush.msrb.mxu2 %v2790_v26  ;;  %4419 = vmatpush.msra.mxu0 %v3446_v27  ;;  %v3398_v42 = vld [vmem:[#allocation14 + $0x3418] sm:$0xff]  ;;  %v2471_v23 = vld [vmem:[#allocation14 + $0x1720] sm:$0xff] }
 0x326   :  { %4360 = vmatpush.msrb.mxu1 %v2662_v28  ;;  %4476 = vmatpush.msra.mxu3 %v2215_v29  ;;  %v2614_v47 = vld [vmem:[#allocation14 + $0x1b98] sm:$0xff]  ;;  %v1799_v25 = vld [vmem:[#allocation14 + $0x220] sm:$0xff] }
 0x327   :  { %4389 = vmatpush.msrb.mxu2 %v2774_v30  ;;  %4420 = vmatpush.msra.mxu0 %v3430_v32  ;;  %v3382_v48 = vld [vmem:[#allocation14 + $0x3398] sm:$0xff]  ;;  %v2007_v26 = vld [vmem:[#allocation14 + $0x8a0] sm:$0xff] }
 0x328   :  { %4361 = vmatpush.msrb.mxu1 %v2646_v33  ;;  %4477 = vmatpush.msra.mxu3 %v2199_v34  ;;  %v2598_v52 = vld [vmem:[#allocation14 + $0x1b18] sm:$0xff]  ;;  %v2455_v27 = vld [vmem:[#allocation14 + $0x16a0] sm:$0xff] }
 0x329   :  { %4390 = vmatpush.msrb.mxu2 %v2758_v35  ;;  %4421 = vmatpush.msra.mxu0 %v3414_v36  ;;  %v3366_v54 = vld [vmem:[#allocation14 + $0x3318] sm:$0xff]  ;;  %v1783_v29 = vld [vmem:[#allocation14 + $0x1a0] sm:$0xff] }
 0x32a   :  { %4391 = vmatmul.f32.vlgmr.msrb.gmra.mxu2 %v7737_v44  ;;  %4478 = vmatpush.msra.mxu3 %v2183_v39  ;;  %v2582_v57 = vld [vmem:[#allocation14 + $0x1a98] sm:$0xff]  ;;  %v1991_v30 = vld [vmem:[#allocation14 + $0x820] sm:$0xff] }
 0x32b   :  { %4455 = vmatpush.msra.mxu2 %v1975_v38  ;;  %4362 = vmatpush.msrb.mxu1 %v2630_v41  ;;  %v3350_v58 = vld [vmem:[#allocation14 + $0x3298] sm:$0xff]  ;;  %v2439_v32 = vld [vmem:[#allocation14 + $0x1620] sm:$0xff] }
 0x32c   :  { %4422 = vmatpush.msra.mxu0 %v3398_v42  ;;  %4479 = vmatpush.msra.mxu3 %v2167_v45  ;;  %v2566_v61 = vld [vmem:[#allocation14 + $0x1a18] sm:$0xff]  ;;  %v3255_v34 = vld [vmem:[#allocation14 + $0x2fa0] sm:$0xff] }
 0x32d   :  { %4456 = vmatpush.msra.mxu2 %v1959_v43  ;;  %4363 = vmatpush.msrb.mxu1 %v2614_v47  ;;  %v3334_v62 = vld [vmem:[#allocation14 + $0x3218] sm:$0xff]  ;;  %v1767_v35 = vld [vmem:[#allocation14 + $0x120] sm:$0xff] }
 0x32e   :  { %4423 = vmatpush.msra.mxu0 %v3382_v48  ;;  %4480 = vmatpush.msra.mxu3 %v2151_v51  ;;  %v2550_v0 = vld [vmem:[#allocation14 + $0x1998] sm:$0xff]  ;;  %v2423_v36 = vld [vmem:[#allocation14 + $0x15a0] sm:$0xff] }
 0x32f   :  { %4457 = vmatpush.msra.mxu2 %v1943_v49  ;;  %4364 = vmatpush.msrb.mxu1 %v2598_v52  ;;  %v3318_v1 = vld [vmem:[#allocation14 + $0x3198] sm:$0xff]  ;;  %v3239_v39 = vld [vmem:[#allocation14 + $0x2f20] sm:$0xff] }
 0x330   :  { %4424 = vmatpush.msra.mxu0 %v3366_v54  ;;  %4481 = vmatpush.msra.mxu3 %v2135_v56  ;;  %v2534_v4 = vld [vmem:[#allocation14 + $0x1918] sm:$0xff]  ;;  %v1751_v41 = vld [vmem:[#allocation14 + $0xa0] sm:$0xff] }
 0x331   :  { %4458 = vmatpush.msra.mxu2 %v1927_v55  ;;  %4365 = vmatpush.msrb.mxu1 %v2582_v57  ;;  %v3302_v5 = vld [vmem:[#allocation14 + $0x3118] sm:$0xff]  ;;  %v2407_v42 = vld [vmem:[#allocation14 + $0x1520] sm:$0xff] }
 0x332   :  { %4425 = vmatpush.msra.mxu0 %v3350_v58  ;;  %4482 = vmatpush.msra.mxu3 %v2119_v60  ;;  %v2518_v59 = vld [vmem:[#allocation14 + $0x1898] sm:$0xff]  ;;  %v3223_v45 = vld [vmem:[#allocation14 + $0x2ea0] sm:$0xff] }
 0x333   :  { %4459 = vmatpush.msra.mxu2 %v1911_v46  ;;  %4366 = vmatpush.msrb.mxu1 %v2566_v61  ;;  %v3286_v9 = vld [vmem:[#allocation14 + $0x3098] sm:$0xff]  ;;  %v1735_v47 = vld [vmem:[#allocation14 + $0x20] sm:$0xff] }
 0x334   :  { %4426 = vmatpush.msra.mxu0 %v3334_v62  ;;  %4483 = vmatpush.msra.mxu3 %v2103_v63  ;;  %v2502_v14 = vld [vmem:[#allocation14 + $0x1818] sm:$0xff]  ;;  %v2391_v48 = vld [vmem:[#allocation14 + $0x14a0] sm:$0xff] }
 0x335   :  { %4460 = vmatpush.msra.mxu2 %v1895_v20  ;;  %4367 = vmatpush.msrb.mxu1 %v2550_v0  ;;  %v3270_v15 = vld [vmem:[#allocation14 + $0x3018] sm:$0xff]  ;;  %v2999_v49 = vld [vmem:[#allocation14 + $0x27a0] sm:$0xff] }
 0x336   :  { %4427 = vmatpush.msra.mxu0 %v3318_v1  ;;  %4484 = vmatpush.msra.mxu3 %v2087_v12  ;;  %v3766_v16 = vld [vmem:[#allocation14 + $0x3f98] sm:$0xff]  ;;  %v3207_v51 = vld [vmem:[#allocation14 + $0x2e20] sm:$0xff] }
 0x337   :  { %4461 = vmatpush.msra.mxu2 %v1879_v3  ;;  %4368 = vmatpush.msrb.mxu1 %v2534_v4  ;;  %v3750_v19 = vld [vmem:[#allocation14 + $0x3f18] sm:$0xff]  ;;  %v2375_v54 = vld [vmem:[#allocation14 + $0x1420] sm:$0xff] }
 0x338   :  { %4428 = vmatpush.msra.mxu0 %v3302_v5  ;;  %4485 = vmatpush.msra.mxu3 %v2071_v8  ;;  %v3734_v24 = vld [vmem:[#allocation14 + $0x3e98] sm:$0xff]  ;;  %v2983_v55 = vld [vmem:[#allocation14 + $0x2720] sm:$0xff] }
 0x339   :  { %4462 = vmatpush.msra.mxu2 %v1863_v6  ;;  %4369 = vmatpush.msrb.mxu1 %v2518_v59  ;;  %v3718_v28 = vld [vmem:[#allocation14 + $0x3e18] sm:$0xff]  ;;  %v3191_v56 = vld [vmem:[#allocation14 + $0x2da0] sm:$0xff] }
 0x33a   :  { %4429 = vmatpush.msra.mxu0 %v3286_v9  ;;  %4486 = vmatpush.msra.mxu3 %v2055_v31  ;;  %v3702_v33 = vld [vmem:[#allocation14 + $0x3d98] sm:$0xff]  ;;  %v2359_v58 = vld [vmem:[#allocation14 + $0x13a0] sm:$0xff] }
 0x33b   :  { %4463 = vmatpush.msra.mxu2 %v1847_v10  ;;  %4370 = vmatpush.msrb.mxu1 %v2502_v14  ;;  %v3686_v38 = vld [vmem:[#allocation14 + $0x3d18] sm:$0xff]  ;;  %v2967_v46 = vld [vmem:[#allocation14 + $0x26a0] sm:$0xff] }
 0x33c   :  { %4430 = vmatpush.msra.mxu0 %v3270_v15  ;;  %4371 = vmatmul.f32.vlgmr.msrb.gmra.mxu1 %v7728_v40  ;;  %v3670_v43 = vld [vmem:[#allocation14 + $0x3c98] sm:$0xff]  ;;  %v3175_v60 = vld [vmem:[#allocation14 + $0x2d20] sm:$0xff] }
 0x33d   :  { %4431 = vmatmul.f32.vlgmr.msra.gmra.mxu0 %v7746_v21  ;;  %4435 = vmatpush.msra.mxu1 %v3766_v16  ;;  %v3654_v52 = vld [vmem:[#allocation14 + $0x3c18] sm:$0xff]  ;;  %v2343_v62 = vld [vmem:[#allocation14 + $0x1320] sm:$0xff] }
 0x33e   :  { %4464 = vmatpush.msra.mxu2 %v1831_v17  ;;  %4487 = vmatpush.msra.mxu3 %v2039_v37  ;;  %v3638_v57 = vld [vmem:[#allocation14 + $0x3b98] sm:$0xff]  ;;  %v2951_v20 = vld [vmem:[#allocation14 + $0x2620] sm:$0xff] }
 0x33f   :  { %4495 = vmatpush.msrb.mxu0 %v2487_v18  ;;  %4436 = vmatpush.msra.mxu1 %v3750_v19  ;;  %v3622_v61 = vld [vmem:[#allocation14 + $0x3b18] sm:$0xff]  ;;  %v3159_v63 = vld [vmem:[#allocation14 + $0x2ca0] sm:$0xff] }
 0x340   :  { %4465 = vmatpush.msra.mxu2 %v1815_v2  ;;  %4488 = vmatpush.msra.mxu3 %v2023_v22  ;;  %v3606_v0 = vld [vmem:[#allocation14 + $0x3a98] sm:$0xff]  ;;  %v2327_v1 = vld [vmem:[#allocation14 + $0x12a0] sm:$0xff] }
 0x341   :  { %4496 = vmatpush.msrb.mxu0 %v2471_v23  ;;  %4437 = vmatpush.msra.mxu1 %v3734_v24  ;;  %v2935_v3 = vld [vmem:[#allocation14 + $0x25a0] sm:$0xff]  ;;  %v3590_v4 = vld [vmem:[#allocation14 + $0x3a18] sm:$0xff] }
 0x342   :  { %4466 = vmatpush.msra.mxu2 %v1799_v25  ;;  %4489 = vmatpush.msra.mxu3 %v2007_v26  ;;  %v3143_v12 = vld [vmem:[#allocation14 + $0x2c20] sm:$0xff]  ;;  %v3574_v59 = vld [vmem:[#allocation14 + $0x3998] sm:$0xff] }
 0x343   :  { %4497 = vmatpush.msrb.mxu0 %v2455_v27  ;;  %4438 = vmatpush.msra.mxu1 %v3718_v28  ;;  %v2311_v5 = vld [vmem:[#allocation14 + $0x1220] sm:$0xff]  ;;  %v3558_v14 = vld [vmem:[#allocation14 + $0x3918] sm:$0xff] }
 0x344   :  { %4467 = vmatpush.msra.mxu2 %v1783_v29  ;;  %4490 = vmatpush.msra.mxu3 %v1991_v30  ;;  %v2919_v6 = vld [vmem:[#allocation14 + $0x2520] sm:$0xff]  ;;  %v3542_v37 = vld [vmem:[#allocation14 + $0x3898] sm:$0xff] }
 0x345   :  { %4498 = vmatpush.msrb.mxu0 %v2439_v32  ;;  %4491 = vmatmul.f32.vlgmr.msra.gmra.mxu3 %v7718_v13  ;;  %v3127_v8 = vld [vmem:[#allocation14 + $0x2ba0] sm:$0xff]  ;;  %v3526_v22 = vld [vmem:[#allocation14 + $0x3818] sm:$0xff] }
 0x346   :  { %4439 = vmatpush.msra.mxu1 %v3702_v33  ;;  %4555 = vmatpush.msrb.mxu3 %v3255_v34  ;;  %v2295_v9 = vld [vmem:[#allocation14 + $0x11a0] sm:$0xff] }
 0x347   :  { %4468 = vmatpush.msra.mxu2 %v1767_v35  ;;  %4499 = vmatpush.msrb.mxu0 %v2423_v36  ;;  %v2903_v10 = vld [vmem:[#allocation14 + $0x24a0] sm:$0xff] }
 0x348   :  { %4440 = vmatpush.msra.mxu1 %v3686_v38  ;;  %4556 = vmatpush.msrb.mxu3 %v3239_v39  ;;  %v3111_v31 = vld [vmem:[#allocation14 + $0x2b20] sm:$0xff] }
 0x349   :  { %4469 = vmatpush.msra.mxu2 %v1751_v41  ;;  %4500 = vmatpush.msrb.mxu0 %v2407_v42  ;;  %v2279_v15 = vld [vmem:[#allocation14 + $0x1120] sm:$0xff] }
 0x34a   :  { %4441 = vmatpush.msra.mxu1 %v3670_v43  ;;  %4557 = vmatpush.msrb.mxu3 %v3223_v45  ;;  %v2887_v16 = vld [vmem:[#allocation14 + $0x2420] sm:$0xff]  ;;  %v2232_v45 = vld [vmem:[#allocation14 + $0xfa8] sm:$0xff] }
 0x34b   :  { %4470 = vmatpush.msra.mxu2 %v1735_v47  ;;  %4501 = vmatpush.msrb.mxu0 %v2391_v48  ;;  %v3095_v17 = vld [vmem:[#allocation14 + $0x2aa0] sm:$0xff] }
 0x34c   :  { %4471 = vmatmul.f32.vlgmr.msra.gmra.mxu2 %v7724_v11  ;;  %4558 = vmatpush.msrb.mxu3 %v3207_v51  ;;  %v2263_v18 = vld [vmem:[#allocation14 + $0x10a0] sm:$0xff]  ;;  %v2216_v51 = vld [vmem:[#allocation14 + $0xf28] sm:$0xff] }
 0x34d   :  { %4535 = vmatpush.msrb.mxu2 %v2999_v49  ;;  %4442 = vmatpush.msra.mxu1 %v3654_v52  ;;  %v2871_v19 = vld [vmem:[#allocation14 + $0x23a0] sm:$0xff] }
 0x34e   :  { %4502 = vmatpush.msrb.mxu0 %v2375_v54  ;;  %4559 = vmatpush.msrb.mxu3 %v3191_v56  ;;  %v3079_v2 = vld [vmem:[#allocation14 + $0x2a20] sm:$0xff]  ;;  %v2200_v56 = vld [vmem:[#allocation14 + $0xea8] sm:$0xff] }
 0x34f   :  { %4536 = vmatpush.msrb.mxu2 %v2983_v55  ;;  %4443 = vmatpush.msra.mxu1 %v3638_v57  ;;  %v2247_v23 = vld [vmem:[#allocation14 + $0x1020] sm:$0xff] }
 0x350   :  { %4503 = vmatpush.msrb.mxu0 %v2359_v58  ;;  %4560 = vmatpush.msrb.mxu3 %v3175_v60  ;;  %v2743_v24 = vld [vmem:[#allocation14 + $0x1fa0] sm:$0xff]  ;;  %v2184_v60 = vld [vmem:[#allocation14 + $0xe28] sm:$0xff] }
 0x351   :  { %4537 = vmatpush.msrb.mxu2 %v2967_v46  ;;  %4444 = vmatpush.msra.mxu1 %v3622_v61  ;;  %v2855_v25 = vld [vmem:[#allocation14 + $0x2320] sm:$0xff]  ;;  %v1976_v46 = vld [vmem:[#allocation14 + $0x7a8] sm:$0xff] }
 0x352   :  { %4504 = vmatpush.msrb.mxu0 %v2343_v62  ;;  %4561 = vmatpush.msrb.mxu3 %v3159_v63  ;;  %v3063_v26 = vld [vmem:[#allocation14 + $0x29a0] sm:$0xff]  ;;  %v2168_v63 = vld [vmem:[#allocation14 + $0xda8] sm:$0xff] }
 0x353   :  { %4538 = vmatpush.msrb.mxu2 %v2951_v20  ;;  %4445 = vmatpush.msra.mxu1 %v3606_v0  ;;  %v3511_v27 = vld [vmem:[#allocation14 + $0x37a0] sm:$0xff]  ;;  %v1960_v20 = vld [vmem:[#allocation14 + $0x728] sm:$0xff] }
 0x354   :  { %4505 = vmatpush.msrb.mxu0 %v2327_v1  ;;  %4562 = vmatpush.msrb.mxu3 %v3143_v12  ;;  %v2727_v28 = vld [vmem:[#allocation14 + $0x1f20] sm:$0xff]  ;;  %v2152_v12 = vld [vmem:[#allocation14 + $0xd28] sm:$0xff] }
 0x355   :  { %4539 = vmatpush.msrb.mxu2 %v2935_v3  ;;  %4446 = vmatpush.msra.mxu1 %v3590_v4  ;;  %v2839_v29 = vld [vmem:[#allocation14 + $0x22a0] sm:$0xff]  ;;  %v1944_v3 = vld [vmem:[#allocation14 + $0x6a8] sm:$0xff] }
 0x356   :  { %4506 = vmatpush.msrb.mxu0 %v2311_v5  ;;  %4563 = vmatpush.msrb.mxu3 %v3127_v8  ;;  %v3047_v30 = vld [vmem:[#allocation14 + $0x2920] sm:$0xff]  ;;  %v2136_v8 = vld [vmem:[#allocation14 + $0xca8] sm:$0xff] }
 0x357   :  { %4540 = vmatpush.msrb.mxu2 %v2919_v6  ;;  %4447 = vmatpush.msra.mxu1 %v3574_v59  ;;  %v3495_v32 = vld [vmem:[#allocation14 + $0x3720] sm:$0xff]  ;;  %v1928_v6 = vld [vmem:[#allocation14 + $0x628] sm:$0xff] }
 0x358   :  { %4507 = vmatpush.msrb.mxu0 %v2295_v9  ;;  %4564 = vmatpush.msrb.mxu3 %v3111_v31  ;;  %v2711_v33 = vld [vmem:[#allocation14 + $0x1ea0] sm:$0xff]  ;;  %v2120_v31 = vld [vmem:[#allocation14 + $0xc28] sm:$0xff] }
 0x359   :  { %4541 = vmatpush.msrb.mxu2 %v2903_v10  ;;  %4448 = vmatpush.msra.mxu1 %v3558_v14  ;;  %v2823_v34 = vld [vmem:[#allocation14 + $0x2220] sm:$0xff]  ;;  %v1912_v10 = vld [vmem:[#allocation14 + $0x5a8] sm:$0xff] }
 0x35a   :  { %4508 = vmatpush.msrb.mxu0 %v2279_v15  ;;  %4565 = vmatpush.msrb.mxu3 %v3095_v17  ;;  %v3031_v35 = vld [vmem:[#allocation14 + $0x28a0] sm:$0xff]  ;;  %v2104_v17 = vld [vmem:[#allocation14 + $0xba8] sm:$0xff] }
 0x35b   :  { %4542 = vmatpush.msrb.mxu2 %v2887_v16  ;;  %4449 = vmatpush.msra.mxu1 %v3542_v37  ;;  %v3479_v36 = vld [vmem:[#allocation14 + $0x36a0] sm:$0xff]  ;;  %v1896_v16 = vld [vmem:[#allocation14 + $0x528] sm:$0xff] }
 0x35c   :  { %4509 = vmatpush.msrb.mxu0 %v2263_v18  ;;  %4566 = vmatpush.msrb.mxu3 %v3079_v2  ;;  %v2695_v38 = vld [vmem:[#allocation14 + $0x1e20] sm:$0xff]  ;;  %v2088_v2 = vld [vmem:[#allocation14 + $0xb28] sm:$0xff] }
 0x35d   :  { %4543 = vmatpush.msrb.mxu2 %v2871_v19  ;;  %4450 = vmatpush.msra.mxu1 %v3526_v22  ;;  %v2807_v39 = vld [vmem:[#allocation14 + $0x21a0] sm:$0xff]  ;;  %v1880_v19 = vld [vmem:[#allocation14 + $0x4a8] sm:$0xff] }
 0x35e   :  { %4510 = vmatpush.msrb.mxu0 %v2247_v23  ;;  %4451 = vmatmul.f32.vlgmr.msra.gmra.mxu1 %v7752_v50  ;;  %v3015_v41 = vld [vmem:[#allocation14 + $0x2820] sm:$0xff] }
 0x35f   :  { %4511 = vmatmul.f32.vlgmr.msrb.gmra.mxu0 %v7732_v53  ;;  %4515 = vmatpush.msrb.mxu1 %v2743_v24  ;;  %v3463_v42 = vld [vmem:[#allocation14 + $0x3620] sm:$0xff]  ;;  %v1864_v24 = vld [vmem:[#allocation14 + $0x428] sm:$0xff] }
 0x360   :  { %4544 = vmatpush.msrb.mxu2 %v2855_v25  ;;  %4567 = vmatpush.msrb.mxu3 %v3063_v26  ;;  %v2679_v43 = vld [vmem:[#allocation14 + $0x1da0] sm:$0xff]  ;;  %v2072_v25 = vld [vmem:[#allocation14 + $0xaa8] sm:$0xff] }
 0x361   :  { %4575 = vmatpush.msra.mxu0 %v3511_v27  ;;  %4516 = vmatpush.msrb.mxu1 %v2727_v28  ;;  %v2791_v47 = vld [vmem:[#allocation14 + $0x2120] sm:$0xff]  ;;  %v1848_v28 = vld [vmem:[#allocation14 + $0x3a8] sm:$0xff] }
 0x362   :  { %4545 = vmatpush.msrb.mxu2 %v2839_v29  ;;  %4568 = vmatpush.msrb.mxu3 %v3047_v30  ;;  %v3447_v48 = vld [vmem:[#allocation14 + $0x35a0] sm:$0xff]  ;;  %v2056_v29 = vld [vmem:[#allocation14 + $0xa28] sm:$0xff] }
 0x363   :  { %4576 = vmatpush.msra.mxu0 %v3495_v32  ;;  %4517 = vmatpush.msrb.mxu1 %v2711_v33  ;;  %v2663_v49 = vld [vmem:[#allocation14 + $0x1d20] sm:$0xff] }
 0x364   :  { %4546 = vmatpush.msrb.mxu2 %v2823_v34  ;;  %4569 = vmatpush.msrb.mxu3 %v3031_v35  ;;  %v2775_v52 = vld [vmem:[#allocation14 + $0x20a0] sm:$0xff]  ;;  %v1832_v34 = vld [vmem:[#allocation14 + $0x328] sm:$0xff] }
 0x365   :  { %4577 = vmatpush.msra.mxu0 %v3479_v36  ;;  %4518 = vmatpush.msrb.mxu1 %v2695_v38  ;;  %v3431_v54 = vld [vmem:[#allocation14 + $0x3520] sm:$0xff]  ;;  %v2040_v35 = vld [vmem:[#allocation14 + $0x9a8] sm:$0xff] }
 0x366   :  { %4547 = vmatpush.msrb.mxu2 %v2807_v39  ;;  %4570 = vmatpush.msrb.mxu3 %v3015_v41  ;;  %v2647_v55 = vld [vmem:[#allocation14 + $0x1ca0] sm:$0xff]  ;;  %v2488_v36 = vld [vmem:[#allocation14 + $0x17a8] sm:$0xff] }
 0x367   :  { %4578 = vmatpush.msra.mxu0 %v3463_v42  ;;  %4571 = vmatmul.f32.vlgmr.msrb.gmra.mxu3 %v7740_v7  ;;  %v2759_v57 = vld [vmem:[#allocation14 + $0x2020] sm:$0xff]  ;;  %v1816_v39 = vld [vmem:[#allocation14 + $0x2a8] sm:$0xff] }
 0x368   :  { %4519 = vmatpush.msrb.mxu1 %v2679_v43  ;;  %4635 = vmatpush.msra.mxu3 %v2232_v45  ;;  %v3415_v58 = vld [vmem:[#allocation14 + $0x34a0] sm:$0xff]  ;;  %v2024_v41 = vld [vmem:[#allocation14 + $0x928] sm:$0xff] }
 0x369   :  { %4548 = vmatpush.msrb.mxu2 %v2791_v47  ;;  %4579 = vmatpush.msra.mxu0 %v3447_v48  ;;  %v2631_v61 = vld [vmem:[#allocation14 + $0x1c20] sm:$0xff]  ;;  %v2472_v42 = vld [vmem:[#allocation14 + $0x1728] sm:$0xff] }
 0x36a   :  { %4520 = vmatpush.msrb.mxu1 %v2663_v49  ;;  %4636 = vmatpush.msra.mxu3 %v2216_v51  ;;  %v3399_v62 = vld [vmem:[#allocation14 + $0x3420] sm:$0xff]  ;;  %v1800_v45 = vld [vmem:[#allocation14 + $0x228] sm:$0xff] }
 0x36b   :  { %4549 = vmatpush.msrb.mxu2 %v2775_v52  ;;  %4580 = vmatpush.msra.mxu0 %v3431_v54  ;;  %v2615_v0 = vld [vmem:[#allocation14 + $0x1ba0] sm:$0xff]  ;;  %v2008_v47 = vld [vmem:[#allocation14 + $0x8a8] sm:$0xff] }
 0x36c   :  { %4521 = vmatpush.msrb.mxu1 %v2647_v55  ;;  %4637 = vmatpush.msra.mxu3 %v2200_v56  ;;  %v3383_v1 = vld [vmem:[#allocation14 + $0x33a0] sm:$0xff]  ;;  %v2456_v48 = vld [vmem:[#allocation14 + $0x16a8] sm:$0xff] }
 0x36d   :  { %4550 = vmatpush.msrb.mxu2 %v2759_v57  ;;  %4581 = vmatpush.msra.mxu0 %v3415_v58  ;;  %v2599_v4 = vld [vmem:[#allocation14 + $0x1b20] sm:$0xff]  ;;  %v1784_v51 = vld [vmem:[#allocation14 + $0x1a8] sm:$0xff] }
 0x36e   :  { %4551 = vmatmul.f32.vlgmr.msrb.gmra.mxu2 %v7737_v44  ;;  %4638 = vmatpush.msra.mxu3 %v2184_v60  ;;  %v3367_v5 = vld [vmem:[#allocation14 + $0x3320] sm:$0xff]  ;;  %v1992_v52 = vld [vmem:[#allocation14 + $0x828] sm:$0xff] }
 0x36f   :  { %4615 = vmatpush.msra.mxu2 %v1976_v46  ;;  %4522 = vmatpush.msrb.mxu1 %v2631_v61  ;;  %v2583_v59 = vld [vmem:[#allocation14 + $0x1aa0] sm:$0xff]  ;;  %v2440_v54 = vld [vmem:[#allocation14 + $0x1628] sm:$0xff] }
 0x370   :  { %4582 = vmatpush.msra.mxu0 %v3399_v62  ;;  %4639 = vmatpush.msra.mxu3 %v2168_v63  ;;  %v3351_v9 = vld [vmem:[#allocation14 + $0x32a0] sm:$0xff]  ;;  %v3256_v56 = vld [vmem:[#allocation14 + $0x2fa8] sm:$0xff] }
 0x371   :  { %4616 = vmatpush.msra.mxu2 %v1960_v20  ;;  %4523 = vmatpush.msrb.mxu1 %v2615_v0  ;;  %v2567_v14 = vld [vmem:[#allocation14 + $0x1a20] sm:$0xff]  ;;  %v1768_v57 = vld [vmem:[#allocation14 + $0x128] sm:$0xff] }
 0x372   :  { %4583 = vmatpush.msra.mxu0 %v3383_v1  ;;  %4640 = vmatpush.msra.mxu3 %v2152_v12  ;;  %v3335_v15 = vld [vmem:[#allocation14 + $0x3220] sm:$0xff]  ;;  %v2424_v58 = vld [vmem:[#allocation14 + $0x15a8] sm:$0xff] }
 0x373   :  { %4617 = vmatpush.msra.mxu2 %v1944_v3  ;;  %4524 = vmatpush.msrb.mxu1 %v2599_v4  ;;  %v2551_v37 = vld [vmem:[#allocation14 + $0x19a0] sm:$0xff]  ;;  %v3240_v60 = vld [vmem:[#allocation14 + $0x2f28] sm:$0xff] }
 0x374   :  { %4584 = vmatpush.msra.mxu0 %v3367_v5  ;;  %4641 = vmatpush.msra.mxu3 %v2136_v8  ;;  %v3319_v18 = vld [vmem:[#allocation14 + $0x31a0] sm:$0xff]  ;;  %v1752_v61 = vld [vmem:[#allocation14 + $0xa8] sm:$0xff] }
 0x375   :  { %4618 = vmatpush.msra.mxu2 %v1928_v6  ;;  %4525 = vmatpush.msrb.mxu1 %v2583_v59  ;;  %v2535_v22 = vld [vmem:[#allocation14 + $0x1920] sm:$0xff]  ;;  %v2408_v62 = vld [vmem:[#allocation14 + $0x1528] sm:$0xff] }
 0x376   :  { %4585 = vmatpush.msra.mxu0 %v3351_v9  ;;  %4642 = vmatpush.msra.mxu3 %v2120_v31  ;;  %v3303_v23 = vld [vmem:[#allocation14 + $0x3120] sm:$0xff]  ;;  %v3224_v63 = vld [vmem:[#allocation14 + $0x2ea8] sm:$0xff] }
 0x377   :  { %4619 = vmatpush.msra.mxu2 %v1912_v10  ;;  %4526 = vmatpush.msrb.mxu1 %v2567_v14  ;;  %v2519_v26 = vld [vmem:[#allocation14 + $0x18a0] sm:$0xff]  ;;  %v1736_v0 = vld [vmem:[#allocation14 + $0x28] sm:$0xff] }
 0x378   :  { %4586 = vmatpush.msra.mxu0 %v3335_v15  ;;  %4643 = vmatpush.msra.mxu3 %v2104_v17  ;;  %v3287_v27 = vld [vmem:[#allocation14 + $0x30a0] sm:$0xff]  ;;  %v2392_v1 = vld [vmem:[#allocation14 + $0x14a8] sm:$0xff] }
 0x379   :  { %4620 = vmatpush.msra.mxu2 %v1896_v16  ;;  %4527 = vmatpush.msrb.mxu1 %v2551_v37  ;;  %v2503_v30 = vld [vmem:[#allocation14 + $0x1820] sm:$0xff]  ;;  %v3000_v3 = vld [vmem:[#allocation14 + $0x27a8] sm:$0xff] }
 0x37a   :  { %4587 = vmatpush.msra.mxu0 %v3319_v18  ;;  %4644 = vmatpush.msra.mxu3 %v2088_v2  ;;  %v3271_v32 = vld [vmem:[#allocation14 + $0x3020] sm:$0xff]  ;;  %v3208_v12 = vld [vmem:[#allocation14 + $0x2e28] sm:$0xff] }
 0x37b   :  { %4621 = vmatpush.msra.mxu2 %v1880_v19  ;;  %4528 = vmatpush.msrb.mxu1 %v2535_v22  ;;  %v3767_v33 = vld [vmem:[#allocation14 + $0x3fa0] sm:$0xff]  ;;  %v2376_v5 = vld [vmem:[#allocation14 + $0x1428] sm:$0xff] }
 0x37c   :  { %4588 = vmatpush.msra.mxu0 %v3303_v23  ;;  %4645 = vmatpush.msra.mxu3 %v2072_v25  ;;  %v3751_v38 = vld [vmem:[#allocation14 + $0x3f20] sm:$0xff]  ;;  %v2984_v6 = vld [vmem:[#allocation14 + $0x2728] sm:$0xff] }
 0x37d   :  { %4622 = vmatpush.msra.mxu2 %v1864_v24  ;;  %4529 = vmatpush.msrb.mxu1 %v2519_v26  ;;  %v3735_v43 = vld [vmem:[#allocation14 + $0x3ea0] sm:$0xff]  ;;  %v3192_v8 = vld [vmem:[#allocation14 + $0x2da8] sm:$0xff] }
 0x37e   :  { %4589 = vmatpush.msra.mxu0 %v3287_v27  ;;  %4646 = vmatpush.msra.mxu3 %v2056_v29  ;;  %v3719_v49 = vld [vmem:[#allocation14 + $0x3e20] sm:$0xff]  ;;  %v2360_v9 = vld [vmem:[#allocation14 + $0x13a8] sm:$0xff] }
 0x37f   :  { %4623 = vmatpush.msra.mxu2 %v1848_v28  ;;  %4530 = vmatpush.msrb.mxu1 %v2503_v30  ;;  %v3703_v55 = vld [vmem:[#allocation14 + $0x3da0] sm:$0xff]  ;;  %v2968_v10 = vld [vmem:[#allocation14 + $0x26a8] sm:$0xff] }
 0x380   :  { %4590 = vmatpush.msra.mxu0 %v3271_v32  ;;  %4531 = vmatmul.f32.vlgmr.msrb.gmra.mxu1 %v7728_v40  ;;  %v3687_v46 = vld [vmem:[#allocation14 + $0x3d20] sm:$0xff]  ;;  %v3176_v31 = vld [vmem:[#allocation14 + $0x2d28] sm:$0xff] }
 0x381   :  { %4591 = vmatmul.f32.vlgmr.msra.gmra.mxu0 %v7746_v21  ;;  %4595 = vmatpush.msra.mxu1 %v3767_v33  ;;  %v3671_v20 = vld [vmem:[#allocation14 + $0x3ca0] sm:$0xff]  ;;  %v2344_v15 = vld [vmem:[#allocation14 + $0x1328] sm:$0xff] }
 0x382   :  { %4624 = vmatpush.msra.mxu2 %v1832_v34  ;;  %4647 = vmatpush.msra.mxu3 %v2040_v35  ;;  %v3655_v4 = vld [vmem:[#allocation14 + $0x3c20] sm:$0xff]  ;;  %v2952_v16 = vld [vmem:[#allocation14 + $0x2628] sm:$0xff] }
 0x383   :  { %4655 = vmatpush.msrb.mxu0 %v2488_v36  ;;  %4596 = vmatpush.msra.mxu1 %v3751_v38  ;;  %v3639_v59 = vld [vmem:[#allocation14 + $0x3ba0] sm:$0xff]  ;;  %v3160_v17 = vld [vmem:[#allocation14 + $0x2ca8] sm:$0xff] }
 0x384   :  { %4625 = vmatpush.msra.mxu2 %v1816_v39  ;;  %4648 = vmatpush.msra.mxu3 %v2024_v41  ;;  %v3623_v14 = vld [vmem:[#allocation14 + $0x3b20] sm:$0xff]  ;;  %v2328_v18 = vld [vmem:[#allocation14 + $0x12a8] sm:$0xff] }
 0x385   :  { %4656 = vmatpush.msrb.mxu0 %v2472_v42  ;;  %4597 = vmatpush.msra.mxu1 %v3735_v43  ;;  %v3607_v37 = vld [vmem:[#allocation14 + $0x3aa0] sm:$0xff]  ;;  %v2936_v19 = vld [vmem:[#allocation14 + $0x25a8] sm:$0xff] }
 0x386   :  { %4626 = vmatpush.msra.mxu2 %v1800_v45  ;;  %4649 = vmatpush.msra.mxu3 %v2008_v47  ;;  %v3144_v2 = vld [vmem:[#allocation14 + $0x2c28] sm:$0xff]  ;;  %v3591_v22 = vld [vmem:[#allocation14 + $0x3a20] sm:$0xff] }
 0x387   :  { %4657 = vmatpush.msrb.mxu0 %v2456_v48  ;;  %4598 = vmatpush.msra.mxu1 %v3719_v49  ;;  %v2312_v23 = vld [vmem:[#allocation14 + $0x1228] sm:$0xff]  ;;  %v3575_v26 = vld [vmem:[#allocation14 + $0x39a0] sm:$0xff] }
 0x388   :  { %4627 = vmatpush.msra.mxu2 %v1784_v51  ;;  %4650 = vmatpush.msra.mxu3 %v1992_v52  ;;  %v2920_v24 = vld [vmem:[#allocation14 + $0x2528] sm:$0xff]  ;;  %v3559_v30 = vld [vmem:[#allocation14 + $0x3920] sm:$0xff] }
 0x389   :  { %4658 = vmatpush.msrb.mxu0 %v2440_v54  ;;  %4651 = vmatmul.f32.vlgmr.msra.gmra.mxu3 %v7718_v13  ;;  %v3128_v25 = vld [vmem:[#allocation14 + $0x2ba8] sm:$0xff]  ;;  %v3543_v35 = vld [vmem:[#allocation14 + $0x38a0] sm:$0xff] }
 0x38a   :  { %4599 = vmatpush.msra.mxu1 %v3703_v55  ;;  %4715 = vmatpush.msrb.mxu3 %v3256_v56  ;;  %v2296_v27 = vld [vmem:[#allocation14 + $0x11a8] sm:$0xff]  ;;  %v3527_v41 = vld [vmem:[#allocation14 + $0x3820] sm:$0xff] }
 0x38b   :  { %4628 = vmatpush.msra.mxu2 %v1768_v57  ;;  %4659 = vmatpush.msrb.mxu0 %v2424_v58  ;;  %v2904_v28 = vld [vmem:[#allocation14 + $0x24a8] sm:$0xff] }
 0x38c   :  { %4600 = vmatpush.msra.mxu1 %v3687_v46  ;;  %4716 = vmatpush.msrb.mxu3 %v3240_v60  ;;  %v3112_v29 = vld [vmem:[#allocation14 + $0x2b28] sm:$0xff] }
 0x38d   :  { %4629 = vmatpush.msra.mxu2 %v1752_v61  ;;  %4660 = vmatpush.msrb.mxu0 %v2408_v62  ;;  %v2280_v32 = vld [vmem:[#allocation14 + $0x1128] sm:$0xff] }
 0x38e   :  { %4601 = vmatpush.msra.mxu1 %v3671_v20  ;;  %4717 = vmatpush.msrb.mxu3 %v3224_v63  ;;  %v2888_v33 = vld [vmem:[#allocation14 + $0x2428] sm:$0xff]  ;;  %v2233_v63 = vld [vmem:[#allocation14 + $0xfb0] sm:$0xff] }
 0x38f   :  { %4630 = vmatpush.msra.mxu2 %v1736_v0  ;;  %4661 = vmatpush.msrb.mxu0 %v2392_v1  ;;  %v3096_v34 = vld [vmem:[#allocation14 + $0x2aa8] sm:$0xff] }
 0x390   :  { %4631 = vmatmul.f32.vlgmr.msra.gmra.mxu2 %v7724_v11  ;;  %4718 = vmatpush.msrb.mxu3 %v3208_v12  ;;  %v2264_v36 = vld [vmem:[#allocation14 + $0x10a8] sm:$0xff]  ;;  %v2217_v12 = vld [vmem:[#allocation14 + $0xf30] sm:$0xff] }
 0x391   :  { %4695 = vmatpush.msrb.mxu2 %v3000_v3  ;;  %4602 = vmatpush.msra.mxu1 %v3655_v4  ;;  %v2872_v38 = vld [vmem:[#allocation14 + $0x23a8] sm:$0xff] }
 0x392   :  { %4662 = vmatpush.msrb.mxu0 %v2376_v5  ;;  %4719 = vmatpush.msrb.mxu3 %v3192_v8  ;;  %v3080_v39 = vld [vmem:[#allocation14 + $0x2a28] sm:$0xff]  ;;  %v2201_v8 = vld [vmem:[#allocation14 + $0xeb0] sm:$0xff] }
 0x393   :  { %4696 = vmatpush.msrb.mxu2 %v2984_v6  ;;  %4603 = vmatpush.msra.mxu1 %v3639_v59  ;;  %v2248_v42 = vld [vmem:[#allocation14 + $0x1028] sm:$0xff] }
 0x394   :  { %4663 = vmatpush.msrb.mxu0 %v2360_v9  ;;  %4720 = vmatpush.msrb.mxu3 %v3176_v31  ;;  %v2744_v43 = vld [vmem:[#allocation14 + $0x1fa8] sm:$0xff]  ;;  %v2185_v31 = vld [vmem:[#allocation14 + $0xe30] sm:$0xff] }
 0x395   :  { %4697 = vmatpush.msrb.mxu2 %v2968_v10  ;;  %4604 = vmatpush.msra.mxu1 %v3623_v14  ;;  %v2856_v45 = vld [vmem:[#allocation14 + $0x2328] sm:$0xff]  ;;  %v1977_v10 = vld [vmem:[#allocation14 + $0x7b0] sm:$0xff] }
 0x396   :  { %4664 = vmatpush.msrb.mxu0 %v2344_v15  ;;  %4721 = vmatpush.msrb.mxu3 %v3160_v17  ;;  %v3064_v47 = vld [vmem:[#allocation14 + $0x29a8] sm:$0xff]  ;;  %v2169_v17 = vld [vmem:[#allocation14 + $0xdb0] sm:$0xff] }
 0x397   :  { %4698 = vmatpush.msrb.mxu2 %v2952_v16  ;;  %4605 = vmatpush.msra.mxu1 %v3607_v37  ;;  %v3512_v48 = vld [vmem:[#allocation14 + $0x37a8] sm:$0xff]  ;;  %v1961_v16 = vld [vmem:[#allocation14 + $0x730] sm:$0xff] }
 0x398   :  { %4665 = vmatpush.msrb.mxu0 %v2328_v18  ;;  %4722 = vmatpush.msrb.mxu3 %v3144_v2  ;;  %v2728_v49 = vld [vmem:[#allocation14 + $0x1f28] sm:$0xff]  ;;  %v2153_v2 = vld [vmem:[#allocation14 + $0xd30] sm:$0xff] }
 0x399   :  { %4699 = vmatpush.msrb.mxu2 %v2936_v19  ;;  %4606 = vmatpush.msra.mxu1 %v3591_v22  ;;  %v2840_v51 = vld [vmem:[#allocation14 + $0x22a8] sm:$0xff]  ;;  %v1945_v19 = vld [vmem:[#allocation14 + $0x6b0] sm:$0xff] }
 0x39a   :  { %4666 = vmatpush.msrb.mxu0 %v2312_v23  ;;  %4723 = vmatpush.msrb.mxu3 %v3128_v25  ;;  %v3048_v52 = vld [vmem:[#allocation14 + $0x2928] sm:$0xff]  ;;  %v2137_v25 = vld [vmem:[#allocation14 + $0xcb0] sm:$0xff] }
 0x39b   :  { %4700 = vmatpush.msrb.mxu2 %v2920_v24  ;;  %4607 = vmatpush.msra.mxu1 %v3575_v26  ;;  %v3496_v54 = vld [vmem:[#allocation14 + $0x3728] sm:$0xff]  ;;  %v1929_v24 = vld [vmem:[#allocation14 + $0x630] sm:$0xff] }
 0x39c   :  { %4667 = vmatpush.msrb.mxu0 %v2296_v27  ;;  %4724 = vmatpush.msrb.mxu3 %v3112_v29  ;;  %v2712_v55 = vld [vmem:[#allocation14 + $0x1ea8] sm:$0xff]  ;;  %v2121_v29 = vld [vmem:[#allocation14 + $0xc30] sm:$0xff] }
 0x39d   :  { %4701 = vmatpush.msrb.mxu2 %v2904_v28  ;;  %4608 = vmatpush.msra.mxu1 %v3559_v30  ;;  %v2824_v56 = vld [vmem:[#allocation14 + $0x2228] sm:$0xff]  ;;  %v1913_v28 = vld [vmem:[#allocation14 + $0x5b0] sm:$0xff] }
 0x39e   :  { %4668 = vmatpush.msrb.mxu0 %v2280_v32  ;;  %4725 = vmatpush.msrb.mxu3 %v3096_v34  ;;  %v3032_v57 = vld [vmem:[#allocation14 + $0x28a8] sm:$0xff]  ;;  %v2105_v34 = vld [vmem:[#allocation14 + $0xbb0] sm:$0xff] }
 0x39f   :  { %4702 = vmatpush.msrb.mxu2 %v2888_v33  ;;  %4609 = vmatpush.msra.mxu1 %v3543_v35  ;;  %v3480_v58 = vld [vmem:[#allocation14 + $0x36a8] sm:$0xff]  ;;  %v1897_v33 = vld [vmem:[#allocation14 + $0x530] sm:$0xff] }
 0x3a0   :  { %4669 = vmatpush.msrb.mxu0 %v2264_v36  ;;  %4726 = vmatpush.msrb.mxu3 %v3080_v39  ;;  %v2696_v46 = vld [vmem:[#allocation14 + $0x1e28] sm:$0xff]  ;;  %v2089_v39 = vld [vmem:[#allocation14 + $0xb30] sm:$0xff] }
 0x3a1   :  { %4703 = vmatpush.msrb.mxu2 %v2872_v38  ;;  %4610 = vmatpush.msra.mxu1 %v3527_v41  ;;  %v2808_v60 = vld [vmem:[#allocation14 + $0x21a8] sm:$0xff]  ;;  %v1881_v38 = vld [vmem:[#allocation14 + $0x4b0] sm:$0xff] }
 0x3a2   :  { %4670 = vmatpush.msrb.mxu0 %v2248_v42  ;;  %4611 = vmatmul.f32.vlgmr.msra.gmra.mxu1 %v7752_v50  ;;  %v3016_v61 = vld [vmem:[#allocation14 + $0x2828] sm:$0xff] }
 0x3a3   :  { %4671 = vmatmul.f32.vlgmr.msrb.gmra.mxu0 %v7732_v53  ;;  %4675 = vmatpush.msrb.mxu1 %v2744_v43  ;;  %v3464_v62 = vld [vmem:[#allocation14 + $0x3628] sm:$0xff]  ;;  %v1865_v43 = vld [vmem:[#allocation14 + $0x430] sm:$0xff] }
 0x3a4   :  { %4704 = vmatpush.msrb.mxu2 %v2856_v45  ;;  %4727 = vmatpush.msrb.mxu3 %v3064_v47  ;;  %v2680_v20 = vld [vmem:[#allocation14 + $0x1da8] sm:$0xff]  ;;  %v2073_v45 = vld [vmem:[#allocation14 + $0xab0] sm:$0xff] }
 0x3a5   :  { %4735 = vmatpush.msra.mxu0 %v3512_v48  ;;  %4676 = vmatpush.msrb.mxu1 %v2728_v49  ;;  %v2792_v0 = vld [vmem:[#allocation14 + $0x2128] sm:$0xff]  ;;  %v1849_v49 = vld [vmem:[#allocation14 + $0x3b0] sm:$0xff] }
 0x3a6   :  { %4705 = vmatpush.msrb.mxu2 %v2840_v51  ;;  %4728 = vmatpush.msrb.mxu3 %v3048_v52  ;;  %v3448_v1 = vld [vmem:[#allocation14 + $0x35a8] sm:$0xff]  ;;  %v2057_v51 = vld [vmem:[#allocation14 + $0xa30] sm:$0xff] }
 0x3a7   :  { %4736 = vmatpush.msra.mxu0 %v3496_v54  ;;  %4677 = vmatpush.msrb.mxu1 %v2712_v55  ;;  %v2664_v3 = vld [vmem:[#allocation14 + $0x1d28] sm:$0xff] }
 0x3a8   :  { %4706 = vmatpush.msrb.mxu2 %v2824_v56  ;;  %4729 = vmatpush.msrb.mxu3 %v3032_v57  ;;  %v2776_v4 = vld [vmem:[#allocation14 + $0x20a8] sm:$0xff]  ;;  %v1833_v56 = vld [vmem:[#allocation14 + $0x330] sm:$0xff] }
 0x3a9   :  { %4737 = vmatpush.msra.mxu0 %v3480_v58  ;;  %4678 = vmatpush.msrb.mxu1 %v2696_v46  ;;  %v3432_v5 = vld [vmem:[#allocation14 + $0x3528] sm:$0xff]  ;;  %v2041_v57 = vld [vmem:[#allocation14 + $0x9b0] sm:$0xff] }
 0x3aa   :  { %4707 = vmatpush.msrb.mxu2 %v2808_v60  ;;  %4730 = vmatpush.msrb.mxu3 %v3016_v61  ;;  %v2648_v6 = vld [vmem:[#allocation14 + $0x1ca8] sm:$0xff]  ;;  %v2489_v58 = vld [vmem:[#allocation14 + $0x17b0] sm:$0xff] }
 0x3ab   :  { %4738 = vmatpush.msra.mxu0 %v3464_v62  ;;  %4731 = vmatmul.f32.vlgmr.msrb.gmra.mxu3 %v7740_v7  ;;  %v2760_v59 = vld [vmem:[#allocation14 + $0x2028] sm:$0xff]  ;;  %v1817_v60 = vld [vmem:[#allocation14 + $0x2b0] sm:$0xff] }
 0x3ac   :  { %4679 = vmatpush.msrb.mxu1 %v2680_v20  ;;  %4795 = vmatpush.msra.mxu3 %v2233_v63  ;;  %v3416_v9 = vld [vmem:[#allocation14 + $0x34a8] sm:$0xff]  ;;  %v2025_v61 = vld [vmem:[#allocation14 + $0x930] sm:$0xff] }
 0x3ad   :  { %4708 = vmatpush.msrb.mxu2 %v2792_v0  ;;  %4739 = vmatpush.msra.mxu0 %v3448_v1  ;;  %v2632_v14 = vld [vmem:[#allocation14 + $0x1c28] sm:$0xff]  ;;  %v2473_v62 = vld [vmem:[#allocation14 + $0x1730] sm:$0xff] }
 0x3ae   :  { %4680 = vmatpush.msrb.mxu1 %v2664_v3  ;;  %4796 = vmatpush.msra.mxu3 %v2217_v12  ;;  %v3400_v15 = vld [vmem:[#allocation14 + $0x3428] sm:$0xff]  ;;  %v1801_v63 = vld [vmem:[#allocation14 + $0x230] sm:$0xff] }
 0x3af   :  { %4709 = vmatpush.msrb.mxu2 %v2776_v4  ;;  %4740 = vmatpush.msra.mxu0 %v3432_v5  ;;  %v2616_v37 = vld [vmem:[#allocation14 + $0x1ba8] sm:$0xff]  ;;  %v2009_v0 = vld [vmem:[#allocation14 + $0x8b0] sm:$0xff] }
 0x3b0   :  { %4681 = vmatpush.msrb.mxu1 %v2648_v6  ;;  %4797 = vmatpush.msra.mxu3 %v2201_v8  ;;  %v3384_v18 = vld [vmem:[#allocation14 + $0x33a8] sm:$0xff]  ;;  %v2457_v1 = vld [vmem:[#allocation14 + $0x16b0] sm:$0xff] }
 0x3b1   :  { %4710 = vmatpush.msrb.mxu2 %v2760_v59  ;;  %4741 = vmatpush.msra.mxu0 %v3416_v9  ;;  %v2600_v22 = vld [vmem:[#allocation14 + $0x1b28] sm:$0xff]  ;;  %v1785_v12 = vld [vmem:[#allocation14 + $0x1b0] sm:$0xff] }
 0x3b2   :  { %4711 = vmatmul.f32.vlgmr.msrb.gmra.mxu2 %v7737_v44  ;;  %4798 = vmatpush.msra.mxu3 %v2185_v31  ;;  %v3368_v23 = vld [vmem:[#allocation14 + $0x3328] sm:$0xff]  ;;  %v1993_v4 = vld [vmem:[#allocation14 + $0x830] sm:$0xff] }
 0x3b3   :  { %4775 = vmatpush.msra.mxu2 %v1977_v10  ;;  %4682 = vmatpush.msrb.mxu1 %v2632_v14  ;;  %v2584_v26 = vld [vmem:[#allocation14 + $0x1aa8] sm:$0xff]  ;;  %v2441_v5 = vld [vmem:[#allocation14 + $0x1630] sm:$0xff] }
 0x3b4   :  { %4742 = vmatpush.msra.mxu0 %v3400_v15  ;;  %4799 = vmatpush.msra.mxu3 %v2169_v17  ;;  %v3352_v27 = vld [vmem:[#allocation14 + $0x32a8] sm:$0xff]  ;;  %v3257_v8 = vld [vmem:[#allocation14 + $0x2fb0] sm:$0xff] }
 0x3b5   :  { %4776 = vmatpush.msra.mxu2 %v1961_v16  ;;  %4683 = vmatpush.msrb.mxu1 %v2616_v37  ;;  %v2568_v30 = vld [vmem:[#allocation14 + $0x1a28] sm:$0xff]  ;;  %v1769_v59 = vld [vmem:[#allocation14 + $0x130] sm:$0xff] }
 0x3b6   :  { %4743 = vmatpush.msra.mxu0 %v3384_v18  ;;  %4800 = vmatpush.msra.mxu3 %v2153_v2  ;;  %v3336_v32 = vld [vmem:[#allocation14 + $0x3228] sm:$0xff]  ;;  %v2425_v9 = vld [vmem:[#allocation14 + $0x15b0] sm:$0xff] }
 0x3b7   :  { %4777 = vmatpush.msra.mxu2 %v1945_v19  ;;  %4684 = vmatpush.msrb.mxu1 %v2600_v22  ;;  %v2552_v35 = vld [vmem:[#allocation14 + $0x19a8] sm:$0xff]  ;;  %v3241_v31 = vld [vmem:[#allocation14 + $0x2f30] sm:$0xff] }
 0x3b8   :  { %4744 = vmatpush.msra.mxu0 %v3368_v23  ;;  %4801 = vmatpush.msra.mxu3 %v2137_v25  ;;  %v3320_v36 = vld [vmem:[#allocation14 + $0x31a8] sm:$0xff]  ;;  %v1753_v14 = vld [vmem:[#allocation14 + $0xb0] sm:$0xff] }
 0x3b9   :  { %4778 = vmatpush.msra.mxu2 %v1929_v24  ;;  %4685 = vmatpush.msrb.mxu1 %v2584_v26  ;;  %v2536_v41 = vld [vmem:[#allocation14 + $0x1928] sm:$0xff]  ;;  %v2409_v15 = vld [vmem:[#allocation14 + $0x1530] sm:$0xff] }
 0x3ba   :  { %4745 = vmatpush.msra.mxu0 %v3352_v27  ;;  %4802 = vmatpush.msra.mxu3 %v2121_v29  ;;  %v3304_v42 = vld [vmem:[#allocation14 + $0x3128] sm:$0xff]  ;;  %v3225_v17 = vld [vmem:[#allocation14 + $0x2eb0] sm:$0xff] }
 0x3bb   :  { %4779 = vmatpush.msra.mxu2 %v1913_v28  ;;  %4686 = vmatpush.msrb.mxu1 %v2568_v30  ;;  %v2520_v47 = vld [vmem:[#allocation14 + $0x18a8] sm:$0xff]  ;;  %v1737_v37 = vld [vmem:[#allocation14 + $0x30] sm:$0xff] }
 0x3bc   :  { %4746 = vmatpush.msra.mxu0 %v3336_v32  ;;  %4803 = vmatpush.msra.mxu3 %v2105_v34  ;;  %v3288_v48 = vld [vmem:[#allocation14 + $0x30a8] sm:$0xff]  ;;  %v2393_v18 = vld [vmem:[#allocation14 + $0x14b0] sm:$0xff] }
 0x3bd   :  { %4780 = vmatpush.msra.mxu2 %v1897_v33  ;;  %4687 = vmatpush.msrb.mxu1 %v2552_v35  ;;  %v2504_v52 = vld [vmem:[#allocation14 + $0x1828] sm:$0xff]  ;;  %v3001_v19 = vld [vmem:[#allocation14 + $0x27b0] sm:$0xff] }
 0x3be   :  { %4747 = vmatpush.msra.mxu0 %v3320_v36  ;;  %4804 = vmatpush.msra.mxu3 %v2089_v39  ;;  %v3272_v54 = vld [vmem:[#allocation14 + $0x3028] sm:$0xff]  ;;  %v3209_v2 = vld [vmem:[#allocation14 + $0x2e30] sm:$0xff] }
 0x3bf   :  { %4781 = vmatpush.msra.mxu2 %v1881_v38  ;;  %4688 = vmatpush.msrb.mxu1 %v2536_v41  ;;  %v3768_v55 = vld [vmem:[#allocation14 + $0x3fa8] sm:$0xff]  ;;  %v2377_v23 = vld [vmem:[#allocation14 + $0x1430] sm:$0xff] }
 0x3c0   :  { %4748 = vmatpush.msra.mxu0 %v3304_v42  ;;  %4805 = vmatpush.msra.mxu3 %v2073_v45  ;;  %v3752_v46 = vld [vmem:[#allocation14 + $0x3f28] sm:$0xff]  ;;  %v2985_v24 = vld [vmem:[#allocation14 + $0x2730] sm:$0xff] }
 0x3c1   :  { %4782 = vmatpush.msra.mxu2 %v1865_v43  ;;  %4689 = vmatpush.msrb.mxu1 %v2520_v47  ;;  %v3736_v20 = vld [vmem:[#allocation14 + $0x3ea8] sm:$0xff]  ;;  %v3193_v25 = vld [vmem:[#allocation14 + $0x2db0] sm:$0xff] }
 0x3c2   :  { %4749 = vmatpush.msra.mxu0 %v3288_v48  ;;  %4806 = vmatpush.msra.mxu3 %v2057_v51  ;;  %v3720_v3 = vld [vmem:[#allocation14 + $0x3e28] sm:$0xff]  ;;  %v2361_v27 = vld [vmem:[#allocation14 + $0x13b0] sm:$0xff] }
 0x3c3   :  { %4783 = vmatpush.msra.mxu2 %v1849_v49  ;;  %4690 = vmatpush.msrb.mxu1 %v2504_v52  ;;  %v3704_v6 = vld [vmem:[#allocation14 + $0x3da8] sm:$0xff]  ;;  %v2969_v28 = vld [vmem:[#allocation14 + $0x26b0] sm:$0xff] }
 0x3c4   :  { %4750 = vmatpush.msra.mxu0 %v3272_v54  ;;  %4691 = vmatmul.f32.vlgmr.msrb.gmra.mxu1 %v7728_v40  ;;  %v3688_v10 = vld [vmem:[#allocation14 + $0x3d28] sm:$0xff]  ;;  %v3177_v29 = vld [vmem:[#allocation14 + $0x2d30] sm:$0xff] }
 0x3c5   :  { %4751 = vmatmul.f32.vlgmr.msra.gmra.mxu0 %v7746_v21  ;;  %4755 = vmatpush.msra.mxu1 %v3768_v55  ;;  %v3672_v16 = vld [vmem:[#allocation14 + $0x3ca8] sm:$0xff]  ;;  %v2345_v32 = vld [vmem:[#allocation14 + $0x1330] sm:$0xff] }
 0x3c6   :  { %4784 = vmatpush.msra.mxu2 %v1833_v56  ;;  %4807 = vmatpush.msra.mxu3 %v2041_v57  ;;  %v3656_v22 = vld [vmem:[#allocation14 + $0x3c28] sm:$0xff]  ;;  %v2953_v33 = vld [vmem:[#allocation14 + $0x2630] sm:$0xff] }
 0x3c7   :  { %4815 = vmatpush.msrb.mxu0 %v2489_v58  ;;  %4756 = vmatpush.msra.mxu1 %v3752_v46  ;;  %v3640_v26 = vld [vmem:[#allocation14 + $0x3ba8] sm:$0xff]  ;;  %v3161_v34 = vld [vmem:[#allocation14 + $0x2cb0] sm:$0xff] }
 0x3c8   :  { %4785 = vmatpush.msra.mxu2 %v1817_v60  ;;  %4808 = vmatpush.msra.mxu3 %v2025_v61  ;;  %v3624_v30 = vld [vmem:[#allocation14 + $0x3b28] sm:$0xff]  ;;  %v2329_v36 = vld [vmem:[#allocation14 + $0x12b0] sm:$0xff] }
 0x3c9   :  { %4816 = vmatpush.msrb.mxu0 %v2473_v62  ;;  %4757 = vmatpush.msra.mxu1 %v3736_v20  ;;  %v3608_v35 = vld [vmem:[#allocation14 + $0x3aa8] sm:$0xff]  ;;  %v2937_v38 = vld [vmem:[#allocation14 + $0x25b0] sm:$0xff] }
 0x3ca   :  { %4786 = vmatpush.msra.mxu2 %v1801_v63  ;;  %4809 = vmatpush.msra.mxu3 %v2009_v0  ;;  %v3145_v39 = vld [vmem:[#allocation14 + $0x2c30] sm:$0xff]  ;;  %v3592_v41 = vld [vmem:[#allocation14 + $0x3a28] sm:$0xff] }
 0x3cb   :  { %4817 = vmatpush.msrb.mxu0 %v2457_v1  ;;  %4758 = vmatpush.msra.mxu1 %v3720_v3  ;;  %v2313_v42 = vld [vmem:[#allocation14 + $0x1230] sm:$0xff]  ;;  %v3576_v47 = vld [vmem:[#allocation14 + $0x39a8] sm:$0xff] }
 0x3cc   :  { %4787 = vmatpush.msra.mxu2 %v1785_v12  ;;  %4810 = vmatpush.msra.mxu3 %v1993_v4  ;;  %v2921_v43 = vld [vmem:[#allocation14 + $0x2530] sm:$0xff]  ;;  %v3560_v52 = vld [vmem:[#allocation14 + $0x3928] sm:$0xff] }
 0x3cd   :  { %4818 = vmatpush.msrb.mxu0 %v2441_v5  ;;  %4811 = vmatmul.f32.vlgmr.msra.gmra.mxu3 %v7718_v13  ;;  %v3129_v45 = vld [vmem:[#allocation14 + $0x2bb0] sm:$0xff]  ;;  %v3544_v57 = vld [vmem:[#allocation14 + $0x38a8] sm:$0xff] }
 0x3ce   :  { %4759 = vmatpush.msra.mxu1 %v3704_v6  ;;  %4875 = vmatpush.msrb.mxu3 %v3257_v8  ;;  %v2297_v48 = vld [vmem:[#allocation14 + $0x11b0] sm:$0xff]  ;;  %v3528_v61 = vld [vmem:[#allocation14 + $0x3828] sm:$0xff] }
 0x3cf   :  { %4788 = vmatpush.msra.mxu2 %v1769_v59  ;;  %4819 = vmatpush.msrb.mxu0 %v2425_v9  ;;  %v2905_v49 = vld [vmem:[#allocation14 + $0x24b0] sm:$0xff] }
 0x3d0   :  { %4760 = vmatpush.msra.mxu1 %v3688_v10  ;;  %4876 = vmatpush.msrb.mxu3 %v3241_v31  ;;  %v3113_v51 = vld [vmem:[#allocation14 + $0x2b30] sm:$0xff] }
 0x3d1   :  { %4789 = vmatpush.msra.mxu2 %v1753_v14  ;;  %4820 = vmatpush.msrb.mxu0 %v2409_v15  ;;  %v2281_v54 = vld [vmem:[#allocation14 + $0x1130] sm:$0xff] }
 0x3d2   :  { %4761 = vmatpush.msra.mxu1 %v3672_v16  ;;  %4877 = vmatpush.msrb.mxu3 %v3225_v17  ;;  %v2889_v55 = vld [vmem:[#allocation14 + $0x2430] sm:$0xff]  ;;  %v2234_v17 = vld [vmem:[#allocation14 + $0xfb8] sm:$0xff] }
 0x3d3   :  { %4790 = vmatpush.msra.mxu2 %v1737_v37  ;;  %4821 = vmatpush.msrb.mxu0 %v2393_v18  ;;  %v3097_v56 = vld [vmem:[#allocation14 + $0x2ab0] sm:$0xff] }
 0x3d4   :  { %4791 = vmatmul.f32.vlgmr.msra.gmra.mxu2 %v7724_v11  ;;  %4878 = vmatpush.msrb.mxu3 %v3209_v2  ;;  %v2265_v58 = vld [vmem:[#allocation14 + $0x10b0] sm:$0xff]  ;;  %v2218_v2 = vld [vmem:[#allocation14 + $0xf38] sm:$0xff] }
 0x3d5   :  { %4855 = vmatpush.msrb.mxu2 %v3001_v19  ;;  %4762 = vmatpush.msra.mxu1 %v3656_v22  ;;  %v2873_v46 = vld [vmem:[#allocation14 + $0x23b0] sm:$0xff] }
 0x3d6   :  { %4822 = vmatpush.msrb.mxu0 %v2377_v23  ;;  %4879 = vmatpush.msrb.mxu3 %v3193_v25  ;;  %v3081_v60 = vld [vmem:[#allocation14 + $0x2a30] sm:$0xff]  ;;  %v2202_v25 = vld [vmem:[#allocation14 + $0xeb8] sm:$0xff] }
 0x3d7   :  { %4856 = vmatpush.msrb.mxu2 %v2985_v24  ;;  %4763 = vmatpush.msra.mxu1 %v3640_v26  ;;  %v2249_v62 = vld [vmem:[#allocation14 + $0x1030] sm:$0xff] }
 0x3d8   :  { %4823 = vmatpush.msrb.mxu0 %v2361_v27  ;;  %4880 = vmatpush.msrb.mxu3 %v3177_v29  ;;  %v2745_v20 = vld [vmem:[#allocation14 + $0x1fb0] sm:$0xff]  ;;  %v2186_v29 = vld [vmem:[#allocation14 + $0xe38] sm:$0xff] }
 0x3d9   :  { %4857 = vmatpush.msrb.mxu2 %v2969_v28  ;;  %4764 = vmatpush.msra.mxu1 %v3624_v30  ;;  %v2857_v63 = vld [vmem:[#allocation14 + $0x2330] sm:$0xff]  ;;  %v1978_v28 = vld [vmem:[#allocation14 + $0x7b8] sm:$0xff] }
 0x3da   :  { %4824 = vmatpush.msrb.mxu0 %v2345_v32  ;;  %4881 = vmatpush.msrb.mxu3 %v3161_v34  ;;  %v3065_v0 = vld [vmem:[#allocation14 + $0x29b0] sm:$0xff]  ;;  %v2170_v34 = vld [vmem:[#allocation14 + $0xdb8] sm:$0xff] }
 0x3db   :  { %4858 = vmatpush.msrb.mxu2 %v2953_v33  ;;  %4765 = vmatpush.msra.mxu1 %v3608_v35  ;;  %v3513_v1 = vld [vmem:[#allocation14 + $0x37b0] sm:$0xff]  ;;  %v1962_v33 = vld [vmem:[#allocation14 + $0x738] sm:$0xff]  ;;  %v7795_v35 = vpop.f32.mrf.mxu3 }
 0x3dc   :  { %4825 = vmatpush.msrb.mxu0 %v2329_v36  ;;  %4882 = vmatpush.msrb.mxu3 %v3145_v39  ;;  %v2729_v3 = vld [vmem:[#allocation14 + $0x1f30] sm:$0xff]  ;;  %v7797_v36 = vpop.f32.mrf.mxu2 }
 0x3dd   :  { %4859 = vmatpush.msrb.mxu2 %v2937_v38  ;;  %4766 = vmatpush.msra.mxu1 %v3592_v41  ;;  %v2841_v12 = vld [vmem:[#allocation14 + $0x22b0] sm:$0xff]  ;;  %v1946_v41 = vld [vmem:[#allocation14 + $0x6b8] sm:$0xff] }
 0x3de   :  { %4826 = vmatpush.msrb.mxu0 %v2313_v42  ;;  %4883 = vmatpush.msrb.mxu3 %v3129_v45  ;;  %v3049_v4 = vld [vmem:[#allocation14 + $0x2930] sm:$0xff]  ;;  %v2154_v42 = vld [vmem:[#allocation14 + $0xd38] sm:$0xff] }
 0x3df   :  { %4860 = vmatpush.msrb.mxu2 %v2921_v43  ;;  %4767 = vmatpush.msra.mxu1 %v3576_v47  ;;  %v3497_v5 = vld [vmem:[#allocation14 + $0x3730] sm:$0xff]  ;;  %v1930_v47 = vld [vmem:[#allocation14 + $0x638] sm:$0xff] }
 0x3e0   :  { %4827 = vmatpush.msrb.mxu0 %v2297_v48  ;;  %4884 = vmatpush.msrb.mxu3 %v3113_v51  ;;  %v2713_v6 = vld [vmem:[#allocation14 + $0x1eb0] sm:$0xff]  ;;  %v2138_v48 = vld [vmem:[#allocation14 + $0xcb8] sm:$0xff] }
 0x3e1   :  { %4861 = vmatpush.msrb.mxu2 %v2905_v49  ;;  %4768 = vmatpush.msra.mxu1 %v3560_v52  ;;  %v2825_v8 = vld [vmem:[#allocation14 + $0x2230] sm:$0xff]  ;;  %v1914_v52 = vld [vmem:[#allocation14 + $0x5b8] sm:$0xff] }
 0x3e2   :  { %4828 = vmatpush.msrb.mxu0 %v2281_v54  ;;  %4885 = vmatpush.msrb.mxu3 %v3097_v56  ;;  %v3033_v59 = vld [vmem:[#allocation14 + $0x28b0] sm:$0xff]  ;;  %v2122_v54 = vld [vmem:[#allocation14 + $0xc38] sm:$0xff] }
 0x3e3   :  { %4862 = vmatpush.msrb.mxu2 %v2889_v55  ;;  %4769 = vmatpush.msra.mxu1 %v3544_v57  ;;  %v3481_v9 = vld [vmem:[#allocation14 + $0x36b0] sm:$0xff]  ;;  %v1898_v57 = vld [vmem:[#allocation14 + $0x538] sm:$0xff] }
 0x3e4   :  { %4829 = vmatpush.msrb.mxu0 %v2265_v58  ;;  %4886 = vmatpush.msrb.mxu3 %v3081_v60  ;;  %v2697_v10 = vld [vmem:[#allocation14 + $0x1e30] sm:$0xff]  ;;  %v2106_v58 = vld [vmem:[#allocation14 + $0xbb8] sm:$0xff]  ;;  %v7801_v60 = vpop.f32.mrf.mxu3 }
 0x3e5   :  { %4863 = vmatpush.msrb.mxu2 %v2873_v46  ;;  %4770 = vmatpush.msra.mxu1 %v3528_v61  ;;  %v2809_v31 = vld [vmem:[#allocation14 + $0x21b0] sm:$0xff]  ;;  %v7799_v46 = vpop.f32.mrf.mxu2 }
 0x3e6   :  { %4830 = vmatpush.msrb.mxu0 %v2249_v62  ;;  %4771 = vmatmul.f32.vlgmr.msra.gmra.mxu1 %v7752_v50  ;;  %v3017_v14 = vld [vmem:[#allocation14 + $0x2830] sm:$0xff] }
 0x3e7   :  { %4831 = vmatmul.f32.vlgmr.msrb.gmra.mxu0 %v7732_v53  ;;  %4835 = vmatpush.msrb.mxu1 %v2745_v20  ;;  %v3465_v15 = vld [vmem:[#allocation14 + $0x3630] sm:$0xff]  ;;  %v1882_v20 = vld [vmem:[#allocation14 + $0x4b8] sm:$0xff] }
 0x3e8   :  { %4864 = vmatpush.msrb.mxu2 %v2857_v63  ;;  %4887 = vmatpush.msrb.mxu3 %v3065_v0  ;;  %v2681_v16 = vld [vmem:[#allocation14 + $0x1db0] sm:$0xff]  ;;  %v2090_v63 = vld [vmem:[#allocation14 + $0xb38] sm:$0xff] }
 0x3e9   :  { %4895 = vmatpush.msra.mxu0 %v3513_v1  ;;  %4836 = vmatpush.msrb.mxu1 %v2729_v3  ;;  %v2793_v37 = vld [vmem:[#allocation14 + $0x2130] sm:$0xff]  ;;  %v7803_v3 = vpop.f32.mrf.mxu0 }
 0x3ea   :  { %4865 = vmatpush.msrb.mxu2 %v2841_v12  ;;  %4888 = vmatpush.msrb.mxu3 %v3049_v4  ;;  %v3449_v18 = vld [vmem:[#allocation14 + $0x35b0] sm:$0xff]  ;;  %v1866_v12 = vld [vmem:[#allocation14 + $0x438] sm:$0xff] }
 0x3eb   :  { %4896 = vmatpush.msra.mxu0 %v3497_v5  ;;  %4837 = vmatpush.msrb.mxu1 %v2713_v6  ;;  %v2665_v19 = vld [vmem:[#allocation14 + $0x1d30] sm:$0xff]  ;;  %v2074_v4 = vld [vmem:[#allocation14 + $0xab8] sm:$0xff] }
 0x3ec   :  { %4866 = vmatpush.msrb.mxu2 %v2825_v8  ;;  %4889 = vmatpush.msrb.mxu3 %v3033_v59  ;;  %v2777_v22 = vld [vmem:[#allocation14 + $0x20b0] sm:$0xff]  ;;  %v1850_v8 = vld [vmem:[#allocation14 + $0x3b8] sm:$0xff] }
 0x3ed   :  { %4897 = vmatpush.msra.mxu0 %v3481_v9  ;;  %4838 = vmatpush.msrb.mxu1 %v2697_v10  ;;  %v3433_v23 = vld [vmem:[#allocation14 + $0x3530] sm:$0xff]  ;;  %v2058_v59 = vld [vmem:[#allocation14 + $0xa38] sm:$0xff] }
 0x3ee   :  { %4867 = vmatpush.msrb.mxu2 %v2809_v31  ;;  %4890 = vmatpush.msrb.mxu3 %v3017_v14  ;;  %v2649_v24 = vld [vmem:[#allocation14 + $0x1cb0] sm:$0xff]  ;;  %v7805_v31 = vpop.f32.mrf.mxu2 }
 0x3ef   :  { %4898 = vmatpush.msra.mxu0 %v3465_v15  ;;  %4891 = vmatmul.f32.vlgmr.msrb.gmra.mxu3 %v7740_v7  ;;  %v2761_v26 = vld [vmem:[#allocation14 + $0x2030] sm:$0xff]  ;;  %v1834_v15 = vld [vmem:[#allocation14 + $0x338] sm:$0xff] }
 0x3f0   :  { %4839 = vmatpush.msrb.mxu1 %v2681_v16  ;;  %4955 = vmatpush.msra.mxu3 %v2234_v17  ;;  %v3417_v27 = vld [vmem:[#allocation14 + $0x34b0] sm:$0xff]  ;;  %v2042_v16 = vld [vmem:[#allocation14 + $0x9b8] sm:$0xff] }
 0x3f1   :  { %4868 = vmatpush.msrb.mxu2 %v2793_v37  ;;  %4899 = vmatpush.msra.mxu0 %v3449_v18  ;;  %v2633_v30 = vld [vmem:[#allocation14 + $0x1c30] sm:$0xff]  ;;  %v2490_v17 = vld [vmem:[#allocation14 + $0x17b8] sm:$0xff]  ;;  %v7807_v37 = vpop.f32.mrf.mxu3 }
 0x3f2   :  { %4840 = vmatpush.msrb.mxu1 %v2665_v19  ;;  %4956 = vmatpush.msra.mxu3 %v2218_v2  ;;  %v3401_v32 = vld [vmem:[#allocation14 + $0x3430] sm:$0xff]  ;;  %v1818_v19 = vld [vmem:[#allocation14 + $0x2b8] sm:$0xff]  ;;  %v7811_v2 = vpop.f32.mrf.mxu0 }
 0x3f3   :  { %4869 = vmatpush.msrb.mxu2 %v2777_v22  ;;  %4900 = vmatpush.msra.mxu0 %v3433_v23  ;;  %v2617_v38 = vld [vmem:[#allocation14 + $0x1bb0] sm:$0xff]  ;;  %v2026_v22 = vld [vmem:[#allocation14 + $0x938] sm:$0xff] }
 0x3f4   :  { %4841 = vmatpush.msrb.mxu1 %v2649_v24  ;;  %4957 = vmatpush.msra.mxu3 %v2202_v25  ;;  %v3385_v39 = vld [vmem:[#allocation14 + $0x33b0] sm:$0xff]  ;;  %v2474_v23 = vld [vmem:[#allocation14 + $0x1738] sm:$0xff] }
 0x3f5   :  { %4870 = vmatpush.msrb.mxu2 %v2761_v26  ;;  %4901 = vmatpush.msra.mxu0 %v3417_v27  ;;  %v2601_v43 = vld [vmem:[#allocation14 + $0x1b30] sm:$0xff]  ;;  %v1802_v25 = vld [vmem:[#allocation14 + $0x238] sm:$0xff] }
 0x3f6   :  { %4871 = vmatmul.f32.vlgmr.msrb.gmra.mxu2 %v7737_v44  ;;  %4958 = vmatpush.msra.mxu3 %v2186_v29  ;;  %v3369_v45 = vld [vmem:[#allocation14 + $0x3330] sm:$0xff]  ;;  %v2010_v26 = vld [vmem:[#allocation14 + $0x8b8] sm:$0xff] }
 0x3f7   :  { %4935 = vmatpush.msra.mxu2 %v1978_v28  ;;  %4842 = vmatpush.msrb.mxu1 %v2633_v30  ;;  %v2585_v49 = vld [vmem:[#allocation14 + $0x1ab0] sm:$0xff]  ;;  %v2458_v27 = vld [vmem:[#allocation14 + $0x16b8] sm:$0xff] }
 0x3f8   :  { %4902 = vmatpush.msra.mxu0 %v3401_v32  ;;  %4959 = vmatpush.msra.mxu3 %v2170_v34  ;;  %v3353_v51 = vld [vmem:[#allocation14 + $0x32b0] sm:$0xff]  ;;  %v1786_v29 = vld [vmem:[#allocation14 + $0x1b8] sm:$0xff] }
 0x3f9   :  { %4936 = vmatpush.msra.mxu2 %v1962_v33  ;;  %4843 = vmatpush.msrb.mxu1 %v2617_v38  ;;  %v2569_v55 = vld [vmem:[#allocation14 + $0x1a30] sm:$0xff]  ;;  %v1994_v30 = vld [vmem:[#allocation14 + $0x838] sm:$0xff]  ;;  %v7813_v33 = vpop.f32.mrf.mxu2 }
 0x3fa   :  { %4903 = vmatpush.msra.mxu0 %v3385_v39  ;;  %4960 = vmatpush.msra.mxu3 %v2154_v42  ;;  %v3337_v56 = vld [vmem:[#allocation14 + $0x3230] sm:$0xff]  ;;  %v2442_v32 = vld [vmem:[#allocation14 + $0x1638] sm:$0xff] }
 0x3fb   :  { %4937 = vmatpush.msra.mxu2 %v1946_v41  ;;  %4844 = vmatpush.msrb.mxu1 %v2601_v43  ;;  %v2553_v61 = vld [vmem:[#allocation14 + $0x19b0] sm:$0xff]  ;;  %v3258_v38 = vld [vmem:[#allocation14 + $0x2fb8] sm:$0xff]  ;;  %v7815_v41 = vpop.f32.mrf.mxu3 }
 0x3fc   :  { %4904 = vmatpush.msra.mxu0 %v3369_v45  ;;  %4961 = vmatpush.msra.mxu3 %v2138_v48  ;;  %v3321_v62 = vld [vmem:[#allocation14 + $0x31b0] sm:$0xff]  ;;  %v1770_v39 = vld [vmem:[#allocation14 + $0x138] sm:$0xff] }
 0x3fd   :  { %4938 = vmatpush.msra.mxu2 %v1930_v47  ;;  %4845 = vmatpush.msrb.mxu1 %v2585_v49  ;;  %v2537_v0 = vld [vmem:[#allocation14 + $0x1930] sm:$0xff]  ;;  %v2426_v42 = vld [vmem:[#allocation14 + $0x15b8] sm:$0xff] }
 0x3fe   :  { %4905 = vmatpush.msra.mxu0 %v3353_v51  ;;  %4962 = vmatpush.msra.mxu3 %v2122_v54  ;;  %v3305_v1 = vld [vmem:[#allocation14 + $0x3130] sm:$0xff]  ;;  %v3242_v45 = vld [vmem:[#allocation14 + $0x2f38] sm:$0xff]  ;;  %v7818_v51 = vpop.f32.mrf.mxu0 }
 0x3ff   :  { %4939 = vmatpush.msra.mxu2 %v1914_v52  ;;  %4846 = vmatpush.msrb.mxu1 %v2569_v55  ;;  %v2521_v5 = vld [vmem:[#allocation14 + $0x18b0] sm:$0xff]  ;;  %v1754_v47 = vld [vmem:[#allocation14 + $0xb8] sm:$0xff] }
 0x400   :  { %4906 = vmatpush.msra.mxu0 %v3337_v56  ;;  %4963 = vmatpush.msra.mxu3 %v2106_v58  ;;  %v3289_v6 = vld [vmem:[#allocation14 + $0x30b0] sm:$0xff]  ;;  %v2410_v48 = vld [vmem:[#allocation14 + $0x1538] sm:$0xff] }
 0x401   :  { %4940 = vmatpush.msra.mxu2 %v1898_v57  ;;  %4847 = vmatpush.msrb.mxu1 %v2553_v61  ;;  %v2505_v9 = vld [vmem:[#allocation14 + $0x1830] sm:$0xff]  ;;  %v3226_v52 = vld [vmem:[#allocation14 + $0x2eb8] sm:$0xff]  ;;  %v7820_v58 = vpop.f32.mrf.mxu2 }
 0x402   :  { %4907 = vmatpush.msra.mxu0 %v3321_v62  ;;  %4964 = vmatpush.msra.mxu3 %v2090_v63  ;;  %v3273_v10 = vld [vmem:[#allocation14 + $0x3030] sm:$0xff]  ;;  %v1738_v54 = vld [vmem:[#allocation14 + $0x38] sm:$0xff] }
 0x403   :  { %4941 = vmatpush.msra.mxu2 %v1882_v20  ;;  %4848 = vmatpush.msrb.mxu1 %v2537_v0  ;;  %v3769_v14 = vld [vmem:[#allocation14 + $0x3fb0] sm:$0xff]  ;;  %v2394_v55 = vld [vmem:[#allocation14 + $0x14b8] sm:$0xff]  ;;  %v7823_v0 = vpop.f32.mrf.mxu3 }
 0x404   :  { %4908 = vmatpush.msra.mxu0 %v3305_v1  ;;  %4965 = vmatpush.msra.mxu3 %v2074_v4  ;;  %v3753_v18 = vld [vmem:[#allocation14 + $0x3f30] sm:$0xff]  ;;  %v3002_v56 = vld [vmem:[#allocation14 + $0x27b8] sm:$0xff]  ;;  %8309 = vst [vmem:[#allocation33_spill] sm:$0xff] %v7823_v0 }
 0x405   :  { %4942 = vmatpush.msra.mxu2 %v1866_v12  ;;  %4849 = vmatpush.msrb.mxu1 %v2521_v5  ;;  %v3737_v24 = vld [vmem:[#allocation14 + $0x3eb0] sm:$0xff]  ;;  %v3210_v57 = vld [vmem:[#allocation14 + $0x2e38] sm:$0xff] }
 0x406   :  { %4909 = vmatpush.msra.mxu0 %v3289_v6  ;;  %4966 = vmatpush.msra.mxu3 %v2058_v59  ;;  %v3721_v28 = vld [vmem:[#allocation14 + $0x3e30] sm:$0xff]  ;;  %v2378_v62 = vld [vmem:[#allocation14 + $0x1438] sm:$0xff]  ;;  %v7825_v59 = vpop.f32.mrf.mxu0 }
 0x407   :  { %4943 = vmatpush.msra.mxu2 %v1850_v8  ;;  %4850 = vmatpush.msrb.mxu1 %v2505_v9  ;;  %v3705_v34 = vld [vmem:[#allocation14 + $0x3db0] sm:$0xff]  ;;  %v2986_v20 = vld [vmem:[#allocation14 + $0x2738] sm:$0xff] }
 0x408   :  { %4910 = vmatpush.msra.mxu0 %v3273_v10  ;;  %4851 = vmatmul.f32.vlgmr.msrb.gmra.mxu1 %v7728_v40  ;;  %v3689_v43 = vld [vmem:[#allocation14 + $0x3d30] sm:$0xff]  ;;  %v3194_v63 = vld [vmem:[#allocation14 + $0x2db8] sm:$0xff] }
 0x409   :  { %4911 = vmatmul.f32.vlgmr.msra.gmra.mxu0 %v7746_v21  ;;  %4915 = vmatpush.msra.mxu1 %v3769_v14  ;;  %v3673_v49 = vld [vmem:[#allocation14 + $0x3cb0] sm:$0xff]  ;;  %v2362_v12 = vld [vmem:[#allocation14 + $0x13b8] sm:$0xff] }
 0x40a   :  { %4944 = vmatpush.msra.mxu2 %v1834_v15  ;;  %4967 = vmatpush.msra.mxu3 %v2042_v16  ;;  %v3657_v61 = vld [vmem:[#allocation14 + $0x3c30] sm:$0xff]  ;;  %v2970_v4 = vld [vmem:[#allocation14 + $0x26b8] sm:$0xff] }
 0x40b   :  { %4975 = vmatpush.msrb.mxu0 %v2490_v17  ;;  %4916 = vmatpush.msra.mxu1 %v3753_v18  ;;  %v3641_v1 = vld [vmem:[#allocation14 + $0x3bb0] sm:$0xff]  ;;  %v3178_v5 = vld [vmem:[#allocation14 + $0x2d38] sm:$0xff]  ;;  %v7827_v18 = vpop.f32.mrf.mxu2 }
 0x40c   :  { %4945 = vmatpush.msra.mxu2 %v1818_v19  ;;  %4968 = vmatpush.msra.mxu3 %v2026_v22  ;;  %v3625_v6 = vld [vmem:[#allocation14 + $0x3b30] sm:$0xff]  ;;  %v2346_v8 = vld [vmem:[#allocation14 + $0x1338] sm:$0xff]  ;;  %8310 = vst [vmem:[#allocation34_spill] sm:$0xff] %v7827_v18  ;;  %v1868_v18 = vld [vmem:[#allocation14 + $0x448] sm:$0xff] }
 0x40d   :  { %4976 = vmatpush.msrb.mxu0 %v2474_v23  ;;  %4917 = vmatpush.msra.mxu1 %v3737_v24  ;;  %v2954_v9 = vld [vmem:[#allocation14 + $0x2638] sm:$0xff]  ;;  %v3609_v14 = vld [vmem:[#allocation14 + $0x3ab0] sm:$0xff] }
 0x40e   :  { %4946 = vmatpush.msra.mxu2 %v1802_v25  ;;  %4969 = vmatpush.msra.mxu3 %v2010_v26  ;;  %v3162_v10 = vld [vmem:[#allocation14 + $0x2cb8] sm:$0xff]  ;;  %v3593_v19 = vld [vmem:[#allocation14 + $0x3a30] sm:$0xff]  ;;  %v7829_v25 = vpop.f32.mrf.mxu3 }
 0x40f   :  { %4977 = vmatpush.msrb.mxu0 %v2458_v27  ;;  %4918 = vmatpush.msra.mxu1 %v3721_v28  ;;  %v2330_v15 = vld [vmem:[#allocation14 + $0x12b8] sm:$0xff]  ;;  %8311 = vst [vmem:[#allocation35_spill] sm:$0xff] %v7829_v25  ;;  %v3577_v26 = vld [vmem:[#allocation14 + $0x39b0] sm:$0xff] }
 0x410   :  { %4947 = vmatpush.msra.mxu2 %v1786_v29  ;;  %4970 = vmatpush.msra.mxu3 %v1994_v30  ;;  %v2938_v16 = vld [vmem:[#allocation14 + $0x25b8] sm:$0xff]  ;;  %v3561_v30 = vld [vmem:[#allocation14 + $0x3930] sm:$0xff] }
 0x411   :  { %4978 = vmatpush.msrb.mxu0 %v2442_v32  ;;  %4971 = vmatmul.f32.vlgmr.msra.gmra.mxu3 %v7718_v13  ;;  %v3146_v17 = vld [vmem:[#allocation14 + $0x2c38] sm:$0xff] }
 0x412   :  { %4919 = vmatpush.msra.mxu1 %v3705_v34  ;;  %5035 = vmatpush.msrb.mxu3 %v3258_v38  ;;  %v2314_v22 = vld [vmem:[#allocation14 + $0x1238] sm:$0xff]  ;;  %v7831_v34 = vpop.f32.mrf.mxu1  ;;  %v7833_v38 = vpop.f32.mrf.mxu0 }
 0x413   :  { %4948 = vmatpush.msra.mxu2 %v1770_v39  ;;  %4979 = vmatpush.msrb.mxu0 %v2426_v42  ;;  %v2922_v23 = vld [vmem:[#allocation14 + $0x2538] sm:$0xff]  ;;  %8312 = vst [vmem:[#allocation36_spill] sm:$0xff] %v7833_v38  ;;  %v2929_v38 = vld [vmem:[#allocation14 + $0x2570] sm:$0xff] }
 0x414   :  { %4920 = vmatpush.msra.mxu1 %v3689_v43  ;;  %5036 = vmatpush.msrb.mxu3 %v3242_v45  ;;  %v3130_v24 = vld [vmem:[#allocation14 + $0x2bb8] sm:$0xff]  ;;  %v3545_v43 = vld [vmem:[#allocation14 + $0x38b0] sm:$0xff] }
 0x415   :  { %4949 = vmatpush.msra.mxu2 %v1754_v47  ;;  %4980 = vmatpush.msrb.mxu0 %v2410_v48  ;;  %v2298_v27 = vld [vmem:[#allocation14 + $0x11b8] sm:$0xff] }
 0x416   :  { %4921 = vmatpush.msra.mxu1 %v3673_v49  ;;  %5037 = vmatpush.msrb.mxu3 %v3226_v52  ;;  %v2906_v28 = vld [vmem:[#allocation14 + $0x24b8] sm:$0xff]  ;;  %v7835_v49 = vpop.f32.mrf.mxu2  ;;  %v3529_v52 = vld [vmem:[#allocation14 + $0x3830] sm:$0xff] }
 0x417   :  { %4950 = vmatpush.msra.mxu2 %v1738_v54  ;;  %4981 = vmatpush.msrb.mxu0 %v2394_v55  ;;  %v3114_v29 = vld [vmem:[#allocation14 + $0x2b38] sm:$0xff]  ;;  %8313 = vst [vmem:[#allocation37_spill] sm:$0xff] %v7835_v49  ;;  %v7837_v55 = vpop.f32.mrf.mxu3  ;;  %v3467_v49 = vld [vmem:[#allocation14 + $0x3640] sm:$0xff] }
 0x418   :  { %4951 = vmatmul.f32.vlgmr.msra.gmra.mxu2 %v7724_v11  ;;  %5038 = vmatpush.msrb.mxu3 %v3210_v57  ;;  %v2282_v32 = vld [vmem:[#allocation14 + $0x1138] sm:$0xff]  ;;  %8314 = vst [vmem:[#allocation38_spill] sm:$0xff] %v7837_v55 }
 0x419   :  { %5015 = vmatpush.msrb.mxu2 %v3002_v56  ;;  %4922 = vmatpush.msra.mxu1 %v3657_v61  ;;  %v2890_v39 = vld [vmem:[#allocation14 + $0x2438] sm:$0xff] }
 0x41a   :  { %4982 = vmatpush.msrb.mxu0 %v2378_v62  ;;  %5039 = vmatpush.msrb.mxu3 %v3194_v63  ;;  %v3098_v42 = vld [vmem:[#allocation14 + $0x2ab8] sm:$0xff] }
 0x41b   :  { %5016 = vmatpush.msrb.mxu2 %v2986_v20  ;;  %4923 = vmatpush.msra.mxu1 %v3641_v1  ;;  %v2266_v45 = vld [vmem:[#allocation14 + $0x10b8] sm:$0xff]  ;;  %v7841_v1 = vpop.f32.mrf.mxu1 }
 0x41c   :  { %4983 = vmatpush.msrb.mxu0 %v2362_v12  ;;  %5040 = vmatpush.msrb.mxu3 %v3178_v5  ;;  %v2874_v47 = vld [vmem:[#allocation14 + $0x23b8] sm:$0xff]  ;;  %8315 = vst [vmem:[#allocation39_spill] sm:$0xff] %v7841_v1  ;;  %v7843_v12 = vpop.f32.mrf.mxu0 }
 0x41d   :  { %5017 = vmatpush.msrb.mxu2 %v2970_v4  ;;  %4924 = vmatpush.msra.mxu1 %v3625_v6  ;;  %v3082_v48 = vld [vmem:[#allocation14 + $0x2a38] sm:$0xff]  ;;  %8316 = vst [vmem:[#allocation40_spill] sm:$0xff] %v7843_v12  ;;  %v3355_v12 = vld [vmem:[#allocation14 + $0x32c0] sm:$0xff] }
 0x41e   :  { %4984 = vmatpush.msrb.mxu0 %v2346_v8  ;;  %5041 = vmatpush.msrb.mxu3 %v3162_v10  ;;  %v2250_v54 = vld [vmem:[#allocation14 + $0x1038] sm:$0xff] }
 0x41f   :  { %5018 = vmatpush.msrb.mxu2 %v2954_v9  ;;  %4925 = vmatpush.msra.mxu1 %v3609_v14  ;;  %v2746_v56 = vld [vmem:[#allocation14 + $0x1fb8] sm:$0xff]  ;;  %v7845_v14 = vpop.f32.mrf.mxu2 }
 0x420   :  { %4985 = vmatpush.msrb.mxu0 %v2330_v15  ;;  %5042 = vmatpush.msrb.mxu3 %v3146_v17  ;;  %v2858_v57 = vld [vmem:[#allocation14 + $0x2338] sm:$0xff]  ;;  %8317 = vst [vmem:[#allocation41_spill] sm:$0xff] %v7845_v14 }
 0x421   :  { %5019 = vmatpush.msrb.mxu2 %v2938_v16  ;;  %4926 = vmatpush.msra.mxu1 %v3593_v19  ;;  %v3066_v61 = vld [vmem:[#allocation14 + $0x29b8] sm:$0xff] }
 0x422   :  { %4986 = vmatpush.msrb.mxu0 %v2314_v22  ;;  %5043 = vmatpush.msrb.mxu3 %v3130_v24  ;;  %v3514_v62 = vld [vmem:[#allocation14 + $0x37b8] sm:$0xff]  ;;  %v7847_v22 = vpop.f32.mrf.mxu3  ;;  %v2235_v24 = vld [vmem:[#allocation14 + $0xfc0] sm:$0xff] }
 0x423   :  { %5020 = vmatpush.msrb.mxu2 %v2922_v23  ;;  %4927 = vmatpush.msra.mxu1 %v3577_v26  ;;  %v2730_v20 = vld [vmem:[#allocation14 + $0x1f38] sm:$0xff]  ;;  %8318 = vst [vmem:[#allocation42_spill] sm:$0xff] %v7847_v22  ;;  %v1739_v22 = vld [vmem:[#allocation14 + $0x40] sm:$0xff] }
 0x424   :  { %4987 = vmatpush.msrb.mxu0 %v2298_v27  ;;  %5044 = vmatpush.msrb.mxu3 %v3114_v29  ;;  %v2842_v63 = vld [vmem:[#allocation14 + $0x22b8] sm:$0xff]  ;;  %v7849_v29 = vpop.f32.mrf.mxu0 }
 0x425   :  { %5021 = vmatpush.msrb.mxu2 %v2906_v28  ;;  %4928 = vmatpush.msra.mxu1 %v3561_v30  ;;  %v3050_v4 = vld [vmem:[#allocation14 + $0x2938] sm:$0xff]  ;;  %8319 = vst [vmem:[#allocation43_spill] sm:$0xff] %v7849_v29  ;;  %v2219_v30 = vld [vmem:[#allocation14 + $0xf40] sm:$0xff] }
 0x426   :  { %4988 = vmatpush.msrb.mxu0 %v2282_v32  ;;  %5045 = vmatpush.msrb.mxu3 %v3098_v42  ;;  %v3498_v5 = vld [vmem:[#allocation14 + $0x3738] sm:$0xff] }
 0x427   :  { %5022 = vmatpush.msrb.mxu2 %v2890_v39  ;;  %4929 = vmatpush.msra.mxu1 %v3545_v43  ;;  %v2714_v6 = vld [vmem:[#allocation14 + $0x1eb8] sm:$0xff]  ;;  %v7852_v43 = vpop.f32.mrf.mxu1 }
 0x428   :  { %4989 = vmatpush.msrb.mxu0 %v2266_v45  ;;  %5046 = vmatpush.msrb.mxu3 %v3082_v48  ;;  %v2826_v8 = vld [vmem:[#allocation14 + $0x2238] sm:$0xff]  ;;  %v2203_v45 = vld [vmem:[#allocation14 + $0xec0] sm:$0xff]  ;;  %v7854_v48 = vpop.f32.mrf.mxu2 }
 0x429   :  { %5023 = vmatpush.msrb.mxu2 %v2874_v47  ;;  %4930 = vmatpush.msra.mxu1 %v3529_v52  ;;  %v3034_v9 = vld [vmem:[#allocation14 + $0x28b8] sm:$0xff] }
 0x42a   :  { %4990 = vmatpush.msrb.mxu0 %v2250_v54  ;;  %4931 = vmatmul.f32.vlgmr.msra.gmra.mxu1 %v7752_v50  ;;  %v3482_v10 = vld [vmem:[#allocation14 + $0x36b8] sm:$0xff]  ;;  %v1979_v54 = vld [vmem:[#allocation14 + $0x7c0] sm:$0xff] }
 0x42b   :  { %4991 = vmatmul.f32.vlgmr.msrb.gmra.mxu0 %v7732_v53  ;;  %4995 = vmatpush.msrb.mxu1 %v2746_v56  ;;  %v2698_v15 = vld [vmem:[#allocation14 + $0x1e38] sm:$0xff]  ;;  %v2187_v56 = vld [vmem:[#allocation14 + $0xe40] sm:$0xff] }
 0x42c   :  { %5024 = vmatpush.msrb.mxu2 %v2858_v57  ;;  %5047 = vmatpush.msrb.mxu3 %v3066_v61  ;;  %v2810_v16 = vld [vmem:[#allocation14 + $0x21b8] sm:$0xff]  ;;  %v7856_v57 = vpop.f32.mrf.mxu3 }
 0x42d   :  { %5055 = vmatpush.msra.mxu0 %v3514_v62  ;;  %4996 = vmatpush.msrb.mxu1 %v2730_v20  ;;  %v3018_v17 = vld [vmem:[#allocation14 + $0x2838] sm:$0xff]  ;;  %v1963_v20 = vld [vmem:[#allocation14 + $0x740] sm:$0xff] }
 0x42e   :  { %5025 = vmatpush.msrb.mxu2 %v2842_v63  ;;  %5048 = vmatpush.msrb.mxu3 %v3050_v4  ;;  %v3466_v19 = vld [vmem:[#allocation14 + $0x3638] sm:$0xff]  ;;  %v2171_v63 = vld [vmem:[#allocation14 + $0xdc0] sm:$0xff] }
 0x42f   :  { %5056 = vmatpush.msra.mxu0 %v3498_v5  ;;  %4997 = vmatpush.msrb.mxu1 %v2714_v6  ;;  %v2682_v23 = vld [vmem:[#allocation14 + $0x1db8] sm:$0xff]  ;;  %v7859_v6 = vpop.f32.mrf.mxu0 }
 0x430   :  { %5026 = vmatpush.msrb.mxu2 %v2826_v8  ;;  %5049 = vmatpush.msrb.mxu3 %v3034_v9  ;;  %v2794_v26 = vld [vmem:[#allocation14 + $0x2138] sm:$0xff]  ;;  %8320 = vst [vmem:[#allocation44_spill] sm:$0xff] %v7859_v6  ;;  %v1947_v8 = vld [vmem:[#allocation14 + $0x6c0] sm:$0xff] }
 0x431   :  { %5057 = vmatpush.msra.mxu0 %v3482_v10  ;;  %4998 = vmatpush.msrb.mxu1 %v2698_v15  ;;  %v3450_v27 = vld [vmem:[#allocation14 + $0x35b8] sm:$0xff]  ;;  %v2155_v9 = vld [vmem:[#allocation14 + $0xd40] sm:$0xff] }
 0x432   :  { %5027 = vmatpush.msrb.mxu2 %v2810_v16  ;;  %5050 = vmatpush.msrb.mxu3 %v3018_v17  ;;  %v2666_v28 = vld [vmem:[#allocation14 + $0x1d38] sm:$0xff]  ;;  %v7861_v16 = vpop.f32.mrf.mxu1  ;;  %v1931_v17 = vld [vmem:[#allocation14 + $0x640] sm:$0xff] }
 0x433   :  { %5058 = vmatpush.msra.mxu0 %v3466_v19  ;;  %5051 = vmatmul.f32.vlgmr.msrb.gmra.mxu3 %v7740_v7  ;;  %v2778_v32 = vld [vmem:[#allocation14 + $0x20b8] sm:$0xff]  ;;  %v2139_v19 = vld [vmem:[#allocation14 + $0xcc0] sm:$0xff] }
 0x434   :  { %4999 = vmatpush.msrb.mxu1 %v2682_v23  ;;  %5115 = vmatpush.msra.mxu3 %v2235_v24  ;;  %v3434_v39 = vld [vmem:[#allocation14 + $0x3538] sm:$0xff]  ;;  %v7863_v23 = vpop.f32.mrf.mxu2  ;;  %v3227_v6 = vld [vmem:[#allocation14 + $0x2ec0] sm:$0xff] }
 0x435   :  { %5028 = vmatpush.msrb.mxu2 %v2794_v26  ;;  %v2650_v42 = vld [vmem:[#allocation14 + $0x1cb8] sm:$0xff]  ;;  %5059 = vmatpush.msra.mxu0 %v3450_v27  ;;  %v1915_v27 = vld [vmem:[#allocation14 + $0x5c0] sm:$0xff] }
 0x436   :  { %5000 = vmatpush.msrb.mxu1 %v2666_v28  ;;  %v2762_v47 = vld [vmem:[#allocation14 + $0x2038] sm:$0xff]  ;;  %5116 = vmatpush.msra.mxu3 %v2219_v30  ;;  %v2123_v28 = vld [vmem:[#allocation14 + $0xc40] sm:$0xff]  ;;  %v7865_v30 = vpop.f32.mrf.mxu3 }
 0x437   :  { %5029 = vmatpush.msrb.mxu2 %v2778_v32  ;;  %v3418_v52 = vld [vmem:[#allocation14 + $0x34b8] sm:$0xff]  ;;  %5060 = vmatpush.msra.mxu0 %v3434_v39 }
 0x438   :  { %5001 = vmatpush.msrb.mxu1 %v2650_v42  ;;  %5117 = vmatpush.msra.mxu3 %v2203_v45  ;;  %v2634_v61 = vld [vmem:[#allocation14 + $0x1c38] sm:$0xff]  ;;  %v1899_v42 = vld [vmem:[#allocation14 + $0x540] sm:$0xff] }
 0x439   :  { %5030 = vmatpush.msrb.mxu2 %v2762_v47  ;;  %v3402_v62 = vld [vmem:[#allocation14 + $0x3438] sm:$0xff]  ;;  %5061 = vmatpush.msra.mxu0 %v3418_v52  ;;  %v2107_v45 = vld [vmem:[#allocation14 + $0xbc0] sm:$0xff] }
 0x43a   :  { %5031 = vmatmul.f32.vlgmr.msrb.gmra.mxu2 %v7737_v44  ;;  %5118 = vmatpush.msra.mxu3 %v2187_v56  ;;  %v2618_v4 = vld [vmem:[#allocation14 + $0x1bb8] sm:$0xff]  ;;  %v1883_v56 = vld [vmem:[#allocation14 + $0x4c0] sm:$0xff] }
 0x43b   :  { %5095 = vmatpush.msra.mxu2 %v1979_v54  ;;  %v3386_v5 = vld [vmem:[#allocation14 + $0x33b8] sm:$0xff]  ;;  %5002 = vmatpush.msrb.mxu1 %v2634_v61  ;;  %v7867_v54 = vpop.f32.mrf.mxu0  ;;  %v2091_v61 = vld [vmem:[#allocation14 + $0xb40] sm:$0xff] }
 0x43c   :  { %5062 = vmatpush.msra.mxu0 %v3402_v62  ;;  %5119 = vmatpush.msra.mxu3 %v2171_v63  ;;  %v2602_v10 = vld [vmem:[#allocation14 + $0x1b38] sm:$0xff]  ;;  %v7869_v63 = vpop.f32.mrf.mxu1 }
 0x43d   :  { %5096 = vmatpush.msra.mxu2 %v1963_v20  ;;  %v3370_v15 = vld [vmem:[#allocation14 + $0x3338] sm:$0xff]  ;;  %5003 = vmatpush.msrb.mxu1 %v2618_v4  ;;  %8321 = vst [vmem:[#allocation45_spill] sm:$0xff] %v7869_v63  ;;  %v1867_v4 = vld [vmem:[#allocation14 + $0x440] sm:$0xff] }
 0x43e   :  { %5063 = vmatpush.msra.mxu0 %v3386_v5  ;;  %5120 = vmatpush.msra.mxu3 %v2155_v9  ;;  %v2586_v24 = vld [vmem:[#allocation14 + $0x1ab8] sm:$0xff]  ;;  %v2075_v5 = vld [vmem:[#allocation14 + $0xac0] sm:$0xff] }
 0x43f   :  { %5097 = vmatpush.msra.mxu2 %v1947_v8  ;;  %v3354_v26 = vld [vmem:[#allocation14 + $0x32b8] sm:$0xff]  ;;  %5004 = vmatpush.msrb.mxu1 %v2602_v10  ;;  %v7871_v8 = vpop.f32.mrf.mxu2  ;;  %v3291_v63 = vld [vmem:[#allocation14 + $0x30c0] sm:$0xff] }
 0x440   :  { %5064 = vmatpush.msra.mxu0 %v3370_v15  ;;  %5121 = vmatpush.msra.mxu3 %v2139_v19  ;;  %v2570_v32 = vld [vmem:[#allocation14 + $0x1a38] sm:$0xff]  ;;  %v1851_v15 = vld [vmem:[#allocation14 + $0x3c0] sm:$0xff]  ;;  %v7873_v19 = vpop.f32.mrf.mxu3 }
 0x441   :  { %5098 = vmatpush.msra.mxu2 %v1931_v17  ;;  %v3338_v39 = vld [vmem:[#allocation14 + $0x3238] sm:$0xff]  ;;  %5005 = vmatpush.msrb.mxu1 %v2586_v24  ;;  %v2059_v17 = vld [vmem:[#allocation14 + $0xa40] sm:$0xff] }
 0x442   :  { %5065 = vmatpush.msra.mxu0 %v3354_v26  ;;  %5122 = vmatpush.msra.mxu3 %v2123_v28  ;;  %v2554_v47 = vld [vmem:[#allocation14 + $0x19b8] sm:$0xff]  ;;  %v1835_v28 = vld [vmem:[#allocation14 + $0x340] sm:$0xff] }
 0x443   :  { %5099 = vmatpush.msra.mxu2 %v1915_v27  ;;  %v3322_v52 = vld [vmem:[#allocation14 + $0x31b8] sm:$0xff]  ;;  %5006 = vmatpush.msrb.mxu1 %v2570_v32  ;;  %v7875_v32 = vpop.f32.mrf.mxu0 }
 0x444   :  { %5066 = vmatpush.msra.mxu0 %v3338_v39  ;;  %5123 = vmatpush.msra.mxu3 %v2107_v45  ;;  %v2538_v62 = vld [vmem:[#allocation14 + $0x1938] sm:$0xff]  ;;  %v2043_v39 = vld [vmem:[#allocation14 + $0x9c0] sm:$0xff] }
 0x445   :  { %5100 = vmatpush.msra.mxu2 %v1899_v42  ;;  %v3306_v20 = vld [vmem:[#allocation14 + $0x3138] sm:$0xff]  ;;  %5007 = vmatpush.msrb.mxu1 %v2554_v47  ;;  %v2491_v42 = vld [vmem:[#allocation14 + $0x17c0] sm:$0xff] }
 0x446   :  { %5067 = vmatpush.msra.mxu0 %v3322_v52  ;;  %5124 = vmatpush.msra.mxu3 %v2091_v61  ;;  %v2522_v9 = vld [vmem:[#allocation14 + $0x18b8] sm:$0xff]  ;;  %v1819_v47 = vld [vmem:[#allocation14 + $0x2c0] sm:$0xff]  ;;  %v7879_v52 = vpop.f32.mrf.mxu1 }
 0x447   :  { %5101 = vmatpush.msra.mxu2 %v1883_v56  ;;  %v3290_v10 = vld [vmem:[#allocation14 + $0x30b8] sm:$0xff]  ;;  %5008 = vmatpush.msrb.mxu1 %v2538_v62  ;;  %8322 = vst [vmem:[#allocation46_spill] sm:$0xff] %v7879_v52  ;;  %v2027_v56 = vld [vmem:[#allocation14 + $0x940] sm:$0xff]  ;;  %v7881_v62 = vpop.f32.mrf.mxu2 }
 0x448   :  { %5068 = vmatpush.msra.mxu0 %v3306_v20  ;;  %5125 = vmatpush.msra.mxu3 %v2075_v5  ;;  %v2506_v24 = vld [vmem:[#allocation14 + $0x1838] sm:$0xff]  ;;  %v2475_v61 = vld [vmem:[#allocation14 + $0x1740] sm:$0xff] }
 0x449   :  { %5102 = vmatpush.msra.mxu2 %v1867_v4  ;;  %v3274_v26 = vld [vmem:[#allocation14 + $0x3038] sm:$0xff]  ;;  %5009 = vmatpush.msrb.mxu1 %v2522_v9  ;;  %v1803_v4 = vld [vmem:[#allocation14 + $0x240] sm:$0xff] }
 0x44a   :  { %5069 = vmatpush.msra.mxu0 %v3290_v10  ;;  %5126 = vmatpush.msra.mxu3 %v2059_v17  ;;  %v3770_v27 = vld [vmem:[#allocation14 + $0x3fb8] sm:$0xff]  ;;  %v2011_v5 = vld [vmem:[#allocation14 + $0x8c0] sm:$0xff]  ;;  %v7883_v10 = vpop.f32.mrf.mxu3 }
 0x44b   :  { %5103 = vmatpush.msra.mxu2 %v1851_v15  ;;  %5010 = vmatpush.msrb.mxu1 %v2506_v24  ;;  %v3754_v45 = vld [vmem:[#allocation14 + $0x3f38] sm:$0xff]  ;;  %v2459_v9 = vld [vmem:[#allocation14 + $0x16c0] sm:$0xff] }
 0x44c   :  { %5070 = vmatpush.msra.mxu0 %v3274_v26  ;;  %5011 = vmatmul.f32.vlgmr.msrb.gmra.mxu1 %v7728_v40  ;;  %v3738_v20 = vld [vmem:[#allocation14 + $0x3eb8] sm:$0xff]  ;;  %v1787_v17 = vld [vmem:[#allocation14 + $0x1c0] sm:$0xff] }
 0x44d   :  { %5071 = vmatmul.f32.vlgmr.msra.gmra.mxu0 %v7746_v21  ;;  %5075 = vmatpush.msra.mxu1 %v3770_v27  ;;  %v3722_v15 = vld [vmem:[#allocation14 + $0x3e38] sm:$0xff]  ;;  %v1995_v24 = vld [vmem:[#allocation14 + $0x840] sm:$0xff] }
 0x44e   :  { %5104 = vmatpush.msra.mxu2 %v1835_v28  ;;  %5127 = vmatpush.msra.mxu3 %v2043_v39  ;;  %v2443_v26 = vld [vmem:[#allocation14 + $0x1640] sm:$0xff]  ;;  %v3706_v28 = vld [vmem:[#allocation14 + $0x3db8] sm:$0xff]  ;;  %v7887_v39 = vpop.f32.mrf.mxu0 }
 0x44f   :  { %5135 = vmatpush.msrb.mxu0 %v2491_v42  ;;  %5076 = vmatpush.msra.mxu1 %v3754_v45  ;;  %v7885_v27 = vld [vmem:[#allocation15] sm:$0xff] }
 0x450   :  { %5105 = vmatpush.msra.mxu2 %v1819_v47  ;;  %5128 = vmatpush.msra.mxu3 %v2027_v56  ;;  %v3259_v42 = vld [vmem:[#allocation14 + $0x2fc0] sm:$0xff]  ;;  %v3789_v47 = vperm.slane %v7885_v27, 6 }
 0x451   :  { %5136 = vmatpush.msrb.mxu0 %v2475_v61  ;;  %5077 = vmatpush.msra.mxu1 %v3738_v20  ;;  %v1771_v45 = vld [vmem:[#allocation14 + $0x140] sm:$0xff]  ;;  %v3690_v61 = vld [vmem:[#allocation14 + $0x3d38] sm:$0xff]  ;;  %v7890_v20 = vpop.f32.mrf.mxu1 }
 0x452   :  { %5106 = vmatpush.msra.mxu2 %v1803_v4  ;;  %5129 = vmatpush.msra.mxu3 %v2011_v5  ;;  %v2427_v56 = vld [vmem:[#allocation14 + $0x15c0] sm:$0xff]  ;;  %8323 = vst [vmem:[#allocation47_spill] sm:$0xff] %v7890_v20  ;;  %v4812_v14 = vpop.f32.mrf.mxu3 }
 0x453   :  { %5137 = vmatpush.msrb.mxu0 %v2459_v9  ;;  %5078 = vmatpush.msra.mxu1 %v3722_v15  ;;  %v3243_v4 = vld [vmem:[#allocation14 + $0x2f40] sm:$0xff]  ;;  %v3674_v15 = vld [vmem:[#allocation14 + $0x3cb8] sm:$0xff] }
 0x454   :  { %5107 = vmatpush.msra.mxu2 %v1787_v17  ;;  %5130 = vmatpush.msra.mxu3 %v1995_v24  ;;  %v1755_v5 = vld [vmem:[#allocation14 + $0xc0] sm:$0xff] }
 0x455   :  { %5138 = vmatpush.msrb.mxu0 %v2443_v26  ;;  %5131 = vmatmul.f32.vlgmr.msra.gmra.mxu3 %v7718_v13  ;;  %v2411_v9 = vld [vmem:[#allocation14 + $0x1540] sm:$0xff] }
 0x456   :  { %5079 = vmatpush.msra.mxu1 %v3706_v28  ;;  %5195 = vmatpush.msrb.mxu3 %v3259_v42  ;;  %v2395_v26 = vld [vmem:[#allocation14 + $0x14c0] sm:$0xff]  ;;  %v3658_v42 = vld [vmem:[#allocation14 + $0x3c38] sm:$0xff]  ;;  %v7893_v55 = vpop.f32.mrf.mxu0 }
 0x457   :  { %5108 = vmatpush.msra.mxu2 %v1771_v45  ;;  %v4792_v17 = vpop.f32.mrf.mxu2  ;;  %5139 = vmatpush.msrb.mxu0 %v2427_v56  ;;  %v3003_v20 = vld [vmem:[#allocation14 + $0x27c0] sm:$0xff] }
 0x458   :  { %5080 = vmatpush.msra.mxu1 %v3690_v61  ;;  %v4793_v24 = vadd.f32 %v4792_v17, %v3789_v47  ;;  %5196 = vmatpush.msrb.mxu3 %v3243_v4  ;;  %v3211_v28 = vld [vmem:[#allocation14 + $0x2e40] sm:$0xff]  ;;  %v3642_v61 = vld [vmem:[#allocation14 + $0x3bb8] sm:$0xff] }
 0x459   :  { %5109 = vmatpush.msra.mxu2 %v1755_v5  ;;  %5140 = vmatpush.msrb.mxu0 %v2411_v9  ;;  %v2379_v45 = vld [vmem:[#allocation14 + $0x1440] sm:$0xff]  ;;  %v7896_v5 = vpop.f32.mrf.mxu1 }
 0x45a   :  { %5081 = vmatpush.msra.mxu1 %v3674_v15  ;;  %v4813_v29 = vadd.f32 %v4812_v14, %v4793_v24  ;;  %5197 = vmatpush.msrb.mxu3 %v3227_v6  ;;  %v2987_v56 = vld [vmem:[#allocation14 + $0x2740] sm:$0xff]  ;;  %8324 = vst [vmem:[#allocation48_spill] sm:$0xff] %v7896_v5 }
 0x45b   :  { %5110 = vmatpush.msra.mxu2 %v1739_v22  ;;  %5141 = vmatpush.msrb.mxu0 %v2395_v26  ;;  %v3195_v47 = vld [vmem:[#allocation14 + $0x2dc0] sm:$0xff]  ;;  %v3626_v22 = vld [vmem:[#allocation14 + $0x3b38] sm:$0xff] }
 0x45c   :  { %5111 = vmatmul.f32.vlgmr.msra.gmra.mxu2 %v7724_v11  ;;  %5198 = vmatpush.msrb.mxu3 %v3211_v28  ;;  %v2363_v4 = vld [vmem:[#allocation14 + $0x13c0] sm:$0xff] }
 0x45d   :  { %5175 = vmatpush.msrb.mxu2 %v3003_v20  ;;  %5082 = vmatpush.msra.mxu1 %v3658_v42  ;;  %v2971_v14 = vld [vmem:[#allocation14 + $0x26c0] sm:$0xff]  ;;  %v3610_v20 = vld [vmem:[#allocation14 + $0x3ab8] sm:$0xff] }
 0x45e   :  { %5142 = vmatpush.msrb.mxu0 %v2379_v45  ;;  %v3179_v6 = vld [vmem:[#allocation14 + $0x2d40] sm:$0xff]  ;;  %5199 = vmatpush.msrb.mxu3 %v3195_v47  ;;  %v3594_v42 = vld [vmem:[#allocation14 + $0x3a38] sm:$0xff] }
 0x45f   :  { %5176 = vmatpush.msrb.mxu2 %v2987_v56  ;;  %v2347_v9 = vld [vmem:[#allocation14 + $0x1340] sm:$0xff]  ;;  %5083 = vmatpush.msra.mxu1 %v3642_v61 }
 0x460   :  { %5143 = vmatpush.msrb.mxu0 %v2363_v4  ;;  %v2955_v15 = vld [vmem:[#allocation14 + $0x2640] sm:$0xff]  ;;  %5200 = vmatpush.msrb.mxu3 %v3179_v6  ;;  %v3578_v4 = vld [vmem:[#allocation14 + $0x39b8] sm:$0xff] }
 0x461   :  { %v3163_v17 = vld [vmem:[#allocation14 + $0x2cc0] sm:$0xff]  ;;  %5177 = vmatpush.msrb.mxu2 %v2971_v14  ;;  %5084 = vmatpush.msra.mxu1 %v3626_v22  ;;  %v7900_v5 = vpop.f32.mrf.mxu1 }
 0x462   :  { %v2331_v24 = vld [vmem:[#allocation14 + $0x12c0] sm:$0xff]  ;;  %5144 = vmatpush.msrb.mxu0 %v2347_v9  ;;  %5201 = vmatpush.msrb.mxu3 %v3163_v17 }
 0x463   :  { %v2939_v26 = vld [vmem:[#allocation14 + $0x25c0] sm:$0xff]  ;;  %5178 = vmatpush.msrb.mxu2 %v2955_v15  ;;  %5085 = vmatpush.msra.mxu1 %v3610_v20  ;;  %v3562_v15 = vld [vmem:[#allocation14 + $0x3938] sm:$0xff] }
 0x464   :  { %v3147_v28 = vld [vmem:[#allocation14 + $0x2c40] sm:$0xff]  ;;  %5145 = vmatpush.msrb.mxu0 %v2331_v24  ;;  %v4832_v61 = vpop.f32.mrf.mxu0 }
 0x465   :  { %v2315_v45 = vld [vmem:[#allocation14 + $0x1240] sm:$0xff]  ;;  %5179 = vmatpush.msrb.mxu2 %v2939_v26  ;;  %5202 = vmatpush.msrb.mxu3 %v3147_v28  ;;  %v7898_v6 = vadd.f32 %v4832_v61, %v4813_v29  ;;  %v3546_v26 = vld [vmem:[#allocation14 + $0x38b8] sm:$0xff] }
 0x466   :  { %v2923_v56 = vld [vmem:[#allocation14 + $0x2540] sm:$0xff]  ;;  %5086 = vmatpush.msra.mxu1 %v3594_v42  ;;  %5146 = vmatpush.msrb.mxu0 %v2315_v45  ;;  %v3530_v42 = vld [vmem:[#allocation14 + $0x3838] sm:$0xff] }
 0x467   :  { %v3131_v47 = vld [vmem:[#allocation14 + $0x2bc0] sm:$0xff]  ;;  %5180 = vmatpush.msrb.mxu2 %v2923_v56 }
 0x468   :  { %v2299_v14 = vld [vmem:[#allocation14 + $0x11c0] sm:$0xff]  ;;  %5203 = vmatpush.msrb.mxu3 %v3131_v47  ;;  %5087 = vmatpush.msra.mxu1 %v3578_v4 }
 0x469   :  { %v2907_v22 = vld [vmem:[#allocation14 + $0x24c0] sm:$0xff]  ;;  %5147 = vmatpush.msrb.mxu0 %v2299_v14  ;;  %v7902_v4 = vpop.f32.mrf.mxu1 }
 0x46a   :  { %v3115_v9 = vld [vmem:[#allocation14 + $0x2b40] sm:$0xff]  ;;  %5181 = vmatpush.msrb.mxu2 %v2907_v22  ;;  %5088 = vmatpush.msra.mxu1 %v3562_v15  ;;  %8325 = vst [vmem:[#allocation49_spill] sm:$0xff] %v7902_v4  ;;  %v2273_v4 = vld [vmem:[#allocation14 + $0x10f0] sm:$0xff] }
 0x46b   :  { %v2283_v17 = vld [vmem:[#allocation14 + $0x1140] sm:$0xff]  ;;  %5204 = vmatpush.msrb.mxu3 %v3115_v9 }
 0x46c   :  { %v2891_v20 = vld [vmem:[#allocation14 + $0x2440] sm:$0xff]  ;;  %5148 = vmatpush.msrb.mxu0 %v2283_v17  ;;  %5089 = vmatpush.msra.mxu1 %v3546_v26 }
 0x46d   :  { %v3099_v24 = vld [vmem:[#allocation14 + $0x2ac0] sm:$0xff]  ;;  %5182 = vmatpush.msrb.mxu2 %v2891_v20 }
 0x46e   :  { %v2267_v28 = vld [vmem:[#allocation14 + $0x10c0] sm:$0xff]  ;;  %5205 = vmatpush.msrb.mxu3 %v3099_v24  ;;  %5090 = vmatpush.msra.mxu1 %v3530_v42 }
 0x46f   :  { %v2875_v29 = vld [vmem:[#allocation14 + $0x23c0] sm:$0xff]  ;;  %5149 = vmatpush.msrb.mxu0 %v2267_v28  ;;  %5091 = vmatmul.f32.vlgmr.msra.gmra.mxu1 %v7752_v50 }
 0x470   :  { %v3083_v61 = vld [vmem:[#allocation14 + $0x2a40] sm:$0xff]  ;;  %5183 = vmatpush.msrb.mxu2 %v2875_v29 }
 0x471   :  { %v2251_v45 = vld [vmem:[#allocation14 + $0x1040] sm:$0xff]  ;;  %5206 = vmatpush.msrb.mxu3 %v3083_v61 }
 0x472   :  { %v2747_v56 = vld [vmem:[#allocation14 + $0x1fc0] sm:$0xff]  ;;  %5150 = vmatpush.msrb.mxu0 %v2251_v45 }
 0x473   :  { %v2859_v47 = vld [vmem:[#allocation14 + $0x2340] sm:$0xff]  ;;  %5151 = vmatmul.f32.vlgmr.msrb.gmra.mxu0 %v7732_v53  ;;  %5155 = vmatpush.msrb.mxu1 %v2747_v56 }
 0x474   :  { %v3067_v14 = vld [vmem:[#allocation14 + $0x29c0] sm:$0xff]  ;;  %5184 = vmatpush.msrb.mxu2 %v2859_v47  ;;  %v7906_v47 = vpop.f32.mrf.mxu1 }
 0x475   :  { %v3515_v22 = vld [vmem:[#allocation14 + $0x37c0] sm:$0xff]  ;;  %5207 = vmatpush.msrb.mxu3 %v3067_v14  ;;  %v2236_v14 = vld [vmem:[#allocation14 + $0xfc8] sm:$0xff] }
 0x476   :  { %v2731_v9 = vld [vmem:[#allocation14 + $0x1f40] sm:$0xff]  ;;  %5215 = vmatpush.msra.mxu0 %v3515_v22 }
 0x477   :  { %v2843_v15 = vld [vmem:[#allocation14 + $0x22c0] sm:$0xff]  ;;  %5156 = vmatpush.msrb.mxu1 %v2731_v9 }
 0x478   :  { %v3051_v17 = vld [vmem:[#allocation14 + $0x2940] sm:$0xff]  ;;  %5185 = vmatpush.msrb.mxu2 %v2843_v15 }
 0x479   :  { %v3499_v20 = vld [vmem:[#allocation14 + $0x3740] sm:$0xff]  ;;  %5208 = vmatpush.msrb.mxu3 %v3051_v17  ;;  %v2220_v17 = vld [vmem:[#allocation14 + $0xf48] sm:$0xff]  ;;  %v4872_v25 = vpop.f32.mrf.mxu2 }
 0x47a   :  { %v2715_v24 = vld [vmem:[#allocation14 + $0x1ec0] sm:$0xff]  ;;  %5216 = vmatpush.msra.mxu0 %v3499_v20 }
 0x47b   :  { %v2827_v26 = vld [vmem:[#allocation14 + $0x2240] sm:$0xff]  ;;  %5157 = vmatpush.msrb.mxu1 %v2715_v24 }
 0x47c   :  { %v3035_v28 = vld [vmem:[#allocation14 + $0x28c0] sm:$0xff]  ;;  %5186 = vmatpush.msrb.mxu2 %v2827_v26  ;;  %v7909_v52 = vpop.f32.mrf.mxu1 }
 0x47d   :  { %v3483_v29 = vld [vmem:[#allocation14 + $0x36c0] sm:$0xff]  ;;  %5209 = vmatpush.msrb.mxu3 %v3035_v28  ;;  %v2204_v28 = vld [vmem:[#allocation14 + $0xec8] sm:$0xff] }
 0x47e   :  { %v2699_v61 = vld [vmem:[#allocation14 + $0x1e40] sm:$0xff]  ;;  %5217 = vmatpush.msra.mxu0 %v3483_v29 }
 0x47f   :  { %v2811_v42 = vld [vmem:[#allocation14 + $0x21c0] sm:$0xff]  ;;  %5158 = vmatpush.msrb.mxu1 %v2699_v61 }
 0x480   :  { %v3019_v45 = vld [vmem:[#allocation14 + $0x2840] sm:$0xff]  ;;  %5187 = vmatpush.msrb.mxu2 %v2811_v42  ;;  %5218 = vmatpush.msra.mxu0 %v3467_v49  ;;  %v1980_v49 = vld [vmem:[#allocation14 + $0x7c8] sm:$0xff] }
 0x481   :  { %v2683_v56 = vld [vmem:[#allocation14 + $0x1dc0] sm:$0xff]  ;;  %5210 = vmatpush.msrb.mxu3 %v3019_v45  ;;  %v2188_v42 = vld [vmem:[#allocation14 + $0xe48] sm:$0xff] }
 0x482   :  { %v2795_v22 = vld [vmem:[#allocation14 + $0x2140] sm:$0xff]  ;;  %5211 = vmatmul.f32.vlgmr.msrb.gmra.mxu3 %v7740_v7  ;;  %5159 = vmatpush.msrb.mxu1 %v2683_v56 }
 0x483   :  { %v3451_v9 = vld [vmem:[#allocation14 + $0x35c0] sm:$0xff]  ;;  %5275 = vmatpush.msra.mxu3 %v2236_v14  ;;  %5188 = vmatpush.msrb.mxu2 %v2795_v22  ;;  %v1964_v14 = vld [vmem:[#allocation14 + $0x748] sm:$0xff] }
 0x484   :  { %v2667_v15 = vld [vmem:[#allocation14 + $0x1d40] sm:$0xff]  ;;  %5219 = vmatpush.msra.mxu0 %v3451_v9  ;;  %v2172_v22 = vld [vmem:[#allocation14 + $0xdc8] sm:$0xff] }
 0x485   :  { %v2779_v20 = vld [vmem:[#allocation14 + $0x20c0] sm:$0xff]  ;;  %5160 = vmatpush.msrb.mxu1 %v2667_v15  ;;  %5276 = vmatpush.msra.mxu3 %v2220_v17  ;;  %v1948_v17 = vld [vmem:[#allocation14 + $0x6c8] sm:$0xff] }
 0x486   :  { %v3435_v24 = vld [vmem:[#allocation14 + $0x3540] sm:$0xff]  ;;  %5189 = vmatpush.msrb.mxu2 %v2779_v20  ;;  %v2156_v20 = vld [vmem:[#allocation14 + $0xd48] sm:$0xff] }
 0x487   :  { %v2651_v26 = vld [vmem:[#allocation14 + $0x1cc0] sm:$0xff]  ;;  %5220 = vmatpush.msra.mxu0 %v3435_v24  ;;  %5277 = vmatpush.msra.mxu3 %v2204_v28  ;;  %v1932_v28 = vld [vmem:[#allocation14 + $0x648] sm:$0xff] }
 0x488   :  { %v2763_v29 = vld [vmem:[#allocation14 + $0x2040] sm:$0xff]  ;;  %5161 = vmatpush.msrb.mxu1 %v2651_v26 }
 0x489   :  { %v3419_v61 = vld [vmem:[#allocation14 + $0x34c0] sm:$0xff]  ;;  %5190 = vmatpush.msrb.mxu2 %v2763_v29  ;;  %5278 = vmatpush.msra.mxu3 %v2188_v42  ;;  %v2140_v29 = vld [vmem:[#allocation14 + $0xcc8] sm:$0xff] }
 0x48a   :  { %v2635_v45 = vld [vmem:[#allocation14 + $0x1c40] sm:$0xff]  ;;  %5221 = vmatpush.msra.mxu0 %v3419_v61  ;;  %5191 = vmatmul.f32.vlgmr.msrb.gmra.mxu2 %v7737_v44  ;;  %v2124_v42 = vld [vmem:[#allocation14 + $0xc48] sm:$0xff] }
 0x48b   :  { %v3403_v56 = vld [vmem:[#allocation14 + $0x3440] sm:$0xff]  ;;  %5255 = vmatpush.msra.mxu2 %v1980_v49  ;;  %5162 = vmatpush.msrb.mxu1 %v2635_v45  ;;  %v1916_v49 = vld [vmem:[#allocation14 + $0x5c8] sm:$0xff] }
 0x48c   :  { %v2619_v9 = vld [vmem:[#allocation14 + $0x1bc0] sm:$0xff]  ;;  %5222 = vmatpush.msra.mxu0 %v3403_v56  ;;  %5279 = vmatpush.msra.mxu3 %v2172_v22  ;;  %v2108_v22 = vld [vmem:[#allocation14 + $0xbc8] sm:$0xff] }
 0x48d   :  { %v3387_v15 = vld [vmem:[#allocation14 + $0x33c0] sm:$0xff]  ;;  %5256 = vmatpush.msra.mxu2 %v1964_v14  ;;  %5163 = vmatpush.msrb.mxu1 %v2619_v9  ;;  %v1900_v14 = vld [vmem:[#allocation14 + $0x548] sm:$0xff]  ;;  %v4852_v9 = vpop.f32.mrf.mxu1 }
 0x48e   :  { %v2603_v24 = vld [vmem:[#allocation14 + $0x1b40] sm:$0xff]  ;;  %5223 = vmatpush.msra.mxu0 %v3387_v15  ;;  %5280 = vmatpush.msra.mxu3 %v2156_v20  ;;  %v4853_v20 = vadd.f32 %v4852_v9, %v7898_v6  ;;  %v4912_v9 = vpop.f32.mrf.mxu0 }
 0x48f   :  { %v3371_v26 = vld [vmem:[#allocation14 + $0x3340] sm:$0xff]  ;;  %5257 = vmatpush.msra.mxu2 %v1948_v17  ;;  %5164 = vmatpush.msrb.mxu1 %v2603_v24  ;;  %v1884_v24 = vld [vmem:[#allocation14 + $0x4c8] sm:$0xff] }
 0x490   :  { %v2587_v61 = vld [vmem:[#allocation14 + $0x1ac0] sm:$0xff]  ;;  %5224 = vmatpush.msra.mxu0 %v3371_v26  ;;  %5281 = vmatpush.msra.mxu3 %v2140_v29  ;;  %v2092_v26 = vld [vmem:[#allocation14 + $0xb48] sm:$0xff] }
 0x491   :  { %5258 = vmatpush.msra.mxu2 %v1932_v28  ;;  %v2571_v45 = vld [vmem:[#allocation14 + $0x1a40] sm:$0xff]  ;;  %5165 = vmatpush.msrb.mxu1 %v2587_v61  ;;  %v4873_v61 = vadd.f32 %v4872_v25, %v4853_v20  ;;  %v2044_v20 = vld [vmem:[#allocation14 + $0x9c8] sm:$0xff] }
 0x492   :  { %v3339_v56 = vld [vmem:[#allocation14 + $0x3240] sm:$0xff]  ;;  %5225 = vmatpush.msra.mxu0 %v3355_v12  ;;  %5282 = vmatpush.msra.mxu3 %v2124_v42  ;;  %v4892_v12 = vpop.f32.mrf.mxu3 }
 0x493   :  { %5259 = vmatpush.msra.mxu2 %v1916_v49  ;;  %v2555_v15 = vld [vmem:[#allocation14 + $0x19c0] sm:$0xff]  ;;  %5166 = vmatpush.msrb.mxu1 %v2571_v45  ;;  %v2076_v49 = vld [vmem:[#allocation14 + $0xac8] sm:$0xff]  ;;  %v4893_v6 = vadd.f32 %v4892_v12, %v4873_v61 }
 0x494   :  { %v3323_v17 = vld [vmem:[#allocation14 + $0x31c0] sm:$0xff]  ;;  %5226 = vmatpush.msra.mxu0 %v3339_v56  ;;  %5283 = vmatpush.msra.mxu3 %v2108_v22  ;;  %v1852_v45 = vld [vmem:[#allocation14 + $0x3c8] sm:$0xff] }
 0x495   :  { %5260 = vmatpush.msra.mxu2 %v1900_v14  ;;  %v2539_v28 = vld [vmem:[#allocation14 + $0x1940] sm:$0xff]  ;;  %5167 = vmatpush.msrb.mxu1 %v2555_v15  ;;  %v2060_v56 = vld [vmem:[#allocation14 + $0xa48] sm:$0xff]  ;;  %v7913_v25 = vadd.f32 %v4912_v9, %v4893_v6 }
 0x496   :  { %v3307_v29 = vld [vmem:[#allocation14 + $0x3140] sm:$0xff]  ;;  %5227 = vmatpush.msra.mxu0 %v3323_v17  ;;  %5284 = vmatpush.msra.mxu3 %v2092_v26  ;;  %v1836_v17 = vld [vmem:[#allocation14 + $0x348] sm:$0xff] }
 0x497   :  { %5261 = vmatpush.msra.mxu2 %v1884_v24  ;;  %v2523_v42 = vld [vmem:[#allocation14 + $0x18c0] sm:$0xff]  ;;  %5168 = vmatpush.msrb.mxu1 %v2539_v28  ;;  %v2492_v24 = vld [vmem:[#allocation14 + $0x17c8] sm:$0xff] }
 0x498   :  { %5228 = vmatpush.msra.mxu0 %v3307_v29  ;;  %5285 = vmatpush.msra.mxu3 %v2076_v49  ;;  %v2507_v14 = vld [vmem:[#allocation14 + $0x1840] sm:$0xff]  ;;  %v1820_v26 = vld [vmem:[#allocation14 + $0x2c8] sm:$0xff] }
 0x499   :  { %5262 = vmatpush.msra.mxu2 %v1868_v18  ;;  %v3275_v22 = vld [vmem:[#allocation14 + $0x3040] sm:$0xff]  ;;  %5169 = vmatpush.msrb.mxu1 %v2523_v42  ;;  %v2028_v28 = vld [vmem:[#allocation14 + $0x948] sm:$0xff] }
 0x49a   :  { %5229 = vmatpush.msra.mxu0 %v3291_v63  ;;  %5286 = vmatpush.msra.mxu3 %v2060_v56  ;;  %v3771_v15 = vld [vmem:[#allocation14 + $0x3fc0] sm:$0xff]  ;;  %v2476_v29 = vld [vmem:[#allocation14 + $0x1748] sm:$0xff] }
 0x49b   :  { %5263 = vmatpush.msra.mxu2 %v1852_v45  ;;  %5170 = vmatpush.msrb.mxu1 %v2507_v14  ;;  %v3755_v18 = vld [vmem:[#allocation14 + $0x3f40] sm:$0xff]  ;;  %v1804_v61 = vld [vmem:[#allocation14 + $0x248] sm:$0xff] }
 0x49c   :  { %5230 = vmatpush.msra.mxu0 %v3275_v22  ;;  %5171 = vmatmul.f32.vlgmr.msrb.gmra.mxu1 %v7728_v40  ;;  %v3739_v63 = vld [vmem:[#allocation14 + $0x3ec0] sm:$0xff]  ;;  %v2012_v12 = vld [vmem:[#allocation14 + $0x8c8] sm:$0xff] }
 0x49d   :  { %5231 = vmatmul.f32.vlgmr.msra.gmra.mxu0 %v7746_v21  ;;  %5235 = vmatpush.msra.mxu1 %v3771_v15  ;;  %v2460_v49 = vld [vmem:[#allocation14 + $0x16c8] sm:$0xff]  ;;  %v3723_v42 = vld [vmem:[#allocation14 + $0x3e40] sm:$0xff]  ;;  %v3790_v15 = vperm.slane %v7885_v27, 7 }
 0x49e   :  { %5264 = vmatpush.msra.mxu2 %v1836_v17  ;;  %5287 = vmatpush.msra.mxu3 %v2044_v20  ;;  %v1788_v6 = vld [vmem:[#allocation14 + $0x1c8] sm:$0xff]  ;;  %v3707_v9 = vld [vmem:[#allocation14 + $0x3dc0] sm:$0xff] }
 0x49f   :  { %5295 = vmatpush.msrb.mxu0 %v2492_v24  ;;  %5236 = vmatpush.msra.mxu1 %v3755_v18  ;;  %v1996_v45 = vld [vmem:[#allocation14 + $0x848] sm:$0xff]  ;;  %v3691_v20 = vld [vmem:[#allocation14 + $0x3d40] sm:$0xff] }
 0x4a0   :  { %5265 = vmatpush.msra.mxu2 %v1820_v26  ;;  %5288 = vmatpush.msra.mxu3 %v2028_v28  ;;  %v2444_v56 = vld [vmem:[#allocation14 + $0x1648] sm:$0xff]  ;;  %v3675_v28 = vld [vmem:[#allocation14 + $0x3cc0] sm:$0xff] }
 0x4a1   :  { %5296 = vmatpush.msrb.mxu0 %v2476_v29  ;;  %5237 = vmatpush.msra.mxu1 %v3739_v63  ;;  %v3260_v14 = vld [vmem:[#allocation14 + $0x2fc8] sm:$0xff]  ;;  %v4952_v29 = vpop.f32.mrf.mxu2 }
 0x4a2   :  { %5266 = vmatpush.msra.mxu2 %v1804_v61  ;;  %5289 = vmatpush.msra.mxu3 %v2012_v12  ;;  %v1772_v22 = vld [vmem:[#allocation14 + $0x148] sm:$0xff]  ;;  %v4953_v12 = vadd.f32 %v4952_v29, %v3790_v15  ;;  %v3643_v15 = vld [vmem:[#allocation14 + $0x3bc0] sm:$0xff] }
 0x4a3   :  { %5297 = vmatpush.msrb.mxu0 %v2460_v49  ;;  %5238 = vmatpush.msra.mxu1 %v3723_v42  ;;  %v2428_v17 = vld [vmem:[#allocation14 + $0x15c8] sm:$0xff]  ;;  %v4972_v49 = vpop.f32.mrf.mxu3 }
 0x4a4   :  { %5267 = vmatpush.msra.mxu2 %v1788_v6  ;;  %5290 = vmatpush.msra.mxu3 %v1996_v45  ;;  %v3244_v24 = vld [vmem:[#allocation14 + $0x2f48] sm:$0xff]  ;;  %v4973_v45 = vadd.f32 %v4972_v49, %v4953_v12  ;;  %v3595_v49 = vld [vmem:[#allocation14 + $0x3a40] sm:$0xff] }
 0x4a5   :  { %5298 = vmatpush.msrb.mxu0 %v2444_v56  ;;  %5291 = vmatmul.f32.vlgmr.msra.gmra.mxu3 %v7718_v13  ;;  %v1756_v18 = vld [vmem:[#allocation14 + $0xc8] sm:$0xff]  ;;  %v3659_v56 = vld [vmem:[#allocation14 + $0x3c40] sm:$0xff] }
 0x4a6   :  { %5239 = vmatpush.msra.mxu1 %v3707_v9  ;;  %5355 = vmatpush.msrb.mxu3 %v3260_v14  ;;  %v2412_v26 = vld [vmem:[#allocation14 + $0x1548] sm:$0xff] }
 0x4a7   :  { %5268 = vmatpush.msra.mxu2 %v1772_v22  ;;  %5299 = vmatpush.msrb.mxu0 %v2428_v17  ;;  %v3228_v63 = vld [vmem:[#allocation14 + $0x2ec8] sm:$0xff] }
 0x4a8   :  { %5240 = vmatpush.msra.mxu1 %v3691_v20  ;;  %v1740_v61 = vld [vmem:[#allocation14 + $0x48] sm:$0xff]  ;;  %5356 = vmatpush.msrb.mxu3 %v3244_v24 }
 0x4a9   :  { %5269 = vmatpush.msra.mxu2 %v1756_v18  ;;  %v2396_v27 = vld [vmem:[#allocation14 + $0x14c8] sm:$0xff]  ;;  %5300 = vmatpush.msrb.mxu0 %v2412_v26  ;;  %v3627_v18 = vld [vmem:[#allocation14 + $0x3b40] sm:$0xff] }
 0x4aa   :  { %5241 = vmatpush.msra.mxu1 %v3675_v28  ;;  %v3004_v42 = vld [vmem:[#allocation14 + $0x27c8] sm:$0xff]  ;;  %5357 = vmatpush.msrb.mxu3 %v3228_v63  ;;  %v3611_v63 = vld [vmem:[#allocation14 + $0x3ac0] sm:$0xff] }
 0x4ab   :  { %v3212_v6 = vld [vmem:[#allocation14 + $0x2e48] sm:$0xff]  ;;  %5270 = vmatpush.msra.mxu2 %v1740_v61  ;;  %5301 = vmatpush.msrb.mxu0 %v2396_v27 }
 0x4ac   :  { %v2380_v9 = vld [vmem:[#allocation14 + $0x1448] sm:$0xff]  ;;  %5271 = vmatmul.f32.vlgmr.msra.gmra.mxu2 %v7724_v11  ;;  %5358 = vmatpush.msrb.mxu3 %v3212_v6 }
 0x4ad   :  { %v2988_v14 = vld [vmem:[#allocation14 + $0x2748] sm:$0xff]  ;;  %5335 = vmatpush.msrb.mxu2 %v3004_v42  ;;  %5242 = vmatpush.msra.mxu1 %v3659_v56 }
 0x4ae   :  { %v3196_v22 = vld [vmem:[#allocation14 + $0x2dc8] sm:$0xff]  ;;  %5302 = vmatpush.msrb.mxu0 %v2380_v9  ;;  %v4932_v9 = vpop.f32.mrf.mxu1 }
 0x4af   :  { %v2364_v17 = vld [vmem:[#allocation14 + $0x13c8] sm:$0xff]  ;;  %5336 = vmatpush.msrb.mxu2 %v2988_v14  ;;  %5359 = vmatpush.msrb.mxu3 %v3196_v22  ;;  %v4992_v14 = vpop.f32.mrf.mxu0  ;;  %v3579_v22 = vld [vmem:[#allocation14 + $0x39c0] sm:$0xff] }
 0x4b0   :  { %v2972_v20 = vld [vmem:[#allocation14 + $0x26c8] sm:$0xff]  ;;  %5243 = vmatpush.msra.mxu1 %v3643_v15  ;;  %5303 = vmatpush.msrb.mxu0 %v2364_v17  ;;  %v7921_v17 = vadd.f32 %v4932_v9, %v7913_v25 }
 0x4b1   :  { %v3180_v24 = vld [vmem:[#allocation14 + $0x2d48] sm:$0xff]  ;;  %5337 = vmatpush.msrb.mxu2 %v2972_v20  ;;  %v7923_v20 = vadd.f32 %v4992_v14, %v4973_v45 }
 0x4b2   :  { %v2348_v26 = vld [vmem:[#allocation14 + $0x1348] sm:$0xff]  ;;  %5360 = vmatpush.msrb.mxu3 %v3180_v24  ;;  %5244 = vmatpush.msra.mxu1 %v3627_v18  ;;  %8326 = vst [vmem:[#allocation50_spill] sm:$0xff] %v7921_v17 }
 0x4b3   :  { %v2956_v28 = vld [vmem:[#allocation14 + $0x2648] sm:$0xff]  ;;  %5304 = vmatpush.msrb.mxu0 %v2348_v26  ;;  %v3563_v26 = vld [vmem:[#allocation14 + $0x3940] sm:$0xff] }
 0x4b4   :  { %v3164_v29 = vld [vmem:[#allocation14 + $0x2cc8] sm:$0xff]  ;;  %5338 = vmatpush.msrb.mxu2 %v2956_v28  ;;  %5245 = vmatpush.msra.mxu1 %v3611_v63 }
 0x4b5   :  { %v2332_v61 = vld [vmem:[#allocation14 + $0x12c8] sm:$0xff]  ;;  %5361 = vmatpush.msrb.mxu3 %v3164_v29 }
 0x4b6   :  { %v2940_v12 = vld [vmem:[#allocation14 + $0x25c8] sm:$0xff]  ;;  %5305 = vmatpush.msrb.mxu0 %v2332_v61  ;;  %5246 = vmatpush.msra.mxu1 %v3595_v49  ;;  %v3547_v61 = vld [vmem:[#allocation14 + $0x38c0] sm:$0xff] }
 0x4b7   :  { %v3148_v27 = vld [vmem:[#allocation14 + $0x2c48] sm:$0xff]  ;;  %5339 = vmatpush.msrb.mxu2 %v2940_v12 }
 0x4b8   :  { %v2316_v42 = vld [vmem:[#allocation14 + $0x1248] sm:$0xff]  ;;  %5362 = vmatpush.msrb.mxu3 %v3148_v27  ;;  %5247 = vmatpush.msra.mxu1 %v3579_v22  ;;  %v3531_v27 = vld [vmem:[#allocation14 + $0x3840] sm:$0xff] }
 0x4b9   :  { %v2924_v6 = vld [vmem:[#allocation14 + $0x2548] sm:$0xff]  ;;  %5306 = vmatpush.msrb.mxu0 %v2316_v42 }
 0x4ba   :  { %v3132_v56 = vld [vmem:[#allocation14 + $0x2bc8] sm:$0xff]  ;;  %5340 = vmatpush.msrb.mxu2 %v2924_v6  ;;  %5248 = vmatpush.msra.mxu1 %v3563_v26 }
 0x4bb   :  { %v2300_v15 = vld [vmem:[#allocation14 + $0x11c8] sm:$0xff]  ;;  %5363 = vmatpush.msrb.mxu3 %v3132_v56 }
 0x4bc   :  { %v2908_v24 = vld [vmem:[#allocation14 + $0x24c8] sm:$0xff]  ;;  %5307 = vmatpush.msrb.mxu0 %v2300_v15  ;;  %5249 = vmatpush.msra.mxu1 %v3547_v61 }
 0x4bd   :  { %v3116_v18 = vld [vmem:[#allocation14 + $0x2b48] sm:$0xff]  ;;  %5341 = vmatpush.msrb.mxu2 %v2908_v24 }
 0x4be   :  { %v2284_v28 = vld [vmem:[#allocation14 + $0x1148] sm:$0xff]  ;;  %5364 = vmatpush.msrb.mxu3 %v3116_v18  ;;  %5250 = vmatpush.msra.mxu1 %v3531_v27  ;;  %v2237_v27 = vld [vmem:[#allocation14 + $0xfd0] sm:$0xff] }
 0x4bf   :  { %v2892_v29 = vld [vmem:[#allocation14 + $0x2448] sm:$0xff]  ;;  %5308 = vmatpush.msrb.mxu0 %v2284_v28  ;;  %5251 = vmatmul.f32.vlgmr.msra.gmra.mxu1 %v7752_v50 }
 0x4c0   :  { %v3100_v63 = vld [vmem:[#allocation14 + $0x2ac8] sm:$0xff]  ;;  %5342 = vmatpush.msrb.mxu2 %v2892_v29 }
 0x4c1   :  { %v2268_v12 = vld [vmem:[#allocation14 + $0x10c8] sm:$0xff]  ;;  %5365 = vmatpush.msrb.mxu3 %v3100_v63 }
 0x4c2   :  { %v2876_v25 = vld [vmem:[#allocation14 + $0x23c8] sm:$0xff]  ;;  %5309 = vmatpush.msrb.mxu0 %v2268_v12 }
 0x4c3   :  { %v3084_v45 = vld [vmem:[#allocation14 + $0x2a48] sm:$0xff]  ;;  %5343 = vmatpush.msrb.mxu2 %v2876_v25 }
 0x4c4   :  { %v2252_v49 = vld [vmem:[#allocation14 + $0x1048] sm:$0xff]  ;;  %5366 = vmatpush.msrb.mxu3 %v3084_v45 }
 0x4c5   :  { %v2748_v42 = vld [vmem:[#allocation14 + $0x1fc8] sm:$0xff]  ;;  %5310 = vmatpush.msrb.mxu0 %v2252_v49 }
 0x4c6   :  { %v2860_v6 = vld [vmem:[#allocation14 + $0x2348] sm:$0xff]  ;;  %5311 = vmatmul.f32.vlgmr.msrb.gmra.mxu0 %v7732_v53  ;;  %5315 = vmatpush.msrb.mxu1 %v2748_v42 }
 0x4c7   :  { %v3068_v56 = vld [vmem:[#allocation14 + $0x29c8] sm:$0xff]  ;;  %5344 = vmatpush.msrb.mxu2 %v2860_v6 }
 0x4c8   :  { %v3516_v9 = vld [vmem:[#allocation14 + $0x37c8] sm:$0xff]  ;;  %5367 = vmatpush.msrb.mxu3 %v3068_v56  ;;  %v2221_v56 = vld [vmem:[#allocation14 + $0xf50] sm:$0xff] }
 0x4c9   :  { %v2732_v14 = vld [vmem:[#allocation14 + $0x1f48] sm:$0xff]  ;;  %5375 = vmatpush.msra.mxu0 %v3516_v9 }
 0x4ca   :  { %v2844_v22 = vld [vmem:[#allocation14 + $0x22c8] sm:$0xff]  ;;  %5316 = vmatpush.msrb.mxu1 %v2732_v14 }
 0x4cb   :  { %v3052_v15 = vld [vmem:[#allocation14 + $0x2948] sm:$0xff]  ;;  %5345 = vmatpush.msrb.mxu2 %v2844_v22 }
 0x4cc   :  { %v3500_v24 = vld [vmem:[#allocation14 + $0x3748] sm:$0xff]  ;;  %5368 = vmatpush.msrb.mxu3 %v3052_v15  ;;  %v2205_v15 = vld [vmem:[#allocation14 + $0xed0] sm:$0xff] }
 0x4cd   :  { %v2716_v18 = vld [vmem:[#allocation14 + $0x1ec8] sm:$0xff]  ;;  %5376 = vmatpush.msra.mxu0 %v3500_v24 }
 0x4ce   :  { %v2828_v26 = vld [vmem:[#allocation14 + $0x2248] sm:$0xff]  ;;  %5317 = vmatpush.msrb.mxu1 %v2716_v18 }
 0x4cf   :  { %v3036_v28 = vld [vmem:[#allocation14 + $0x28c8] sm:$0xff]  ;;  %5346 = vmatpush.msrb.mxu2 %v2828_v26  ;;  %v1981_v26 = vld [vmem:[#allocation14 + $0x7d0] sm:$0xff] }
 0x4d0   :  { %v3484_v29 = vld [vmem:[#allocation14 + $0x36c8] sm:$0xff]  ;;  %5369 = vmatpush.msrb.mxu3 %v3036_v28  ;;  %v2189_v28 = vld [vmem:[#allocation14 + $0xe50] sm:$0xff] }
 0x4d1   :  { %v2700_v63 = vld [vmem:[#allocation14 + $0x1e48] sm:$0xff]  ;;  %5377 = vmatpush.msra.mxu0 %v3484_v29 }
 0x4d2   :  { %v2812_v61 = vld [vmem:[#allocation14 + $0x21c8] sm:$0xff]  ;;  %5318 = vmatpush.msrb.mxu1 %v2700_v63 }
 0x4d3   :  { %v3020_v12 = vld [vmem:[#allocation14 + $0x2848] sm:$0xff]  ;;  %5347 = vmatpush.msrb.mxu2 %v2812_v61  ;;  %v1965_v61 = vld [vmem:[#allocation14 + $0x750] sm:$0xff] }
 0x4d4   :  { %v3468_v25 = vld [vmem:[#allocation14 + $0x3648] sm:$0xff]  ;;  %5370 = vmatpush.msrb.mxu3 %v3020_v12  ;;  %v2173_v12 = vld [vmem:[#allocation14 + $0xdd0] sm:$0xff] }
 0x4d5   :  { %v2684_v45 = vld [vmem:[#allocation14 + $0x1dc8] sm:$0xff]  ;;  %5378 = vmatpush.msra.mxu0 %v3468_v25  ;;  %5371 = vmatmul.f32.vlgmr.msrb.gmra.mxu3 %v7740_v7 }
 0x4d6   :  { %v2796_v49 = vld [vmem:[#allocation14 + $0x2148] sm:$0xff]  ;;  %5319 = vmatpush.msrb.mxu1 %v2684_v45  ;;  %5435 = vmatpush.msra.mxu3 %v2237_v27  ;;  %v1949_v27 = vld [vmem:[#allocation14 + $0x6d0] sm:$0xff] }
 0x4d7   :  { %v3452_v42 = vld [vmem:[#allocation14 + $0x35c8] sm:$0xff]  ;;  %5348 = vmatpush.msrb.mxu2 %v2796_v49  ;;  %v2157_v49 = vld [vmem:[#allocation14 + $0xd50] sm:$0xff] }
 0x4d8   :  { %v2668_v6 = vld [vmem:[#allocation14 + $0x1d48] sm:$0xff]  ;;  %5379 = vmatpush.msra.mxu0 %v3452_v42  ;;  %5436 = vmatpush.msra.mxu3 %v2221_v56  ;;  %v1933_v56 = vld [vmem:[#allocation14 + $0x650] sm:$0xff] }
 0x4d9   :  { %v2780_v9 = vld [vmem:[#allocation14 + $0x20c8] sm:$0xff]  ;;  %5320 = vmatpush.msrb.mxu1 %v2668_v6 }
 0x4da   :  { %v3436_v14 = vld [vmem:[#allocation14 + $0x3548] sm:$0xff]  ;;  %5349 = vmatpush.msrb.mxu2 %v2780_v9  ;;  %5437 = vmatpush.msra.mxu3 %v2205_v15  ;;  %v2141_v9 = vld [vmem:[#allocation14 + $0xcd0] sm:$0xff] }
 0x4db   :  { %v2652_v22 = vld [vmem:[#allocation14 + $0x1cc8] sm:$0xff]  ;;  %5380 = vmatpush.msra.mxu0 %v3436_v14  ;;  %v1917_v15 = vld [vmem:[#allocation14 + $0x5d0] sm:$0xff] }
 0x4dc   :  { %v2764_v24 = vld [vmem:[#allocation14 + $0x2048] sm:$0xff]  ;;  %5321 = vmatpush.msrb.mxu1 %v2652_v22  ;;  %5438 = vmatpush.msra.mxu3 %v2189_v28  ;;  %v1901_v28 = vld [vmem:[#allocation14 + $0x550] sm:$0xff] }
 0x4dd   :  { %v3420_v18 = vld [vmem:[#allocation14 + $0x34c8] sm:$0xff]  ;;  %5350 = vmatpush.msrb.mxu2 %v2764_v24  ;;  %v2125_v24 = vld [vmem:[#allocation14 + $0xc50] sm:$0xff] }
 0x4de   :  { %v2636_v29 = vld [vmem:[#allocation14 + $0x1c48] sm:$0xff]  ;;  %5381 = vmatpush.msra.mxu0 %v3420_v18  ;;  %5351 = vmatmul.f32.vlgmr.msrb.gmra.mxu2 %v7737_v44 }
 0x4df   :  { %v3404_v63 = vld [vmem:[#allocation14 + $0x3448] sm:$0xff]  ;;  %5415 = vmatpush.msra.mxu2 %v1981_v26  ;;  %5322 = vmatpush.msrb.mxu1 %v2636_v29  ;;  %v2109_v29 = vld [vmem:[#allocation14 + $0xbd0] sm:$0xff] }
 0x4e0   :  { %v2620_v25 = vld [vmem:[#allocation14 + $0x1bc8] sm:$0xff]  ;;  %5382 = vmatpush.msra.mxu0 %v3404_v63  ;;  %5439 = vmatpush.msra.mxu3 %v2173_v12  ;;  %v5012_v63 = vpop.f32.mrf.mxu1 }
 0x4e1   :  { %v3388_v45 = vld [vmem:[#allocation14 + $0x33c8] sm:$0xff]  ;;  %5416 = vmatpush.msra.mxu2 %v1965_v61  ;;  %5323 = vmatpush.msrb.mxu1 %v2620_v25  ;;  %v5013_v25 = vadd.f32 %v5012_v63, %v7923_v20  ;;  %v5072_v63 = vpop.f32.mrf.mxu0 }
 0x4e2   :  { %v2604_v42 = vld [vmem:[#allocation14 + $0x1b48] sm:$0xff]  ;;  %5383 = vmatpush.msra.mxu0 %v3388_v45  ;;  %5440 = vmatpush.msra.mxu3 %v2157_v49  ;;  %v5032_v45 = vpop.f32.mrf.mxu2  ;;  %v2093_v49 = vld [vmem:[#allocation14 + $0xb50] sm:$0xff] }
 0x4e3   :  { %v3372_v6 = vld [vmem:[#allocation14 + $0x3348] sm:$0xff]  ;;  %5417 = vmatpush.msra.mxu2 %v1949_v27  ;;  %5324 = vmatpush.msrb.mxu1 %v2604_v42  ;;  %v1885_v27 = vld [vmem:[#allocation14 + $0x4d0] sm:$0xff] }
 0x4e4   :  { %v2588_v14 = vld [vmem:[#allocation14 + $0x1ac8] sm:$0xff]  ;;  %5384 = vmatpush.msra.mxu0 %v3372_v6  ;;  %5441 = vmatpush.msra.mxu3 %v2141_v9  ;;  %v5052_v9 = vpop.f32.mrf.mxu3 }
 0x4e5   :  { %v3356_v22 = vld [vmem:[#allocation14 + $0x32c8] sm:$0xff]  ;;  %5418 = vmatpush.msra.mxu2 %v1933_v56  ;;  %5325 = vmatpush.msrb.mxu1 %v2588_v14  ;;  %v5033_v56 = vadd.f32 %v5032_v45, %v5013_v25  ;;  %v1869_v14 = vld [vmem:[#allocation14 + $0x450] sm:$0xff] }
 0x4e6   :  { %v2572_v18 = vld [vmem:[#allocation14 + $0x1a48] sm:$0xff]  ;;  %5385 = vmatpush.msra.mxu0 %v3356_v22  ;;  %5442 = vmatpush.msra.mxu3 %v2125_v24  ;;  %v2077_v22 = vld [vmem:[#allocation14 + $0xad0] sm:$0xff] }
 0x4e7   :  { %v3340_v26 = vld [vmem:[#allocation14 + $0x3248] sm:$0xff]  ;;  %5419 = vmatpush.msra.mxu2 %v1917_v15  ;;  %5326 = vmatpush.msrb.mxu1 %v2572_v18  ;;  %v5053_v20 = vadd.f32 %v5052_v9, %v5033_v56  ;;  %v1853_v18 = vld [vmem:[#allocation14 + $0x3d0] sm:$0xff] }
 0x4e8   :  { %v2556_v61 = vld [vmem:[#allocation14 + $0x19c8] sm:$0xff]  ;;  %5386 = vmatpush.msra.mxu0 %v3340_v26  ;;  %5443 = vmatpush.msra.mxu3 %v2109_v29  ;;  %v2061_v26 = vld [vmem:[#allocation14 + $0xa50] sm:$0xff] }
 0x4e9   :  { %v3324_v12 = vld [vmem:[#allocation14 + $0x31c8] sm:$0xff]  ;;  %5420 = vmatpush.msra.mxu2 %v1901_v28  ;;  %5327 = vmatpush.msrb.mxu1 %v2556_v61  ;;  %v7930_v25 = vadd.f32 %v5072_v63, %v5053_v20  ;;  %v2045_v45 = vld [vmem:[#allocation14 + $0x9d0] sm:$0xff] }
 0x4ea   :  { %v2540_v42 = vld [vmem:[#allocation14 + $0x1948] sm:$0xff]  ;;  %5387 = vmatpush.msra.mxu0 %v3324_v12  ;;  %5444 = vmatpush.msra.mxu3 %v2093_v49  ;;  %v1837_v12 = vld [vmem:[#allocation14 + $0x350] sm:$0xff] }
 0x4eb   :  { %v3308_v6 = vld [vmem:[#allocation14 + $0x3148] sm:$0xff]  ;;  %5421 = vmatpush.msra.mxu2 %v1885_v27  ;;  %5328 = vmatpush.msrb.mxu1 %v2540_v42  ;;  %v2493_v27 = vld [vmem:[#allocation14 + $0x17d0] sm:$0xff] }
 0x4ec   :  { %v2524_v15 = vld [vmem:[#allocation14 + $0x18c8] sm:$0xff]  ;;  %5388 = vmatpush.msra.mxu0 %v3308_v6  ;;  %5445 = vmatpush.msra.mxu3 %v2077_v22  ;;  %v1821_v42 = vld [vmem:[#allocation14 + $0x2d0] sm:$0xff] }
 0x4ed   :  { %v3292_v24 = vld [vmem:[#allocation14 + $0x30c8] sm:$0xff]  ;;  %5422 = vmatpush.msra.mxu2 %v1869_v14  ;;  %5329 = vmatpush.msrb.mxu1 %v2524_v15  ;;  %v2029_v6 = vld [vmem:[#allocation14 + $0x950] sm:$0xff] }
 0x4ee   :  { %v2508_v28 = vld [vmem:[#allocation14 + $0x1848] sm:$0xff]  ;;  %5389 = vmatpush.msra.mxu0 %v3292_v24  ;;  %5446 = vmatpush.msra.mxu3 %v2061_v26  ;;  %v2477_v56 = vld [vmem:[#allocation14 + $0x1750] sm:$0xff] }
 0x4ef   :  { %v3276_v29 = vld [vmem:[#allocation14 + $0x3048] sm:$0xff]  ;;  %5423 = vmatpush.msra.mxu2 %v1853_v18  ;;  %5330 = vmatpush.msrb.mxu1 %v2508_v28  ;;  %v1805_v14 = vld [vmem:[#allocation14 + $0x250] sm:$0xff] }
 0x4f0   :  { %v3772_v61 = vld [vmem:[#allocation14 + $0x3fc8] sm:$0xff]  ;;  %5390 = vmatpush.msra.mxu0 %v3276_v29  ;;  %5331 = vmatmul.f32.vlgmr.msrb.gmra.mxu1 %v7728_v40  ;;  %v2013_v22 = vld [vmem:[#allocation14 + $0x8d0] sm:$0xff] }
 0x4f1   :  { %5391 = vmatmul.f32.vlgmr.msra.gmra.mxu0 %v7746_v21  ;;  %v3756_v49 = vld [vmem:[#allocation14 + $0x3f48] sm:$0xff]  ;;  %5395 = vmatpush.msra.mxu1 %v3772_v61  ;;  %v2461_v15 = vld [vmem:[#allocation14 + $0x16d0] sm:$0xff] }
 0x4f2   :  { %5424 = vmatpush.msra.mxu2 %v1837_v12  ;;  %5447 = vmatpush.msra.mxu3 %v2045_v45  ;;  %v3740_v9 = vld [vmem:[#allocation14 + $0x3ec8] sm:$0xff]  ;;  %v1789_v20 = vld [vmem:[#allocation14 + $0x1d0] sm:$0xff] }
 0x4f3   :  { %5455 = vmatpush.msrb.mxu0 %v2493_v27  ;;  %5396 = vmatpush.msra.mxu1 %v3756_v49  ;;  %v3724_v24 = vld [vmem:[#allocation14 + $0x3e48] sm:$0xff]  ;;  %v1997_v18 = vld [vmem:[#allocation14 + $0x850] sm:$0xff] }
 0x4f4   :  { %5425 = vmatpush.msra.mxu2 %v1821_v42  ;;  %5448 = vmatpush.msra.mxu3 %v2029_v6  ;;  %v2445_v26 = vld [vmem:[#allocation14 + $0x1650] sm:$0xff]  ;;  %v3708_v63 = vld [vmem:[#allocation14 + $0x3dc8] sm:$0xff] }
 0x4f5   :  { %5456 = vmatpush.msrb.mxu0 %v2477_v56  ;;  %5397 = vmatpush.msra.mxu1 %v3740_v9  ;;  %v3261_v28 = vld [vmem:[#allocation14 + $0x2fd0] sm:$0xff]  ;;  %v3692_v12 = vld [vmem:[#allocation14 + $0x3d48] sm:$0xff] }
 0x4f6   :  { %5426 = vmatpush.msra.mxu2 %v1805_v14  ;;  %5449 = vmatpush.msra.mxu3 %v2013_v22  ;;  %v1773_v29 = vld [vmem:[#allocation14 + $0x150] sm:$0xff]  ;;  %v3676_v42 = vld [vmem:[#allocation14 + $0x3cc8] sm:$0xff] }
 0x4f7   :  { %5457 = vmatpush.msrb.mxu0 %v2461_v15  ;;  %5398 = vmatpush.msra.mxu1 %v3724_v24  ;;  %v2429_v61 = vld [vmem:[#allocation14 + $0x15d0] sm:$0xff]  ;;  %v3660_v15 = vld [vmem:[#allocation14 + $0x3c48] sm:$0xff] }
 0x4f8   :  { %5427 = vmatpush.msra.mxu2 %v1789_v20  ;;  %5450 = vmatpush.msra.mxu3 %v1997_v18  ;;  %v3245_v45 = vld [vmem:[#allocation14 + $0x2f50] sm:$0xff] }
 0x4f9   :  { %5458 = vmatpush.msrb.mxu0 %v2445_v26  ;;  %5451 = vmatmul.f32.vlgmr.msra.gmra.mxu3 %v7718_v13  ;;  %v1757_v27 = vld [vmem:[#allocation14 + $0xd0] sm:$0xff]  ;;  %v3644_v26 = vld [vmem:[#allocation14 + $0x3bc8] sm:$0xff] }
 0x4fa   :  { %5399 = vmatpush.msra.mxu1 %v3708_v63  ;;  %5515 = vmatpush.msrb.mxu3 %v3261_v28  ;;  %v2413_v49 = vld [vmem:[#allocation14 + $0x1550] sm:$0xff] }
 0x4fb   :  { %5428 = vmatpush.msra.mxu2 %v1773_v29  ;;  %5459 = vmatpush.msrb.mxu0 %v2429_v61  ;;  %v3229_v6 = vld [vmem:[#allocation14 + $0x2ed0] sm:$0xff]  ;;  %v3628_v61 = vld [vmem:[#allocation14 + $0x3b48] sm:$0xff] }
 0x4fc   :  { %5400 = vmatpush.msra.mxu1 %v3692_v12  ;;  %v1741_v56 = vld [vmem:[#allocation14 + $0x50] sm:$0xff]  ;;  %5516 = vmatpush.msrb.mxu3 %v3245_v45 }
 0x4fd   :  { %5429 = vmatpush.msra.mxu2 %v1757_v27  ;;  %v2397_v9 = vld [vmem:[#allocation14 + $0x14d0] sm:$0xff]  ;;  %5460 = vmatpush.msrb.mxu0 %v2413_v49  ;;  %v3612_v49 = vld [vmem:[#allocation14 + $0x3ac8] sm:$0xff] }
 0x4fe   :  { %5401 = vmatpush.msra.mxu1 %v3676_v42  ;;  %v3005_v14 = vld [vmem:[#allocation14 + $0x27d0] sm:$0xff]  ;;  %5517 = vmatpush.msrb.mxu3 %v3229_v6 }
 0x4ff   :  { %v3213_v22 = vld [vmem:[#allocation14 + $0x2e50] sm:$0xff]  ;;  %5430 = vmatpush.msra.mxu2 %v1741_v56  ;;  %5461 = vmatpush.msrb.mxu0 %v2397_v9  ;;  %v3596_v9 = vld [vmem:[#allocation14 + $0x3a48] sm:$0xff] }
 0x500   :  { %v2381_v24 = vld [vmem:[#allocation14 + $0x1450] sm:$0xff]  ;;  %5431 = vmatmul.f32.vlgmr.msra.gmra.mxu2 %v7724_v11  ;;  %5518 = vmatpush.msrb.mxu3 %v3213_v22 }
 0x501   :  { %v2989_v20 = vld [vmem:[#allocation14 + $0x2750] sm:$0xff]  ;;  %5495 = vmatpush.msrb.mxu2 %v3005_v14  ;;  %5402 = vmatpush.msra.mxu1 %v3660_v15 }
 0x502   :  { %v3197_v18 = vld [vmem:[#allocation14 + $0x2dd0] sm:$0xff]  ;;  %5462 = vmatpush.msrb.mxu0 %v2381_v24  ;;  %v5092_v24 = vpop.f32.mrf.mxu1 }
 0x503   :  { %v2365_v63 = vld [vmem:[#allocation14 + $0x13d0] sm:$0xff]  ;;  %5496 = vmatpush.msrb.mxu2 %v2989_v20  ;;  %5519 = vmatpush.msrb.mxu3 %v3197_v18  ;;  %v3580_v20 = vld [vmem:[#allocation14 + $0x39c8] sm:$0xff] }
 0x504   :  { %v2973_v28 = vld [vmem:[#allocation14 + $0x26d0] sm:$0xff]  ;;  %5403 = vmatpush.msra.mxu1 %v3644_v26  ;;  %5463 = vmatpush.msrb.mxu0 %v2365_v63  ;;  %v7937_v26 = vadd.f32 %v5092_v24, %v7930_v25 }
 0x505   :  { %v3181_v29 = vld [vmem:[#allocation14 + $0x2d50] sm:$0xff]  ;;  %5497 = vmatpush.msrb.mxu2 %v2973_v28 }
 0x506   :  { %v2349_v12 = vld [vmem:[#allocation14 + $0x1350] sm:$0xff]  ;;  %5520 = vmatpush.msrb.mxu3 %v3181_v29  ;;  %5404 = vmatpush.msra.mxu1 %v3628_v61  ;;  %8327 = vst [vmem:[#allocation51_spill] sm:$0xff] %v7937_v26  ;;  %v3564_v29 = vld [vmem:[#allocation14 + $0x3948] sm:$0xff] }
 0x507   :  { %v2957_v45 = vld [vmem:[#allocation14 + $0x2650] sm:$0xff]  ;;  %5464 = vmatpush.msrb.mxu0 %v2349_v12 }
 0x508   :  { %v3165_v27 = vld [vmem:[#allocation14 + $0x2cd0] sm:$0xff]  ;;  %5498 = vmatpush.msrb.mxu2 %v2957_v45  ;;  %5405 = vmatpush.msra.mxu1 %v3612_v49 }
 0x509   :  { %v2333_v42 = vld [vmem:[#allocation14 + $0x12d0] sm:$0xff]  ;;  %5521 = vmatpush.msrb.mxu3 %v3165_v27  ;;  %v3548_v27 = vld [vmem:[#allocation14 + $0x38c8] sm:$0xff] }
 0x50a   :  { %v2941_v6 = vld [vmem:[#allocation14 + $0x25d0] sm:$0xff]  ;;  %5465 = vmatpush.msrb.mxu0 %v2333_v42  ;;  %5406 = vmatpush.msra.mxu1 %v3596_v9 }
 0x50b   :  { %v3149_v56 = vld [vmem:[#allocation14 + $0x2c50] sm:$0xff]  ;;  %5499 = vmatpush.msrb.mxu2 %v2941_v6  ;;  %v3532_v6 = vld [vmem:[#allocation14 + $0x3848] sm:$0xff] }
 0x50c   :  { %v2317_v14 = vld [vmem:[#allocation14 + $0x1250] sm:$0xff]  ;;  %5522 = vmatpush.msrb.mxu3 %v3149_v56  ;;  %5407 = vmatpush.msra.mxu1 %v3580_v20 }
 0x50d   :  { %v2925_v22 = vld [vmem:[#allocation14 + $0x2550] sm:$0xff]  ;;  %5466 = vmatpush.msrb.mxu0 %v2317_v14 }
 0x50e   :  { %v3133_v15 = vld [vmem:[#allocation14 + $0x2bd0] sm:$0xff]  ;;  %5500 = vmatpush.msrb.mxu2 %v2925_v22  ;;  %5408 = vmatpush.msra.mxu1 %v3564_v29 }
 0x50f   :  { %v2301_v18 = vld [vmem:[#allocation14 + $0x11d0] sm:$0xff]  ;;  %5523 = vmatpush.msrb.mxu3 %v3133_v15 }
 0x510   :  { %v2909_v63 = vld [vmem:[#allocation14 + $0x24d0] sm:$0xff]  ;;  %5467 = vmatpush.msrb.mxu0 %v2301_v18  ;;  %5409 = vmatpush.msra.mxu1 %v3548_v27 }
 0x511   :  { %v3117_v28 = vld [vmem:[#allocation14 + $0x2b50] sm:$0xff]  ;;  %5501 = vmatpush.msrb.mxu2 %v2909_v63 }
 0x512   :  { %v2285_v61 = vld [vmem:[#allocation14 + $0x1150] sm:$0xff]  ;;  %5524 = vmatpush.msrb.mxu3 %v3117_v28  ;;  %5410 = vmatpush.msra.mxu1 %v3532_v6  ;;  %v2238_v6 = vld [vmem:[#allocation14 + $0xfd8] sm:$0xff] }
 0x513   :  { %v2893_v12 = vld [vmem:[#allocation14 + $0x2450] sm:$0xff]  ;;  %5468 = vmatpush.msrb.mxu0 %v2285_v61  ;;  %5411 = vmatmul.f32.vlgmr.msra.gmra.mxu1 %v7752_v50 }
 0x514   :  { %v3101_v45 = vld [vmem:[#allocation14 + $0x2ad0] sm:$0xff]  ;;  %5502 = vmatpush.msrb.mxu2 %v2893_v12 }
 0x515   :  { %v2269_v49 = vld [vmem:[#allocation14 + $0x10d0] sm:$0xff]  ;;  %5525 = vmatpush.msrb.mxu3 %v3101_v45 }
 0x516   :  { %v2877_v25 = vld [vmem:[#allocation14 + $0x23d0] sm:$0xff]  ;;  %5469 = vmatpush.msrb.mxu0 %v2269_v49 }
 0x517   :  { %v3085_v42 = vld [vmem:[#allocation14 + $0x2a50] sm:$0xff]  ;;  %5503 = vmatpush.msrb.mxu2 %v2877_v25 }
 0x518   :  { %v2253_v56 = vld [vmem:[#allocation14 + $0x1050] sm:$0xff]  ;;  %5526 = vmatpush.msrb.mxu3 %v3085_v42 }
 0x519   :  { %v2749_v9 = vld [vmem:[#allocation14 + $0x1fd0] sm:$0xff]  ;;  %5470 = vmatpush.msrb.mxu0 %v2253_v56 }
 0x51a   :  { %v2861_v14 = vld [vmem:[#allocation14 + $0x2350] sm:$0xff]  ;;  %5471 = vmatmul.f32.vlgmr.msrb.gmra.mxu0 %v7732_v53  ;;  %5475 = vmatpush.msrb.mxu1 %v2749_v9 }
 0x51b   :  { %v3069_v22 = vld [vmem:[#allocation14 + $0x29d0] sm:$0xff]  ;;  %5504 = vmatpush.msrb.mxu2 %v2861_v14 }
 0x51c   :  { %v3517_v15 = vld [vmem:[#allocation14 + $0x37d0] sm:$0xff]  ;;  %5527 = vmatpush.msrb.mxu3 %v3069_v22  ;;  %v2222_v22 = vld [vmem:[#allocation14 + $0xf58] sm:$0xff] }
 0x51d   :  { %v2733_v24 = vld [vmem:[#allocation14 + $0x1f50] sm:$0xff]  ;;  %5535 = vmatpush.msra.mxu0 %v3517_v15 }
 0x51e   :  { %v2845_v20 = vld [vmem:[#allocation14 + $0x22d0] sm:$0xff]  ;;  %5476 = vmatpush.msrb.mxu1 %v2733_v24 }
 0x51f   :  { %v3053_v18 = vld [vmem:[#allocation14 + $0x2950] sm:$0xff]  ;;  %5505 = vmatpush.msrb.mxu2 %v2845_v20 }
 0x520   :  { %v3501_v63 = vld [vmem:[#allocation14 + $0x3750] sm:$0xff]  ;;  %5528 = vmatpush.msrb.mxu3 %v3053_v18  ;;  %v2206_v18 = vld [vmem:[#allocation14 + $0xed8] sm:$0xff] }
 0x521   :  { %v2717_v28 = vld [vmem:[#allocation14 + $0x1ed0] sm:$0xff]  ;;  %5536 = vmatpush.msra.mxu0 %v3501_v63 }
 0x522   :  { %v2829_v29 = vld [vmem:[#allocation14 + $0x2250] sm:$0xff]  ;;  %5477 = vmatpush.msrb.mxu1 %v2717_v28 }
 0x523   :  { %v3037_v61 = vld [vmem:[#allocation14 + $0x28d0] sm:$0xff]  ;;  %5506 = vmatpush.msrb.mxu2 %v2829_v29  ;;  %v1982_v29 = vld [vmem:[#allocation14 + $0x7d8] sm:$0xff] }
 0x524   :  { %v3485_v12 = vld [vmem:[#allocation14 + $0x36d0] sm:$0xff]  ;;  %5529 = vmatpush.msrb.mxu3 %v3037_v61  ;;  %v2190_v61 = vld [vmem:[#allocation14 + $0xe58] sm:$0xff] }
 0x525   :  { %v2701_v45 = vld [vmem:[#allocation14 + $0x1e50] sm:$0xff]  ;;  %5537 = vmatpush.msra.mxu0 %v3485_v12 }
 0x526   :  { %v2813_v27 = vld [vmem:[#allocation14 + $0x21d0] sm:$0xff]  ;;  %5478 = vmatpush.msrb.mxu1 %v2701_v45 }
 0x527   :  { %v3021_v49 = vld [vmem:[#allocation14 + $0x2850] sm:$0xff]  ;;  %5507 = vmatpush.msrb.mxu2 %v2813_v27  ;;  %v1966_v27 = vld [vmem:[#allocation14 + $0x758] sm:$0xff] }
 0x528   :  { %v3469_v25 = vld [vmem:[#allocation14 + $0x3650] sm:$0xff]  ;;  %5530 = vmatpush.msrb.mxu3 %v3021_v49  ;;  %v2174_v49 = vld [vmem:[#allocation14 + $0xdd8] sm:$0xff] }
 0x529   :  { %v2685_v42 = vld [vmem:[#allocation14 + $0x1dd0] sm:$0xff]  ;;  %5538 = vmatpush.msra.mxu0 %v3469_v25  ;;  %5531 = vmatmul.f32.vlgmr.msrb.gmra.mxu3 %v7740_v7 }
 0x52a   :  { %v2797_v56 = vld [vmem:[#allocation14 + $0x2150] sm:$0xff]  ;;  %5479 = vmatpush.msrb.mxu1 %v2685_v42  ;;  %5595 = vmatpush.msra.mxu3 %v2238_v6  ;;  %v1950_v6 = vld [vmem:[#allocation14 + $0x6d8] sm:$0xff] }
 0x52b   :  { %v3453_v9 = vld [vmem:[#allocation14 + $0x35d0] sm:$0xff]  ;;  %5508 = vmatpush.msrb.mxu2 %v2797_v56  ;;  %v2158_v56 = vld [vmem:[#allocation14 + $0xd58] sm:$0xff] }
 0x52c   :  { %v2669_v14 = vld [vmem:[#allocation14 + $0x1d50] sm:$0xff]  ;;  %5539 = vmatpush.msra.mxu0 %v3453_v9  ;;  %5596 = vmatpush.msra.mxu3 %v2222_v22  ;;  %v1934_v22 = vld [vmem:[#allocation14 + $0x658] sm:$0xff] }
 0x52d   :  { %v2781_v15 = vld [vmem:[#allocation14 + $0x20d0] sm:$0xff]  ;;  %5480 = vmatpush.msrb.mxu1 %v2669_v14 }
 0x52e   :  { %v3437_v24 = vld [vmem:[#allocation14 + $0x3550] sm:$0xff]  ;;  %5509 = vmatpush.msrb.mxu2 %v2781_v15  ;;  %5597 = vmatpush.msra.mxu3 %v2206_v18  ;;  %v2142_v15 = vld [vmem:[#allocation14 + $0xcd8] sm:$0xff] }
 0x52f   :  { %v2653_v20 = vld [vmem:[#allocation14 + $0x1cd0] sm:$0xff]  ;;  %5540 = vmatpush.msra.mxu0 %v3437_v24  ;;  %v1918_v18 = vld [vmem:[#allocation14 + $0x5d8] sm:$0xff] }
 0x530   :  { %v2765_v63 = vld [vmem:[#allocation14 + $0x2050] sm:$0xff]  ;;  %5481 = vmatpush.msrb.mxu1 %v2653_v20  ;;  %5598 = vmatpush.msra.mxu3 %v2190_v61  ;;  %v1902_v61 = vld [vmem:[#allocation14 + $0x558] sm:$0xff] }
 0x531   :  { %v3421_v28 = vld [vmem:[#allocation14 + $0x34d0] sm:$0xff]  ;;  %5510 = vmatpush.msrb.mxu2 %v2765_v63  ;;  %v2126_v63 = vld [vmem:[#allocation14 + $0xc58] sm:$0xff] }
 0x532   :  { %v2637_v12 = vld [vmem:[#allocation14 + $0x1c50] sm:$0xff]  ;;  %5541 = vmatpush.msra.mxu0 %v3421_v28  ;;  %5511 = vmatmul.f32.vlgmr.msrb.gmra.mxu2 %v7737_v44 }
 0x533   :  { %v3405_v45 = vld [vmem:[#allocation14 + $0x3450] sm:$0xff]  ;;  %5575 = vmatpush.msra.mxu2 %v1982_v29  ;;  %5482 = vmatpush.msrb.mxu1 %v2637_v12  ;;  %v2110_v12 = vld [vmem:[#allocation14 + $0xbd8] sm:$0xff] }
 0x534   :  { %v2621_v25 = vld [vmem:[#allocation14 + $0x1bd0] sm:$0xff]  ;;  %5542 = vmatpush.msra.mxu0 %v3405_v45  ;;  %5599 = vmatpush.msra.mxu3 %v2174_v49  ;;  %v1886_v49 = vld [vmem:[#allocation14 + $0x4d8] sm:$0xff] }
 0x535   :  { %v3389_v42 = vld [vmem:[#allocation14 + $0x33d0] sm:$0xff]  ;;  %5576 = vmatpush.msra.mxu2 %v1966_v27  ;;  %5483 = vmatpush.msrb.mxu1 %v2621_v25  ;;  %v2094_v25 = vld [vmem:[#allocation14 + $0xb58] sm:$0xff] }
 0x536   :  { %v2605_v9 = vld [vmem:[#allocation14 + $0x1b50] sm:$0xff]  ;;  %5543 = vmatpush.msra.mxu0 %v3389_v42  ;;  %5600 = vmatpush.msra.mxu3 %v2158_v56  ;;  %v1870_v56 = vld [vmem:[#allocation14 + $0x458] sm:$0xff] }
 0x537   :  { %v3373_v14 = vld [vmem:[#allocation14 + $0x3350] sm:$0xff]  ;;  %5577 = vmatpush.msra.mxu2 %v1950_v6  ;;  %5484 = vmatpush.msrb.mxu1 %v2605_v9  ;;  %v2078_v9 = vld [vmem:[#allocation14 + $0xad8] sm:$0xff] }
 0x538   :  { %v2589_v24 = vld [vmem:[#allocation14 + $0x1ad0] sm:$0xff]  ;;  %5544 = vmatpush.msra.mxu0 %v3373_v14  ;;  %5601 = vmatpush.msra.mxu3 %v2142_v15  ;;  %v1854_v15 = vld [vmem:[#allocation14 + $0x3d8] sm:$0xff] }
 0x539   :  { %v3357_v20 = vld [vmem:[#allocation14 + $0x32d0] sm:$0xff]  ;;  %5578 = vmatpush.msra.mxu2 %v1934_v22  ;;  %5485 = vmatpush.msrb.mxu1 %v2589_v24  ;;  %v2062_v24 = vld [vmem:[#allocation14 + $0xa58] sm:$0xff] }
 0x53a   :  { %v2573_v28 = vld [vmem:[#allocation14 + $0x1a50] sm:$0xff]  ;;  %5545 = vmatpush.msra.mxu0 %v3357_v20  ;;  %5602 = vmatpush.msra.mxu3 %v2126_v63 }
 0x53b   :  { %v3341_v29 = vld [vmem:[#allocation14 + $0x3250] sm:$0xff]  ;;  %5579 = vmatpush.msra.mxu2 %v1918_v18  ;;  %5486 = vmatpush.msrb.mxu1 %v2573_v28  ;;  %v1838_v28 = vld [vmem:[#allocation14 + $0x358] sm:$0xff] }
 0x53c   :  { %v2557_v45 = vld [vmem:[#allocation14 + $0x19d0] sm:$0xff]  ;;  %5546 = vmatpush.msra.mxu0 %v3341_v29  ;;  %5603 = vmatpush.msra.mxu3 %v2110_v12  ;;  %v2046_v29 = vld [vmem:[#allocation14 + $0x9d8] sm:$0xff] }
 0x53d   :  { %v3325_v27 = vld [vmem:[#allocation14 + $0x31d0] sm:$0xff]  ;;  %5580 = vmatpush.msra.mxu2 %v1902_v61  ;;  %5487 = vmatpush.msrb.mxu1 %v2557_v45  ;;  %v2494_v61 = vld [vmem:[#allocation14 + $0x17d8] sm:$0xff] }
 0x53e   :  { %v2541_v42 = vld [vmem:[#allocation14 + $0x1950] sm:$0xff]  ;;  %5547 = vmatpush.msra.mxu0 %v3325_v27  ;;  %5604 = vmatpush.msra.mxu3 %v2094_v25  ;;  %v1822_v45 = vld [vmem:[#allocation14 + $0x2d8] sm:$0xff] }
 0x53f   :  { %v3309_v6 = vld [vmem:[#allocation14 + $0x3150] sm:$0xff]  ;;  %5581 = vmatpush.msra.mxu2 %v1886_v49  ;;  %5488 = vmatpush.msrb.mxu1 %v2541_v42  ;;  %v2030_v27 = vld [vmem:[#allocation14 + $0x958] sm:$0xff] }
 0x540   :  { %v2525_v14 = vld [vmem:[#allocation14 + $0x18d0] sm:$0xff]  ;;  %5548 = vmatpush.msra.mxu0 %v3309_v6  ;;  %5605 = vmatpush.msra.mxu3 %v2078_v9  ;;  %v2478_v49 = vld [vmem:[#allocation14 + $0x1758] sm:$0xff] }
 0x541   :  { %v3293_v22 = vld [vmem:[#allocation14 + $0x30d0] sm:$0xff]  ;;  %5582 = vmatpush.msra.mxu2 %v1870_v56  ;;  %5489 = vmatpush.msrb.mxu1 %v2525_v14  ;;  %v1806_v42 = vld [vmem:[#allocation14 + $0x258] sm:$0xff] }
 0x542   :  { %v2509_v20 = vld [vmem:[#allocation14 + $0x1850] sm:$0xff]  ;;  %5549 = vmatpush.msra.mxu0 %v3293_v22  ;;  %5606 = vmatpush.msra.mxu3 %v2062_v24  ;;  %v2014_v6 = vld [vmem:[#allocation14 + $0x8d8] sm:$0xff] }
 0x543   :  { %v3277_v18 = vld [vmem:[#allocation14 + $0x3050] sm:$0xff]  ;;  %5583 = vmatpush.msra.mxu2 %v1854_v15  ;;  %5490 = vmatpush.msrb.mxu1 %v2509_v20  ;;  %v2462_v56 = vld [vmem:[#allocation14 + $0x16d8] sm:$0xff] }
 0x544   :  { %v3773_v63 = vld [vmem:[#allocation14 + $0x3fd0] sm:$0xff]  ;;  %5550 = vmatpush.msra.mxu0 %v3277_v18  ;;  %5491 = vmatmul.f32.vlgmr.msrb.gmra.mxu1 %v7728_v40  ;;  %v1790_v14 = vld [vmem:[#allocation14 + $0x1d8] sm:$0xff] }
 0x545   :  { %5551 = vmatmul.f32.vlgmr.msra.gmra.mxu0 %v7746_v21  ;;  %v3757_v12 = vld [vmem:[#allocation14 + $0x3f50] sm:$0xff]  ;;  %5555 = vmatpush.msra.mxu1 %v3773_v63  ;;  %v1998_v22 = vld [vmem:[#allocation14 + $0x858] sm:$0xff] }
 0x546   :  { %5584 = vmatpush.msra.mxu2 %v1838_v28  ;;  %5607 = vmatpush.msra.mxu3 %v2046_v29  ;;  %v3741_v25 = vld [vmem:[#allocation14 + $0x3ed0] sm:$0xff]  ;;  %v2446_v15 = vld [vmem:[#allocation14 + $0x1658] sm:$0xff] }
 0x547   :  { %5615 = vmatpush.msrb.mxu0 %v2494_v61  ;;  %5556 = vmatpush.msra.mxu1 %v3757_v12  ;;  %v3725_v9 = vld [vmem:[#allocation14 + $0x3e50] sm:$0xff]  ;;  %v3262_v20 = vld [vmem:[#allocation14 + $0x2fd8] sm:$0xff] }
 0x548   :  { %5585 = vmatpush.msra.mxu2 %v1822_v45  ;;  %5608 = vmatpush.msra.mxu3 %v2030_v27  ;;  %v3709_v24 = vld [vmem:[#allocation14 + $0x3dd0] sm:$0xff]  ;;  %v1774_v18 = vld [vmem:[#allocation14 + $0x158] sm:$0xff] }
 0x549   :  { %5616 = vmatpush.msrb.mxu0 %v2478_v49  ;;  %5557 = vmatpush.msra.mxu1 %v3741_v25  ;;  %v2430_v63 = vld [vmem:[#allocation14 + $0x15d8] sm:$0xff]  ;;  %v3693_v28 = vld [vmem:[#allocation14 + $0x3d50] sm:$0xff] }
 0x54a   :  { %5586 = vmatpush.msra.mxu2 %v1806_v42  ;;  %5609 = vmatpush.msra.mxu3 %v2014_v6  ;;  %v3246_v29 = vld [vmem:[#allocation14 + $0x2f58] sm:$0xff]  ;;  %v3677_v45 = vld [vmem:[#allocation14 + $0x3cd0] sm:$0xff] }
 0x54b   :  { %5617 = vmatpush.msrb.mxu0 %v2462_v56  ;;  %5558 = vmatpush.msra.mxu1 %v3725_v9  ;;  %v1758_v61 = vld [vmem:[#allocation14 + $0xd8] sm:$0xff]  ;;  %v3661_v56 = vld [vmem:[#allocation14 + $0x3c50] sm:$0xff] }
 0x54c   :  { %5587 = vmatpush.msra.mxu2 %v1790_v14  ;;  %5610 = vmatpush.msra.mxu3 %v1998_v22  ;;  %v2414_v12 = vld [vmem:[#allocation14 + $0x1558] sm:$0xff]  ;;  %v3201_v26 = vld [vmem:[#allocation14 + $0x2df0] sm:$0xff] }
 0x54d   :  { %5618 = vmatpush.msrb.mxu0 %v2446_v15  ;;  %5611 = vmatmul.f32.vlgmr.msra.gmra.mxu3 %v7718_v13  ;;  %v3230_v27 = vld [vmem:[#allocation14 + $0x2ed8] sm:$0xff]  ;;  %v3645_v15 = vld [vmem:[#allocation14 + $0x3bd0] sm:$0xff] }
 0x54e   :  { %5559 = vmatpush.msra.mxu1 %v3709_v24  ;;  %5675 = vmatpush.msrb.mxu3 %v3262_v20  ;;  %v1742_v49 = vld [vmem:[#allocation14 + $0x58] sm:$0xff] }
 0x54f   :  { %5588 = vmatpush.msra.mxu2 %v1774_v18  ;;  %5619 = vmatpush.msrb.mxu0 %v2430_v63  ;;  %v2398_v25 = vld [vmem:[#allocation14 + $0x14d8] sm:$0xff]  ;;  %v3629_v63 = vld [vmem:[#allocation14 + $0x3b50] sm:$0xff] }
 0x550   :  { %5560 = vmatpush.msra.mxu1 %v3693_v28  ;;  %5676 = vmatpush.msrb.mxu3 %v3246_v29  ;;  %v3006_v42 = vld [vmem:[#allocation14 + $0x27d8] sm:$0xff] }
 0x551   :  { %5589 = vmatpush.msra.mxu2 %v1758_v61  ;;  %5620 = vmatpush.msrb.mxu0 %v2414_v12  ;;  %v3214_v6 = vld [vmem:[#allocation14 + $0x2e58] sm:$0xff]  ;;  %v3613_v12 = vld [vmem:[#allocation14 + $0x3ad0] sm:$0xff] }
 0x552   :  { %5561 = vmatpush.msra.mxu1 %v3677_v45  ;;  %5677 = vmatpush.msrb.mxu3 %v3230_v27  ;;  %v2382_v9 = vld [vmem:[#allocation14 + $0x1458] sm:$0xff] }
 0x553   :  { %5590 = vmatpush.msra.mxu2 %v1742_v49  ;;  %5621 = vmatpush.msrb.mxu0 %v2398_v25  ;;  %v2990_v14 = vld [vmem:[#allocation14 + $0x2758] sm:$0xff]  ;;  %v3597_v25 = vld [vmem:[#allocation14 + $0x3a50] sm:$0xff] }
 0x554   :  { %5591 = vmatmul.f32.vlgmr.msra.gmra.mxu2 %v7724_v11  ;;  %v3198_v22 = vld [vmem:[#allocation14 + $0x2dd8] sm:$0xff]  ;;  %5678 = vmatpush.msrb.mxu3 %v3214_v6 }
 0x555   :  { %5655 = vmatpush.msrb.mxu2 %v3006_v42  ;;  %v2366_v24 = vld [vmem:[#allocation14 + $0x13d8] sm:$0xff]  ;;  %5562 = vmatpush.msra.mxu1 %v3661_v56 }
 0x556   :  { %5622 = vmatpush.msrb.mxu0 %v2382_v9  ;;  %v2974_v20 = vld [vmem:[#allocation14 + $0x26d8] sm:$0xff]  ;;  %5679 = vmatpush.msrb.mxu3 %v3198_v22  ;;  %v3581_v9 = vld [vmem:[#allocation14 + $0x39d0] sm:$0xff] }
 0x557   :  { %v3182_v18 = vld [vmem:[#allocation14 + $0x2d58] sm:$0xff]  ;;  %5656 = vmatpush.msrb.mxu2 %v2990_v14  ;;  %5563 = vmatpush.msra.mxu1 %v3645_v15 }
 0x558   :  { %v2350_v28 = vld [vmem:[#allocation14 + $0x1358] sm:$0xff]  ;;  %5623 = vmatpush.msrb.mxu0 %v2366_v24  ;;  %5680 = vmatpush.msrb.mxu3 %v3182_v18  ;;  %v3565_v24 = vld [vmem:[#allocation14 + $0x3950] sm:$0xff] }
 0x559   :  { %v2958_v29 = vld [vmem:[#allocation14 + $0x2658] sm:$0xff]  ;;  %5657 = vmatpush.msrb.mxu2 %v2974_v20  ;;  %5564 = vmatpush.msra.mxu1 %v3629_v63 }
 0x55a   :  { %v3166_v61 = vld [vmem:[#allocation14 + $0x2cd8] sm:$0xff]  ;;  %5624 = vmatpush.msrb.mxu0 %v2350_v28  ;;  %v3549_v28 = vld [vmem:[#allocation14 + $0x38d0] sm:$0xff] }
 0x55b   :  { %v2334_v45 = vld [vmem:[#allocation14 + $0x12d8] sm:$0xff]  ;;  %5658 = vmatpush.msrb.mxu2 %v2958_v29  ;;  %5681 = vmatpush.msrb.mxu3 %v3166_v61 }
 0x55c   :  { %v2942_v27 = vld [vmem:[#allocation14 + $0x25d8] sm:$0xff]  ;;  %5565 = vmatpush.msra.mxu1 %v3613_v12  ;;  %5625 = vmatpush.msrb.mxu0 %v2334_v45  ;;  %v3533_v45 = vld [vmem:[#allocation14 + $0x3850] sm:$0xff] }
 0x55d   :  { %v3150_v49 = vld [vmem:[#allocation14 + $0x2c58] sm:$0xff]  ;;  %5659 = vmatpush.msrb.mxu2 %v2942_v27 }
 0x55e   :  { %v2318_v42 = vld [vmem:[#allocation14 + $0x1258] sm:$0xff]  ;;  %5682 = vmatpush.msrb.mxu3 %v3150_v49  ;;  %5566 = vmatpush.msra.mxu1 %v3597_v25 }
 0x55f   :  { %v2926_v6 = vld [vmem:[#allocation14 + $0x2558] sm:$0xff]  ;;  %5626 = vmatpush.msrb.mxu0 %v2318_v42 }
 0x560   :  { %v3134_v56 = vld [vmem:[#allocation14 + $0x2bd8] sm:$0xff]  ;;  %5660 = vmatpush.msrb.mxu2 %v2926_v6  ;;  %5567 = vmatpush.msra.mxu1 %v3581_v9 }
 0x561   :  { %v2302_v14 = vld [vmem:[#allocation14 + $0x11d8] sm:$0xff]  ;;  %5683 = vmatpush.msrb.mxu3 %v3134_v56 }
 0x562   :  { %v2910_v22 = vld [vmem:[#allocation14 + $0x24d8] sm:$0xff]  ;;  %5627 = vmatpush.msrb.mxu0 %v2302_v14  ;;  %5568 = vmatpush.msra.mxu1 %v3565_v24 }
 0x563   :  { %v3118_v15 = vld [vmem:[#allocation14 + $0x2b58] sm:$0xff]  ;;  %5661 = vmatpush.msrb.mxu2 %v2910_v22 }
 0x564   :  { %v2286_v20 = vld [vmem:[#allocation14 + $0x1158] sm:$0xff]  ;;  %5684 = vmatpush.msrb.mxu3 %v3118_v15  ;;  %5569 = vmatpush.msra.mxu1 %v3549_v28 }
 0x565   :  { %v2894_v18 = vld [vmem:[#allocation14 + $0x2458] sm:$0xff]  ;;  %5628 = vmatpush.msrb.mxu0 %v2286_v20 }
 0x566   :  { %v3102_v63 = vld [vmem:[#allocation14 + $0x2ad8] sm:$0xff]  ;;  %5662 = vmatpush.msrb.mxu2 %v2894_v18  ;;  %5570 = vmatpush.msra.mxu1 %v3533_v45  ;;  %v2239_v45 = vld [vmem:[#allocation14 + $0xfe0] sm:$0xff] }
 0x567   :  { %v2270_v29 = vld [vmem:[#allocation14 + $0x10d8] sm:$0xff]  ;;  %5685 = vmatpush.msrb.mxu3 %v3102_v63  ;;  %5571 = vmatmul.f32.vlgmr.msra.gmra.mxu1 %v7752_v50 }
 0x568   :  { %v2878_v61 = vld [vmem:[#allocation14 + $0x23d8] sm:$0xff]  ;;  %5629 = vmatpush.msrb.mxu0 %v2270_v29 }
 0x569   :  { %v3086_v12 = vld [vmem:[#allocation14 + $0x2a58] sm:$0xff]  ;;  %5663 = vmatpush.msrb.mxu2 %v2878_v61 }
 0x56a   :  { %v2254_v27 = vld [vmem:[#allocation14 + $0x1058] sm:$0xff]  ;;  %5686 = vmatpush.msrb.mxu3 %v3086_v12 }
 0x56b   :  { %v2750_v49 = vld [vmem:[#allocation14 + $0x1fd8] sm:$0xff]  ;;  %5630 = vmatpush.msrb.mxu0 %v2254_v27 }
 0x56c   :  { %v2862_v25 = vld [vmem:[#allocation14 + $0x2358] sm:$0xff]  ;;  %5631 = vmatmul.f32.vlgmr.msrb.gmra.mxu0 %v7732_v53  ;;  %5635 = vmatpush.msrb.mxu1 %v2750_v49 }
 0x56d   :  { %v3070_v42 = vld [vmem:[#allocation14 + $0x29d8] sm:$0xff]  ;;  %5664 = vmatpush.msrb.mxu2 %v2862_v25 }
 0x56e   :  { %v3518_v6 = vld [vmem:[#allocation14 + $0x37d8] sm:$0xff]  ;;  %5687 = vmatpush.msrb.mxu3 %v3070_v42  ;;  %v2223_v42 = vld [vmem:[#allocation14 + $0xf60] sm:$0xff] }
 0x56f   :  { %v2734_v56 = vld [vmem:[#allocation14 + $0x1f58] sm:$0xff]  ;;  %5695 = vmatpush.msra.mxu0 %v3518_v6 }
 0x570   :  { %v2846_v9 = vld [vmem:[#allocation14 + $0x22d8] sm:$0xff]  ;;  %5636 = vmatpush.msrb.mxu1 %v2734_v56 }
 0x571   :  { %v3054_v14 = vld [vmem:[#allocation14 + $0x2958] sm:$0xff]  ;;  %5665 = vmatpush.msrb.mxu2 %v2846_v9 }
 0x572   :  { %v3502_v22 = vld [vmem:[#allocation14 + $0x3758] sm:$0xff]  ;;  %5688 = vmatpush.msrb.mxu3 %v3054_v14  ;;  %v2207_v14 = vld [vmem:[#allocation14 + $0xee0] sm:$0xff] }
 0x573   :  { %v2718_v15 = vld [vmem:[#allocation14 + $0x1ed8] sm:$0xff]  ;;  %5696 = vmatpush.msra.mxu0 %v3502_v22 }
 0x574   :  { %v2830_v24 = vld [vmem:[#allocation14 + $0x2258] sm:$0xff]  ;;  %5637 = vmatpush.msrb.mxu1 %v2718_v15 }
 0x575   :  { %v3038_v20 = vld [vmem:[#allocation14 + $0x28d8] sm:$0xff]  ;;  %5666 = vmatpush.msrb.mxu2 %v2830_v24  ;;  %v1983_v24 = vld [vmem:[#allocation14 + $0x7e0] sm:$0xff] }
 0x576   :  { %v3486_v18 = vld [vmem:[#allocation14 + $0x36d8] sm:$0xff]  ;;  %5689 = vmatpush.msrb.mxu3 %v3038_v20  ;;  %v2191_v20 = vld [vmem:[#allocation14 + $0xe60] sm:$0xff] }
 0x577   :  { %v2702_v63 = vld [vmem:[#allocation14 + $0x1e58] sm:$0xff]  ;;  %5697 = vmatpush.msra.mxu0 %v3486_v18 }
 0x578   :  { %v2814_v28 = vld [vmem:[#allocation14 + $0x21d8] sm:$0xff]  ;;  %5638 = vmatpush.msrb.mxu1 %v2702_v63 }
 0x579   :  { %v3022_v29 = vld [vmem:[#allocation14 + $0x2858] sm:$0xff]  ;;  %5667 = vmatpush.msrb.mxu2 %v2814_v28  ;;  %v1967_v28 = vld [vmem:[#allocation14 + $0x760] sm:$0xff] }
 0x57a   :  { %v3470_v61 = vld [vmem:[#allocation14 + $0x3658] sm:$0xff]  ;;  %5690 = vmatpush.msrb.mxu3 %v3022_v29  ;;  %v2175_v29 = vld [vmem:[#allocation14 + $0xde0] sm:$0xff] }
 0x57b   :  { %v2686_v12 = vld [vmem:[#allocation14 + $0x1dd8] sm:$0xff]  ;;  %5698 = vmatpush.msra.mxu0 %v3470_v61  ;;  %5691 = vmatmul.f32.vlgmr.msrb.gmra.mxu3 %v7740_v7 }
 0x57c   :  { %v2798_v27 = vld [vmem:[#allocation14 + $0x2158] sm:$0xff]  ;;  %5639 = vmatpush.msrb.mxu1 %v2686_v12  ;;  %5755 = vmatpush.msra.mxu3 %v2239_v45  ;;  %v1951_v45 = vld [vmem:[#allocation14 + $0x6e0] sm:$0xff] }
 0x57d   :  { %v3454_v49 = vld [vmem:[#allocation14 + $0x35d8] sm:$0xff]  ;;  %5668 = vmatpush.msrb.mxu2 %v2798_v27  ;;  %v2159_v27 = vld [vmem:[#allocation14 + $0xd60] sm:$0xff] }
 0x57e   :  { %v2670_v25 = vld [vmem:[#allocation14 + $0x1d58] sm:$0xff]  ;;  %5699 = vmatpush.msra.mxu0 %v3454_v49  ;;  %5756 = vmatpush.msra.mxu3 %v2223_v42  ;;  %v1935_v42 = vld [vmem:[#allocation14 + $0x660] sm:$0xff] }
 0x57f   :  { %v2782_v6 = vld [vmem:[#allocation14 + $0x20d8] sm:$0xff]  ;;  %5640 = vmatpush.msrb.mxu1 %v2670_v25 }
 0x580   :  { %v3438_v56 = vld [vmem:[#allocation14 + $0x3558] sm:$0xff]  ;;  %5669 = vmatpush.msrb.mxu2 %v2782_v6  ;;  %5757 = vmatpush.msra.mxu3 %v2207_v14  ;;  %v2143_v6 = vld [vmem:[#allocation14 + $0xce0] sm:$0xff] }
 0x581   :  { %v2654_v9 = vld [vmem:[#allocation14 + $0x1cd8] sm:$0xff]  ;;  %5700 = vmatpush.msra.mxu0 %v3438_v56  ;;  %v1919_v14 = vld [vmem:[#allocation14 + $0x5e0] sm:$0xff] }
 0x582   :  { %v2766_v22 = vld [vmem:[#allocation14 + $0x2058] sm:$0xff]  ;;  %5641 = vmatpush.msrb.mxu1 %v2654_v9  ;;  %5758 = vmatpush.msra.mxu3 %v2191_v20  ;;  %v1903_v20 = vld [vmem:[#allocation14 + $0x560] sm:$0xff] }
 0x583   :  { %v3422_v15 = vld [vmem:[#allocation14 + $0x34d8] sm:$0xff]  ;;  %5670 = vmatpush.msrb.mxu2 %v2766_v22  ;;  %v2127_v22 = vld [vmem:[#allocation14 + $0xc60] sm:$0xff] }
 0x584   :  { %v2638_v18 = vld [vmem:[#allocation14 + $0x1c58] sm:$0xff]  ;;  %5701 = vmatpush.msra.mxu0 %v3422_v15  ;;  %5671 = vmatmul.f32.vlgmr.msrb.gmra.mxu2 %v7737_v44 }
 0x585   :  { %v3406_v63 = vld [vmem:[#allocation14 + $0x3458] sm:$0xff]  ;;  %5735 = vmatpush.msra.mxu2 %v1983_v24  ;;  %5642 = vmatpush.msrb.mxu1 %v2638_v18  ;;  %v2111_v18 = vld [vmem:[#allocation14 + $0xbe0] sm:$0xff] }
 0x586   :  { %v2622_v61 = vld [vmem:[#allocation14 + $0x1bd8] sm:$0xff]  ;;  %5702 = vmatpush.msra.mxu0 %v3406_v63  ;;  %5759 = vmatpush.msra.mxu3 %v2175_v29  ;;  %v1887_v29 = vld [vmem:[#allocation14 + $0x4e0] sm:$0xff] }
 0x587   :  { %v3390_v12 = vld [vmem:[#allocation14 + $0x33d8] sm:$0xff]  ;;  %5736 = vmatpush.msra.mxu2 %v1967_v28  ;;  %5643 = vmatpush.msrb.mxu1 %v2622_v61  ;;  %v2095_v61 = vld [vmem:[#allocation14 + $0xb60] sm:$0xff] }
 0x588   :  { %v2606_v49 = vld [vmem:[#allocation14 + $0x1b58] sm:$0xff]  ;;  %5703 = vmatpush.msra.mxu0 %v3390_v12  ;;  %5760 = vmatpush.msra.mxu3 %v2159_v27  ;;  %v1871_v27 = vld [vmem:[#allocation14 + $0x460] sm:$0xff] }
 0x589   :  { %v3374_v25 = vld [vmem:[#allocation14 + $0x3358] sm:$0xff]  ;;  %5737 = vmatpush.msra.mxu2 %v1951_v45  ;;  %5644 = vmatpush.msrb.mxu1 %v2606_v49  ;;  %v2079_v49 = vld [vmem:[#allocation14 + $0xae0] sm:$0xff] }
 0x58a   :  { %v2590_v56 = vld [vmem:[#allocation14 + $0x1ad8] sm:$0xff]  ;;  %5704 = vmatpush.msra.mxu0 %v3374_v25  ;;  %5761 = vmatpush.msra.mxu3 %v2143_v6  ;;  %v1855_v6 = vld [vmem:[#allocation14 + $0x3e0] sm:$0xff] }
 0x58b   :  { %v3358_v9 = vld [vmem:[#allocation14 + $0x32d8] sm:$0xff]  ;;  %5738 = vmatpush.msra.mxu2 %v1935_v42  ;;  %5645 = vmatpush.msrb.mxu1 %v2590_v56  ;;  %v2063_v56 = vld [vmem:[#allocation14 + $0xa60] sm:$0xff] }
 0x58c   :  { %v2574_v15 = vld [vmem:[#allocation14 + $0x1a58] sm:$0xff]  ;;  %5705 = vmatpush.msra.mxu0 %v3358_v9  ;;  %5762 = vmatpush.msra.mxu3 %v2127_v22 }
 0x58d   :  { %v3342_v24 = vld [vmem:[#allocation14 + $0x3258] sm:$0xff]  ;;  %5739 = vmatpush.msra.mxu2 %v1919_v14  ;;  %5646 = vmatpush.msrb.mxu1 %v2574_v15  ;;  %v1839_v15 = vld [vmem:[#allocation14 + $0x360] sm:$0xff] }
 0x58e   :  { %v2558_v63 = vld [vmem:[#allocation14 + $0x19d8] sm:$0xff]  ;;  %5706 = vmatpush.msra.mxu0 %v3342_v24  ;;  %5763 = vmatpush.msra.mxu3 %v2111_v18  ;;  %v2047_v24 = vld [vmem:[#allocation14 + $0x9e0] sm:$0xff] }
 0x58f   :  { %v3326_v28 = vld [vmem:[#allocation14 + $0x31d8] sm:$0xff]  ;;  %5740 = vmatpush.msra.mxu2 %v1903_v20  ;;  %5647 = vmatpush.msrb.mxu1 %v2558_v63  ;;  %v2495_v20 = vld [vmem:[#allocation14 + $0x17e0] sm:$0xff] }
 0x590   :  { %v2542_v12 = vld [vmem:[#allocation14 + $0x1958] sm:$0xff]  ;;  %5707 = vmatpush.msra.mxu0 %v3326_v28  ;;  %5764 = vmatpush.msra.mxu3 %v2095_v61  ;;  %v1823_v63 = vld [vmem:[#allocation14 + $0x2e0] sm:$0xff] }
 0x591   :  { %v3310_v45 = vld [vmem:[#allocation14 + $0x3158] sm:$0xff]  ;;  %5741 = vmatpush.msra.mxu2 %v1887_v29  ;;  %5648 = vmatpush.msrb.mxu1 %v2542_v12  ;;  %v2031_v28 = vld [vmem:[#allocation14 + $0x960] sm:$0xff] }
 0x592   :  { %v2526_v25 = vld [vmem:[#allocation14 + $0x18d8] sm:$0xff]  ;;  %5708 = vmatpush.msra.mxu0 %v3310_v45  ;;  %5765 = vmatpush.msra.mxu3 %v2079_v49  ;;  %v2479_v29 = vld [vmem:[#allocation14 + $0x1760] sm:$0xff] }
 0x593   :  { %v3294_v42 = vld [vmem:[#allocation14 + $0x30d8] sm:$0xff]  ;;  %5742 = vmatpush.msra.mxu2 %v1871_v27  ;;  %5649 = vmatpush.msrb.mxu1 %v2526_v25  ;;  %v1807_v12 = vld [vmem:[#allocation14 + $0x260] sm:$0xff] }
 0x594   :  { %v2510_v9 = vld [vmem:[#allocation14 + $0x1858] sm:$0xff]  ;;  %5709 = vmatpush.msra.mxu0 %v3294_v42  ;;  %5766 = vmatpush.msra.mxu3 %v2063_v56  ;;  %v2015_v45 = vld [vmem:[#allocation14 + $0x8e0] sm:$0xff] }
 0x595   :  { %v3278_v14 = vld [vmem:[#allocation14 + $0x3058] sm:$0xff]  ;;  %5743 = vmatpush.msra.mxu2 %v1855_v6  ;;  %5650 = vmatpush.msrb.mxu1 %v2510_v9  ;;  %v2463_v27 = vld [vmem:[#allocation14 + $0x16e0] sm:$0xff] }
 0x596   :  { %v3774_v22 = vld [vmem:[#allocation14 + $0x3fd8] sm:$0xff]  ;;  %5710 = vmatpush.msra.mxu0 %v3278_v14  ;;  %5651 = vmatmul.f32.vlgmr.msrb.gmra.mxu1 %v7728_v40  ;;  %v1791_v25 = vld [vmem:[#allocation14 + $0x1e0] sm:$0xff] }
 0x597   :  { %5711 = vmatmul.f32.vlgmr.msra.gmra.mxu0 %v7746_v21  ;;  %v3758_v18 = vld [vmem:[#allocation14 + $0x3f58] sm:$0xff]  ;;  %5715 = vmatpush.msra.mxu1 %v3774_v22  ;;  %v1999_v42 = vld [vmem:[#allocation14 + $0x860] sm:$0xff] }
 0x598   :  { %5744 = vmatpush.msra.mxu2 %v1839_v15  ;;  %5767 = vmatpush.msra.mxu3 %v2047_v24  ;;  %v3742_v61 = vld [vmem:[#allocation14 + $0x3ed8] sm:$0xff]  ;;  %v2447_v6 = vld [vmem:[#allocation14 + $0x1660] sm:$0xff] }
 0x599   :  { %5775 = vmatpush.msrb.mxu0 %v2495_v20  ;;  %5716 = vmatpush.msra.mxu1 %v3758_v18  ;;  %v3726_v49 = vld [vmem:[#allocation14 + $0x3e58] sm:$0xff]  ;;  %v3263_v9 = vld [vmem:[#allocation14 + $0x2fe0] sm:$0xff] }
 0x59a   :  { %5745 = vmatpush.msra.mxu2 %v1823_v63  ;;  %5768 = vmatpush.msra.mxu3 %v2031_v28  ;;  %v3710_v56 = vld [vmem:[#allocation14 + $0x3dd8] sm:$0xff]  ;;  %v1775_v14 = vld [vmem:[#allocation14 + $0x160] sm:$0xff] }
 0x59b   :  { %5776 = vmatpush.msrb.mxu0 %v2479_v29  ;;  %5717 = vmatpush.msra.mxu1 %v3742_v61  ;;  %v2431_v22 = vld [vmem:[#allocation14 + $0x15e0] sm:$0xff]  ;;  %v3694_v15 = vld [vmem:[#allocation14 + $0x3d58] sm:$0xff] }
 0x59c   :  { %5746 = vmatpush.msra.mxu2 %v1807_v12  ;;  %5769 = vmatpush.msra.mxu3 %v2015_v45  ;;  %v3247_v24 = vld [vmem:[#allocation14 + $0x2f60] sm:$0xff]  ;;  %v3678_v63 = vld [vmem:[#allocation14 + $0x3cd8] sm:$0xff] }
 0x59d   :  { %5777 = vmatpush.msrb.mxu0 %v2463_v27  ;;  %5718 = vmatpush.msra.mxu1 %v3726_v49  ;;  %v1759_v20 = vld [vmem:[#allocation14 + $0xe0] sm:$0xff]  ;;  %v3662_v27 = vld [vmem:[#allocation14 + $0x3c58] sm:$0xff] }
 0x59e   :  { %5747 = vmatpush.msra.mxu2 %v1791_v25  ;;  %5770 = vmatpush.msra.mxu3 %v1999_v42  ;;  %v2415_v18 = vld [vmem:[#allocation14 + $0x1560] sm:$0xff] }
 0x59f   :  { %5778 = vmatpush.msrb.mxu0 %v2447_v6  ;;  %5771 = vmatmul.f32.vlgmr.msra.gmra.mxu3 %v7718_v13  ;;  %v3231_v28 = vld [vmem:[#allocation14 + $0x2ee0] sm:$0xff]  ;;  %v3646_v6 = vld [vmem:[#allocation14 + $0x3bd8] sm:$0xff] }
 0x5a0   :  { %5719 = vmatpush.msra.mxu1 %v3710_v56  ;;  %5835 = vmatpush.msrb.mxu3 %v3263_v9  ;;  %v1743_v29 = vld [vmem:[#allocation14 + $0x60] sm:$0xff] }
 0x5a1   :  { %5748 = vmatpush.msra.mxu2 %v1775_v14  ;;  %5779 = vmatpush.msrb.mxu0 %v2431_v22  ;;  %v2399_v61 = vld [vmem:[#allocation14 + $0x14e0] sm:$0xff]  ;;  %v3630_v22 = vld [vmem:[#allocation14 + $0x3b58] sm:$0xff] }
 0x5a2   :  { %5720 = vmatpush.msra.mxu1 %v3694_v15  ;;  %5836 = vmatpush.msrb.mxu3 %v3247_v24  ;;  %v3007_v12 = vld [vmem:[#allocation14 + $0x27e0] sm:$0xff] }
 0x5a3   :  { %5749 = vmatpush.msra.mxu2 %v1759_v20  ;;  %5780 = vmatpush.msrb.mxu0 %v2415_v18  ;;  %v3215_v45 = vld [vmem:[#allocation14 + $0x2e60] sm:$0xff]  ;;  %v3614_v18 = vld [vmem:[#allocation14 + $0x3ad8] sm:$0xff] }
 0x5a4   :  { %5721 = vmatpush.msra.mxu1 %v3678_v63  ;;  %5837 = vmatpush.msrb.mxu3 %v3231_v28  ;;  %v2383_v49 = vld [vmem:[#allocation14 + $0x1460] sm:$0xff] }
 0x5a5   :  { %5750 = vmatpush.msra.mxu2 %v1743_v29  ;;  %5781 = vmatpush.msrb.mxu0 %v2399_v61  ;;  %v2991_v25 = vld [vmem:[#allocation14 + $0x2760] sm:$0xff]  ;;  %v3598_v61 = vld [vmem:[#allocation14 + $0x3a58] sm:$0xff] }
 0x5a6   :  { %5751 = vmatmul.f32.vlgmr.msra.gmra.mxu2 %v7724_v11  ;;  %v3199_v42 = vld [vmem:[#allocation14 + $0x2de0] sm:$0xff]  ;;  %5838 = vmatpush.msrb.mxu3 %v3215_v45 }
 0x5a7   :  { %5815 = vmatpush.msrb.mxu2 %v3007_v12  ;;  %v2367_v56 = vld [vmem:[#allocation14 + $0x13e0] sm:$0xff]  ;;  %5722 = vmatpush.msra.mxu1 %v3662_v27 }
 0x5a8   :  { %5782 = vmatpush.msrb.mxu0 %v2383_v49  ;;  %v2975_v9 = vld [vmem:[#allocation14 + $0x26e0] sm:$0xff]  ;;  %5839 = vmatpush.msrb.mxu3 %v3199_v42  ;;  %v3582_v49 = vld [vmem:[#allocation14 + $0x39d8] sm:$0xff] }
 0x5a9   :  { %v3183_v14 = vld [vmem:[#allocation14 + $0x2d60] sm:$0xff]  ;;  %5816 = vmatpush.msrb.mxu2 %v2991_v25  ;;  %5723 = vmatpush.msra.mxu1 %v3646_v6 }
 0x5aa   :  { %v2351_v15 = vld [vmem:[#allocation14 + $0x1360] sm:$0xff]  ;;  %5783 = vmatpush.msrb.mxu0 %v2367_v56  ;;  %5840 = vmatpush.msrb.mxu3 %v3183_v14  ;;  %v3566_v56 = vld [vmem:[#allocation14 + $0x3958] sm:$0xff] }
 0x5ab   :  { %v2959_v24 = vld [vmem:[#allocation14 + $0x2660] sm:$0xff]  ;;  %5817 = vmatpush.msrb.mxu2 %v2975_v9  ;;  %5724 = vmatpush.msra.mxu1 %v3630_v22 }
 0x5ac   :  { %v3167_v20 = vld [vmem:[#allocation14 + $0x2ce0] sm:$0xff]  ;;  %5784 = vmatpush.msrb.mxu0 %v2351_v15  ;;  %v3550_v15 = vld [vmem:[#allocation14 + $0x38d8] sm:$0xff] }
 0x5ad   :  { %v2335_v63 = vld [vmem:[#allocation14 + $0x12e0] sm:$0xff]  ;;  %5818 = vmatpush.msrb.mxu2 %v2959_v24  ;;  %5841 = vmatpush.msrb.mxu3 %v3167_v20 }
 0x5ae   :  { %v2943_v28 = vld [vmem:[#allocation14 + $0x25e0] sm:$0xff]  ;;  %5725 = vmatpush.msra.mxu1 %v3614_v18  ;;  %5785 = vmatpush.msrb.mxu0 %v2335_v63  ;;  %v3534_v63 = vld [vmem:[#allocation14 + $0x3858] sm:$0xff] }
 0x5af   :  { %v3151_v29 = vld [vmem:[#allocation14 + $0x2c60] sm:$0xff]  ;;  %5819 = vmatpush.msrb.mxu2 %v2943_v28 }
 0x5b0   :  { %v2319_v12 = vld [vmem:[#allocation14 + $0x1260] sm:$0xff]  ;;  %5842 = vmatpush.msrb.mxu3 %v3151_v29  ;;  %5726 = vmatpush.msra.mxu1 %v3598_v61 }
 0x5b1   :  { %v2927_v45 = vld [vmem:[#allocation14 + $0x2560] sm:$0xff]  ;;  %5786 = vmatpush.msrb.mxu0 %v2319_v12 }
 0x5b2   :  { %v3135_v27 = vld [vmem:[#allocation14 + $0x2be0] sm:$0xff]  ;;  %5820 = vmatpush.msrb.mxu2 %v2927_v45  ;;  %5727 = vmatpush.msra.mxu1 %v3582_v49 }
 0x5b3   :  { %v2303_v25 = vld [vmem:[#allocation14 + $0x11e0] sm:$0xff]  ;;  %5843 = vmatpush.msrb.mxu3 %v3135_v27 }
 0x5b4   :  { %v2911_v42 = vld [vmem:[#allocation14 + $0x24e0] sm:$0xff]  ;;  %5787 = vmatpush.msrb.mxu0 %v2303_v25  ;;  %5728 = vmatpush.msra.mxu1 %v3566_v56 }
 0x5b5   :  { %v3119_v6 = vld [vmem:[#allocation14 + $0x2b60] sm:$0xff]  ;;  %5821 = vmatpush.msrb.mxu2 %v2911_v42 }
 0x5b6   :  { %v2287_v9 = vld [vmem:[#allocation14 + $0x1160] sm:$0xff]  ;;  %5844 = vmatpush.msrb.mxu3 %v3119_v6  ;;  %5729 = vmatpush.msra.mxu1 %v3550_v15 }
 0x5b7   :  { %v2895_v14 = vld [vmem:[#allocation14 + $0x2460] sm:$0xff]  ;;  %5788 = vmatpush.msrb.mxu0 %v2287_v9 }
 0x5b8   :  { %v3103_v22 = vld [vmem:[#allocation14 + $0x2ae0] sm:$0xff]  ;;  %5822 = vmatpush.msrb.mxu2 %v2895_v14  ;;  %5730 = vmatpush.msra.mxu1 %v3534_v63  ;;  %v2240_v63 = vld [vmem:[#allocation14 + $0xfe8] sm:$0xff] }
 0x5b9   :  { %v2271_v24 = vld [vmem:[#allocation14 + $0x10e0] sm:$0xff]  ;;  %5845 = vmatpush.msrb.mxu3 %v3103_v22  ;;  %5731 = vmatmul.f32.vlgmr.msra.gmra.mxu1 %v7752_v50 }
 0x5ba   :  { %v2879_v20 = vld [vmem:[#allocation14 + $0x23e0] sm:$0xff]  ;;  %5789 = vmatpush.msrb.mxu0 %v2271_v24 }
 0x5bb   :  { %v3087_v18 = vld [vmem:[#allocation14 + $0x2a60] sm:$0xff]  ;;  %5823 = vmatpush.msrb.mxu2 %v2879_v20 }
 0x5bc   :  { %v2255_v28 = vld [vmem:[#allocation14 + $0x1060] sm:$0xff]  ;;  %5846 = vmatpush.msrb.mxu3 %v3087_v18 }
 0x5bd   :  { %v2751_v29 = vld [vmem:[#allocation14 + $0x1fe0] sm:$0xff]  ;;  %5790 = vmatpush.msrb.mxu0 %v2255_v28 }
 0x5be   :  { %v2863_v61 = vld [vmem:[#allocation14 + $0x2360] sm:$0xff]  ;;  %5791 = vmatmul.f32.vlgmr.msrb.gmra.mxu0 %v7732_v53  ;;  %5795 = vmatpush.msrb.mxu1 %v2751_v29 }
 0x5bf   :  { %v3071_v12 = vld [vmem:[#allocation14 + $0x29e0] sm:$0xff]  ;;  %5824 = vmatpush.msrb.mxu2 %v2863_v61 }
 0x5c0   :  { %v3519_v45 = vld [vmem:[#allocation14 + $0x37e0] sm:$0xff]  ;;  %5847 = vmatpush.msrb.mxu3 %v3071_v12  ;;  %v2224_v12 = vld [vmem:[#allocation14 + $0xf68] sm:$0xff] }
 0x5c1   :  { %v2735_v27 = vld [vmem:[#allocation14 + $0x1f60] sm:$0xff]  ;;  %5855 = vmatpush.msra.mxu0 %v3519_v45 }
 0x5c2   :  { %v2847_v49 = vld [vmem:[#allocation14 + $0x22e0] sm:$0xff]  ;;  %5796 = vmatpush.msrb.mxu1 %v2735_v27 }
 0x5c3   :  { %v3055_v25 = vld [vmem:[#allocation14 + $0x2960] sm:$0xff]  ;;  %5825 = vmatpush.msrb.mxu2 %v2847_v49 }
 0x5c4   :  { %v3503_v42 = vld [vmem:[#allocation14 + $0x3760] sm:$0xff]  ;;  %5848 = vmatpush.msrb.mxu3 %v3055_v25  ;;  %v2208_v25 = vld [vmem:[#allocation14 + $0xee8] sm:$0xff] }
 0x5c5   :  { %v2719_v6 = vld [vmem:[#allocation14 + $0x1ee0] sm:$0xff]  ;;  %5856 = vmatpush.msra.mxu0 %v3503_v42 }
 0x5c6   :  { %v2831_v56 = vld [vmem:[#allocation14 + $0x2260] sm:$0xff]  ;;  %5797 = vmatpush.msrb.mxu1 %v2719_v6 }
 0x5c7   :  { %v3039_v9 = vld [vmem:[#allocation14 + $0x28e0] sm:$0xff]  ;;  %5826 = vmatpush.msrb.mxu2 %v2831_v56  ;;  %v1984_v56 = vld [vmem:[#allocation14 + $0x7e8] sm:$0xff] }
 0x5c8   :  { %v3487_v14 = vld [vmem:[#allocation14 + $0x36e0] sm:$0xff]  ;;  %5849 = vmatpush.msrb.mxu3 %v3039_v9  ;;  %v2192_v9 = vld [vmem:[#allocation14 + $0xe68] sm:$0xff] }
 0x5c9   :  { %v2703_v22 = vld [vmem:[#allocation14 + $0x1e60] sm:$0xff]  ;;  %5857 = vmatpush.msra.mxu0 %v3487_v14 }
 0x5ca   :  { %v2815_v15 = vld [vmem:[#allocation14 + $0x21e0] sm:$0xff]  ;;  %5798 = vmatpush.msrb.mxu1 %v2703_v22 }
 0x5cb   :  { %v3023_v24 = vld [vmem:[#allocation14 + $0x2860] sm:$0xff]  ;;  %5827 = vmatpush.msrb.mxu2 %v2815_v15  ;;  %v1968_v15 = vld [vmem:[#allocation14 + $0x768] sm:$0xff] }
 0x5cc   :  { %v3471_v20 = vld [vmem:[#allocation14 + $0x3660] sm:$0xff]  ;;  %5850 = vmatpush.msrb.mxu3 %v3023_v24  ;;  %v2176_v24 = vld [vmem:[#allocation14 + $0xde8] sm:$0xff] }
 0x5cd   :  { %v2687_v18 = vld [vmem:[#allocation14 + $0x1de0] sm:$0xff]  ;;  %5858 = vmatpush.msra.mxu0 %v3471_v20  ;;  %5851 = vmatmul.f32.vlgmr.msrb.gmra.mxu3 %v7740_v7 }
 0x5ce   :  { %v2799_v28 = vld [vmem:[#allocation14 + $0x2160] sm:$0xff]  ;;  %5799 = vmatpush.msrb.mxu1 %v2687_v18  ;;  %5915 = vmatpush.msra.mxu3 %v2240_v63  ;;  %v1952_v63 = vld [vmem:[#allocation14 + $0x6e8] sm:$0xff] }
 0x5cf   :  { %v3455_v29 = vld [vmem:[#allocation14 + $0x35e0] sm:$0xff]  ;;  %5828 = vmatpush.msrb.mxu2 %v2799_v28  ;;  %v2160_v28 = vld [vmem:[#allocation14 + $0xd68] sm:$0xff] }
 0x5d0   :  { %v2671_v61 = vld [vmem:[#allocation14 + $0x1d60] sm:$0xff]  ;;  %5859 = vmatpush.msra.mxu0 %v3455_v29  ;;  %5916 = vmatpush.msra.mxu3 %v2224_v12  ;;  %v1936_v12 = vld [vmem:[#allocation14 + $0x668] sm:$0xff] }
 0x5d1   :  { %v2783_v45 = vld [vmem:[#allocation14 + $0x20e0] sm:$0xff]  ;;  %5800 = vmatpush.msrb.mxu1 %v2671_v61 }
 0x5d2   :  { %v3439_v27 = vld [vmem:[#allocation14 + $0x3560] sm:$0xff]  ;;  %5829 = vmatpush.msrb.mxu2 %v2783_v45  ;;  %5917 = vmatpush.msra.mxu3 %v2208_v25  ;;  %v2144_v45 = vld [vmem:[#allocation14 + $0xce8] sm:$0xff] }
 0x5d3   :  { %v2655_v49 = vld [vmem:[#allocation14 + $0x1ce0] sm:$0xff]  ;;  %5860 = vmatpush.msra.mxu0 %v3439_v27  ;;  %v1920_v25 = vld [vmem:[#allocation14 + $0x5e8] sm:$0xff] }
 0x5d4   :  { %v2767_v42 = vld [vmem:[#allocation14 + $0x2060] sm:$0xff]  ;;  %5801 = vmatpush.msrb.mxu1 %v2655_v49  ;;  %5918 = vmatpush.msra.mxu3 %v2192_v9  ;;  %v1904_v9 = vld [vmem:[#allocation14 + $0x568] sm:$0xff] }
 0x5d5   :  { %v3423_v6 = vld [vmem:[#allocation14 + $0x34e0] sm:$0xff]  ;;  %5830 = vmatpush.msrb.mxu2 %v2767_v42  ;;  %v2128_v42 = vld [vmem:[#allocation14 + $0xc68] sm:$0xff] }
 0x5d6   :  { %v2639_v14 = vld [vmem:[#allocation14 + $0x1c60] sm:$0xff]  ;;  %5861 = vmatpush.msra.mxu0 %v3423_v6  ;;  %5831 = vmatmul.f32.vlgmr.msrb.gmra.mxu2 %v7737_v44 }
 0x5d7   :  { %v3407_v22 = vld [vmem:[#allocation14 + $0x3460] sm:$0xff]  ;;  %5895 = vmatpush.msra.mxu2 %v1984_v56  ;;  %5802 = vmatpush.msrb.mxu1 %v2639_v14  ;;  %v2112_v14 = vld [vmem:[#allocation14 + $0xbe8] sm:$0xff] }
 0x5d8   :  { %v2623_v20 = vld [vmem:[#allocation14 + $0x1be0] sm:$0xff]  ;;  %5862 = vmatpush.msra.mxu0 %v3407_v22  ;;  %5919 = vmatpush.msra.mxu3 %v2176_v24  ;;  %v1888_v24 = vld [vmem:[#allocation14 + $0x4e8] sm:$0xff] }
 0x5d9   :  { %v3391_v18 = vld [vmem:[#allocation14 + $0x33e0] sm:$0xff]  ;;  %5896 = vmatpush.msra.mxu2 %v1968_v15  ;;  %5803 = vmatpush.msrb.mxu1 %v2623_v20  ;;  %v2096_v20 = vld [vmem:[#allocation14 + $0xb68] sm:$0xff] }
 0x5da   :  { %v2607_v29 = vld [vmem:[#allocation14 + $0x1b60] sm:$0xff]  ;;  %5863 = vmatpush.msra.mxu0 %v3391_v18  ;;  %5920 = vmatpush.msra.mxu3 %v2160_v28  ;;  %v1872_v28 = vld [vmem:[#allocation14 + $0x468] sm:$0xff] }
 0x5db   :  { %v3375_v61 = vld [vmem:[#allocation14 + $0x3360] sm:$0xff]  ;;  %5897 = vmatpush.msra.mxu2 %v1952_v63  ;;  %5804 = vmatpush.msrb.mxu1 %v2607_v29  ;;  %v2080_v29 = vld [vmem:[#allocation14 + $0xae8] sm:$0xff] }
 0x5dc   :  { %v2591_v27 = vld [vmem:[#allocation14 + $0x1ae0] sm:$0xff]  ;;  %5864 = vmatpush.msra.mxu0 %v3375_v61  ;;  %5921 = vmatpush.msra.mxu3 %v2144_v45  ;;  %v1856_v45 = vld [vmem:[#allocation14 + $0x3e8] sm:$0xff] }
 0x5dd   :  { %v3359_v49 = vld [vmem:[#allocation14 + $0x32e0] sm:$0xff]  ;;  %5898 = vmatpush.msra.mxu2 %v1936_v12  ;;  %5805 = vmatpush.msrb.mxu1 %v2591_v27  ;;  %v2064_v27 = vld [vmem:[#allocation14 + $0xa68] sm:$0xff] }
 0x5de   :  { %v2575_v6 = vld [vmem:[#allocation14 + $0x1a60] sm:$0xff]  ;;  %5865 = vmatpush.msra.mxu0 %v3359_v49  ;;  %5922 = vmatpush.msra.mxu3 %v2128_v42 }
 0x5df   :  { %v3343_v56 = vld [vmem:[#allocation14 + $0x3260] sm:$0xff]  ;;  %5899 = vmatpush.msra.mxu2 %v1920_v25  ;;  %5806 = vmatpush.msrb.mxu1 %v2575_v6  ;;  %v1840_v6 = vld [vmem:[#allocation14 + $0x368] sm:$0xff] }
 0x5e0   :  { %v2559_v22 = vld [vmem:[#allocation14 + $0x19e0] sm:$0xff]  ;;  %5866 = vmatpush.msra.mxu0 %v3343_v56  ;;  %5923 = vmatpush.msra.mxu3 %v2112_v14  ;;  %v2048_v56 = vld [vmem:[#allocation14 + $0x9e8] sm:$0xff] }
 0x5e1   :  { %v3327_v15 = vld [vmem:[#allocation14 + $0x31e0] sm:$0xff]  ;;  %5900 = vmatpush.msra.mxu2 %v1904_v9  ;;  %5807 = vmatpush.msrb.mxu1 %v2559_v22  ;;  %v2496_v9 = vld [vmem:[#allocation14 + $0x17e8] sm:$0xff] }
 0x5e2   :  { %v2543_v18 = vld [vmem:[#allocation14 + $0x1960] sm:$0xff]  ;;  %5867 = vmatpush.msra.mxu0 %v3327_v15  ;;  %5924 = vmatpush.msra.mxu3 %v2096_v20  ;;  %v1824_v22 = vld [vmem:[#allocation14 + $0x2e8] sm:$0xff] }
 0x5e3   :  { %v3311_v63 = vld [vmem:[#allocation14 + $0x3160] sm:$0xff]  ;;  %5901 = vmatpush.msra.mxu2 %v1888_v24  ;;  %5808 = vmatpush.msrb.mxu1 %v2543_v18  ;;  %v2032_v15 = vld [vmem:[#allocation14 + $0x968] sm:$0xff] }
 0x5e4   :  { %v2527_v61 = vld [vmem:[#allocation14 + $0x18e0] sm:$0xff]  ;;  %5868 = vmatpush.msra.mxu0 %v3311_v63  ;;  %5925 = vmatpush.msra.mxu3 %v2080_v29  ;;  %v2480_v24 = vld [vmem:[#allocation14 + $0x1768] sm:$0xff] }
 0x5e5   :  { %v3295_v12 = vld [vmem:[#allocation14 + $0x30e0] sm:$0xff]  ;;  %5902 = vmatpush.msra.mxu2 %v1872_v28  ;;  %5809 = vmatpush.msrb.mxu1 %v2527_v61  ;;  %v1808_v18 = vld [vmem:[#allocation14 + $0x268] sm:$0xff] }
 0x5e6   :  { %v2511_v49 = vld [vmem:[#allocation14 + $0x1860] sm:$0xff]  ;;  %5869 = vmatpush.msra.mxu0 %v3295_v12  ;;  %5926 = vmatpush.msra.mxu3 %v2064_v27  ;;  %v2016_v63 = vld [vmem:[#allocation14 + $0x8e8] sm:$0xff] }
 0x5e7   :  { %v3279_v25 = vld [vmem:[#allocation14 + $0x3060] sm:$0xff]  ;;  %5903 = vmatpush.msra.mxu2 %v1856_v45  ;;  %5810 = vmatpush.msrb.mxu1 %v2511_v49  ;;  %v2464_v28 = vld [vmem:[#allocation14 + $0x16e8] sm:$0xff] }
 0x5e8   :  { %v3775_v42 = vld [vmem:[#allocation14 + $0x3fe0] sm:$0xff]  ;;  %5870 = vmatpush.msra.mxu0 %v3279_v25  ;;  %5811 = vmatmul.f32.vlgmr.msrb.gmra.mxu1 %v7728_v40  ;;  %v1792_v61 = vld [vmem:[#allocation14 + $0x1e8] sm:$0xff] }
 0x5e9   :  { %5871 = vmatmul.f32.vlgmr.msra.gmra.mxu0 %v7746_v21  ;;  %v3759_v14 = vld [vmem:[#allocation14 + $0x3f60] sm:$0xff]  ;;  %5875 = vmatpush.msra.mxu1 %v3775_v42  ;;  %v2000_v12 = vld [vmem:[#allocation14 + $0x868] sm:$0xff] }
 0x5ea   :  { %5904 = vmatpush.msra.mxu2 %v1840_v6  ;;  %5927 = vmatpush.msra.mxu3 %v2048_v56  ;;  %v3743_v20 = vld [vmem:[#allocation14 + $0x3ee0] sm:$0xff]  ;;  %v2448_v45 = vld [vmem:[#allocation14 + $0x1668] sm:$0xff] }
 0x5eb   :  { %5935 = vmatpush.msrb.mxu0 %v2496_v9  ;;  %5876 = vmatpush.msra.mxu1 %v3759_v14  ;;  %v3727_v29 = vld [vmem:[#allocation14 + $0x3e60] sm:$0xff]  ;;  %v3264_v49 = vld [vmem:[#allocation14 + $0x2fe8] sm:$0xff] }
 0x5ec   :  { %5905 = vmatpush.msra.mxu2 %v1824_v22  ;;  %5928 = vmatpush.msra.mxu3 %v2032_v15  ;;  %v3711_v27 = vld [vmem:[#allocation14 + $0x3de0] sm:$0xff]  ;;  %v1776_v25 = vld [vmem:[#allocation14 + $0x168] sm:$0xff] }
 0x5ed   :  { %5936 = vmatpush.msrb.mxu0 %v2480_v24  ;;  %5877 = vmatpush.msra.mxu1 %v3743_v20  ;;  %v2432_v42 = vld [vmem:[#allocation14 + $0x15e8] sm:$0xff]  ;;  %v3695_v6 = vld [vmem:[#allocation14 + $0x3d60] sm:$0xff] }
 0x5ee   :  { %5906 = vmatpush.msra.mxu2 %v1808_v18  ;;  %5929 = vmatpush.msra.mxu3 %v2016_v63  ;;  %v3248_v56 = vld [vmem:[#allocation14 + $0x2f68] sm:$0xff]  ;;  %v3679_v22 = vld [vmem:[#allocation14 + $0x3ce0] sm:$0xff] }
 0x5ef   :  { %5937 = vmatpush.msrb.mxu0 %v2464_v28  ;;  %5878 = vmatpush.msra.mxu1 %v3727_v29  ;;  %v1760_v9 = vld [vmem:[#allocation14 + $0xe8] sm:$0xff]  ;;  %v3663_v28 = vld [vmem:[#allocation14 + $0x3c60] sm:$0xff] }
 0x5f0   :  { %5907 = vmatpush.msra.mxu2 %v1792_v61  ;;  %5930 = vmatpush.msra.mxu3 %v2000_v12  ;;  %v2416_v14 = vld [vmem:[#allocation14 + $0x1568] sm:$0xff] }
 0x5f1   :  { %5938 = vmatpush.msrb.mxu0 %v2448_v45  ;;  %5931 = vmatmul.f32.vlgmr.msra.gmra.mxu3 %v7718_v13  ;;  %v3232_v15 = vld [vmem:[#allocation14 + $0x2ee8] sm:$0xff]  ;;  %v3647_v45 = vld [vmem:[#allocation14 + $0x3be0] sm:$0xff] }
 0x5f2   :  { %5879 = vmatpush.msra.mxu1 %v3711_v27  ;;  %5995 = vmatpush.msrb.mxu3 %v3264_v49  ;;  %v1744_v24 = vld [vmem:[#allocation14 + $0x68] sm:$0xff] }
 0x5f3   :  { %5908 = vmatpush.msra.mxu2 %v1776_v25  ;;  %5939 = vmatpush.msrb.mxu0 %v2432_v42  ;;  %v2400_v20 = vld [vmem:[#allocation14 + $0x14e8] sm:$0xff]  ;;  %v3631_v42 = vld [vmem:[#allocation14 + $0x3b60] sm:$0xff] }
 0x5f4   :  { %5880 = vmatpush.msra.mxu1 %v3695_v6  ;;  %5996 = vmatpush.msrb.mxu3 %v3248_v56  ;;  %v3008_v18 = vld [vmem:[#allocation14 + $0x27e8] sm:$0xff] }
 0x5f5   :  { %5909 = vmatpush.msra.mxu2 %v1760_v9  ;;  %5940 = vmatpush.msrb.mxu0 %v2416_v14  ;;  %v3216_v63 = vld [vmem:[#allocation14 + $0x2e68] sm:$0xff]  ;;  %v3615_v14 = vld [vmem:[#allocation14 + $0x3ae0] sm:$0xff] }
 0x5f6   :  { %5881 = vmatpush.msra.mxu1 %v3679_v22  ;;  %5997 = vmatpush.msrb.mxu3 %v3232_v15  ;;  %v2384_v29 = vld [vmem:[#allocation14 + $0x1468] sm:$0xff] }
 0x5f7   :  { %5910 = vmatpush.msra.mxu2 %v1744_v24  ;;  %5941 = vmatpush.msrb.mxu0 %v2400_v20  ;;  %v2992_v61 = vld [vmem:[#allocation14 + $0x2768] sm:$0xff]  ;;  %v3599_v20 = vld [vmem:[#allocation14 + $0x3a60] sm:$0xff] }
 0x5f8   :  { %5911 = vmatmul.f32.vlgmr.msra.gmra.mxu2 %v7724_v11  ;;  %v3200_v12 = vld [vmem:[#allocation14 + $0x2de8] sm:$0xff]  ;;  %5998 = vmatpush.msrb.mxu3 %v3216_v63 }
 0x5f9   :  { %5975 = vmatpush.msrb.mxu2 %v3008_v18  ;;  %v2368_v27 = vld [vmem:[#allocation14 + $0x13e8] sm:$0xff]  ;;  %5882 = vmatpush.msra.mxu1 %v3663_v28 }
 0x5fa   :  { %5942 = vmatpush.msrb.mxu0 %v2384_v29  ;;  %v2976_v49 = vld [vmem:[#allocation14 + $0x26e8] sm:$0xff]  ;;  %5999 = vmatpush.msrb.mxu3 %v3200_v12  ;;  %v3583_v29 = vld [vmem:[#allocation14 + $0x39e0] sm:$0xff] }
 0x5fb   :  { %v3184_v25 = vld [vmem:[#allocation14 + $0x2d68] sm:$0xff]  ;;  %5976 = vmatpush.msrb.mxu2 %v2992_v61  ;;  %5883 = vmatpush.msra.mxu1 %v3647_v45 }
 0x5fc   :  { %v2352_v6 = vld [vmem:[#allocation14 + $0x1368] sm:$0xff]  ;;  %5943 = vmatpush.msrb.mxu0 %v2368_v27  ;;  %6000 = vmatpush.msrb.mxu3 %v3184_v25  ;;  %v3567_v27 = vld [vmem:[#allocation14 + $0x3960] sm:$0xff] }
 0x5fd   :  { %v2960_v56 = vld [vmem:[#allocation14 + $0x2668] sm:$0xff]  ;;  %5977 = vmatpush.msrb.mxu2 %v2976_v49  ;;  %5884 = vmatpush.msra.mxu1 %v3631_v42 }
 0x5fe   :  { %v3168_v9 = vld [vmem:[#allocation14 + $0x2ce8] sm:$0xff]  ;;  %5944 = vmatpush.msrb.mxu0 %v2352_v6  ;;  %v3551_v6 = vld [vmem:[#allocation14 + $0x38e0] sm:$0xff] }
 0x5ff   :  { %v2336_v22 = vld [vmem:[#allocation14 + $0x12e8] sm:$0xff]  ;;  %5978 = vmatpush.msrb.mxu2 %v2960_v56  ;;  %6001 = vmatpush.msrb.mxu3 %v3168_v9 }
 0x600   :  { %v2944_v15 = vld [vmem:[#allocation14 + $0x25e8] sm:$0xff]  ;;  %5885 = vmatpush.msra.mxu1 %v3615_v14  ;;  %5945 = vmatpush.msrb.mxu0 %v2336_v22  ;;  %v3535_v22 = vld [vmem:[#allocation14 + $0x3860] sm:$0xff] }
 0x601   :  { %v3152_v24 = vld [vmem:[#allocation14 + $0x2c68] sm:$0xff]  ;;  %5979 = vmatpush.msrb.mxu2 %v2944_v15 }
 0x602   :  { %v2320_v18 = vld [vmem:[#allocation14 + $0x1268] sm:$0xff]  ;;  %6002 = vmatpush.msrb.mxu3 %v3152_v24  ;;  %5886 = vmatpush.msra.mxu1 %v3599_v20 }
 0x603   :  { %v2928_v63 = vld [vmem:[#allocation14 + $0x2568] sm:$0xff]  ;;  %5946 = vmatpush.msrb.mxu0 %v2320_v18 }
 0x604   :  { %v3136_v28 = vld [vmem:[#allocation14 + $0x2be8] sm:$0xff]  ;;  %5980 = vmatpush.msrb.mxu2 %v2928_v63  ;;  %5887 = vmatpush.msra.mxu1 %v3583_v29 }
 0x605   :  { %v2304_v61 = vld [vmem:[#allocation14 + $0x11e8] sm:$0xff]  ;;  %6003 = vmatpush.msrb.mxu3 %v3136_v28 }
 0x606   :  { %v2912_v12 = vld [vmem:[#allocation14 + $0x24e8] sm:$0xff]  ;;  %5947 = vmatpush.msrb.mxu0 %v2304_v61  ;;  %5888 = vmatpush.msra.mxu1 %v3567_v27 }
 0x607   :  { %v3120_v45 = vld [vmem:[#allocation14 + $0x2b68] sm:$0xff]  ;;  %5981 = vmatpush.msrb.mxu2 %v2912_v12 }
 0x608   :  { %v2288_v49 = vld [vmem:[#allocation14 + $0x1168] sm:$0xff]  ;;  %6004 = vmatpush.msrb.mxu3 %v3120_v45  ;;  %5889 = vmatpush.msra.mxu1 %v3551_v6 }
 0x609   :  { %v2896_v25 = vld [vmem:[#allocation14 + $0x2468] sm:$0xff]  ;;  %5948 = vmatpush.msrb.mxu0 %v2288_v49 }
 0x60a   :  { %v3104_v42 = vld [vmem:[#allocation14 + $0x2ae8] sm:$0xff]  ;;  %5982 = vmatpush.msrb.mxu2 %v2896_v25  ;;  %5890 = vmatpush.msra.mxu1 %v3535_v22  ;;  %v2241_v22 = vld [vmem:[#allocation14 + $0xff0] sm:$0xff] }
 0x60b   :  { %v2272_v56 = vld [vmem:[#allocation14 + $0x10e8] sm:$0xff]  ;;  %6005 = vmatpush.msrb.mxu3 %v3104_v42  ;;  %5891 = vmatmul.f32.vlgmr.msra.gmra.mxu1 %v7752_v50 }
 0x60c   :  { %v2880_v9 = vld [vmem:[#allocation14 + $0x23e8] sm:$0xff]  ;;  %5949 = vmatpush.msrb.mxu0 %v2272_v56 }
 0x60d   :  { %v3088_v14 = vld [vmem:[#allocation14 + $0x2a68] sm:$0xff]  ;;  %5983 = vmatpush.msrb.mxu2 %v2880_v9 }
 0x60e   :  { %v2256_v15 = vld [vmem:[#allocation14 + $0x1068] sm:$0xff]  ;;  %6006 = vmatpush.msrb.mxu3 %v3088_v14 }
 0x60f   :  { %v2752_v24 = vld [vmem:[#allocation14 + $0x1fe8] sm:$0xff]  ;;  %5950 = vmatpush.msrb.mxu0 %v2256_v15 }
 0x610   :  { %v2864_v20 = vld [vmem:[#allocation14 + $0x2368] sm:$0xff]  ;;  %5951 = vmatmul.f32.vlgmr.msrb.gmra.mxu0 %v7732_v53  ;;  %5955 = vmatpush.msrb.mxu1 %v2752_v24 }
 0x611   :  { %v3072_v18 = vld [vmem:[#allocation14 + $0x29e8] sm:$0xff]  ;;  %5984 = vmatpush.msrb.mxu2 %v2864_v20 }
 0x612   :  { %v3520_v63 = vld [vmem:[#allocation14 + $0x37e8] sm:$0xff]  ;;  %6007 = vmatpush.msrb.mxu3 %v3072_v18  ;;  %v2225_v18 = vld [vmem:[#allocation14 + $0xf70] sm:$0xff] }
 0x613   :  { %v2736_v28 = vld [vmem:[#allocation14 + $0x1f68] sm:$0xff]  ;;  %6015 = vmatpush.msra.mxu0 %v3520_v63 }
 0x614   :  { %v2848_v29 = vld [vmem:[#allocation14 + $0x22e8] sm:$0xff]  ;;  %5956 = vmatpush.msrb.mxu1 %v2736_v28 }
 0x615   :  { %v3056_v61 = vld [vmem:[#allocation14 + $0x2968] sm:$0xff]  ;;  %5985 = vmatpush.msrb.mxu2 %v2848_v29 }
 0x616   :  { %v3504_v12 = vld [vmem:[#allocation14 + $0x3768] sm:$0xff]  ;;  %6008 = vmatpush.msrb.mxu3 %v3056_v61  ;;  %v2209_v61 = vld [vmem:[#allocation14 + $0xef0] sm:$0xff] }
 0x617   :  { %v2720_v45 = vld [vmem:[#allocation14 + $0x1ee8] sm:$0xff]  ;;  %6016 = vmatpush.msra.mxu0 %v3504_v12 }
 0x618   :  { %v2832_v27 = vld [vmem:[#allocation14 + $0x2268] sm:$0xff]  ;;  %5957 = vmatpush.msrb.mxu1 %v2720_v45 }
 0x619   :  { %v3040_v49 = vld [vmem:[#allocation14 + $0x28e8] sm:$0xff]  ;;  %5986 = vmatpush.msrb.mxu2 %v2832_v27  ;;  %v1985_v27 = vld [vmem:[#allocation14 + $0x7f0] sm:$0xff] }
 0x61a   :  { %v3488_v25 = vld [vmem:[#allocation14 + $0x36e8] sm:$0xff]  ;;  %6009 = vmatpush.msrb.mxu3 %v3040_v49  ;;  %v2193_v49 = vld [vmem:[#allocation14 + $0xe70] sm:$0xff] }
 0x61b   :  { %v2704_v42 = vld [vmem:[#allocation14 + $0x1e68] sm:$0xff]  ;;  %6017 = vmatpush.msra.mxu0 %v3488_v25 }
 0x61c   :  { %v2816_v6 = vld [vmem:[#allocation14 + $0x21e8] sm:$0xff]  ;;  %5958 = vmatpush.msrb.mxu1 %v2704_v42 }
 0x61d   :  { %v3024_v56 = vld [vmem:[#allocation14 + $0x2868] sm:$0xff]  ;;  %5987 = vmatpush.msrb.mxu2 %v2816_v6  ;;  %v1969_v6 = vld [vmem:[#allocation14 + $0x770] sm:$0xff] }
 0x61e   :  { %v3472_v9 = vld [vmem:[#allocation14 + $0x3668] sm:$0xff]  ;;  %6010 = vmatpush.msrb.mxu3 %v3024_v56  ;;  %v2177_v56 = vld [vmem:[#allocation14 + $0xdf0] sm:$0xff] }
 0x61f   :  { %v2688_v14 = vld [vmem:[#allocation14 + $0x1de8] sm:$0xff]  ;;  %6018 = vmatpush.msra.mxu0 %v3472_v9  ;;  %6011 = vmatmul.f32.vlgmr.msrb.gmra.mxu3 %v7740_v7 }
 0x620   :  { %v2800_v15 = vld [vmem:[#allocation14 + $0x2168] sm:$0xff]  ;;  %5959 = vmatpush.msrb.mxu1 %v2688_v14  ;;  %6075 = vmatpush.msra.mxu3 %v2241_v22  ;;  %v1953_v22 = vld [vmem:[#allocation14 + $0x6f0] sm:$0xff] }
 0x621   :  { %v3456_v24 = vld [vmem:[#allocation14 + $0x35e8] sm:$0xff]  ;;  %5988 = vmatpush.msrb.mxu2 %v2800_v15  ;;  %v2161_v15 = vld [vmem:[#allocation14 + $0xd70] sm:$0xff] }
 0x622   :  { %v2672_v20 = vld [vmem:[#allocation14 + $0x1d68] sm:$0xff]  ;;  %6019 = vmatpush.msra.mxu0 %v3456_v24  ;;  %6076 = vmatpush.msra.mxu3 %v2225_v18  ;;  %v1937_v18 = vld [vmem:[#allocation14 + $0x670] sm:$0xff] }
 0x623   :  { %v2784_v63 = vld [vmem:[#allocation14 + $0x20e8] sm:$0xff]  ;;  %5960 = vmatpush.msrb.mxu1 %v2672_v20 }
 0x624   :  { %v3440_v28 = vld [vmem:[#allocation14 + $0x3568] sm:$0xff]  ;;  %5989 = vmatpush.msrb.mxu2 %v2784_v63  ;;  %6077 = vmatpush.msra.mxu3 %v2209_v61  ;;  %v2145_v63 = vld [vmem:[#allocation14 + $0xcf0] sm:$0xff] }
 0x625   :  { %v2656_v29 = vld [vmem:[#allocation14 + $0x1ce8] sm:$0xff]  ;;  %6020 = vmatpush.msra.mxu0 %v3440_v28  ;;  %v1921_v61 = vld [vmem:[#allocation14 + $0x5f0] sm:$0xff] }
 0x626   :  { %v2768_v12 = vld [vmem:[#allocation14 + $0x2068] sm:$0xff]  ;;  %5961 = vmatpush.msrb.mxu1 %v2656_v29  ;;  %6078 = vmatpush.msra.mxu3 %v2193_v49  ;;  %v1905_v49 = vld [vmem:[#allocation14 + $0x570] sm:$0xff] }
 0x627   :  { %v3424_v45 = vld [vmem:[#allocation14 + $0x34e8] sm:$0xff]  ;;  %5990 = vmatpush.msrb.mxu2 %v2768_v12  ;;  %v2129_v12 = vld [vmem:[#allocation14 + $0xc70] sm:$0xff] }
 0x628   :  { %v2640_v25 = vld [vmem:[#allocation14 + $0x1c68] sm:$0xff]  ;;  %6021 = vmatpush.msra.mxu0 %v3424_v45  ;;  %5991 = vmatmul.f32.vlgmr.msrb.gmra.mxu2 %v7737_v44 }
 0x629   :  { %v3408_v42 = vld [vmem:[#allocation14 + $0x3468] sm:$0xff]  ;;  %6055 = vmatpush.msra.mxu2 %v1985_v27  ;;  %5962 = vmatpush.msrb.mxu1 %v2640_v25  ;;  %v2113_v25 = vld [vmem:[#allocation14 + $0xbf0] sm:$0xff] }
 0x62a   :  { %v2624_v9 = vld [vmem:[#allocation14 + $0x1be8] sm:$0xff]  ;;  %6022 = vmatpush.msra.mxu0 %v3408_v42  ;;  %6079 = vmatpush.msra.mxu3 %v2177_v56  ;;  %v1889_v56 = vld [vmem:[#allocation14 + $0x4f0] sm:$0xff] }
 0x62b   :  { %v3392_v14 = vld [vmem:[#allocation14 + $0x33e8] sm:$0xff]  ;;  %6056 = vmatpush.msra.mxu2 %v1969_v6  ;;  %5963 = vmatpush.msrb.mxu1 %v2624_v9  ;;  %v2097_v9 = vld [vmem:[#allocation14 + $0xb70] sm:$0xff] }
 0x62c   :  { %v2608_v24 = vld [vmem:[#allocation14 + $0x1b68] sm:$0xff]  ;;  %6023 = vmatpush.msra.mxu0 %v3392_v14  ;;  %6080 = vmatpush.msra.mxu3 %v2161_v15  ;;  %v1873_v15 = vld [vmem:[#allocation14 + $0x470] sm:$0xff] }
 0x62d   :  { %v3376_v20 = vld [vmem:[#allocation14 + $0x3368] sm:$0xff]  ;;  %6057 = vmatpush.msra.mxu2 %v1953_v22  ;;  %5964 = vmatpush.msrb.mxu1 %v2608_v24  ;;  %v2081_v24 = vld [vmem:[#allocation14 + $0xaf0] sm:$0xff] }
 0x62e   :  { %v2592_v28 = vld [vmem:[#allocation14 + $0x1ae8] sm:$0xff]  ;;  %6024 = vmatpush.msra.mxu0 %v3376_v20  ;;  %6081 = vmatpush.msra.mxu3 %v2145_v63  ;;  %v1857_v63 = vld [vmem:[#allocation14 + $0x3f0] sm:$0xff] }
 0x62f   :  { %v3360_v29 = vld [vmem:[#allocation14 + $0x32e8] sm:$0xff]  ;;  %6058 = vmatpush.msra.mxu2 %v1937_v18  ;;  %5965 = vmatpush.msrb.mxu1 %v2592_v28  ;;  %v2065_v28 = vld [vmem:[#allocation14 + $0xa70] sm:$0xff] }
 0x630   :  { %v2576_v45 = vld [vmem:[#allocation14 + $0x1a68] sm:$0xff]  ;;  %6025 = vmatpush.msra.mxu0 %v3360_v29  ;;  %6082 = vmatpush.msra.mxu3 %v2129_v12 }
 0x631   :  { %v3344_v27 = vld [vmem:[#allocation14 + $0x3268] sm:$0xff]  ;;  %6059 = vmatpush.msra.mxu2 %v1921_v61  ;;  %5966 = vmatpush.msrb.mxu1 %v2576_v45  ;;  %v1841_v45 = vld [vmem:[#allocation14 + $0x370] sm:$0xff] }
 0x632   :  { %v2560_v42 = vld [vmem:[#allocation14 + $0x19e8] sm:$0xff]  ;;  %6026 = vmatpush.msra.mxu0 %v3344_v27  ;;  %6083 = vmatpush.msra.mxu3 %v2113_v25  ;;  %v2049_v27 = vld [vmem:[#allocation14 + $0x9f0] sm:$0xff] }
 0x633   :  { %v3328_v6 = vld [vmem:[#allocation14 + $0x31e8] sm:$0xff]  ;;  %6060 = vmatpush.msra.mxu2 %v1905_v49  ;;  %5967 = vmatpush.msrb.mxu1 %v2560_v42  ;;  %v2497_v49 = vld [vmem:[#allocation14 + $0x17f0] sm:$0xff] }
 0x634   :  { %v2544_v14 = vld [vmem:[#allocation14 + $0x1968] sm:$0xff]  ;;  %6027 = vmatpush.msra.mxu0 %v3328_v6  ;;  %6084 = vmatpush.msra.mxu3 %v2097_v9  ;;  %v1825_v42 = vld [vmem:[#allocation14 + $0x2f0] sm:$0xff] }
 0x635   :  { %v3312_v22 = vld [vmem:[#allocation14 + $0x3168] sm:$0xff]  ;;  %6061 = vmatpush.msra.mxu2 %v1889_v56  ;;  %5968 = vmatpush.msrb.mxu1 %v2544_v14  ;;  %v2033_v6 = vld [vmem:[#allocation14 + $0x970] sm:$0xff] }
 0x636   :  { %v2528_v20 = vld [vmem:[#allocation14 + $0x18e8] sm:$0xff]  ;;  %6028 = vmatpush.msra.mxu0 %v3312_v22  ;;  %6085 = vmatpush.msra.mxu3 %v2081_v24  ;;  %v2481_v56 = vld [vmem:[#allocation14 + $0x1770] sm:$0xff]  ;;  %v7969_v22 = vpop.f32.mrf.mxu2 }
 0x637   :  { %v3296_v18 = vld [vmem:[#allocation14 + $0x30e8] sm:$0xff]  ;;  %6062 = vmatpush.msra.mxu2 %v1873_v15  ;;  %5969 = vmatpush.msrb.mxu1 %v2528_v20  ;;  %v1809_v14 = vld [vmem:[#allocation14 + $0x270] sm:$0xff] }
 0x638   :  { %v2512_v29 = vld [vmem:[#allocation14 + $0x1868] sm:$0xff]  ;;  %6029 = vmatpush.msra.mxu0 %v3296_v18  ;;  %6086 = vmatpush.msra.mxu3 %v2065_v28  ;;  %v2017_v15 = vld [vmem:[#allocation14 + $0x8f0] sm:$0xff] }
 0x639   :  { %v3280_v61 = vld [vmem:[#allocation14 + $0x3068] sm:$0xff]  ;;  %6063 = vmatpush.msra.mxu2 %v1857_v63  ;;  %5970 = vmatpush.msrb.mxu1 %v2512_v29  ;;  %v2465_v24 = vld [vmem:[#allocation14 + $0x16f0] sm:$0xff] }
 0x63a   :  { %v3776_v12 = vld [vmem:[#allocation14 + $0x3fe8] sm:$0xff]  ;;  %6030 = vmatpush.msra.mxu0 %v3280_v61  ;;  %5971 = vmatmul.f32.vlgmr.msrb.gmra.mxu1 %v7728_v40  ;;  %v1793_v18 = vld [vmem:[#allocation14 + $0x1f0] sm:$0xff] }
 0x63b   :  { %6031 = vmatmul.f32.vlgmr.msra.gmra.mxu0 %v7746_v21  ;;  %v3760_v25 = vld [vmem:[#allocation14 + $0x3f68] sm:$0xff]  ;;  %6035 = vmatpush.msra.mxu1 %v3776_v12  ;;  %v2001_v63 = vld [vmem:[#allocation14 + $0x870] sm:$0xff] }
 0x63c   :  { %6064 = vmatpush.msra.mxu2 %v1841_v45  ;;  %6087 = vmatpush.msra.mxu3 %v2049_v27  ;;  %v3744_v9 = vld [vmem:[#allocation14 + $0x3ee8] sm:$0xff]  ;;  %v2449_v28 = vld [vmem:[#allocation14 + $0x1670] sm:$0xff] }
 0x63d   :  { %6095 = vmatpush.msrb.mxu0 %v2497_v49  ;;  %6036 = vmatpush.msra.mxu1 %v3760_v25  ;;  %v3728_v20 = vld [vmem:[#allocation14 + $0x3e68] sm:$0xff]  ;;  %v3265_v61 = vld [vmem:[#allocation14 + $0x2ff0] sm:$0xff]  ;;  %v7971_v49 = vpop.f32.mrf.mxu3  ;;  %v7973_v25 = vpop.f32.mrf.mxu0 }
 0x63e   :  { %6065 = vmatpush.msra.mxu2 %v1825_v42  ;;  %6088 = vmatpush.msra.mxu3 %v2033_v6  ;;  %v3712_v29 = vld [vmem:[#allocation14 + $0x3de8] sm:$0xff]  ;;  %v1777_v12 = vld [vmem:[#allocation14 + $0x170] sm:$0xff] }
 0x63f   :  { %6096 = vmatpush.msrb.mxu0 %v2481_v56  ;;  %6037 = vmatpush.msra.mxu1 %v3744_v9  ;;  %v2433_v45 = vld [vmem:[#allocation14 + $0x15f0] sm:$0xff]  ;;  %v3696_v27 = vld [vmem:[#allocation14 + $0x3d68] sm:$0xff] }
 0x640   :  { %6066 = vmatpush.msra.mxu2 %v1809_v14  ;;  %6089 = vmatpush.msra.mxu3 %v2017_v15  ;;  %v3249_v42 = vld [vmem:[#allocation14 + $0x2f70] sm:$0xff]  ;;  %v3680_v9 = vld [vmem:[#allocation14 + $0x3ce8] sm:$0xff]  ;;  %v7976_v14 = vpop.f32.mrf.mxu2  ;;  %v7978_v15 = vpop.f32.mrf.mxu1 }
 0x641   :  { %6097 = vmatpush.msrb.mxu0 %v2465_v24  ;;  %6038 = vmatpush.msra.mxu1 %v3728_v20  ;;  %v1761_v6 = vld [vmem:[#allocation14 + $0xf0] sm:$0xff] }
 0x642   :  { %6067 = vmatpush.msra.mxu2 %v1793_v18  ;;  %6090 = vmatpush.msra.mxu3 %v2001_v63  ;;  %v2417_v56 = vld [vmem:[#allocation14 + $0x1570] sm:$0xff] }
 0x643   :  { %6098 = vmatpush.msrb.mxu0 %v2449_v28  ;;  %6091 = vmatmul.f32.vlgmr.msra.gmra.mxu3 %v7718_v13  ;;  %v3233_v24 = vld [vmem:[#allocation14 + $0x2ef0] sm:$0xff] }
 0x644   :  { %6039 = vmatpush.msra.mxu1 %v3712_v29  ;;  %6155 = vmatpush.msrb.mxu3 %v3265_v61  ;;  %v1745_v20 = vld [vmem:[#allocation14 + $0x70] sm:$0xff]  ;;  %v3664_v29 = vld [vmem:[#allocation14 + $0x3c68] sm:$0xff] }
 0x645   :  { %6068 = vmatpush.msra.mxu2 %v1777_v12  ;;  %6099 = vmatpush.msrb.mxu0 %v2433_v45  ;;  %v2401_v18 = vld [vmem:[#allocation14 + $0x14f0] sm:$0xff]  ;;  %v3648_v45 = vld [vmem:[#allocation14 + $0x3be8] sm:$0xff] }
 0x646   :  { %6040 = vmatpush.msra.mxu1 %v3696_v27  ;;  %6156 = vmatpush.msrb.mxu3 %v3249_v42  ;;  %v3009_v63 = vld [vmem:[#allocation14 + $0x27f0] sm:$0xff]  ;;  %v7981_v42 = vpop.f32.mrf.mxu3 }
 0x647   :  { %6069 = vmatpush.msra.mxu2 %v1761_v6  ;;  %6100 = vmatpush.msrb.mxu0 %v2417_v56  ;;  %v3217_v28 = vld [vmem:[#allocation14 + $0x2e70] sm:$0xff]  ;;  %8328 = vst [vmem:[#allocation52_spill] sm:$0xff] %v7981_v42  ;;  %v7983_v6 = vpop.f32.mrf.mxu0  ;;  %v3552_v42 = vld [vmem:[#allocation14 + $0x38e8] sm:$0xff] }
 0x648   :  { %6041 = vmatpush.msra.mxu1 %v3680_v9  ;;  %6157 = vmatpush.msrb.mxu3 %v3233_v24  ;;  %v2385_v61 = vld [vmem:[#allocation14 + $0x1470] sm:$0xff]  ;;  %8329 = vst [vmem:[#allocation53_spill] sm:$0xff] %v7983_v6  ;;  %v3632_v24 = vld [vmem:[#allocation14 + $0x3b68] sm:$0xff]  ;;  %v7987_v17 = vpop.f32.mrf.mxu1 }
 0x649   :  { %6070 = vmatpush.msra.mxu2 %v1745_v20  ;;  %6101 = vmatpush.msrb.mxu0 %v2401_v18  ;;  %v2993_v12 = vld [vmem:[#allocation14 + $0x2770] sm:$0xff]  ;;  %v7985_v18 = vpop.f32.mrf.mxu2  ;;  %8330 = vst [vmem:[#allocation54_spill] sm:$0xff] %v7987_v17 }
 0x64a   :  { %6071 = vmatmul.f32.vlgmr.msra.gmra.mxu2 %v7724_v11  ;;  %6158 = vmatpush.msrb.mxu3 %v3217_v28  ;;  %v2369_v27 = vld [vmem:[#allocation14 + $0x13f0] sm:$0xff]  ;;  %v3616_v11 = vld [vmem:[#allocation14 + $0x3ae8] sm:$0xff] }
 0x64b   :  { %6135 = vmatpush.msrb.mxu2 %v3009_v63  ;;  %6042 = vmatpush.msra.mxu1 %v3664_v29  ;;  %v2977_v56 = vld [vmem:[#allocation14 + $0x26f0] sm:$0xff] }
 0x64c   :  { %6102 = vmatpush.msrb.mxu0 %v2385_v61  ;;  %v3185_v9 = vld [vmem:[#allocation14 + $0x2d70] sm:$0xff]  ;;  %6159 = vmatpush.msrb.mxu3 %v3201_v26  ;;  %v3600_v26 = vld [vmem:[#allocation14 + $0x3a68] sm:$0xff] }
 0x64d   :  { %6136 = vmatpush.msrb.mxu2 %v2993_v12  ;;  %v2353_v20 = vld [vmem:[#allocation14 + $0x1370] sm:$0xff]  ;;  %6043 = vmatpush.msra.mxu1 %v3648_v45  ;;  %v3584_v45 = vld [vmem:[#allocation14 + $0x39e8] sm:$0xff] }
 0x64e   :  { %6103 = vmatpush.msrb.mxu0 %v2369_v27  ;;  %v2961_v63 = vld [vmem:[#allocation14 + $0x2670] sm:$0xff]  ;;  %6160 = vmatpush.msrb.mxu3 %v3185_v9 }
 0x64f   :  { %v3169_v28 = vld [vmem:[#allocation14 + $0x2cf0] sm:$0xff]  ;;  %6137 = vmatpush.msrb.mxu2 %v2977_v56  ;;  %6044 = vmatpush.msra.mxu1 %v3632_v24  ;;  %v7989_v56 = vpop.f32.mrf.mxu3  ;;  %v7991_v9 = vpop.f32.mrf.mxu0 }
 0x650   :  { %v2337_v6 = vld [vmem:[#allocation14 + $0x12f0] sm:$0xff]  ;;  %6104 = vmatpush.msrb.mxu0 %v2353_v20  ;;  %6161 = vmatpush.msrb.mxu3 %v3169_v28 }
 0x651   :  { %v2945_v29 = vld [vmem:[#allocation14 + $0x25f0] sm:$0xff]  ;;  %6138 = vmatpush.msrb.mxu2 %v2961_v63  ;;  %6045 = vmatpush.msra.mxu1 %v3616_v11  ;;  %v3568_v63 = vld [vmem:[#allocation14 + $0x3968] sm:$0xff]  ;;  %v7993_v11 = vpop.f32.mrf.mxu2 }
 0x652   :  { %v3153_v61 = vld [vmem:[#allocation14 + $0x2c70] sm:$0xff]  ;;  %6105 = vmatpush.msrb.mxu0 %v2337_v6  ;;  %v7995_v6 = vpop.f32.mrf.mxu1 }
 0x653   :  { %v2321_v12 = vld [vmem:[#allocation14 + $0x1270] sm:$0xff]  ;;  %6139 = vmatpush.msrb.mxu2 %v2945_v29  ;;  %6162 = vmatpush.msrb.mxu3 %v3153_v61 }
 0x654   :  { %v3137_v17 = vld [vmem:[#allocation14 + $0x2bf0] sm:$0xff]  ;;  %6046 = vmatpush.msra.mxu1 %v3600_v26  ;;  %6106 = vmatpush.msrb.mxu0 %v2321_v12 }
 0x655   :  { %v2305_v27 = vld [vmem:[#allocation14 + $0x11f0] sm:$0xff]  ;;  %6140 = vmatpush.msrb.mxu2 %v2929_v38  ;;  %6163 = vmatpush.msrb.mxu3 %v3137_v17  ;;  %v3536_v38 = vld [vmem:[#allocation14 + $0x3868] sm:$0xff] }
 0x656   :  { %v2913_v24 = vld [vmem:[#allocation14 + $0x24f0] sm:$0xff]  ;;  %6047 = vmatpush.msra.mxu1 %v3584_v45  ;;  %6107 = vmatpush.msrb.mxu0 %v2305_v27 }
 0x657   :  { %v3121_v20 = vld [vmem:[#allocation14 + $0x2b70] sm:$0xff]  ;;  %6141 = vmatpush.msrb.mxu2 %v2913_v24  ;;  %v7997_v0 = vpop.f32.mrf.mxu3  ;;  %v7999_v24 = vpop.f32.mrf.mxu0 }
 0x658   :  { %v2289_v28 = vld [vmem:[#allocation14 + $0x1170] sm:$0xff]  ;;  %6164 = vmatpush.msrb.mxu3 %v3121_v20  ;;  %6048 = vmatpush.msra.mxu1 %v3568_v63  ;;  %8331 = vst [vmem:[#allocation55_spill] sm:$0xff] %v7999_v24 }
 0x659   :  { %v2897_v29 = vld [vmem:[#allocation14 + $0x2470] sm:$0xff]  ;;  %6108 = vmatpush.msrb.mxu0 %v2289_v28 }
 0x65a   :  { %v3105_v61 = vld [vmem:[#allocation14 + $0x2af0] sm:$0xff]  ;;  %6142 = vmatpush.msrb.mxu2 %v2897_v29  ;;  %6049 = vmatpush.msra.mxu1 %v3552_v42  ;;  %v8003_v42 = vpop.f32.mrf.mxu2 }
 0x65b   :  { %v2881_v26 = vld [vmem:[#allocation14 + $0x23f0] sm:$0xff]  ;;  %6165 = vmatpush.msrb.mxu3 %v3105_v61  ;;  %6109 = vmatpush.msrb.mxu0 %v2273_v4  ;;  %8332 = vst [vmem:[#allocation56_spill] sm:$0xff] %v8003_v42  ;;  %v8005_v4 = vpop.f32.mrf.mxu1 }
 0x65c   :  { %v3089_v12 = vld [vmem:[#allocation14 + $0x2a70] sm:$0xff]  ;;  %6143 = vmatpush.msrb.mxu2 %v2881_v26  ;;  %6050 = vmatpush.msra.mxu1 %v3536_v38  ;;  %8333 = vst [vmem:[#allocation57_spill] sm:$0xff] %v8005_v4 }
 0x65d   :  { %v2257_v17 = vld [vmem:[#allocation14 + $0x1070] sm:$0xff]  ;;  %6166 = vmatpush.msrb.mxu3 %v3089_v12  ;;  %6051 = vmatmul.f32.vlgmr.msra.gmra.mxu1 %v7752_v50 }
 0x65e   :  { %v2753_v45 = vld [vmem:[#allocation14 + $0x1ff0] sm:$0xff]  ;;  %6110 = vmatpush.msrb.mxu0 %v2257_v17 }
 0x65f   :  { %v2865_v27 = vld [vmem:[#allocation14 + $0x2370] sm:$0xff]  ;;  %6111 = vmatmul.f32.vlgmr.msrb.gmra.mxu0 %v7732_v53  ;;  %6115 = vmatpush.msrb.mxu1 %v2753_v45 }
 0x660   :  { %v3073_v20 = vld [vmem:[#allocation14 + $0x29f0] sm:$0xff]  ;;  %6144 = vmatpush.msrb.mxu2 %v2865_v27  ;;  %v8007_v27 = vpop.f32.mrf.mxu3 }
 0x661   :  { %v3521_v63 = vld [vmem:[#allocation14 + $0x37f0] sm:$0xff]  ;;  %6167 = vmatpush.msrb.mxu3 %v3073_v20  ;;  %8334 = vst [vmem:[#allocation58_spill] sm:$0xff] %v8007_v27  ;;  %v8009_v20 = vpop.f32.mrf.mxu0 }
 0x662   :  { %v2737_v28 = vld [vmem:[#allocation14 + $0x1f70] sm:$0xff]  ;;  %6175 = vmatpush.msra.mxu0 %v3521_v63  ;;  %8335 = vst [vmem:[#allocation59_spill] sm:$0xff] %v8009_v20  ;;  %v2242_v63 = vld [vmem:[#allocation14 + $0xff8] sm:$0xff] }
 0x663   :  { %v2849_v29 = vld [vmem:[#allocation14 + $0x22f0] sm:$0xff]  ;;  %6116 = vmatpush.msrb.mxu1 %v2737_v28 }
 0x664   :  { %v3057_v61 = vld [vmem:[#allocation14 + $0x2970] sm:$0xff]  ;;  %6145 = vmatpush.msrb.mxu2 %v2849_v29 }
 0x665   :  { %v3505_v26 = vld [vmem:[#allocation14 + $0x3770] sm:$0xff]  ;;  %6168 = vmatpush.msrb.mxu3 %v3057_v61 }
 0x666   :  { %v2721_v12 = vld [vmem:[#allocation14 + $0x1ef0] sm:$0xff]  ;;  %6176 = vmatpush.msra.mxu0 %v3505_v26  ;;  %v8011_v26 = vld [vmem:[#allocation15] sm:$0xff] }
 0x667   :  { %v2833_v38 = vld [vmem:[#allocation14 + $0x2270] sm:$0xff]  ;;  %6117 = vmatpush.msrb.mxu1 %v2721_v12  ;;  %v3784_v12 = vperm.slane %v8011_v26, 1  ;;  %v3788_v27 = vperm.slane %v8011_v26, 5 }
 0x668   :  { %v3041_v17 = vld [vmem:[#allocation14 + $0x28f0] sm:$0xff]  ;;  %6146 = vmatpush.msrb.mxu2 %v2833_v38  ;;  %v8014_v38 = vpop.f32.mrf.mxu2  ;;  %v8021_v1 = vpop.f32.mrf.mxu3 }
 0x669   :  { %v3489_v50 = vld [vmem:[#allocation14 + $0x36f0] sm:$0xff]  ;;  %6169 = vmatpush.msrb.mxu3 %v3041_v17  ;;  %8336 = vst [vmem:[#allocation60_spill] sm:$0xff] %v8014_v38  ;;  %v2226_v17 = vld [vmem:[#allocation14 + $0xf78] sm:$0xff] }
 0x66a   :  { %v2705_v53 = vld [vmem:[#allocation14 + $0x1e70] sm:$0xff]  ;;  %6177 = vmatpush.msra.mxu0 %v3489_v50  ;;  %v8016_v50 = vpop.f32.mrf.mxu1 }
 0x66b   :  { %v2817_v24 = vld [vmem:[#allocation14 + $0x21f0] sm:$0xff]  ;;  %6118 = vmatpush.msrb.mxu1 %v2705_v53  ;;  %8337 = vst [vmem:[#allocation61_spill] sm:$0xff] %v8016_v50  ;;  %v3993_v50 = vadd.f32 %v7805_v31, %v3784_v12 }
 0x66c   :  { %v3025_v42 = vld [vmem:[#allocation14 + $0x2870] sm:$0xff]  ;;  %6147 = vmatpush.msrb.mxu2 %v2817_v24 }
 0x66d   :  { %v3473_v4 = vld [vmem:[#allocation14 + $0x3670] sm:$0xff]  ;;  %6170 = vmatpush.msrb.mxu3 %v3025_v42 }
 0x66e   :  { %v2689_v45 = vld [vmem:[#allocation14 + $0x1df0] sm:$0xff]  ;;  %6178 = vmatpush.msra.mxu0 %v3473_v4  ;;  %6171 = vmatmul.f32.vlgmr.msrb.gmra.mxu3 %v7740_v7  ;;  %v2210_v4 = vld [vmem:[#allocation14 + $0xef8] sm:$0xff] }
 0x66f   :  { %v2801_v28 = vld [vmem:[#allocation14 + $0x2170] sm:$0xff]  ;;  %6119 = vmatpush.msrb.mxu1 %v2689_v45  ;;  %6235 = vmatpush.msra.mxu3 %v2242_v63  ;;  %v1986_v45 = vld [vmem:[#allocation14 + $0x7f8] sm:$0xff] }
 0x670   :  { %v3457_v29 = vld [vmem:[#allocation14 + $0x35f0] sm:$0xff]  ;;  %6148 = vmatpush.msrb.mxu2 %v2801_v28  ;;  %v2194_v7 = vld [vmem:[#allocation14 + $0xe78] sm:$0xff] }
 0x671   :  { %v2673_v61 = vld [vmem:[#allocation14 + $0x1d70] sm:$0xff]  ;;  %6179 = vmatpush.msra.mxu0 %v3457_v29  ;;  %6236 = vmatpush.msra.mxu3 %v2226_v17  ;;  %v8023_v29 = vpop.f32.mrf.mxu0  ;;  %v2178_v17 = vld [vmem:[#allocation14 + $0xdf8] sm:$0xff] }
 0x672   :  { %v2785_v53 = vld [vmem:[#allocation14 + $0x20f0] sm:$0xff]  ;;  %6120 = vmatpush.msrb.mxu1 %v2673_v61  ;;  %8338 = vst [vmem:[#allocation62_spill] sm:$0xff] %v8023_v29  ;;  %v1970_v61 = vld [vmem:[#allocation14 + $0x778] sm:$0xff] }
 0x673   :  { %v3441_v24 = vld [vmem:[#allocation14 + $0x3570] sm:$0xff]  ;;  %6149 = vmatpush.msrb.mxu2 %v2785_v53  ;;  %6237 = vmatpush.msra.mxu3 %v2210_v4  ;;  %v4633_v53 = vadd.f32 %v7871_v8, %v3788_v27  ;;  %v1954_v4 = vld [vmem:[#allocation14 + $0x6f8] sm:$0xff]  ;;  %v3783_v8 = vperm.slane %v8011_v26, 0  ;;  %v3787_v27 = vperm.slane %v8011_v26, 4 }
 0x674   :  { %v2657_v42 = vld [vmem:[#allocation14 + $0x1cf0] sm:$0xff]  ;;  %6180 = vmatpush.msra.mxu0 %v3441_v24  ;;  %v4013_v24 = vadd.f32 %v7807_v37, %v3993_v50  ;;  %v1938_v37 = vld [vmem:[#allocation14 + $0x678] sm:$0xff] }
 0x675   :  { %v2769_v20 = vld [vmem:[#allocation14 + $0x2070] sm:$0xff]  ;;  %6121 = vmatpush.msrb.mxu1 %v2657_v42  ;;  %6238 = vmatpush.msra.mxu3 %v2194_v7  ;;  %v8030_v42 = vpop.f32.mrf.mxu1  ;;  %v2146_v50 = vld [vmem:[#allocation14 + $0xcf8] sm:$0xff] }
 0x676   :  { %v3425_v38 = vld [vmem:[#allocation14 + $0x34f0] sm:$0xff]  ;;  %6150 = vmatpush.msrb.mxu2 %v2769_v20  ;;  %v8028_v20 = vpop.f32.mrf.mxu2  ;;  %8340 = vst [vmem:[#allocation64_spill] sm:$0xff] %v8030_v42  ;;  %v4033_v7 = vadd.f32 %v7818_v51, %v4013_v24  ;;  %v1922_v51 = vld [vmem:[#allocation14 + $0x5f8] sm:$0xff] }
 0x677   :  { %v2641_v63 = vld [vmem:[#allocation14 + $0x1c70] sm:$0xff]  ;;  %6181 = vmatpush.msra.mxu0 %v3425_v38  ;;  %6151 = vmatmul.f32.vlgmr.msrb.gmra.mxu2 %v7737_v44  ;;  %8339 = vst [vmem:[#allocation63_spill] sm:$0xff] %v8028_v20  ;;  %v2162_v38 = vld [vmem:[#allocation14 + $0xd78] sm:$0xff] }
 0x678   :  { %v3409_v28 = vld [vmem:[#allocation14 + $0x3470] sm:$0xff]  ;;  %6215 = vmatpush.msra.mxu2 %v1986_v45  ;;  %6122 = vmatpush.msrb.mxu1 %v2641_v63  ;;  %v4653_v45 = vadd.f32 %v7873_v19, %v4633_v53  ;;  %v8036_v63 = vld [vmem:[#allocation15 + $0x8] sm:$0xff]  ;;  %v2130_v24 = vld [vmem:[#allocation14 + $0xc78] sm:$0xff]  ;;  %v3833_v53 = vadd.f32 %v7797_v36, %v3783_v8 }
 0x679   :  { %v2625_v31 = vld [vmem:[#allocation14 + $0x1bf0] sm:$0xff]  ;;  %6182 = vmatpush.msra.mxu0 %v3409_v28  ;;  %6239 = vmatpush.msra.mxu3 %v2178_v17  ;;  %v4053_v17 = vadd.f32 %v7852_v43, %v4033_v7  ;;  %v3792_v20 = vperm.slane %v8036_v63, 1  ;;  %v8045_v42 = vpop.f32.mrf.mxu0  ;;  %v2114_v43 = vld [vmem:[#allocation14 + $0xbf8] sm:$0xff] }
 0x67a   :  { %v3393_v12 = vld [vmem:[#allocation14 + $0x33f0] sm:$0xff]  ;;  %6216 = vmatpush.msra.mxu2 %v1970_v61  ;;  %6123 = vmatpush.msrb.mxu1 %v2625_v31  ;;  %v4673_v31 = vadd.f32 %v7887_v39, %v4653_v45  ;;  %v3791_v45 = vperm.slane %v8036_v63, 0 }
 0x67b   :  { %v2609_v44 = vld [vmem:[#allocation14 + $0x1b70] sm:$0xff]  ;;  %6183 = vmatpush.msra.mxu0 %v3393_v12  ;;  %6240 = vmatpush.msra.mxu3 %v2162_v38  ;;  %v8043_v38 = vpop.f32.mrf.mxu3  ;;  %v5273_v36 = vadd.f32 %v7985_v18, %v3792_v20  ;;  %v1874_v18 = vld [vmem:[#allocation14 + $0x478] sm:$0xff] }
 0x67c   :  { %v3377_v29 = vld [vmem:[#allocation14 + $0x3370] sm:$0xff]  ;;  %6217 = vmatpush.msra.mxu2 %v1954_v4  ;;  %6124 = vmatpush.msrb.mxu1 %v2609_v44  ;;  %v4473_v4 = vadd.f32 %v7854_v48, %v3787_v27  ;;  %v1906_v44 = vld [vmem:[#allocation14 + $0x578] sm:$0xff] }
 0x67d   :  { %v2593_v28 = vld [vmem:[#allocation14 + $0x1af0] sm:$0xff]  ;;  %6184 = vmatpush.msra.mxu0 %v3377_v29  ;;  %6241 = vmatpush.msra.mxu3 %v2146_v50  ;;  %v4693_v29 = vadd.f32 %v7906_v47, %v4673_v31  ;;  %v8052_v48 = vpop.f32.mrf.mxu1  ;;  %v1890_v27 = vld [vmem:[#allocation14 + $0x4f8] sm:$0xff] }
 0x67e   :  { %v3361_v61 = vld [vmem:[#allocation14 + $0x32f0] sm:$0xff]  ;;  %6218 = vmatpush.msra.mxu2 %v1938_v37  ;;  %6125 = vmatpush.msrb.mxu1 %v2593_v28  ;;  %v4073_v37 = vadd.f32 %v7813_v33, %v4053_v17  ;;  %v8050_v8 = vpop.f32.mrf.mxu2  ;;  %v2098_v50 = vld [vmem:[#allocation14 + $0xb78] sm:$0xff]  ;;  %v4493_v33 = vadd.f32 %v7856_v57, %v4473_v4 }
 0x67f   :  { %v2577_v12 = vld [vmem:[#allocation14 + $0x1a70] sm:$0xff]  ;;  %6185 = vmatpush.msra.mxu0 %v3361_v61  ;;  %6242 = vmatpush.msra.mxu3 %v2130_v24  ;;  %v3853_v61 = vadd.f32 %v7795_v35, %v3833_v53  ;;  %v2082_v20 = vld [vmem:[#allocation14 + $0xaf8] sm:$0xff]  ;;  %v4713_v17 = vadd.f32 %v7881_v62, %v4693_v29  ;;  %v5113_v53 = vadd.f32 %v7969_v22, %v3791_v45  ;;  %v3795_v22 = vperm.slane %v8036_v63, 4 }
 0x680   :  { %v3345_v19 = vld [vmem:[#allocation14 + $0x3270] sm:$0xff]  ;;  %6219 = vmatpush.msra.mxu2 %v1922_v51  ;;  %6126 = vmatpush.msrb.mxu1 %v2577_v12  ;;  %v4093_v31 = vadd.f32 %v7815_v41, %v4073_v37  ;;  %v4513_v12 = vadd.f32 %v7867_v54, %v4493_v33  ;;  %v1858_v35 = vld [vmem:[#allocation14 + $0x3f8] sm:$0xff] }
 0x681   :  { %v2561_v39 = vld [vmem:[#allocation14 + $0x19f0] sm:$0xff]  ;;  %6186 = vmatpush.msra.mxu0 %v3345_v19  ;;  %6243 = vmatpush.msra.mxu3 %v2114_v43  ;;  %v5293_v19 = vadd.f32 %v7989_v56, %v5273_v36  ;;  %v2066_v57 = vld [vmem:[#allocation14 + $0xa78] sm:$0xff]  ;;  %v8067_v54 = vpop.f32.mrf.mxu0  ;;  %v4733_v56 = vadd.f32 %v7883_v10, %v4713_v17 }
 0x682   :  { %v3329_v7 = vld [vmem:[#allocation14 + $0x31f0] sm:$0xff]  ;;  %6220 = vmatpush.msra.mxu2 %v1906_v44  ;;  %6127 = vmatpush.msrb.mxu1 %v2561_v39  ;;  %v3873_v44 = vadd.f32 %v7803_v3, %v3853_v61  ;;  %v4533_v43 = vadd.f32 %v7900_v5, %v4513_v12  ;;  %v4113_v3 = vadd.f32 %v7825_v59, %v4093_v31  ;;  %v2050_v36 = vld [vmem:[#allocation14 + $0x9f8] sm:$0xff] }
 0x683   :  { %v2545_v47 = vld [vmem:[#allocation14 + $0x1970] sm:$0xff]  ;;  %6187 = vmatpush.msra.mxu0 %v3329_v7  ;;  %6244 = vmatpush.msra.mxu3 %v2098_v50  ;;  %v5313_v41 = vadd.f32 %v7991_v9, %v5293_v19  ;;  %v8065_v29 = vpop.f32.mrf.mxu3  ;;  %v1842_v7 = vld [vmem:[#allocation14 + $0x378] sm:$0xff]  ;;  %v5133_v50 = vadd.f32 %v7971_v49, %v5113_v53  ;;  %v4753_v33 = vadd.f32 %v7893_v55, %v4733_v56 }
 0x684   :  { %v3313_v28 = vld [vmem:[#allocation14 + $0x3170] sm:$0xff]  ;;  %6221 = vmatpush.msra.mxu2 %v1890_v27  ;;  %6128 = vmatpush.msrb.mxu1 %v2545_v47  ;;  %v2498_v27 = vld [vmem:[#allocation14 + $0x17f8] sm:$0xff]  ;;  %v3893_v47 = vadd.f32 %v7831_v34, %v3873_v44  ;;  %v4133_v59 = vadd.f32 %v7861_v16, %v4113_v3 }
 0x685   :  { %v2529_v51 = vld [vmem:[#allocation14 + $0x18f0] sm:$0xff]  ;;  %6188 = vmatpush.msra.mxu0 %v3313_v28  ;;  %6245 = vmatpush.msra.mxu3 %v2082_v20  ;;  %v5333_v5 = vadd.f32 %v7995_v6, %v5313_v41  ;;  %v8073_v9 = vpop.f32.mrf.mxu1  ;;  %v1826_v45 = vld [vmem:[#allocation14 + $0x2f8] sm:$0xff]  ;;  %v4553_v6 = vadd.f32 %v7863_v23, %v4533_v43  ;;  %v5153_v49 = vadd.f32 %v7973_v25, %v5133_v50 }
 0x686   :  { %v3297_v24 = vld [vmem:[#allocation14 + $0x30f0] sm:$0xff]  ;;  %6222 = vmatpush.msra.mxu2 %v1874_v18  ;;  %6129 = vmatpush.msrb.mxu1 %v2529_v51  ;;  %v5752_v37 = vpop.f32.mrf.mxu2  ;;  %v2034_v28 = vld [vmem:[#allocation14 + $0x978] sm:$0xff]  ;;  %v3785_v51 = vperm.slane %v8011_v26, 2  ;;  %v4773_v31 = vadd.f32 %v7909_v52, %v4753_v33 }
 0x687   :  { %v2513_v4 = vld [vmem:[#allocation14 + $0x1870] sm:$0xff]  ;;  %6189 = vmatpush.msra.mxu0 %v3297_v24  ;;  %6246 = vmatpush.msra.mxu3 %v2066_v57  ;;  %v2482_v61 = vld [vmem:[#allocation14 + $0x1778] sm:$0xff]  ;;  %v5753_v18 = vadd.f32 %v5752_v37, %v3795_v22  ;;  %v5353_v34 = vadd.f32 %v7993_v11, %v5333_v5  ;;  %v3913_v24 = vadd.f32 %v7799_v46, %v3893_v47  ;;  %v8341_v37 = vld [vmem:[#allocation39_spill] sm:$0xff] }
 0x688   :  { %v3281_v62 = vld [vmem:[#allocation14 + $0x3070] sm:$0xff]  ;;  %6223 = vmatpush.msra.mxu2 %v1858_v35  ;;  %6130 = vmatpush.msrb.mxu1 %v2513_v4  ;;  %v1810_v17 = vld [vmem:[#allocation14 + $0x278] sm:$0xff]  ;;  %v5173_v55 = vadd.f32 %v7978_v15, %v5153_v49  ;;  %v4573_v19 = vadd.f32 %v7865_v30, %v4553_v6  ;;  %v4153_v15 = vadd.f32 %v7820_v58, %v3785_v51  ;;  %v6380_v22 = vmax.f32 %v4773_v31, 0.0  ;;  %v8344_v6 = vld [vmem:[#allocation55_spill] sm:$0xff] }
 0x689   :  { %v3777_v39 = vld [vmem:[#allocation14 + $0x3ff0] sm:$0xff]  ;;  %6190 = vmatpush.msra.mxu0 %v3281_v62  ;;  %6131 = vmatmul.f32.vlgmr.msrb.gmra.mxu1 %v7728_v40  ;;  %v2018_v16 = vld [vmem:[#allocation14 + $0x8f8] sm:$0xff]  ;;  %v5792_v57 = vpop.f32.mrf.mxu0  ;;  %v3933_v4 = vadd.f32 %v7801_v60, %v3913_v24  ;;  %v6376_v62 = vmax.f32 %v4133_v59, 0.0  ;;  %v5373_v44 = vadd.f32 %v7997_v0, %v5353_v34 }
 0x68a   :  { %6191 = vmatmul.f32.vlgmr.msra.gmra.mxu0 %v7746_v21  ;;  %v3761_v10 = vld [vmem:[#allocation14 + $0x3f70] sm:$0xff]  ;;  %6195 = vmatpush.msra.mxu1 %v3777_v39  ;;  %v2466_v23 = vld [vmem:[#allocation14 + $0x16f8] sm:$0xff]  ;;  %v5193_v39 = vadd.f32 %v7976_v14, %v5173_v55  ;;  %v4593_v5 = vadd.f32 %v7875_v32, %v4573_v19  ;;  %v3793_v32 = vperm.slane %v8036_v63, 2  ;;  %v6397_v33 = vmax.f32 %v6380_v22, 1e-06 }
 0x68b   :  { %6224 = vmatpush.msra.mxu2 %v1842_v7  ;;  %6247 = vmatpush.msra.mxu3 %v2050_v36  ;;  %v3745_v20 = vld [vmem:[#allocation14 + $0x3ef0] sm:$0xff]  ;;  %v1794_v12 = vld [vmem:[#allocation14 + $0x1f8] sm:$0xff]  ;;  %v5772_v35 = vpop.f32.mrf.mxu3  ;;  %v3953_v56 = vadd.f32 %v7811_v2, %v3933_v4 }
 0x68c   :  { %6255 = vmatpush.msrb.mxu0 %v2498_v27  ;;  %6196 = vmatpush.msra.mxu1 %v3761_v10  ;;  %v3729_v25 = vld [vmem:[#allocation14 + $0x3e70] sm:$0xff]  ;;  %v2002_v11 = vld [vmem:[#allocation14 + $0x878] sm:$0xff]  ;;  %v5773_v46 = vadd.f32 %v5772_v35, %v5753_v18  ;;  %v6393_v27 = vmax.f32 %v6376_v62, 1e-06 }
 0x68d   :  { %6225 = vmatpush.msra.mxu2 %v1826_v45  ;;  %6248 = vmatpush.msra.mxu3 %v2034_v28  ;;  %v2450_v53 = vld [vmem:[#allocation14 + $0x1678] sm:$0xff]  ;;  %v3713_v52 = vld [vmem:[#allocation14 + $0x3df0] sm:$0xff]  ;;  %v5812_v43 = vpop.f32.mrf.mxu1  ;;  %v3973_v36 = vadd.f32 %v8341_v37, %v3953_v56  ;;  %v5393_v28 = vadd.f32 %v8344_v6, %v5373_v44  ;;  %v8353_v37 = vld [vmem:[#allocation34_spill] sm:$0xff] }
 0x68e   :  { %6256 = vmatpush.msrb.mxu0 %v2482_v61  ;;  %6197 = vmatpush.msra.mxu1 %v3745_v20  ;;  %v3266_v30 = vld [vmem:[#allocation14 + $0x2ff8] sm:$0xff]  ;;  %v5793_v60 = vadd.f32 %v5792_v57, %v5773_v46  ;;  %v3697_v3 = vld [vmem:[#allocation14 + $0x3d70] sm:$0xff]  ;;  %7122 = vlog2.f32 %v6393_v27 }
 0x68f   :  { %6226 = vmatpush.msra.mxu2 %v1810_v17  ;;  %6249 = vmatpush.msra.mxu3 %v2018_v16  ;;  %v1778_v41 = vld [vmem:[#allocation14 + $0x178] sm:$0xff]  ;;  %v3681_v14 = vld [vmem:[#allocation14 + $0x3cf0] sm:$0xff]  ;;  %v6375_v55 = vmax.f32 %v3973_v36, 0.0  ;;  %7124 = vlog2.f32 %v6397_v33 }
 0x690   :  { %6257 = vmatpush.msrb.mxu0 %v2466_v23  ;;  %6198 = vmatpush.msra.mxu1 %v3729_v25  ;;  %v2434_v7 = vld [vmem:[#allocation14 + $0x15f8] sm:$0xff]  ;;  %v5813_v50 = vadd.f32 %v5812_v43, %v5793_v60  ;;  %v8345_v49 = vld [vmem:[#allocation52_spill] sm:$0xff]  ;;  %v5832_v23 = vpop.f32.mrf.mxu2 }
 0x691   :  { %6227 = vmatpush.msra.mxu2 %v1794_v12  ;;  %6250 = vmatpush.msra.mxu3 %v2002_v11  ;;  %v3250_v58 = vld [vmem:[#allocation14 + $0x2f78] sm:$0xff]  ;;  %v5213_v18 = vadd.f32 %v8345_v49, %v5193_v39  ;;  %v8346_v17 = vld [vmem:[#allocation36_spill] sm:$0xff]  ;;  %v6392_v60 = vmax.f32 %v6375_v55, 1e-06 }
 0x692   :  { %6258 = vmatpush.msrb.mxu0 %v2450_v53  ;;  %6251 = vmatmul.f32.vlgmr.msra.gmra.mxu3 %v7718_v13  ;;  %v1762_v0 = vld [vmem:[#allocation14 + $0xf8] sm:$0xff]  ;;  %v5833_v25 = vadd.f32 %v5832_v23, %v5813_v50  ;;  %v3665_v12 = vld [vmem:[#allocation14 + $0x3c70] sm:$0xff]  ;;  %v8354_v50 = vld [vmem:[#allocation58_spill] sm:$0xff] }
 0x693   :  { %6199 = vmatpush.msra.mxu1 %v3713_v52  ;;  %6315 = vmatpush.msrb.mxu3 %v3266_v30  ;;  %v2418_v2 = vld [vmem:[#allocation14 + $0x1578] sm:$0xff]  ;;  %v8349_v53 = vld [vmem:[#allocation56_spill] sm:$0xff]  ;;  %v5852_v56 = vpop.f32.mrf.mxu3  ;;  %7126 = vlog2.f32 %v6392_v60 }
 0x694   :  { %6228 = vmatpush.msra.mxu2 %v1778_v41  ;;  %v8342_v10 = vld [vmem:[#allocation33_spill] sm:$0xff]  ;;  %6259 = vmatpush.msrb.mxu0 %v2434_v7  ;;  %v5433_v4 = vadd.f32 %v8349_v53, %v3793_v32  ;;  %v8350_v62 = vld [vmem:[#allocation28_spill] sm:$0xff]  ;;  %v8352_v7 = vld [vmem:[#allocation54_spill] sm:$0xff] }
 0x695   :  { %v4173_v45 = vadd.f32 %v8342_v10, %v4153_v15  ;;  %v8343_v47 = vld [vmem:[#allocation49_spill] sm:$0xff]  ;;  %6200 = vmatpush.msra.mxu1 %v3697_v3  ;;  %6316 = vmatpush.msrb.mxu3 %v3250_v58  ;;  %v3649_v43 = vld [vmem:[#allocation14 + $0x3bf0] sm:$0xff] }
 0x696   :  { %v4613_v59 = vadd.f32 %v8343_v47, %v4593_v5  ;;  %v3234_v13 = vld [vmem:[#allocation14 + $0x2ef8] sm:$0xff]  ;;  %6229 = vmatpush.msra.mxu2 %v1762_v0  ;;  %6260 = vmatpush.msrb.mxu0 %v2418_v2  ;;  %v5853_v5 = vadd.f32 %v5852_v56, %v5833_v25  ;;  %v3633_v58 = vld [vmem:[#allocation14 + $0x3b70] sm:$0xff]  ;;  %v5453_v2 = vadd.f32 %v8354_v50, %v5433_v4 }
 0x697   :  { %v1746_v61 = vld [vmem:[#allocation14 + $0x78] sm:$0xff]  ;;  %v4193_v51 = vadd.f32 %v8346_v17, %v4173_v45  ;;  %6201 = vmatpush.msra.mxu1 %v3681_v14  ;;  %6317 = vmatpush.msrb.mxu3 %v3234_v13  ;;  %v7123_v45 = vpop.eup %7122  ;;  %v3617_v47 = vld [vmem:[#allocation14 + $0x3af0] sm:$0xff]  ;;  %v5872_v13 = vpop.f32.mrf.mxu0 }
 0x698   :  { %v2402_v20 = vld [vmem:[#allocation14 + $0x14f8] sm:$0xff]  ;;  %6230 = vmatpush.msra.mxu2 %v1746_v61  ;;  %v6379_v11 = vmax.f32 %v4613_v59, 0.0  ;;  %v7125_v49 = vpop.eup %7124  ;;  %v3601_v17 = vld [vmem:[#allocation14 + $0x3a70] sm:$0xff] }
 0x699   :  { %v8347_v34 = vld [vmem:[#allocation57_spill] sm:$0xff]  ;;  %6261 = vmatpush.msrb.mxu0 %v2402_v20  ;;  %6231 = vmatmul.f32.vlgmr.msra.gmra.mxu2 %v8350_v62  ;;  %v5873_v20 = vadd.f32 %v5872_v13, %v5853_v5  ;;  %v8117_v62 = vstv %s8284_s0  ;;  %v7127_v60 = vpop.eup %7126 }
 0x69a   :  { %v5413_v16 = vadd.f32 %v8347_v34, %v5393_v28  ;;  %v3010_v24 = vld [vmem:[#allocation14 + $0x27f8] sm:$0xff]  ;;  %6202 = vmatpush.msra.mxu1 %v3665_v12  ;;  %v6396_v27 = vmax.f32 %v6379_v11, 1e-06  ;;  %v8355_v28 = vld [vmem:[#allocation59_spill] sm:$0xff]  ;;  %v6411_v34 = vmul.f32 0.6931472, %v7123_v45  ;;  %v5892_v12 = vpop.f32.mrf.mxu1  ;;  %vm6851_vm3 = vweird.f32 %v8117_v62 }
 0x69b   :  { %v3218_v31 = vld [vmem:[#allocation14 + $0x2e78] sm:$0xff]  ;;  %6295 = vmatpush.msrb.mxu2 %v3010_v24  ;;  %v5473_v32 = vadd.f32 %v8355_v28, %v5453_v2  ;;  %v6419_v11 = vmul.f32 0.6931472, %v7125_v49  ;;  %v3537_v2 = vld [vmem:[#allocation14 + $0x3870] sm:$0xff]  ;;  %v6409_v45 = vmul.f32 0.6931472, %v7127_v60 }
 0x69c   :  { %v2386_v19 = vld [vmem:[#allocation14 + $0x1478] sm:$0xff]  ;;  %6318 = vmatpush.msrb.mxu3 %v3218_v31  ;;  %v6384_v41 = vmax.f32 %v5413_v16, 0.0  ;;  %6203 = vmatpush.msra.mxu1 %v3649_v43  ;;  %v8356_v16 = vld [vmem:[#allocation35_spill] sm:$0xff]  ;;  %7128 = vlog2.f32 %v6396_v27  ;;  %v8358_v43 = vld [vmem:[#allocation40_spill] sm:$0xff] }
 0x69d   :  { %v8348_v35 = vld [vmem:[#allocation45_spill] sm:$0xff]  ;;  %6262 = vmatpush.msrb.mxu0 %v2386_v19  ;;  %v3585_v19 = vld [vmem:[#allocation14 + $0x39f0] sm:$0xff] }
 0x69e   :  { %v4213_v57 = vadd.f32 %v8348_v35, %v4193_v51  ;;  %v2994_v46 = vld [vmem:[#allocation14 + $0x2778] sm:$0xff]  ;;  %v6401_v6 = vmax.f32 %v6384_v41, 1e-06  ;;  %6204 = vmatpush.msra.mxu1 %v3633_v58  ;;  %v8359_v41 = vld [vmem:[#allocation60_spill] sm:$0xff] }
 0x69f   :  { %v3202_v52 = vld [vmem:[#allocation14 + $0x2df8] sm:$0xff]  ;;  %6296 = vmatpush.msrb.mxu2 %v2994_v46 }
 0x6a0   :  { %v8351_v15 = vld [vmem:[#allocation53_spill] sm:$0xff]  ;;  %6319 = vmatpush.msrb.mxu3 %v3202_v52  ;;  %v4233_v36 = vadd.f32 %v8353_v37, %v4213_v57  ;;  %6205 = vmatpush.msra.mxu1 %v3617_v47  ;;  %v5893_v57 = vadd.f32 %v5892_v12, %v5873_v20  ;;  %7130 = vlog2.f32 %v6401_v6  ;;  %v3569_v52 = vld [vmem:[#allocation14 + $0x3970] sm:$0xff]  ;;  %v3786_v20 = vperm.slane %v8011_v26, 3 }
 0x6a1   :  { %v5233_v44 = vadd.f32 %v8351_v15, %v5213_v18  ;;  %v2370_v30 = vld [vmem:[#allocation14 + $0x13f8] sm:$0xff] }
 0x6a2   :  { %v2978_v22 = vld [vmem:[#allocation14 + $0x26f8] sm:$0xff]  ;;  %6263 = vmatpush.msrb.mxu0 %v2370_v30  ;;  %v4253_v23 = vadd.f32 %v8356_v16, %v4233_v36  ;;  %6206 = vmatpush.msra.mxu1 %v3601_v17  ;;  %v6387_v5 = vmax.f32 %v5893_v57, 0.0  ;;  %v7129_v58 = vpop.eup %7128  ;;  %v6446_v36 = vmul.f32 %v8117_v62, %v6419_v11  ;;  %v8361_v17 = vld [vmem:[#allocation50_spill] sm:$0xff] }
 0x6a3   :  { %v3186_v39 = vld [vmem:[#allocation14 + $0x2d78] sm:$0xff]  ;;  %v5253_v3 = vadd.f32 %v8352_v7, %v5233_v44  ;;  %6297 = vmatpush.msrb.mxu2 %v2978_v22  ;;  %v6442_v44 = vmul.f32 %v8117_v62, %v6411_v34  ;;  %v3553_v7 = vld [vmem:[#allocation14 + $0x38f0] sm:$0xff]  ;;  %v6417_v6 = vmul.f32 0.6931472, %v7129_v58 }
 0x6a4   :  { %v2354_v0 = vld [vmem:[#allocation14 + $0x1378] sm:$0xff]  ;;  %6320 = vmatpush.msrb.mxu3 %v3186_v39  ;;  %v4273_v30 = vadd.f32 %v8358_v43, %v4253_v23  ;;  %6207 = vmatpush.msra.mxu1 %v3585_v19  ;;  %v6404_v13 = vmax.f32 %v6387_v5, 1e-06 }
 0x6a5   :  { %v2962_v14 = vld [vmem:[#allocation14 + $0x2678] sm:$0xff]  ;;  %6264 = vmatpush.msrb.mxu0 %v2354_v0  ;;  %v6383_v18 = vmax.f32 %v5253_v3, 0.0  ;;  %v8360_v0 = vld [vmem:[#allocation46_spill] sm:$0xff]  ;;  %v6459_v47 = vmul.f32 1.442695, %v6442_v44  ;;  %v6445_v26 = vmul.f32 %v8117_v62, %v6417_v6 }
 0x6a6   :  { %v3170_v10 = vld [vmem:[#allocation14 + $0x2cf8] sm:$0xff]  ;;  %6298 = vmatpush.msrb.mxu2 %v2962_v14  ;;  %v4293_v37 = vadd.f32 %v8360_v0, %v4273_v30  ;;  %6208 = vmatpush.msra.mxu1 %v3569_v52 }
 0x6a7   :  { %v2338_v59 = vld [vmem:[#allocation14 + $0x12f8] sm:$0xff]  ;;  %6321 = vmatpush.msrb.mxu3 %v3170_v10  ;;  %v6400_v46 = vmax.f32 %v6383_v18, 1e-06  ;;  %v7131_v10 = vpop.eup %7130  ;;  %v6465_v5 = vmul.f32 1.442695, %v6445_v26 }
 0x6a8   :  { %v2946_v61 = vld [vmem:[#allocation14 + $0x25f8] sm:$0xff]  ;;  %6265 = vmatpush.msrb.mxu0 %v2338_v59  ;;  %6209 = vmatpush.msra.mxu1 %v3553_v7  ;;  %v6427_v34 = vmul.f32 0.6931472, %v7131_v10 }
 0x6a9   :  { %v3154_v33 = vld [vmem:[#allocation14 + $0x2c78] sm:$0xff]  ;;  %6299 = vmatpush.msrb.mxu2 %v2946_v61  ;;  %7132 = vlog2.f32 %v6400_v46  ;;  %v6377_v61 = vmax.f32 %v4293_v37, 0.0 }
 0x6aa   :  { %v2322_v51 = vld [vmem:[#allocation14 + $0x1278] sm:$0xff]  ;;  %6322 = vmatpush.msrb.mxu3 %v3154_v33  ;;  %v6467_v33 = vmul.f32 1.442695, %v6446_v36  ;;  %6210 = vmatpush.msra.mxu1 %v3537_v2  ;;  %7134 = vlog2.f32 %v6404_v13  ;;  %v8369_v13 = vld [vmem:[#allocation43_spill] sm:$0xff] }
 0x6ab   :  { %v8357_v24 = vld [vmem:[#allocation61_spill] sm:$0xff]  ;;  %6266 = vmatpush.msrb.mxu0 %v2322_v51  ;;  %v6381_v51 = vmax.f32 %v8361_v17, 0.0  ;;  %7136 = vpow2.f32 %v6459_v47 }
 0x6ac   :  { %v5493_v31 = vadd.f32 %v8357_v24, %v5473_v32  ;;  %v2930_v55 = vld [vmem:[#allocation14 + $0x2578] sm:$0xff]  ;;  %7138 = vpow2.f32 %v6467_v33 }
 0x6ad   :  { %v3138_v25 = vld [vmem:[#allocation14 + $0x2bf8] sm:$0xff]  ;;  %6300 = vmatpush.msrb.mxu2 %v2930_v55  ;;  %v8364_v55 = vld [vmem:[#allocation62_spill] sm:$0xff]  ;;  %v6398_v30 = vmax.f32 %v6381_v51, 1e-06  ;;  %v8370_v51 = vld [vmem:[#allocation47_spill] sm:$0xff] }
 0x6ae   :  { %v2306_v35 = vld [vmem:[#allocation14 + $0x11f8] sm:$0xff]  ;;  %6323 = vmatpush.msrb.mxu3 %v3138_v25  ;;  %v5513_v56 = vadd.f32 %v8359_v41, %v5493_v31  ;;  %v6441_v31 = vmul.f32 %v8117_v62, %v6409_v45  ;;  %v6450_v41 = vmul.f32 %v8117_v62, %v6427_v34 }
 0x6af   :  { %v2914_v53 = vld [vmem:[#allocation14 + $0x24f8] sm:$0xff]  ;;  %6267 = vmatpush.msrb.mxu0 %v2306_v35  ;;  %v7133_v35 = vpop.eup %7132 }
 0x6b0   :  { %v3122_v4 = vld [vmem:[#allocation14 + $0x2b78] sm:$0xff]  ;;  %6301 = vmatpush.msrb.mxu2 %v2914_v53  ;;  %v5533_v59 = vadd.f32 %v8021_v1, %v5513_v56  ;;  %v8362_v1 = vld [vmem:[#allocation32_spill] sm:$0xff]  ;;  %v6394_v53 = vmax.f32 %v6377_v61, 1e-06  ;;  %v6425_v60 = vmul.f32 0.6931472, %v7133_v35  ;;  %v7135_v36 = vpop.eup %7134 }
 0x6b1   :  { %v2290_v15 = vld [vmem:[#allocation14 + $0x1178] sm:$0xff]  ;;  %6324 = vmatpush.msrb.mxu3 %v3122_v4  ;;  %6211 = vmatmul.f32.vlgmr.msra.gmra.mxu1 %v8362_v1  ;;  %v8365_v4 = vld [vmem:[#allocation64_spill] sm:$0xff]  ;;  %v6475_v2 = vmul.f32 1.442695, %v6450_v41  ;;  %v7137_v45 = vpop.eup %7136 }
 0x6b2   :  { %v2898_v22 = vld [vmem:[#allocation14 + $0x2478] sm:$0xff]  ;;  %6268 = vmatpush.msrb.mxu0 %v2290_v15  ;;  %v5553_v25 = vadd.f32 %v8364_v55, %v5533_v59  ;;  %7140 = vlog2.f32 %v6394_v53  ;;  %v6449_v47 = vmul.f32 %v8117_v62, %v6425_v60  ;;  %v8368_v59 = vld [vmem:[#allocation31_spill] sm:$0xff] }
 0x6b3   :  { %v3106_v39 = vld [vmem:[#allocation14 + $0x2af8] sm:$0xff]  ;;  %6302 = vmatpush.msrb.mxu2 %v2898_v22  ;;  %7142 = vlog2.f32 %v6398_v30 }
 0x6b4   :  { %v2274_v3 = vld [vmem:[#allocation14 + $0x10f8] sm:$0xff]  ;;  %6325 = vmatpush.msrb.mxu3 %v3106_v39  ;;  %v5573_v46 = vadd.f32 %v8365_v4, %v5553_v25  ;;  %v6457_v39 = vmul.f32 1.442695, %v6441_v31  ;;  %v6473_v55 = vmul.f32 1.442695, %v6449_v47 }
 0x6b5   :  { %v2882_v27 = vld [vmem:[#allocation14 + $0x23f8] sm:$0xff]  ;;  %6269 = vmatpush.msrb.mxu0 %v2274_v3 }
 0x6b6   :  { %v3090_v50 = vld [vmem:[#allocation14 + $0x2a78] sm:$0xff]  ;;  %6303 = vmatpush.msrb.mxu2 %v2882_v27  ;;  %v6385_v0 = vmax.f32 %v5573_v46, 0.0  ;;  %v8367_v27 = vld [vmem:[#allocation38_spill] sm:$0xff]  ;;  %7144 = vpow2.f32 %v6457_v39 }
 0x6b7   :  { %v2258_v14 = vld [vmem:[#allocation14 + $0x1078] sm:$0xff]  ;;  %6326 = vmatpush.msrb.mxu3 %v3090_v50  ;;  %7146 = vpow2.f32 %v6465_v5 }
 0x6b8   :  { %v2754_v28 = vld [vmem:[#allocation14 + $0x1ff8] sm:$0xff]  ;;  %6270 = vmatpush.msrb.mxu0 %v2258_v14  ;;  %v3794_v14 = vperm.slane %v8036_v63, 3  ;;  %7148 = vpow2.f32 %v6475_v2 }
 0x6b9   :  { %v2866_v32 = vld [vmem:[#allocation14 + $0x2378] sm:$0xff]  ;;  %6275 = vmatpush.msrb.mxu1 %v2754_v28 }
 0x6ba   :  { %v3074_v49 = vld [vmem:[#allocation14 + $0x29f8] sm:$0xff]  ;;  %6304 = vmatpush.msrb.mxu2 %v2866_v32  ;;  %v7139_v32 = vpop.eup %7138 }
 0x6bb   :  { %v3522_v18 = vld [vmem:[#allocation14 + $0x37f8] sm:$0xff]  ;;  %6327 = vmatpush.msrb.mxu3 %v3074_v49  ;;  %v6402_v49 = vmax.f32 %v6385_v0, 1e-06  ;;  %v7141_v31 = vpop.eup %7140 }
 0x6bc   :  { %v8363_v16 = vld [vmem:[#allocation29_spill] sm:$0xff]  ;;  %6335 = vmatpush.msra.mxu0 %v3522_v18  ;;  %v6433_v18 = vmul.f32 0.6931472, %v7135_v36  ;;  %v6413_v46 = vmul.f32 0.6931472, %v7141_v31 }
 0x6bd   :  { %6271 = vmatmul.f32.vlgmr.msrb.gmra.mxu0 %v8363_v16  ;;  %v2738_v23 = vld [vmem:[#allocation14 + $0x1f78] sm:$0xff]  ;;  %v8371_v16 = vld [vmem:[#allocation63_spill] sm:$0xff]  ;;  %7150 = vlog2.f32 %v6402_v49 }
 0x6be   :  { %v2850_v24 = vld [vmem:[#allocation14 + $0x22f8] sm:$0xff]  ;;  %6276 = vmatpush.msrb.mxu1 %v2738_v23  ;;  %v5593_v23 = vadd.f32 %v8371_v16, %v3794_v14  ;;  %v6453_v26 = vmul.f32 %v8117_v62, %v6433_v18  ;;  %7152 = vpow2.f32 %v6473_v55  ;;  %v8377_v16 = vld [vmem:[#allocation51_spill] sm:$0xff] }
 0x6bf   :  { %v3058_v12 = vld [vmem:[#allocation14 + $0x2978] sm:$0xff]  ;;  %6305 = vmatpush.msrb.mxu2 %v2850_v24 }
 0x6c0   :  { %v3506_v19 = vld [vmem:[#allocation14 + $0x3778] sm:$0xff]  ;;  %6328 = vmatpush.msrb.mxu3 %v3058_v12  ;;  %v7143_v12 = vpop.eup %7142  ;;  %v6481_v60 = vmul.f32 1.442695, %v6453_v26 }
 0x6c1   :  { %v2722_v57 = vld [vmem:[#allocation14 + $0x1ef8] sm:$0xff]  ;;  %6336 = vmatpush.msra.mxu0 %v3506_v19  ;;  %v7145_v35 = vpop.eup %7144  ;;  %v6421_v30 = vmul.f32 0.6931472, %v7143_v12 }
 0x6c2   :  { %v2834_v11 = vld [vmem:[#allocation14 + $0x2278] sm:$0xff]  ;;  %6277 = vmatpush.msrb.mxu1 %v2722_v57  ;;  %v8372_v57 = vld [vmem:[#allocation30_spill] sm:$0xff]  ;;  %v7147_v4 = vpop.eup %7146  ;;  %7154 = vpow2.f32 %v6481_v60 }
 0x6c3   :  { %v3042_v52 = vld [vmem:[#allocation14 + $0x28f8] sm:$0xff]  ;;  %6306 = vmatpush.msrb.mxu2 %v2834_v11  ;;  %v8147_v11 = vld [vmem:[%s8294_s10] sm:$0x3]  ;;  %s7549_s10 = smov [#allocation20]  }
 0x6c4   :  { %v3490_v15 = vld [vmem:[#allocation14 + $0x36f8] sm:$0xff]  ;;  %6329 = vmatpush.msrb.mxu3 %v3042_v52  ;;  %s7068_s2 = sshll.u32 %s7549_s10, 4  ;;  %s7069_s2 = int_to_ptr.vmem [resolvable:$true] %s7068_s2 }
 0x6c5   :  { %v8366_v44 = vld [vmem:[#allocation37_spill] sm:$0xff]  ;;  %6337 = vmatpush.msra.mxu0 %v3490_v15 }
 0x6c6   :  { %v4313_v43 = vadd.f32 %v8366_v44, %v3786_v20  ;;  %v2706_v56 = vld [vmem:[#allocation14 + $0x1e78] sm:$0xff]  ;;  %v5613_v44 = vadd.f32 %v8043_v38, %v5593_v23  ;;  %v6382_v23 = vmax.f32 %v8377_v16, 0.0 }
 0x6c7   :  { %v2818_v22 = vld [vmem:[#allocation14 + $0x21f8] sm:$0xff]  ;;  %6278 = vmatpush.msrb.mxu1 %v2706_v56  ;;  %v7149_v56 = vpop.eup %7148 }
 0x6c8   :  { %v3026_v7 = vld [vmem:[#allocation14 + $0x2878] sm:$0xff]  ;;  %6307 = vmatpush.msrb.mxu2 %v2818_v22  ;;  %v4333_v50 = vadd.f32 %v8367_v27, %v4313_v43  ;;  %v5633_v22 = vadd.f32 %v8045_v42, %v5613_v44  ;;  %v6447_v42 = vmul.f32 %v8117_v62, %v6421_v30 }
 0x6c9   :  { %v3474_v3 = vld [vmem:[#allocation14 + $0x3678] sm:$0xff]  ;;  %6330 = vmatpush.msrb.mxu3 %v3026_v7  ;;  %v6443_v7 = vmul.f32 %v8117_v62, %v6413_v46  ;;  %v5952_v46 = vpop.f32.mrf.mxu0 }
 0x6ca   :  { %v2690_v58 = vld [vmem:[#allocation14 + $0x1df8] sm:$0xff]  ;;  %6338 = vmatpush.msra.mxu0 %v3474_v3  ;;  %6331 = vmatmul.f32.vlgmr.msrb.gmra.mxu3 %v8368_v59  ;;  %v4353_v61 = vadd.f32 %v8369_v13, %v4333_v50  ;;  %v8374_v3 = vld [vmem:[#allocation42_spill] sm:$0xff] }
 0x6cb   :  { %v2802_v37 = vld [vmem:[#allocation14 + $0x2178] sm:$0xff]  ;;  %6279 = vmatpush.msrb.mxu1 %v2690_v58  ;;  %6529 = vmatpush.msra.mxu3 %v7137_v45  ;;  %v5653_v58 = vadd.f32 %v8052_v48, %v5633_v22  ;;  %v6461_v14 = vmul.f32 1.442695, %v6443_v7 }
 0x6cc   :  { %v3458_v10 = vld [vmem:[#allocation14 + $0x35f8] sm:$0xff]  ;;  %6308 = vmatpush.msrb.mxu2 %v2802_v37  ;;  %v4373_v34 = vadd.f32 %v8370_v51, %v4353_v61  ;;  %v7151_v37 = vpop.eup %7150 }
 0x6cd   :  { %v2674_v6 = vld [vmem:[#allocation14 + $0x1d78] sm:$0xff]  ;;  %6339 = vmatpush.msra.mxu0 %v3458_v10  ;;  %6609 = vmatpush.msrb.mxu3 %v7139_v32  ;;  %v7153_v50 = vpop.eup %7152  ;;  %v8375_v10 = vld [vmem:[#allocation44_spill] sm:$0xff]  ;;  %v6429_v48 = vmul.f32 0.6931472, %v7151_v37  ;;  %v5673_v47 = vadd.f32 %v8050_v8, %v5653_v58  ;;  %7156 = vpow2.f32 %v6461_v14 }
 0x6ce   :  { %v2786_v28 = vld [vmem:[#allocation14 + $0x20f8] sm:$0xff]  ;;  %6280 = vmatpush.msrb.mxu1 %v2674_v6  ;;  %v6469_v6 = vmul.f32 1.442695, %v6447_v42  ;;  %v8376_v32 = vld [vmem:[#allocation48_spill] sm:$0xff] }
 0x6cf   :  { %v3442_v33 = vld [vmem:[#allocation14 + $0x3578] sm:$0xff]  ;;  %6309 = vmatpush.msrb.mxu2 %v2786_v28  ;;  %v6451_v49 = vmul.f32 %v8117_v62, %v6429_v48  ;;  %v5693_v8 = vadd.f32 %v8065_v29, %v5673_v47  ;;  %v3796_v29 = vperm.slane %v8036_v63, 5 }
 0x6d0   :  { %v2658_v20 = vld [vmem:[#allocation14 + $0x1cf8] sm:$0xff]  ;;  %6340 = vmatpush.msra.mxu0 %v3442_v33  ;;  %7158 = vpow2.f32 %v6469_v6 }
 0x6d1   :  { %v2770_v17 = vld [vmem:[#allocation14 + $0x2078] sm:$0xff]  ;;  %6281 = vmatpush.msrb.mxu1 %v2658_v20  ;;  %v7155_v20 = vpop.eup %7154  ;;  %v6477_v31 = vmul.f32 1.442695, %v6451_v49  ;;  %v5713_v55 = vadd.f32 %v8067_v54, %v5693_v8  ;;  %v6032_v47 = vpop.f32.mrf.mxu0 }
 0x6d2   :  { %v3426_v24 = vld [vmem:[#allocation14 + $0x34f8] sm:$0xff]  ;;  %6310 = vmatpush.msrb.mxu2 %v2770_v17  ;;  %7090 = vmatmul.msk.f32.vlgmr.msra.gmra.mxu3 %vm6490_vm2, %v8147_v11 }
 0x6d3   :  { %v2642_v25 = vld [vmem:[#allocation14 + $0x1c78] sm:$0xff]  ;;  %6341 = vmatpush.msra.mxu0 %v3426_v24  ;;  %6311 = vmatmul.f32.vlgmr.msrb.gmra.mxu2 %v8372_v57  ;;  %v5733_v26 = vadd.f32 %v8073_v9, %v5713_v55  ;;  %7160 = vpow2.f32 %v6477_v31  ;;  %v5932_v9 = vpop.f32.mrf.mxu3 }
 0x6d4   :  { %v3410_v19 = vld [vmem:[#allocation14 + $0x3478] sm:$0xff]  ;;  %6509 = vmatpush.msra.mxu2 %v7145_v35  ;;  %6282 = vmatpush.msrb.mxu1 %v2642_v25  ;;  %v5912_v25 = vpop.f32.mrf.mxu2 }
 0x6d5   :  { %v2626_v53 = vld [vmem:[#allocation14 + $0x1bf8] sm:$0xff]  ;;  %6342 = vmatpush.msra.mxu0 %v3410_v19  ;;  %6689 = vmatpush.msra.mxu3 %v7149_v56  ;;  %v7157_v19 = vpop.eup %7156  ;;  %v5913_v63 = vadd.f32 %v5912_v25, %v3796_v29 }
 0x6d6   :  { %v8373_v52 = vld [vmem:[#allocation41_spill] sm:$0xff]  ;;  %6589 = vmatpush.msrb.mxu2 %v7147_v4  ;;  %6283 = vmatpush.msrb.mxu1 %v2626_v53  ;;  %v7159_v57 = vpop.eup %7158  ;;  %v6399_v53 = vmax.f32 %v6382_v23, 1e-06  ;;  %v6386_v4 = vmax.f32 %v5733_v26, 0.0 }
 0x6d7   :  { %v4393_v15 = vadd.f32 %v8373_v52, %v4373_v34  ;;  %v3394_v43 = vld [vmem:[#allocation14 + $0x33f8] sm:$0xff]  ;;  %v5933_v52 = vadd.f32 %v5932_v9, %v5913_v63 }
 0x6d8   :  { %v2610_v41 = vld [vmem:[#allocation14 + $0x1b78] sm:$0xff]  ;;  %6343 = vmatpush.msra.mxu0 %v3394_v43  ;;  %v6403_v30 = vmax.f32 %v6386_v4, 1e-06 }
 0x6d9   :  { %v3378_v39 = vld [vmem:[#allocation14 + $0x3378] sm:$0xff]  ;;  %v4413_v5 = vadd.f32 %v8374_v3, %v4393_v15  ;;  %6284 = vmatpush.msrb.mxu1 %v2610_v41  ;;  %v5972_v15 = vpop.f32.mrf.mxu1  ;;  %v7161_v43 = vpop.eup %7160  ;;  %v5953_v41 = vadd.f32 %v5952_v46, %v5933_v52 }
 0x6da   :  { %v2594_v38 = vld [vmem:[#allocation14 + $0x1af8] sm:$0xff]  ;;  %6344 = vmatpush.msra.mxu0 %v3378_v39  ;;  %7094 = vmatmul.msk.f32.vlgmr.msrb.gmra.mxu3 %vm6490_vm2, %v8147_v11 }
 0x6db   :  { %v3362_v0 = vld [vmem:[#allocation14 + $0x32f8] sm:$0xff]  ;;  %6285 = vmatpush.msrb.mxu1 %v2594_v38  ;;  %7089 = vmatmul.msk.f32.vlgmr.msra.gmra.mxu2 %vm6490_vm2, %v8147_v11  ;;  %v4433_v45 = vadd.f32 %v8375_v10, %v4413_v5  ;;  %v5973_v39 = vadd.f32 %v5972_v15, %v5953_v41 }
 0x6dc   :  { %v2578_v36 = vld [vmem:[#allocation14 + $0x1a78] sm:$0xff]  ;;  %6345 = vmatpush.msra.mxu0 %v3362_v0  ;;  %6669 = vmatpush.msra.mxu2 %v7153_v50  ;;  %v5992_v3 = vpop.f32.mrf.mxu2  ;;  %v6112_v26 = vpop.f32.mrf.mxu0 }
 0x6dd   :  { %v3346_v27 = vld [vmem:[#allocation14 + $0x3278] sm:$0xff]  ;;  %6286 = vmatpush.msrb.mxu1 %v2578_v36  ;;  %v4453_v13 = vadd.f32 %v8376_v32, %v4433_v45  ;;  %v5993_v0 = vadd.f32 %v5992_v3, %v5973_v39  ;;  %v6012_v36 = vpop.f32.mrf.mxu3 }
 0x6de   :  { %v2562_v2 = vld [vmem:[#allocation14 + $0x19f8] sm:$0xff]  ;;  %6346 = vmatpush.msra.mxu0 %v3346_v27 }
 0x6df   :  { %v3330_v59 = vld [vmem:[#allocation14 + $0x31f8] sm:$0xff]  ;;  %6287 = vmatpush.msrb.mxu1 %v2562_v2  ;;  %v6378_v51 = vmax.f32 %v4453_v13, 0.0  ;;  %v6013_v14 = vadd.f32 %v6012_v36, %v5993_v0 }
 0x6e0   :  { %v2546_v28 = vld [vmem:[#allocation14 + $0x1978] sm:$0xff]  ;;  %6347 = vmatpush.msra.mxu0 %v3330_v59 }
 0x6e1   :  { %v3314_v61 = vld [vmem:[#allocation14 + $0x3178] sm:$0xff]  ;;  %6288 = vmatpush.msrb.mxu1 %v2546_v28  ;;  %v6395_v35 = vmax.f32 %v6378_v51, 1e-06  ;;  %v6033_v28 = vadd.f32 %v6032_v47, %v6013_v14  ;;  %v6052_v13 = vpop.f32.mrf.mxu1 }
 0x6e2   :  { %v2530_v33 = vld [vmem:[#allocation14 + $0x18f8] sm:$0xff]  ;;  %6348 = vmatpush.msra.mxu0 %v3314_v61  ;;  %7098 = vmatmul.msk.f32.vlgmr.msra.gmra.mxu3 %vm6490_vm2, %v8147_v11 }
 0x6e3   :  { %v3298_v18 = vld [vmem:[#allocation14 + $0x30f8] sm:$0xff]  ;;  %6289 = vmatpush.msrb.mxu1 %v2530_v33  ;;  %7093 = vmatmul.msk.f32.vlgmr.msrb.gmra.mxu2 %vm6490_vm2, %v8147_v11  ;;  %7162 = vlog2.f32 %v6395_v35  ;;  %v6053_v61 = vadd.f32 %v6052_v13, %v6033_v28 }
 0x6e4   :  { %v2514_v17 = vld [vmem:[#allocation14 + $0x1878] sm:$0xff]  ;;  %6349 = vmatpush.msra.mxu0 %v3298_v18  ;;  %6749 = vmatpush.msrb.mxu2 %v7155_v20  ;;  %7164 = vlog2.f32 %v6399_v53 }
 0x6e5   :  { %v3282_v34 = vld [vmem:[#allocation14 + $0x3078] sm:$0xff]  ;;  %6290 = vmatpush.msrb.mxu1 %v2514_v17  ;;  %7166 = vlog2.f32 %v6403_v30  ;;  %v6388_v8 = vmax.f32 %v6053_v61, 0.0  ;;  %v6092_v35 = vpop.f32.mrf.mxu3 }
 0x6e6   :  { %v3778_v24 = vld [vmem:[#allocation14 + $0x3ff8] sm:$0xff]  ;;  %6350 = vmatpush.msra.mxu0 %v3282_v34  ;;  %6291 = vmatmul.f32.vlgmr.msrb.gmra.mxu1 %v7728_v40 }
 0x6e7   :  { %v3762_v12 = vld [vmem:[#allocation14 + $0x3f78] sm:$0xff]  ;;  %6351 = vmatmul.f32.vlgmr.msra.gmra.mxu0 %v7746_v21  ;;  %6355 = vmatpush.msra.mxu1 %v3778_v24  ;;  %v6405_v20 = vmax.f32 %v6388_v8, 1e-06 }
 0x6e8   :  { %6549 = vmatpush.msrb.mxu0 %v7157_v19  ;;  %v3746_v54 = vld [vmem:[#allocation14 + $0x3ef8] sm:$0xff] }
 0x6e9   :  { %6356 = vmatpush.msra.mxu1 %v3762_v12  ;;  %v3730_v40 = vld [vmem:[#allocation14 + $0x3e78] sm:$0xff]  ;;  %v7163_v22 = vpop.eup %7162  ;;  %v6072_v12 = vpop.f32.mrf.mxu2 }
 0x6ea   :  { %6629 = vmatpush.msra.mxu0 %v7159_v57  ;;  %v3714_v21 = vld [vmem:[#allocation14 + $0x3df8] sm:$0xff]  ;;  %v7165_v60 = vpop.eup %7164  ;;  %v6415_v7 = vmul.f32 0.6931472, %v7163_v22 }
 0x6eb   :  { %6357 = vmatpush.msra.mxu1 %v3746_v54  ;;  %7097 = vmatmul.msk.f32.vlgmr.msra.gmra.mxu2 %vm6490_vm2, %v8147_v11  ;;  %v3698_v44 = vld [vmem:[#allocation14 + $0x3d78] sm:$0xff]  ;;  %v6423_v58 = vmul.f32 0.6931472, %v7165_v60  ;;  %v7167_v50 = vpop.eup %7166 }
 0x6ec   :  { %v3682_v56 = vld [vmem:[#allocation14 + $0x3cf8] sm:$0xff]  ;;  %v6444_v42 = vmul.f32 %v8117_v62, %v6415_v7  ;;  %v6431_v48 = vmul.f32 0.6931472, %v7167_v50 }
 0x6ed   :  { %6358 = vmatpush.msra.mxu1 %v3730_v40  ;;  %v3666_v38 = vld [vmem:[#allocation14 + $0x3c78] sm:$0xff]  ;;  %v6448_v2 = vmul.f32 %v8117_v62, %v6423_v58 }
 0x6ee   :  { %v3650_v5 = vld [vmem:[#allocation14 + $0x3bf8] sm:$0xff]  ;;  %v6463_v45 = vmul.f32 1.442695, %v6444_v42  ;;  %v6452_v33 = vmul.f32 %v8117_v62, %v6431_v48 }
 0x6ef   :  { %6359 = vmatpush.msra.mxu1 %v3714_v21  ;;  %7091 = vmatmul.msk.f32.vlgmr.msrb.gmra.mxu0 %vm6490_vm2, %v8147_v11  ;;  %v3634_v37 = vld [vmem:[#allocation14 + $0x3b78] sm:$0xff]  ;;  %v6471_v6 = vmul.f32 1.442695, %v6448_v2 }
 0x6f0   :  { %6709 = vmatpush.msrb.mxu0 %v7161_v43  ;;  %v3618_v27 = vld [vmem:[#allocation14 + $0x3af8] sm:$0xff]  ;;  %7168 = vpow2.f32 %v6463_v45  ;;  %v6479_v17 = vmul.f32 1.442695, %v6452_v33 }
 0x6f1   :  { %6360 = vmatpush.msra.mxu1 %v3698_v44  ;;  %v3602_v10 = vld [vmem:[#allocation14 + $0x3a78] sm:$0xff]  ;;  %7170 = vpow2.f32 %v6471_v6  ;;  %v6172_v9 = vpop.f32.mrf.mxu3 }
 0x6f2   :  { %v3586_v59 = vld [vmem:[#allocation14 + $0x39f8] sm:$0xff]  ;;  %7172 = vlog2.f32 %v6405_v20 }
 0x6f3   :  { %6361 = vmatpush.msra.mxu1 %v3682_v56  ;;  %7101 = vmatmul.msk.f32.vlgmr.msrb.gmra.mxu2 %vm6490_vm2, %v8147_v11  ;;  %v3570_v32 = vld [vmem:[#allocation14 + $0x3978] sm:$0xff]  ;;  %7174 = vpow2.f32 %v6479_v17 }
 0x6f4   :  { %v3554_v49 = vld [vmem:[#allocation14 + $0x38f8] sm:$0xff] }
 0x6f5   :  { %6362 = vmatpush.msra.mxu1 %v3666_v38  ;;  %v3538_v18 = vld [vmem:[#allocation14 + $0x3878] sm:$0xff] }
 0x6f6   :  { %v7169_v51 = vpop.eup %7168 }
 0x6f7   :  { %6363 = vmatpush.msra.mxu1 %v3650_v5  ;;  %7095 = vmatmul.msk.f32.vlgmr.msra.gmra.mxu0 %vm6490_vm2, %v8147_v11  ;;  %v7171_v34 = vpop.eup %7170 }
 0x6f8   :  { %v7173_v16 = vpop.eup %7172 }
 0x6f9   :  { %6364 = vmatpush.msra.mxu1 %v3634_v37  ;;  %v6435_v23 = vmul.f32 0.6931472, %v7173_v16  ;;  %v7175_v24 = vpop.eup %7174 }
 0x6fa   :  { %v6152_v40 = vpop.f32.mrf.mxu2 }
 0x6fb   :  { %6365 = vmatpush.msra.mxu1 %v3618_v27  ;;  %v6454_v31 = vmul.f32 %v8117_v62, %v6435_v23  ;;  %v6857_v23 = vand.u32 2147483648, %v8117_v62 }
 0x6fd   :  { %6366 = vmatpush.msra.mxu1 %v3602_v10  ;;  %v6483_v55 = vmul.f32 1.442695, %v6454_v31 }
 0x6ff   :  { %6367 = vmatpush.msra.mxu1 %v3586_v59  ;;  %7099 = vmatmul.msk.f32.vlgmr.msrb.gmra.mxu0 %vm6490_vm2, %v8147_v11  ;;  %7176 = vpow2.f32 %v6483_v55 }
 0x701   :  { %6368 = vmatpush.msra.mxu1 %v3570_v32 }
 0x703   :  { %6369 = vmatpush.msra.mxu1 %v3554_v49 }
 0x705   :  { %6370 = vmatpush.msra.mxu1 %v3538_v18  ;;  %v7177_v29 = vpop.eup %7176 }
 0x706   :  { %6371 = vmatmul.f32.vlgmr.msra.gmra.mxu1 %v8362_v1  ;;  %6769 = vmatpush.msrb.mxu3 %v7177_v29  ;;  %v7254_v1 = vld [vmem:[#allocation15 + $0x8] sm:$0xff]  ;;  %v6132_v53 = vpop.f32.mrf.mxu1 }
 0x707   :  { %6569 = vmatpush.msrb.mxu1 %v7169_v51  ;;  %7102 = vmatmul.msk.f32.vlgmr.msrb.gmra.mxu3 %vm6490_vm2, %v8147_v11  ;;  %v3797_v25 = vperm.slane %v7254_v1, 6  ;;  %v6192_v21 = vpop.f32.mrf.mxu0  ;;  %v3798_v38 = vperm.slane %v7254_v1, 7  ;;  %v6858_v1 = vor.u32 1.1754944e-38, %v6857_v23 }
 0x709   :  { %6649 = vmatpush.msra.mxu1 %v7171_v34  ;;  %v6073_v19 = vadd.f32 %v6072_v12, %v3797_v25 }
 0x70b   :  { %v6093_v57 = vadd.f32 %v6092_v35, %v6073_v19 }
 0x70d   :  { %v6113_v54 = vadd.f32 %v6112_v26, %v6093_v57 }
 0x70e   :  { %7092 = vmatmul.msk.f32.vlgmr.msrb.gmra.mxu1 %vm6490_vm2, %v8147_v11 }
 0x70f   :  { %6729 = vmatpush.msrb.mxu1 %v7175_v24  ;;  %v6133_v63 = vadd.f32 %v6132_v53, %v6113_v54 }
 0x711   :  { %v6153_v4 = vadd.f32 %v6152_v40, %v6133_v63 }
 0x713   :  { %v6173_v46 = vadd.f32 %v6172_v9, %v6153_v4 }
 0x715   :  { %v6193_v52 = vadd.f32 %v6192_v21, %v6173_v46  ;;  %v6252_v5 = vpop.f32.mrf.mxu3 }
 0x716   :  { %7096 = vmatmul.msk.f32.vlgmr.msra.gmra.mxu1 %vm6490_vm2, %v8147_v11 }
 0x71c   :  { %v6232_v7 = vpop.f32.mrf.mxu2 }
 0x71d   :  { %v6233_v3 = vadd.f32 %v6232_v7, %v3798_v38 }
 0x71e   :  { %7100 = vmatmul.msk.f32.vlgmr.msrb.gmra.mxu1 %vm6490_vm2, %v8147_v11 }
 0x71f   :  { %v6253_v0 = vadd.f32 %v6252_v5, %v6233_v3 }
 0x72e   :  { %v6212_v15 = vpop.f32.mrf.mxu1 }
 0x72f   :  { %v6213_v44 = vadd.f32 %v6212_v15, %v6193_v52 }
 0x731   :  { %v6389_v43 = vmax.f32 %v6213_v44, 0.0 }
 0x733   :  { %v6406_v30 = vmax.f32 %v6389_v43, 1e-06 }
 0x735   :  { %7178 = vlog2.f32 %v6406_v30 }
 0x73a   :  { %v6272_v58 = vpop.f32.mrf.mxu0 }
 0x73b   :  { %v7179_v41 = vpop.eup %7178  ;;  %v6273_v42 = vadd.f32 %v6272_v58, %v6253_v0 }
 0x73c   :  { %v6437_v56 = vmul.f32 0.6931472, %v7179_v41 }
 0x73e   :  { %v6455_v22 = vmul.f32 %v8117_v62, %v6437_v56 }
 0x740   :  { %v6485_v39 = vmul.f32 1.442695, %v6455_v22 }
 0x742   :  { %7180 = vpow2.f32 %v6485_v39 }
 0x748   :  { %v7181_v60 = vpop.eup %7180 }
 0x749   :  { %6789 = vmatpush.msra.mxu0 %v7181_v60 }
 0x74a   :  { %7103 = vmatmul.msk.f32.vlgmr.msra.gmra.mxu0 %vm6490_vm2, %v8147_v11 }
 0x74d   :  { %v6332_v2 = vpop.f32.mrf.mxu3 }
 0x755   :  { %v6531_v18 = vpop.f32.mrf.mxu3 }
 0x756   :  { %v6312_v27 = vpop.f32.mrf.mxu2 }
 0x75d   :  { %v6611_v31 = vpop.f32.mrf.mxu3 }
 0x75e   :  { %v6511_v16 = vpop.f32.mrf.mxu2 }
 0x763   :  { %v6292_v37 = vpop.f32.mrf.mxu1 }
 0x764   :  { %v6293_v36 = vadd.f32 %v6292_v37, %v6273_v42  ;;  %v6352_v10 = vpop.f32.mrf.mxu0 }
 0x765   :  { %v6691_v46 = vpop.f32.mrf.mxu3 }
 0x766   :  { %v6313_v50 = vadd.f32 %v6312_v27, %v6293_v36  ;;  %v6591_v54 = vpop.f32.mrf.mxu2 }
 0x768   :  { %v6333_v14 = vadd.f32 %v6332_v2, %v6313_v50 }
 0x76a   :  { %v6353_v45 = vadd.f32 %v6352_v10, %v6333_v14  ;;  %v8220_v14 = vld [vmem:[#allocation17] sm:$0xff] }
 0x76c   :  { %v6551_v17 = vpop.f32.mrf.mxu0 }
 0x76e   :  { %v6671_v5 = vpop.f32.mrf.mxu2 }
 0x774   :  { %v6631_v55 = vpop.f32.mrf.mxu0 }
 0x77c   :  { %v6711_v52 = vpop.f32.mrf.mxu0 }
 0x783   :  { %v6372_v48 = vpop.f32.mrf.mxu1 }
 0x784   :  { %v6373_v47 = vadd.f32 %v6372_v48, %v6353_v45 }
 0x786   :  { %v6390_v59 = vmax.f32 %v6373_v47, 0.0 }
 0x788   :  { %v6407_v6 = vmax.f32 %v6390_v59, 1e-06 }
 0x78a   :  { %7182 = vlog2.f32 %v6407_v6 }
 0x78b   :  { %v6571_v51 = vpop.f32.mrf.mxu1 }
 0x790   :  { %v7183_v28 = vpop.eup %7182 }
 0x791   :  { %v6439_v32 = vmul.f32 0.6931472, %v7183_v28 }
 0x793   :  { %v6456_v13 = vmul.f32 %v8117_v62, %v6439_v32  ;;  %v6651_v25 = vpop.f32.mrf.mxu1  ;;  %v6913_v32 = vperm.slane %v8220_v14, 1 }
 0x795   :  { %v6487_v61 = vmul.f32 1.442695, %v6456_v13  ;;  %v8224_v13 = vld [vmem:[#allocation18] sm:$0xff] }
 0x797   :  { %7184 = vpow2.f32 %v6487_v61 }
 0x798   :  { %7186 = vrcp.f32 %v8117_v62 }
 0x799   :  { %7188 = vlog2.f32 %v6531_v18  ;;  %v6915_v18 = vperm.slane %v8220_v14, 3 }
 0x79a   :  { %7190 = vlog2.f32 %v6551_v17 }
 0x79b   :  { %7192 = vlog2.f32 %v6571_v51  ;;  %v6731_v43 = vpop.f32.mrf.mxu1  ;;  %v6965_v51 = vperm.slane %v8224_v13, 1 }
 0x79c   :  { %7194 = vlog2.f32 %v6511_v16 }
 0x79d   :  { %v7185_v33 = vpop.eup %7184  ;;  %7196 = vlog2.f32 %v6611_v31 }
 0x79e   :  { %6809 = vmatpush.msra.mxu1 %v7185_v33  ;;  %v7187_v49 = vpop.eup %7186  ;;  %7198 = vlog2.f32 %v6631_v55 }
 0x79f   :  { %7104 = vmatmul.msk.f32.vlgmr.msra.gmra.mxu1 %vm6490_vm2, %v8147_v11  ;;  %v6847_v8 = vmul.f32 %v7187_v49, %v8117_v62  ;;  %vm6852_vm4 = vweird.f32 %v7187_v49  ;;  %v6855_v11 = vand.u32 2147483647, %v8117_v62  ;;  %v7189_v29 = vpop.eup %7188  ;;  %7200 = vlog2.f32 %v6651_v25 }
 0x7a0   :  { %vm6853_vm5 = vmor %vm6851_vm3, %vm6852_vm4  ;;  %v7191_v12 = vpop.eup %7190  ;;  %v6817_v26 = vmul.f32 0.6931472, %v7189_v29  ;;  %7202 = vlog2.f32 %v6591_v54  ;;  %v6912_v25 = vperm.slane %v8220_v14, 0 }
 0x7a1   :  { %v6848_v20 = vsub.f32 1.0, %v6847_v8  ;;  %vm6856_vm6 = vcmp.eq.f32.partialorder %v6855_v11, 8.507059e+37  ;;  %v7193_v35 = vpop.eup %7192  ;;  %v6819_v53 = vmul.f32 0.6931472, %v7191_v12  ;;  %7204 = vlog2.f32 %v6691_v46 }
 0x7a2   :  { %v6821_v62 = vmul.f32 0.6931472, %v7193_v35  ;;  %v7195_v63 = vpop.eup %7194  ;;  %7206 = vlog2.f32 %v6711_v52  ;;  %v6914_v8 = vperm.slane %v8220_v14, 2 }
 0x7a3   :  { %v6849_v34 = vmul.f32 %v7187_v49, %v6848_v20  ;;  %v7197_v4 = vpop.eup %7196  ;;  %v6815_v44 = vmul.f32 0.6931472, %v7195_v63  ;;  %7208 = vlog2.f32 %v6731_v43  ;;  %v6969_v43 = vperm.slane %v8224_v13, 5 }
 0x7a4   :  { %v7199_v21 = vpop.eup %7198  ;;  %v6825_v56 = vmul.f32 0.6931472, %v7197_v4 }
 0x7a5   :  { %v6850_v24 = vadd.f32 %v7187_v49, %v6849_v34  ;;  %v7201_v30 = vpop.eup %7200  ;;  %v6827_v39 = vmul.f32 0.6931472, %v7199_v21  ;;  %v6966_v34 = vperm.slane %v8224_v13, 2 }
 0x7a6   :  { %v7203_v60 = vpop.eup %7202  ;;  %v6829_v3 = vmul.f32 0.6931472, %v7201_v30  ;;  %v6970_v30 = vperm.slane %v8224_v13, 6 }
 0x7a7   :  { %v6854_v19 = vsel %vm6853_vm5, %v7187_v49, %v6850_v24  ;;  %v7205_v37 = vpop.eup %7204  ;;  %v6823_v42 = vmul.f32 0.6931472, %v7203_v60 }
 0x7a8   :  { %v8211_v57 = vsel %vm6856_vm6, %v6858_v1, %v6854_v19  ;;  %v7207_v36 = vpop.eup %7206  ;;  %v6833_v48 = vmul.f32 0.6931472, %v7205_v37  ;;  %v6967_v1 = vperm.slane %v8224_v13, 3 }
 0x7a9   :  { %v6861_v40 = vmul.f32 %v8211_v57, %v6817_v26  ;;  %v6862_v9 = vmul.f32 %v8211_v57, %v6819_v53  ;;  %v6863_v15 = vmul.f32 %v8211_v57, %v6821_v62  ;;  %v6860_v7 = vmul.f32 %v8211_v57, %v6815_v44  ;;  %v7209_v2 = vpop.eup %7208 }
 0x7aa   :  { %v6865_v58 = vmul.f32 %v8211_v57, %v6825_v56  ;;  %v6866_v0 = vmul.f32 %v8211_v57, %v6827_v39  ;;  %v6867_v50 = vmul.f32 %v8211_v57, %v6829_v3  ;;  %v6864_v59 = vmul.f32 %v8211_v57, %v6823_v42  ;;  %v8243_v39 = vld [vmem:[#allocation17 + $0x8] sm:$0xff] }
 0x7ab   :  { %v6878_v41 = vmul.f32 1.442695, %v6861_v40  ;;  %v6880_v22 = vmul.f32 1.442695, %v6862_v9  ;;  %v6882_v38 = vmul.f32 1.442695, %v6863_v15  ;;  %v6869_v17 = vmul.f32 %v8211_v57, %v6833_v48 }
 0x7ac   :  { %v6876_v27 = vmul.f32 1.442695, %v6860_v7  ;;  %v6886_v10 = vmul.f32 1.442695, %v6865_v58  ;;  %v6888_v45 = vmul.f32 1.442695, %v6866_v0 }
 0x7ad   :  { %7210 = vpow2.f32 %v6878_v41  ;;  %v6835_v6 = vmul.f32 0.6931472, %v7207_v36  ;;  %v6890_v61 = vmul.f32 1.442695, %v6867_v50  ;;  %v6837_v33 = vmul.f32 0.6931472, %v7209_v2 }
 0x7ae   :  { %7212 = vpow2.f32 %v6880_v22  ;;  %v6884_v16 = vmul.f32 1.442695, %v6864_v59  ;;  %v6894_v19 = vmul.f32 1.442695, %v6869_v17  ;;  %v6917_v26 = vperm.slane %v8220_v14, 5 }
 0x7af   :  { %7214 = vlog2.f32 %v6671_v5  ;;  %v6870_v23 = vmul.f32 %v8211_v57, %v6835_v6  ;;  %v6871_v11 = vmul.f32 %v8211_v57, %v6837_v33  ;;  %v6918_v53 = vperm.slane %v8220_v14, 6 }
 0x7b0   :  { %7216 = vpow2.f32 %v6882_v38  ;;  %v6964_v40 = vperm.slane %v8224_v13, 0  ;;  %v6919_v15 = vperm.slane %v8220_v14, 7  ;;  %v6971_v22 = vperm.slane %v8224_v13, 7 }
 0x7b1   :  { %7218 = vpow2.f32 %v6876_v27  ;;  %v6896_v54 = vmul.f32 1.442695, %v6870_v23  ;;  %v6898_v4 = vmul.f32 1.442695, %v6871_v11  ;;  %v6916_v38 = vperm.slane %v8220_v14, 4  ;;  %v8250_v14 = vld [vmem:[#allocation18 + $0x8] sm:$0xff] }
 0x7b2   :  { %7220 = vpow2.f32 %v6886_v10  ;;  %v6968_v42 = vperm.slane %v8224_v13, 4  ;;  %v6921_v36 = vperm.slane %v8243_v39, 1  ;;  %v6922_v2 = vperm.slane %v8243_v39, 2 }
 0x7b3   :  { %v7211_v47 = vpop.eup %7210  ;;  %7222 = vpow2.f32 %v6888_v45  ;;  %v6923_v10 = vperm.slane %v8243_v39, 3  ;;  %v6974_v33 = vperm.slane %v8250_v14, 2  ;;  %v6920_v17 = vperm.slane %v8243_v39, 0 }
 0x7b4   :  { %v7213_v28 = vpop.eup %7212  ;;  %v6945_v24 = vmul.f32 %v7211_v47, %v6913_v32  ;;  %7224 = vpow2.f32 %v6890_v61  ;;  %v6973_v61 = vperm.slane %v8250_v14, 1 }
 0x7b5   :  { %v7215_v49 = vpop.eup %7214  ;;  %v6946_v55 = vmul.f32 %v7213_v28, %v6914_v8  ;;  %7226 = vpow2.f32 %v6884_v16 }
 0x7b6   :  { %v7217_v20 = vpop.eup %7216  ;;  %v6831_v31 = vmul.f32 0.6931472, %v7215_v49  ;;  %v6997_v63 = vadd.f32 %v6965_v51, %v6945_v24  ;;  %7228 = vpow2.f32 %v6894_v19  ;;  %v6975_v49 = vperm.slane %v8250_v14, 3 }
 0x7b7   :  { %v6947_v29 = vmul.f32 %v7217_v20, %v6915_v18  ;;  %v7219_v12 = vpop.eup %7218  ;;  %v6998_v46 = vadd.f32 %v6966_v34, %v6946_v55  ;;  %7230 = vpow2.f32 %v6896_v54  ;;  %v6972_v55 = vperm.slane %v8250_v14, 0 }
 0x7b8   :  { %v7221_v35 = vpop.eup %7220  ;;  %v6868_v9 = vmul.f32 %v8211_v57, %v6831_v31  ;;  %v6944_v52 = vmul.f32 %v7219_v12, %v6912_v25  ;;  %v7028_v60 = vrot.slane %v6997_v63, 6  ;;  %7232 = vpow2.f32 %v6898_v4  ;;  %v6771_v25 = vpop.f32.mrf.mxu3 }
 0x7b9   :  { %v7223_v62 = vpop.eup %7222  ;;  %v6999_v21 = vadd.f32 %v6967_v1, %v6947_v29  ;;  %v6949_v41 = vmul.f32 %v7221_v35, %v6917_v26  ;;  %v7029_v5 = vrot.slane %v6998_v46, 4 }
 0x7ba   :  { %v7225_v44 = vpop.eup %7224  ;;  %v6950_v56 = vmul.f32 %v7223_v62, %v6918_v53  ;;  %v6892_v7 = vmul.f32 1.442695, %v6868_v9  ;;  %v6996_v0 = vadd.f32 %v6964_v40, %v6944_v52  ;;  %v6751_v40 = vpop.f32.mrf.mxu2 }
 0x7bb   :  { %v7227_v3 = vpop.eup %7226  ;;  %v7030_v58 = vrot.slane %v6999_v21, 2  ;;  %v6951_v37 = vmul.f32 %v7225_v44, %v6919_v15  ;;  %v7001_v27 = vadd.f32 %v6969_v43, %v6949_v41 }
 0x7bc   :  { %v7002_v50 = vadd.f32 %v6970_v30, %v6950_v56  ;;  %v7229_v45 = vpop.eup %7228  ;;  %v6948_v48 = vmul.f32 %v7227_v3, %v6916_v38  ;;  %7234 = vpow2.f32 %v6892_v7  ;;  %v7041_v6 = vsel %vm7040_vm7, %v6996_v0, %v7028_v60 }
 0x7bd   :  { %v7231_v47 = vpop.eup %7230  ;;  %v7003_v59 = vadd.f32 %v6971_v22, %v6951_v37  ;;  %v7043_v28 = vsel %vm7042_vm8, %v7029_v5, %v7030_v58  ;;  %v7031_v8 = vrot.slane %v7001_v27, 6  ;;  %v6953_v18 = vmul.f32 %v7229_v45, %v6921_v36 }
 0x7be   :  { %v7233_v32 = vpop.eup %7232  ;;  %v7045_v13 = vsel %vm7044_vm9, %v7041_v6, %v7043_v28  ;;  %v6954_v20 = vmul.f32 %v7231_v47, %v6922_v2  ;;  %v7032_v51 = vrot.slane %v7002_v50, 4  ;;  %v7000_v16 = vadd.f32 %v6968_v42, %v6948_v48 }
 0x7bf   :  { %7059 = vst [vmem:[#allocation20] sm:$0xff] %v7045_v13  ;;  %v7033_v34 = vrot.slane %v7003_v59, 2  ;;  %v6955_v23 = vmul.f32 %v7233_v32, %v6923_v10  ;;  %v7005_v11 = vadd.f32 %v6973_v61, %v6953_v18  ;;  %7236 = vlog2.f32 %v6771_v25 }
 0x7c0   :  { %v7006_v31 = vadd.f32 %v6974_v33, %v6954_v20  ;;  %v7046_v12 = vsel %vm7040_vm7, %v7000_v16, %v7031_v8  ;;  %v6925_v0 = vperm.slane %v8243_v39, 5  ;;  %v6926_v36 = vperm.slane %v8243_v39, 6 }
 0x7c1   :  { %v7007_v29 = vadd.f32 %v6975_v49, %v6955_v23  ;;  %v7047_v19 = vsel %vm7042_vm8, %v7032_v51, %v7033_v34  ;;  %v7034_v53 = vrot.slane %v7005_v11, 6  ;;  %v6977_v10 = vperm.slane %v8250_v14, 5 }
 0x7c2   :  { %v7235_v24 = vpop.eup %7234  ;;  %v7048_v35 = vsel %vm7044_vm9, %v7046_v12, %v7047_v19  ;;  %v7035_v54 = vrot.slane %v7006_v31, 4  ;;  %v6924_v45 = vperm.slane %v8243_v39, 4  ;;  %v6978_v59 = vperm.slane %v8250_v14, 6 }
 0x7c3   :  { %v6952_v1 = vmul.f32 %v7235_v24, %v6920_v17  ;;  %7060 = vst [vmem:[#allocation20 + $0x8] sm:$0xff] %v7048_v35  ;;  %v7036_v62 = vrot.slane %v7007_v29, 2  ;;  %v6927_v28 = vperm.slane %v8243_v39, 7  ;;  %v6979_v61 = vperm.slane %v8250_v14, 7 }
 0x7c5   :  { %v7004_v63 = vadd.f32 %v6972_v55, %v6952_v1  ;;  %v7050_v9 = vsel %vm7042_vm8, %v7035_v54, %v7036_v62  ;;  %v7237_v46 = vpop.eup %7236 }
 0x7c6   :  { %v6841_v15 = vmul.f32 0.6931472, %v7237_v46 }
 0x7c7   :  { %v6791_v26 = vpop.f32.mrf.mxu0  ;;  %v7049_v4 = vsel %vm7040_vm7, %v7004_v63, %v7034_v53 }
 0x7c8   :  { %7238 = vlog2.f32 %v6791_v26  ;;  %v7051_v21 = vsel %vm7044_vm9, %v7049_v4, %v7050_v9  ;;  %v6873_v30 = vmul.f32 %v8211_v57, %v6841_v15 }
 0x7c9   :  { %7240 = vlog2.f32 %v6751_v40  ;;  %7061 = vst [vmem:[#allocation20 + $0x10] sm:$0xff] %v7051_v21 }
 0x7ca   :  { %v6902_v22 = vmul.f32 1.442695, %v6873_v30 }
 0x7ce   :  { %v7239_v52 = vpop.eup %7238 }
 0x7cf   :  { %v7241_v44 = vpop.eup %7240  ;;  %v6843_v43 = vmul.f32 0.6931472, %v7239_v52 }
 0x7d0   :  { %v6839_v41 = vmul.f32 0.6931472, %v7241_v44 }
 0x7d1   :  { %v6874_v56 = vmul.f32 %v8211_v57, %v6843_v43 }
 0x7d2   :  { %v6872_v38 = vmul.f32 %v8211_v57, %v6839_v41 }
 0x7d3   :  { %v6904_v7 = vmul.f32 1.442695, %v6874_v56 }
 0x7d4   :  { %v6900_v3 = vmul.f32 1.442695, %v6872_v38 }
 0x81c   :  { %v6811_v60 = vpop.f32.mrf.mxu1 }
 0x81d   :  { %7242 = vlog2.f32 %v6811_v60 }
 0x81e   :  { %7244 = vpow2.f32 %v6902_v22 }
 0x81f   :  { %7246 = vpow2.f32 %v6904_v7 }
 0x820   :  { %7248 = vpow2.f32 %v6900_v3 }
 0x823   :  { %v7243_v5 = vpop.eup %7242 }
 0x824   :  { %v6845_v58 = vmul.f32 0.6931472, %v7243_v5  ;;  %v7245_v37 = vpop.eup %7244 }
 0x825   :  { %v7247_v27 = vpop.eup %7246  ;;  %v6957_v2 = vmul.f32 %v7245_v37, %v6925_v0 }
 0x826   :  { %v6875_v42 = vmul.f32 %v8211_v57, %v6845_v58  ;;  %v7249_v48 = vpop.eup %7248  ;;  %v6958_v47 = vmul.f32 %v7247_v27, %v6926_v36  ;;  %v6976_v57 = vperm.slane %v8250_v14, 4 }
 0x827   :  { %v7009_v6 = vadd.f32 %v6977_v10, %v6957_v2  ;;  %v6956_v32 = vmul.f32 %v7249_v48, %v6924_v45 }
 0x828   :  { %v6906_v50 = vmul.f32 1.442695, %v6875_v42  ;;  %v7010_v13 = vadd.f32 %v6978_v59, %v6958_v47 }
 0x829   :  { %v7037_v49 = vrot.slane %v7009_v6, 6  ;;  %v7008_v18 = vadd.f32 %v6976_v57, %v6956_v32 }
 0x82a   :  { %7250 = vpow2.f32 %v6906_v50  ;;  %v7038_v20 = vrot.slane %v7010_v13, 4 }
 0x82b   :  { %v7052_v39 = vsel %vm7040_vm7, %v7008_v18, %v7037_v49 }
 0x830   :  { %v7251_v33 = vpop.eup %7250 }
 0x831   :  { %v6959_v8 = vmul.f32 %v7251_v33, %v6927_v28 }
 0x833   :  { %v7011_v17 = vadd.f32 %v6979_v61, %v6959_v8 }
 0x835   :  { %v7039_v51 = vrot.slane %v7011_v17, 2 }
 0x837   :  { %v7053_v34 = vsel %vm7042_vm8, %v7038_v20, %v7039_v51 }
 0x838   :  { %v7054_v14 = vsel %vm7044_vm9, %v7052_v39, %v7053_v34 }
 0x839   :  { %7062 = vst [vmem:[#allocation20 + $0x18] sm:$0xff] %v7054_v14 }
 0x83a   :  { %7073 = dma.vmem_to_hbm [thread:$0]  %s7069_s2, 512, %s7071_s21, [#allocation5]  }
 0x83b   :  { %7531 = dma.done.wait [#allocation5], 512  }
 0x83c   :  { %7532 = vsyncadd [#allocation5], 4294966784 }
 0x83d   :  { %7078 = vsyncpa [#allocation4], 1 }
 0x83e   :  { %7079 = vsyncpa [#allocation7], 1 }
 0x83f   :  { %7080 = vsyncpa [#allocation10], 1 }
 0x840   :  { %7081 = vsyncpa [#allocation13], 1 }
 0x841   :  { %7082 = vsyncpa [#allocation16], 1 }
 0x842   :  { %7083 = vsyncpa [#allocation19], 1 }
 0x843   :  { %7084 = vsyncpa [#allocation5], 1 }

</bundles_post_ra>
